<compile_context>
chip_gen: v6e
topology: v6e:2x2x1
jax: 0.10.0
libtpu: 0.0.40
codegen_flags: <defaults>
</compile_context>

<pallas_src>
import functools

import jax
import jax.numpy as jnp
from jax import lax
from jax.experimental import pallas as pl
from jax.experimental.pallas import tpu as pltpu

PART_ORDER = [[0], [1, 2, 3], [4, 5, 6], [7, 8], [9, 10, 11, 12],
              [13, 14, 15, 16, 17, 18], [19, 20, 21, 22, 23, 24], [25]]

_SELF_KEYS = ('ln1_g', 'ln1_b', 'qkv_w', 'qkv_b', 'o_w', 'o_b',
              'ln2_g', 'ln2_b', 'fc1_w', 'fc1_b', 'fc2_w', 'fc2_b')
_CROSS_KEYS = ('lnq_g', 'lnq_b', 'lnkv_g', 'lnkv_b', 'q_w', 'q_b', 'kv_w', 'kv_b',
               'o_w', 'o_b', 'ln2_g', 'ln2_b', 'fc1_w', 'fc1_b', 'fc2_w', 'fc2_b')


# ----------------------------------------------------------------------------
# In-kernel helpers (values are read from refs AT USE SITE via tiny getters so
# Mosaic can stream matmul operands straight from VMEM instead of spilling)
# ----------------------------------------------------------------------------
def _get(ref, stacked):
    if stacked:
        return lambda: ref[0]
    return lambda: ref[...]


def _ln_rows(x, g, b, eps=1e-5):
    mu = jnp.mean(x, axis=-1, keepdims=True)
    var = jnp.mean(jnp.square(x - mu), axis=-1, keepdims=True)
    return (x - mu) * lax.rsqrt(var + eps) * g + b


def _mha(q, k, v, n_head, kv_mask=None):
    """Multi-head attention on 2-D slabs; q is already scaled by 1/sqrt(dh).

    q: (Lq, D), k/v: (Lk, D).  Returns (concat-head output (Lq, D) f32,
    head-averaged probs (Lq, Lk) f32).  Single fused o_w matmul is done by the
    caller (one K=D matmul instead of n_head K=dh matmuls)."""
    Lq, D = q.shape
    Lk = k.shape[0]
    dh = D // n_head
    qb = q.astype(jnp.bfloat16)
    kb = k.astype(jnp.bfloat16)
    vb = v.astype(jnp.bfloat16)
    attn_sum = jnp.zeros((Lq, Lk), jnp.float32)
    ohs = []
    for h in range(n_head):                                   # static, n_head = 4
        sl = slice(h * dh, (h + 1) * dh)
        s = lax.dot_general(qb[:, sl], kb[:, sl], (((1,), (1,)), ((), ())),
                            preferred_element_type=jnp.float32)
        if kv_mask is not None:
            s = s + kv_mask                                   # additive -1e9 pad mask
        s = s - jnp.max(s, axis=-1, keepdims=True)
        e = jnp.exp(s)
        p = e * pl.reciprocal(jnp.sum(e, axis=-1, keepdims=True), approx=True)
        attn_sum = attn_sum + p
        ohs.append(jnp.dot(p.astype(jnp.bfloat16), vb[:, sl],
                           preferred_element_type=jnp.float32))
    return jnp.concatenate(ohs, axis=-1), attn_sum * (1.0 / n_head)


def _cross_block(q_rows, kv_rows, g, n_head, *, per_b_kv=None, kv_mask=None,
                 need_attn=False):
    """Pre-norm residual cross-attention + MLP block on row slabs.

    q_rows: (R, D) query rows (one per batch element here).
    kv_rows: (Lk_tot, D) key/value rows.  If per_b_kv is None every query row
    attends to all kv rows (shared keys); otherwise query row b attends to
    kv_rows[b*per_b_kv:(b+1)*per_b_kv].  LN + projections run as single slab
    matmuls; only the tiny score/PV matmuls are per-b."""
    R, D = q_rows.shape
    scale = (D // n_head) ** -0.5
    qn = _ln_rows(q_rows, g['lnq_g'](), g['lnq_b']())
    kn = _ln_rows(kv_rows, g['lnkv_g'](), g['lnkv_b']())
    q = (jnp.dot(qn.astype(jnp.bfloat16), g['q_w'](),
                 preferred_element_type=jnp.float32) + g['q_b']()) * scale
    kv = jnp.dot(kn.astype(jnp.bfloat16), g['kv_w'](),
                 preferred_element_type=jnp.float32) + g['kv_b']()
    k, v = kv[:, :D], kv[:, D:]

    if per_b_kv is None:
        o_attn, attn = _mha(q, k, v, n_head, kv_mask=kv_mask)
        attn_out = attn if need_attn else None
    else:
        ohs, attns = [], []
        for b in range(R):                                    # static, R = B = 2
            sl = slice(b * per_b_kv, (b + 1) * per_b_kv)
            ob, ab = _mha(q[b:b + 1], k[sl], v[sl], n_head, kv_mask=kv_mask)
            ohs.append(ob)
            attns.append(ab)
        o_attn = jnp.concatenate(ohs, axis=0)
        attn_out = attns if need_attn else None

    x = q_rows + jnp.dot(o_attn.astype(jnp.bfloat16), g['o_w'](),
                         preferred_element_type=jnp.float32) + g['o_b']()
    xn = _ln_rows(x, g['ln2_g'](), g['ln2_b']())
    h1 = jax.nn.gelu(jnp.dot(xn.astype(jnp.bfloat16), g['fc1_w'](),
                             preferred_element_type=jnp.float32) + g['fc1_b'](),
                     approximate=True)
    x = x + jnp.dot(h1.astype(jnp.bfloat16), g['fc2_w'](),
                    preferred_element_type=jnp.float32) + g['fc2_b']()
    return x, attn_out


# ----------------------------------------------------------------------------
# Kernel 1: merged encoder (CLIP layers + vit block), grid over layers,
# x resident in VMEM scratch, batch folded into each step
# ----------------------------------------------------------------------------
def _encoder_kernel(x0_ref, *refs, num_layers, b_sz, n_tok, n_head):
    nw = len(_SELF_KEYS)
    g = {k: _get(r, True) for k, r in zip(_SELF_KEYS, refs[:nw])}
    x_out_ref, cls_ref, attn_ref, x_sc = refs[nw], refs[nw + 1], refs[nw + 2], refs[nw + 3]

    l = pl.program_id(0)

    @pl.when(l == 0)
    def _():
        x_sc[...] = x0_ref[...]

    x = x_sc[...]                                             # (B*N, D) f32
    D = x.shape[-1]
    scale = (D // n_head) ** -0.5

    xn = _ln_rows(x, g['ln1_g'](), g['ln1_b']())
    qkv = jnp.dot(xn.astype(jnp.bfloat16), g['qkv_w'](),
                  preferred_element_type=jnp.float32) + g['qkv_b']()
    q = qkv[:, :D] * scale
    k = qkv[:, D:2 * D]
    v = qkv[:, 2 * D:]

    ohs = []
    for b in range(b_sz):                                     # static, B = 2
        sl = slice(b * n_tok, (b + 1) * n_tok)
        ob, ab = _mha(q[sl], k[sl], v[sl], n_head)
        attn_ref[0, b] = ab                                   # per-layer attn weights
        ohs.append(ob)
    o_attn = jnp.concatenate(ohs, axis=0)                     # (B*N, D)

    x = x + jnp.dot(o_attn.astype(jnp.bfloat16), g['o_w'](),
                    preferred_element_type=jnp.float32) + g['o_b']()
    xn2 = _ln_rows(x, g['ln2_g'](), g['ln2_b']())
    h1 = jax.nn.gelu(jnp.dot(xn2.astype(jnp.bfloat16), g['fc1_w'](),
                             preferred_element_type=jnp.float32) + g['fc1_b'](),
                     approximate=True)
    x = x + jnp.dot(h1.astype(jnp.bfloat16), g['fc2_w'](),
                    preferred_element_type=jnp.float32) + g['fc2_b']()

    x_sc[...] = x
    cls_ref[0] = jnp.concatenate([x[b * n_tok:b * n_tok + 1] for b in range(b_sz)],
                                 axis=0)

    @pl.when(l == num_layers - 1)
    def _():
        x_out_ref[...] = x


def encoder_stack_p(x0, layer_stacks, b_sz, n_tok, n_head):
    """One pallas_call over all self-attention layers (layer axis = grid)."""
    L = layer_stacks[0].shape[0]
    BN, D = x0.shape

    in_specs = [pl.BlockSpec((BN, D), lambda l: (0, 0))]
    for a in layer_stacks:
        nd = a.ndim
        in_specs.append(pl.BlockSpec((1,) + a.shape[1:],
                                     lambda l, nd=nd: (l,) + (0,) * (nd - 1)))
    out_specs = [pl.BlockSpec((BN, D), lambda l: (0, 0)),
                 pl.BlockSpec((1, b_sz, D), lambda l: (l, 0, 0)),
                 pl.BlockSpec((1, b_sz, n_tok, n_tok), lambda l: (l, 0, 0, 0))]
    out_shape = (jax.ShapeDtypeStruct((BN, D), jnp.float32),
                 jax.ShapeDtypeStruct((L, b_sz, D), jnp.float32),
                 jax.ShapeDtypeStruct((L, b_sz, n_tok, n_tok), jnp.float32))
    return pl.pallas_call(
        functools.partial(_encoder_kernel, num_layers=L, b_sz=b_sz,
                          n_tok=n_tok, n_head=n_head),
        grid=(L,),
        in_specs=in_specs,
        out_specs=out_specs,
        out_shape=out_shape,
        scratch_shapes=[pltpu.VMEM((BN, D), jnp.float32)],
        compiler_params=pltpu.CompilerParams(dimension_semantics=("arbitrary",)),
    )(x0, *layer_stacks)


# ----------------------------------------------------------------------------
# Kernel 2: Global_CAM (row-vector rollout) fused with the blocks_t cross block
# ----------------------------------------------------------------------------
def _cam_text_kernel(attn_ref, x_ref, word_ref, *refs, n_head, b_sz, n_tok):
    nw = len(_CROSS_KEYS)
    g = {k: _get(r, False) for k, r in zip(_CROSS_KEYS, refs[:nw])}
    z_ref = refs[nw]
    L = attn_ref.shape[0]

    cam_rows = []
    for b in range(b_sz):                                     # static, B = 2
        # row 0 of attn[L-1] @ ... @ attn[0], propagated as a (1, N) vector
        am_last = attn_ref[L - 1, b]
        row = am_last[0:1, :]
        for l in range(L - 2, -1, -1):
            row = jnp.dot(row, attn_ref[l, b], preferred_element_type=jnp.float32)
        feat = jnp.maximum(x_ref[b * n_tok + 1:(b + 1) * n_tok, :], 0.0)
        cam_rows.append(jnp.dot(row[:, 1:], feat, preferred_element_type=jnp.float32))
    vis = jnp.concatenate(cam_rows, axis=0)                   # (B, D) global CAM

    # blocks_t: cross block, queries = per-b CAM row, word keys shared across b
    z, _ = _cross_block(vis, word_ref[...], g, n_head)
    z_ref[...] = z


def cam_text_p(attn_stack, x_flat, word, bt_flat, n_head, b_sz, n_tok):
    D = x_flat.shape[-1]
    return pl.pallas_call(
        functools.partial(_cam_text_kernel, n_head=n_head, b_sz=b_sz, n_tok=n_tok),
        out_shape=jax.ShapeDtypeStruct((b_sz, D), jnp.float32),
    )(attn_stack, x_flat, word, *bt_flat)


# ----------------------------------------------------------------------------
# Kernel 3: all 8 part branches, grid=(lmbd,) 'parallel', batch folded
# ----------------------------------------------------------------------------
def _part_kernel(pq_ref, patch_ref, pkv_ref, mask_ref, *refs, n_head, b_sz, n_patch):
    nw = len(_CROSS_KEYS)
    g1 = {k: _get(r, True) for k, r in zip(_CROSS_KEYS, refs[:nw])}
    np_g, np_b = refs[nw], refs[nw + 1]
    g2 = {k: _get(r, True) for k, r in zip(_CROSS_KEYS, refs[nw + 2:2 * nw + 2])}
    npt_g, npt_b = refs[2 * nw + 2], refs[2 * nw + 3]
    out_ref = refs[2 * nw + 4]

    pq = pq_ref[0]                                            # (B, D) part tokens
    patch = patch_ref[...]                                    # (B*(N-1), D)
    pkv = pkv_ref[0]                                          # (Lp, D) padded words
    mask = mask_ref[0]                                        # (1, Lp) additive mask

    # blocks_p[i]: queries = part token per b, keys = that b's patch slab
    t, attn1 = _cross_block(pq, patch, g1, n_head,
                            per_b_kv=n_patch, need_attn=True)
    t_n = _ln_rows(t, np_g[0], np_b[0])                       # norm_p fused

    # part_cam = attn_weight @ patch_embed  (per b: (1, N-1) @ (N-1, D))
    cam_rows = [jnp.dot(attn1[b], patch[b * n_patch:(b + 1) * n_patch, :],
                        preferred_element_type=jnp.float32)
                for b in range(b_sz)]
    vis = jnp.concatenate(cam_rows, axis=0)                   # (B, D)

    # blocks_pt[i]: queries = part CAM per b, word keys shared (masked padding)
    y, _ = _cross_block(vis, pkv, g2, n_head, kv_mask=mask)
    y_n = _ln_rows(y, npt_g[0], npt_b[0])                     # norm_pt fused

    # lane-dense packed store: t in lanes [0, D), y in lanes [D, 2D)
    out_ref[0] = jnp.concatenate([t_n, y_n], axis=-1)


def part_branches_p(part_q, patch_flat, part_kv, part_mask,
                    bp_stack, np_g, np_b, bpt_stack, npt_g, npt_b, n_head):
    lmbd, b_sz, D = part_q.shape
    n_patch = patch_flat.shape[0] // b_sz

    def stacked(a):
        nd = a.ndim
        return pl.BlockSpec((1,) + a.shape[1:],
                            lambda i, nd=nd: (i,) + (0,) * (nd - 1))

    in_specs = [stacked(part_q),
                pl.BlockSpec(patch_flat.shape, lambda i: (0, 0)),
                stacked(part_kv), stacked(part_mask)]
    in_specs += [stacked(a) for a in bp_stack] + [stacked(np_g), stacked(np_b)]
    in_specs += [stacked(a) for a in bpt_stack] + [stacked(npt_g), stacked(npt_b)]
    out_specs = pl.BlockSpec((1, b_sz, 2 * D), lambda i: (i, 0, 0))
    return pl.pallas_call(
        functools.partial(_part_kernel, n_head=n_head, b_sz=b_sz, n_patch=n_patch),
        grid=(lmbd,),
        in_specs=in_specs,
        out_specs=out_specs,
        out_shape=jax.ShapeDtypeStruct((lmbd, b_sz, 2 * D), jnp.float32),
        compiler_params=pltpu.CompilerParams(dimension_semantics=("parallel",)),
    )(part_q, patch_flat, part_kv, part_mask,
      *bp_stack, np_g, np_b, *bpt_stack, npt_g, npt_b)


# ----------------------------------------------------------------------------
# Parameter flattening / plain-JAX glue
# ----------------------------------------------------------------------------
def flat_self_block(p):
    """Self-attention block -> list in _SELF_KEYS order (matmul weights -> bf16)."""
    return [p['ln1']['g'].reshape(1, -1), p['ln1']['b'].reshape(1, -1),
            p['qkv']['w'].astype(jnp.bfloat16), p['qkv']['b'].reshape(1, -1),
            p['o']['w'].astype(jnp.bfloat16), p['o']['b'].reshape(1, -1),
            p['ln2']['g'].reshape(1, -1), p['ln2']['b'].reshape(1, -1),
            p['fc1']['w'].astype(jnp.bfloat16), p['fc1']['b'].reshape(1, -1),
            p['fc2']['w'].astype(jnp.bfloat16), p['fc2']['b'].reshape(1, -1)]


def flat_cross_block(p):
    """Cross block -> list in _CROSS_KEYS order; qkv split into q / kv columns
    at trace time so the kernel never slices the weight (matmul weights bf16)."""
    D = p['o']['w'].shape[0]
    qkv_w, qkv_b = p['qkv']['w'], p['qkv']['b']
    return [p['ln_q']['g'].reshape(1, -1), p['ln_q']['b'].reshape(1, -1),
            p['ln_kv']['g'].reshape(1, -1), p['ln_kv']['b'].reshape(1, -1),
            qkv_w[:, :D].astype(jnp.bfloat16), qkv_b[:D].reshape(1, -1),
            qkv_w[:, D:].astype(jnp.bfloat16), qkv_b[D:].reshape(1, -1),
            p['o']['w'].astype(jnp.bfloat16), p['o']['b'].reshape(1, -1),
            p['ln2']['g'].reshape(1, -1), p['ln2']['b'].reshape(1, -1),
            p['fc1']['w'].astype(jnp.bfloat16), p['fc1']['b'].reshape(1, -1),
            p['fc2']['w'].astype(jnp.bfloat16), p['fc2']['b'].reshape(1, -1)]


def stack_flats(flats):
    return [jnp.stack([f[j] for f in flats], axis=0) for j in range(len(flats[0]))]


def ln_jax(x, p, eps=1e-5):
    """Tiny LayerNorms (the nn.LayerNorm 'bn_*' heads, norm(x)) stay in XLA."""
    mu = jnp.mean(x, axis=-1, keepdims=True)
    var = jnp.mean(jnp.square(x - mu), axis=-1, keepdims=True)
    return (x - mu) * lax.rsqrt(var + eps) * p['g'] + p['b']


# ----------------------------------------------------------------------------
# TransformerClassifier forward
# ----------------------------------------------------------------------------
def transformer_classifier_forward(params, imgs):
    n_head = params['n_head']
    D = params['dim']
    lmbd = 8
    cv = params['clip_visual']

    # ---- patchify + patch projection + cls/pos (tiny: plain JAX / XLA) ------
    B, C, H, W = imgs.shape                                   # NCHW, like PyTorch
    ps = cv['patch_size']
    gh, gw = H // ps, W // ps
    patches = imgs.reshape(B, C, gh, ps, gw, ps).transpose(0, 2, 4, 1, 3, 5)
    patches = patches.reshape(B, gh * gw, C * ps * ps)
    x = patches @ cv['proj']['w'] + cv['proj']['b']
    cls = jnp.broadcast_to(cv['cls'], (B, 1, D))
    x = jnp.concatenate([cls, x], axis=1) + cv['pos']
    N = x.shape[1]
    x0 = x.reshape(B * N, D)

    # ---- ONE pallas_call for all encoder layers (clip layers + vit block) ---
    layer_stacks = stack_flats([flat_self_block(p)
                                for p in (cv['layers'] + [params['vit_block']])])
    x_flat, cls_all, attn_stack = encoder_stack_p(x0, layer_stacks, B, N, n_head)
    all_x_cls = cls_all[:len(cv['layers'])]                   # per-clip-layer cls

    x_norm_flat = ln_jax(x_flat, params['norm'])              # x = norm(x)
    x_norm = x_norm_flat.reshape(B, N, D)

    # feat_g = bn_g(head(x[:, 0]))   (tiny: plain JAX, XLA fuses)
    feat_g = ln_jax(x_norm[:, 0] @ params['head']['w'] + params['head']['b'],
                    params['bn_g'])

    # ---- fused Global_CAM + blocks_t ----------------------------------------
    bt_flat = flat_cross_block(params['blocks_t'])
    z_rows = cam_text_p(attn_stack, x_norm_flat, params['word_table'],
                        bt_flat, n_head, B, N)                # (B, D)
    z = ln_jax(z_rows, params['norm'])
    feat_f = ln_jax(z @ params['head_f']['w'] + params['head_f']['b'],
                    params['bn_f'])

    # ---- all 8 part branches batched into ONE pallas_call -------------------
    part_tokens = x_norm[:, 0:1, :] + params['cls_part_token']   # (B, lmbd, D)
    part_q = jnp.transpose(part_tokens, (1, 0, 2))               # (lmbd, B, D)
    patch_flat = x_norm[:, 1:].reshape(B * (N - 1), D)

    Lp = max(len(g) for g in PART_ORDER)                         # pad groups to 6
    gather_idx = jnp.array([g + [0] * (Lp - len(g)) for g in PART_ORDER],
                           jnp.int32)                            # (lmbd, Lp)
    part_kv = jnp.take(params['word_table'], gather_idx, axis=0)  # (lmbd, Lp, D)
    part_mask = jnp.array([[0.0] * len(g) + [-1e9] * (Lp - len(g))
                           for g in PART_ORDER], jnp.float32)[:, None, :]

    bp_stack = stack_flats([flat_cross_block(p) for p in params['blocks_p']])
    bpt_stack = stack_flats([flat_cross_block(p) for p in params['blocks_pt']])
    np_g = jnp.stack([p['g'].reshape(1, -1) for p in params['norm_p']], axis=0)
    np_b = jnp.stack([p['b'].reshape(1, -1) for p in params['norm_p']], axis=0)
    npt_g = jnp.stack([p['g'].reshape(1, -1) for p in params['norm_pt']], axis=0)
    npt_b = jnp.stack([p['b'].reshape(1, -1) for p in params['norm_pt']], axis=0)

    ty = part_branches_p(part_q, patch_flat, part_kv, part_mask,
                         bp_stack, np_g, np_b, bpt_stack, npt_g, npt_b,
                         n_head)                              # (lmbd, B, 2D)
    t_out, y_out = ty[..., :D], ty[..., D:]

    # tiny per-part heads + nn.LayerNorm(width) in plain JAX (1..6 wide outputs)
    logits_p, logits_pt = [], []
    for i in range(lmbd):
        hp, ht = params['head_p'][i], params['head_pt'][i]
        logits_p.append(ln_jax(t_out[i] @ hp['w'] + hp['b'], params['bn_p'][i]))
        logits_pt.append(ln_jax(y_out[i] @ ht['w'] + ht['b'], params['bn_pt'][i]))
    logits_p = jnp.concatenate(logits_p, axis=1)
    logits_pt = jnp.concatenate(logits_pt, axis=1)

    # features_p concat is dead w.r.t. the module's return value -> dropped.
    logits = [feat_g, feat_f, logits_p, logits_pt]
    vit_cls_g, vit_cls_p = 0, 0
    return logits, all_x_cls, vit_cls_g, vit_cls_p


# ----------------------------------------------------------------------------
# Deterministic parameter initialization
# ----------------------------------------------------------------------------
class KeyGen:
    def __init__(self, key):
        self.key = key

    def __call__(self):
        self.key, sub = jax.random.split(self.key)
        return sub


def init_params(key, *, dim=64, n_head=4, attr_num=26, lmbd=8,
                patch_size=8, img_size=32, in_ch=3, clip_layers=2, mlp_ratio=4):
    kg = KeyGen(key)

    def tn(shape, std=0.02):
        return std * jax.random.truncated_normal(kg(), -2.0, 2.0, shape, jnp.float32)

    def lin(din, dout, std=0.02):
        return {"w": tn((din, dout), std), "b": jnp.zeros((dout,), jnp.float32)}

    def ln(d):
        return {"g": jnp.ones((d,), jnp.float32), "b": jnp.zeros((d,), jnp.float32)}

    def self_blk(d):   # pre-norm self-attention + MLP block, fused QKV
        return {"ln1": ln(d), "qkv": lin(d, 3 * d), "o": lin(d, d),
                "ln2": ln(d), "fc1": lin(d, mlp_ratio * d), "fc2": lin(mlp_ratio * d, d)}

    def cross_blk(d):  # pre-norm residual cross-attention + MLP block
        return {"ln_q": ln(d), "ln_kv": ln(d), "qkv": lin(d, 3 * d), "o": lin(d, d),
                "ln2": ln(d), "fc1": lin(d, mlp_ratio * d), "fc2": lin(mlp_ratio * d, d)}

    n_patch = (img_size // patch_size) ** 2
    clip_visual = {
        "patch_size": patch_size,
        "proj": lin(in_ch * patch_size * patch_size, dim),
        "cls": tn((1, 1, dim)),
        "pos": tn((1, n_patch + 1, dim)),
        "layers": [self_blk(dim) for _ in range(clip_layers)],
    }
    params = {
        "n_head": n_head,
        "dim": dim,
        "clip_visual": clip_visual,
        "word_table": tn((attr_num, dim)),
        "vit_block": self_blk(dim),                # self.blocks = vit.blocks[-1:]
        "norm": ln(dim),
        "head": lin(dim, attr_num),
        "head_f": lin(dim, attr_num),
        "bn_g": ln(attr_num),                      # nn.LayerNorm in the PyTorch spec
        "bn_f": ln(attr_num),
        "blocks_t": cross_blk(dim),
        "cls_part_token": jnp.zeros((1, lmbd, dim), jnp.float32),
        "blocks_p": [cross_blk(dim) for _ in range(lmbd)],
        "blocks_pt": [cross_blk(dim) for _ in range(lmbd)],
        "norm_p": [ln(dim) for _ in range(lmbd)],
        "norm_pt": [ln(dim) for _ in range(lmbd)],
        "head_p": [lin(dim, len(PART_ORDER[i])) for i in range(lmbd)],
        "head_pt": [lin(dim, len(PART_ORDER[i])) for i in range(lmbd)],
        "bn_p": [ln(len(PART_ORDER[i])) for i in range(lmbd)],
        "bn_pt": [ln(len(PART_ORDER[i])) for i in range(lmbd)],
    }
    return params


if __name__ == "__main__":
    root = jax.random.PRNGKey(0)
    k_param, k_img = jax.random.split(root)
    params = init_params(k_param)
    imgs = jax.random.normal(k_img, (2, 3, 32, 32), jnp.float32)   # NCHW

    fwd = jax.jit(functools.partial(transformer_classifier_forward, params))
    logits, all_x_cls, vit_cls_g, vit_cls_p = fwd(imgs)

    for t in logits:
        jax.block_until_ready(t)
    jax.block_until_ready(all_x_cls)

    assert logits[0].shape == (2, 26)   # feat_g
    assert logits[1].shape == (2, 26)   # feat_f
    assert logits[2].shape == (2, 26)   # logits_p  (sum of part-head widths = 26)
    assert logits[3].shape == (2, 26)   # logits_pt
    print("KERNEL_OK")
</pallas_src>

<mosaic_0001>
module attributes {stable_mosaic.version = 11 : i64} {
  func.func @_encoder_kernel(%arg0: i32, %arg1: memref<34x64xf32, #tpu.memory_space<vmem>>, %arg2: memref<1x1x64xf32, #tpu.memory_space<vmem>>, %arg3: memref<1x1x64xf32, #tpu.memory_space<vmem>>, %arg4: memref<1x64x192xbf16, #tpu.memory_space<vmem>>, %arg5: memref<1x1x192xf32, #tpu.memory_space<vmem>>, %arg6: memref<1x64x64xbf16, #tpu.memory_space<vmem>>, %arg7: memref<1x1x64xf32, #tpu.memory_space<vmem>>, %arg8: memref<1x1x64xf32, #tpu.memory_space<vmem>>, %arg9: memref<1x1x64xf32, #tpu.memory_space<vmem>>, %arg10: memref<1x64x256xbf16, #tpu.memory_space<vmem>>, %arg11: memref<1x1x256xf32, #tpu.memory_space<vmem>>, %arg12: memref<1x256x64xbf16, #tpu.memory_space<vmem>>, %arg13: memref<1x1x64xf32, #tpu.memory_space<vmem>>, %arg14: memref<34x64xf32, #tpu.memory_space<vmem>>, %arg15: memref<1x2x64xf32, #tpu.memory_space<vmem>>, %arg16: memref<1x2x17x17xf32, #tpu.memory_space<vmem>>, %arg17: memref<34x64xf32, #tpu.memory_space<vmem>>) attributes {dimension_semantics = [#tpu.dimension_semantics<arbitrary>], iteration_bounds = array<i64: 3>, scalar_prefetch = 0 : i64, scratch_operands = 1 : i64, tpu.core_type = #tpu.core_type<tc>, window_params = [{pipeline_mode = #tpu.pipeline_mode<synchronous>, transform_indices = @transform_0, window_bounds = array<i64: 34, 64>}, {transform_indices = @transform_1, window_bounds = array<i64: 1, 1, 64>}, {transform_indices = @transform_2, window_bounds = array<i64: 1, 1, 64>}, {transform_indices = @transform_3, window_bounds = array<i64: 1, 64, 192>}, {transform_indices = @transform_4, window_bounds = array<i64: 1, 1, 192>}, {transform_indices = @transform_5, window_bounds = array<i64: 1, 64, 64>}, {transform_indices = @transform_6, window_bounds = array<i64: 1, 1, 64>}, {transform_indices = @transform_7, window_bounds = array<i64: 1, 1, 64>}, {transform_indices = @transform_8, window_bounds = array<i64: 1, 1, 64>}, {transform_indices = @transform_9, window_bounds = array<i64: 1, 64, 256>}, {transform_indices = @transform_10, window_bounds = array<i64: 1, 1, 256>}, {transform_indices = @transform_11, window_bounds = array<i64: 1, 256, 64>}, {transform_indices = @transform_12, window_bounds = array<i64: 1, 1, 64>}, {pipeline_mode = #tpu.pipeline_mode<synchronous>, transform_indices = @transform_13, window_bounds = array<i64: 34, 64>}, {transform_indices = @transform_14, window_bounds = array<i64: 1, 2, 64>}, {transform_indices = @transform_15, window_bounds = array<i64: 1, 2, 17, 17>}]} {
    %c0_i32 = arith.constant 0 : i32
    %0 = arith.cmpi eq, %arg0, %c0_i32 : i32
    %1 = arith.extui %0 : i1 to i32
    %c0_i32_0 = arith.constant 0 : i32
    %2 = arith.cmpi ne, %1, %c0_i32_0 : i32
    scf.if %2 {
      %c0_105 = arith.constant 0 : index
      %c0_106 = arith.constant 0 : index
      %281 = vector.load %arg1[%c0_105, %c0_106] : memref<34x64xf32, #tpu.memory_space<vmem>>, vector<34x64xf32>
      %c0_107 = arith.constant 0 : index
      %c0_108 = arith.constant 0 : index
      %282 = vector.load %arg17[%c0_107, %c0_108] : memref<34x64xf32, #tpu.memory_space<vmem>>, vector<34x64xf32>
      tpu.vector_store %arg17[%c0_107, %c0_108], %281 {strides = array<i32>} : memref<34x64xf32, #tpu.memory_space<vmem>>, vector<34x64xf32>,
    } else {
    }
    %c0 = arith.constant 0 : index
    %c0_1 = arith.constant 0 : index
    %3 = vector.load %arg17[%c0, %c0_1] : memref<34x64xf32, #tpu.memory_space<vmem>>, vector<34x64xf32>
    %c0_2 = arith.constant 0 : index
    %c0_3 = arith.constant 0 : index
    %c0_4 = arith.constant 0 : index
    %4 = vector.load %arg2[%c0_2, %c0_3, %c0_4] : memref<1x1x64xf32, #tpu.memory_space<vmem>>, vector<1x1x64xf32>
    %5 = vector.shape_cast %4 : vector<1x1x64xf32> to vector<1x64xf32>
    %c0_5 = arith.constant 0 : index
    %c0_6 = arith.constant 0 : index
    %c0_7 = arith.constant 0 : index
    %6 = vector.load %arg3[%c0_5, %c0_6, %c0_7] : memref<1x1x64xf32, #tpu.memory_space<vmem>>, vector<1x1x64xf32>
    %7 = vector.shape_cast %6 : vector<1x1x64xf32> to vector<1x64xf32>
    %cst = arith.constant dense<0.000000e+00> : vector<34xf32>
    %8 = vector.multi_reduction <add>, %3, %cst [1] : vector<34x64xf32> to vector<34xf32>
    %9 = vector.shape_cast %8 : vector<34xf32> to vector<34x1xf32>
    %cst_8 = arith.constant 6.400000e+01 : f32
    %10 = vector.broadcast %cst_8 : f32 to vector<34x1xf32>
    %11 = arith.divf %9, %10 : vector<34x1xf32>
    %12 = vector.broadcast %11 : vector<34x1xf32> to vector<34x64xf32>
    %13 = arith.subf %3, %12 : vector<34x64xf32>
    %14 = arith.mulf %13, %13 : vector<34x64xf32>
    %cst_9 = arith.constant dense<0.000000e+00> : vector<34xf32>
    %15 = vector.multi_reduction <add>, %14, %cst_9 [1] : vector<34x64xf32> to vector<34xf32>
    %16 = vector.shape_cast %15 : vector<34xf32> to vector<34x1xf32>
    %cst_10 = arith.constant 6.400000e+01 : f32
    %17 = vector.broadcast %cst_10 : f32 to vector<34x1xf32>
    %18 = arith.divf %16, %17 : vector<34x1xf32>
    %19 = vector.broadcast %11 : vector<34x1xf32> to vector<34x64xf32>
    %20 = arith.subf %3, %19 : vector<34x64xf32>
    %cst_11 = arith.constant 9.99999974E-6 : f32
    %21 = vector.broadcast %cst_11 : f32 to vector<34x1xf32>
    %22 = arith.addf %18, %21 : vector<34x1xf32>
    %23 = math.rsqrt %22 : vector<34x1xf32>
    %24 = vector.broadcast %23 : vector<34x1xf32> to vector<34x64xf32>
    %25 = arith.mulf %20, %24 : vector<34x64xf32>
    %26 = vector.broadcast %5 : vector<1x64xf32> to vector<34x64xf32>
    %27 = arith.mulf %25, %26 : vector<34x64xf32>
    %28 = vector.broadcast %7 : vector<1x64xf32> to vector<34x64xf32>
    %29 = arith.addf %27, %28 : vector<34x64xf32>
    %30 = arith.truncf %29 : vector<34x64xf32> to vector<34x64xbf16>
    %c0_12 = arith.constant 0 : index
    %c0_13 = arith.constant 0 : index
    %c0_14 = arith.constant 0 : index
    %31 = vector.load %arg4[%c0_12, %c0_13, %c0_14] : memref<1x64x192xbf16, #tpu.memory_space<vmem>>, vector<1x64x192xbf16>
    %32 = vector.shape_cast %31 : vector<1x64x192xbf16> to vector<64x192xbf16>
    %cst_15 = arith.constant dense<0.000000e+00> : vector<34x192xf32>
    %33 = tpu.matmul %30, %32, %cst_15 {dimension_numbers = #tpu.dot_dimension_numbers<[1], [0], [0], [1], [0, 0, 1, 1], [], []>} : vector<34x64xbf16>, vector<64x192xbf16>, vector<34x192xf32> -> vector<34x192xf32>
    %c0_16 = arith.constant 0 : index
    %c0_17 = arith.constant 0 : index
    %c0_18 = arith.constant 0 : index
    %34 = vector.load %arg5[%c0_16, %c0_17, %c0_18] : memref<1x1x192xf32, #tpu.memory_space<vmem>>, vector<1x1x192xf32>
    %35 = vector.shape_cast %34 : vector<1x1x192xf32> to vector<1x192xf32>
    %36 = vector.broadcast %35 : vector<1x192xf32> to vector<34x192xf32>
    %37 = arith.addf %33, %36 : vector<34x192xf32>
    %38 = vector.extract_strided_slice %37 {offsets = [0, 0], sizes = [34, 64], strides = [1, 1]} : vector<34x192xf32> to vector<34x64xf32>
    %cst_19 = arith.constant 2.500000e-01 : f32
    %39 = vector.broadcast %cst_19 : f32 to vector<34x64xf32>
    %40 = arith.mulf %38, %39 : vector<34x64xf32>
    %41 = vector.extract_strided_slice %37 {offsets = [0, 64], sizes = [34, 64], strides = [1, 1]} : vector<34x192xf32> to vector<34x64xf32>
    %42 = vector.extract_strided_slice %37 {offsets = [0, 128], sizes = [34, 64], strides = [1, 1]} : vector<34x192xf32> to vector<34x64xf32>
    %43 = vector.extract_strided_slice %40 {offsets = [0, 0], sizes = [17, 64], strides = [1, 1]} : vector<34x64xf32> to vector<17x64xf32>
    %44 = vector.extract_strided_slice %41 {offsets = [0, 0], sizes = [17, 64], strides = [1, 1]} : vector<34x64xf32> to vector<17x64xf32>
    %45 = vector.extract_strided_slice %42 {offsets = [0, 0], sizes = [17, 64], strides = [1, 1]} : vector<34x64xf32> to vector<17x64xf32>
    %46 = arith.truncf %43 : vector<17x64xf32> to vector<17x64xbf16>
    %47 = arith.truncf %44 : vector<17x64xf32> to vector<17x64xbf16>
    %48 = arith.truncf %45 : vector<17x64xf32> to vector<17x64xbf16>
    %cst_20 = arith.constant 0.000000e+00 : f32
    %49 = vector.broadcast %cst_20 : f32 to vector<17x17xf32>
    %50 = vector.extract_strided_slice %46 {offsets = [0, 0], sizes = [17, 16], strides = [1, 1]} : vector<17x64xbf16> to vector<17x16xbf16>
    %51 = vector.extract_strided_slice %47 {offsets = [0, 0], sizes = [17, 16], strides = [1, 1]} : vector<17x64xbf16> to vector<17x16xbf16>
    %cst_21 = arith.constant dense<0.000000e+00> : vector<17x17xf32>
    %52 = tpu.matmul %50, %51, %cst_21 {dimension_numbers = #tpu.dot_dimension_numbers<[1], [1], [0], [0], [0, 0, 1, 0], [], []>} : vector<17x16xbf16>, vector<17x16xbf16>, vector<17x17xf32> -> vector<17x17xf32>
    %cst_22 = arith.constant dense<0xFF800000> : vector<17xf32>
    %53 = vector.multi_reduction <maximumf>, %52, %cst_22 [1] : vector<17x17xf32> to vector<17xf32>
    %54 = vector.shape_cast %53 : vector<17xf32> to vector<17x1xf32>
    %55 = vector.broadcast %54 : vector<17x1xf32> to vector<17x17xf32>
    %56 = arith.subf %52, %55 : vector<17x17xf32>
    %57 = math.exp %56 : vector<17x17xf32>
    %cst_23 = arith.constant dense<0.000000e+00> : vector<17xf32>
    %58 = vector.multi_reduction <add>, %57, %cst_23 [1] : vector<17x17xf32> to vector<17xf32>
    %59 = vector.shape_cast %58 : vector<17xf32> to vector<17x1xf32>
    %60 = tpu.reciprocal %59 {approx = true} : vector<17x1xf32> -> vector<17x1xf32>
    %61 = vector.broadcast %60 : vector<17x1xf32> to vector<17x17xf32>
    %62 = arith.mulf %57, %61 : vector<17x17xf32>
    %63 = arith.addf %49, %62 : vector<17x17xf32>
    %64 = arith.truncf %62 : vector<17x17xf32> to vector<17x17xbf16>
    %65 = vector.extract_strided_slice %48 {offsets = [0, 0], sizes = [17, 16], strides = [1, 1]} : vector<17x64xbf16> to vector<17x16xbf16>
    %cst_24 = arith.constant dense<0.000000e+00> : vector<17x16xf32>
    %66 = tpu.matmul %64, %65, %cst_24 {dimension_numbers = #tpu.dot_dimension_numbers<[1], [0], [0], [1], [0, 0, 1, 1], [], []>} : vector<17x17xbf16>, vector<17x16xbf16>, vector<17x16xf32> -> vector<17x16xf32>
    %67 = vector.extract_strided_slice %46 {offsets = [0, 16], sizes = [17, 16], strides = [1, 1]} : vector<17x64xbf16> to vector<17x16xbf16>
    %68 = vector.extract_strided_slice %47 {offsets = [0, 16], sizes = [17, 16], strides = [1, 1]} : vector<17x64xbf16> to vector<17x16xbf16>
    %cst_25 = arith.constant dense<0.000000e+00> : vector<17x17xf32>
    %69 = tpu.matmul %67, %68, %cst_25 {dimension_numbers = #tpu.dot_dimension_numbers<[1], [1], [0], [0], [0, 0, 1, 0], [], []>} : vector<17x16xbf16>, vector<17x16xbf16>, vector<17x17xf32> -> vector<17x17xf32>
    %cst_26 = arith.constant dense<0xFF800000> : vector<17xf32>
    %70 = vector.multi_reduction <maximumf>, %69, %cst_26 [1] : vector<17x17xf32> to vector<17xf32>
    %71 = vector.shape_cast %70 : vector<17xf32> to vector<17x1xf32>
    %72 = vector.broadcast %71 : vector<17x1xf32> to vector<17x17xf32>
    %73 = arith.subf %69, %72 : vector<17x17xf32>
    %74 = math.exp %73 : vector<17x17xf32>
    %cst_27 = arith.constant dense<0.000000e+00> : vector<17xf32>
    %75 = vector.multi_reduction <add>, %74, %cst_27 [1] : vector<17x17xf32> to vector<17xf32>
    %76 = vector.shape_cast %75 : vector<17xf32> to vector<17x1xf32>
    %77 = tpu.reciprocal %76 {approx = true} : vector<17x1xf32> -> vector<17x1xf32>
    %78 = vector.broadcast %77 : vector<17x1xf32> to vector<17x17xf32>
    %79 = arith.mulf %74, %78 : vector<17x17xf32>
    %80 = arith.addf %63, %79 : vector<17x17xf32>
    %81 = arith.truncf %79 : vector<17x17xf32> to vector<17x17xbf16>
    %82 = vector.extract_strided_slice %48 {offsets = [0, 16], sizes = [17, 16], strides = [1, 1]} : vector<17x64xbf16> to vector<17x16xbf16>
    %cst_28 = arith.constant dense<0.000000e+00> : vector<17x16xf32>
    %83 = tpu.matmul %81, %82, %cst_28 {dimension_numbers = #tpu.dot_dimension_numbers<[1], [0], [0], [1], [0, 0, 1, 1], [], []>} : vector<17x17xbf16>, vector<17x16xbf16>, vector<17x16xf32> -> vector<17x16xf32>
    %84 = vector.extract_strided_slice %46 {offsets = [0, 32], sizes = [17, 16], strides = [1, 1]} : vector<17x64xbf16> to vector<17x16xbf16>
    %85 = vector.extract_strided_slice %47 {offsets = [0, 32], sizes = [17, 16], strides = [1, 1]} : vector<17x64xbf16> to vector<17x16xbf16>
    %cst_29 = arith.constant dense<0.000000e+00> : vector<17x17xf32>
    %86 = tpu.matmul %84, %85, %cst_29 {dimension_numbers = #tpu.dot_dimension_numbers<[1], [1], [0], [0], [0, 0, 1, 0], [], []>} : vector<17x16xbf16>, vector<17x16xbf16>, vector<17x17xf32> -> vector<17x17xf32>
    %cst_30 = arith.constant dense<0xFF800000> : vector<17xf32>
    %87 = vector.multi_reduction <maximumf>, %86, %cst_30 [1] : vector<17x17xf32> to vector<17xf32>
    %88 = vector.shape_cast %87 : vector<17xf32> to vector<17x1xf32>
    %89 = vector.broadcast %88 : vector<17x1xf32> to vector<17x17xf32>
    %90 = arith.subf %86, %89 : vector<17x17xf32>
    %91 = math.exp %90 : vector<17x17xf32>
    %cst_31 = arith.constant dense<0.000000e+00> : vector<17xf32>
    %92 = vector.multi_reduction <add>, %91, %cst_31 [1] : vector<17x17xf32> to vector<17xf32>
    %93 = vector.shape_cast %92 : vector<17xf32> to vector<17x1xf32>
    %94 = tpu.reciprocal %93 {approx = true} : vector<17x1xf32> -> vector<17x1xf32>
    %95 = vector.broadcast %94 : vector<17x1xf32> to vector<17x17xf32>
    %96 = arith.mulf %91, %95 : vector<17x17xf32>
    %97 = arith.addf %80, %96 : vector<17x17xf32>
    %98 = arith.truncf %96 : vector<17x17xf32> to vector<17x17xbf16>
    %99 = vector.extract_strided_slice %48 {offsets = [0, 32], sizes = [17, 16], strides = [1, 1]} : vector<17x64xbf16> to vector<17x16xbf16>
    %cst_32 = arith.constant dense<0.000000e+00> : vector<17x16xf32>
    %100 = tpu.matmul %98, %99, %cst_32 {dimension_numbers = #tpu.dot_dimension_numbers<[1], [0], [0], [1], [0, 0, 1, 1], [], []>} : vector<17x17xbf16>, vector<17x16xbf16>, vector<17x16xf32> -> vector<17x16xf32>
    %101 = vector.extract_strided_slice %46 {offsets = [0, 48], sizes = [17, 16], strides = [1, 1]} : vector<17x64xbf16> to vector<17x16xbf16>
    %102 = vector.extract_strided_slice %47 {offsets = [0, 48], sizes = [17, 16], strides = [1, 1]} : vector<17x64xbf16> to vector<17x16xbf16>
    %cst_33 = arith.constant dense<0.000000e+00> : vector<17x17xf32>
    %103 = tpu.matmul %101, %102, %cst_33 {dimension_numbers = #tpu.dot_dimension_numbers<[1], [1], [0], [0], [0, 0, 1, 0], [], []>} : vector<17x16xbf16>, vector<17x16xbf16>, vector<17x17xf32> -> vector<17x17xf32>
    %cst_34 = arith.constant dense<0xFF800000> : vector<17xf32>
    %104 = vector.multi_reduction <maximumf>, %103, %cst_34 [1] : vector<17x17xf32> to vector<17xf32>
    %105 = vector.shape_cast %104 : vector<17xf32> to vector<17x1xf32>
    %106 = vector.broadcast %105 : vector<17x1xf32> to vector<17x17xf32>
    %107 = arith.subf %103, %106 : vector<17x17xf32>
    %108 = math.exp %107 : vector<17x17xf32>
    %cst_35 = arith.constant dense<0.000000e+00> : vector<17xf32>
    %109 = vector.multi_reduction <add>, %108, %cst_35 [1] : vector<17x17xf32> to vector<17xf32>
    %110 = vector.shape_cast %109 : vector<17xf32> to vector<17x1xf32>
    %111 = tpu.reciprocal %110 {approx = true} : vector<17x1xf32> -> vector<17x1xf32>
    %112 = vector.broadcast %111 : vector<17x1xf32> to vector<17x17xf32>
    %113 = arith.mulf %108, %112 : vector<17x17xf32>
    %114 = arith.addf %97, %113 : vector<17x17xf32>
    %115 = arith.truncf %113 : vector<17x17xf32> to vector<17x17xbf16>
    %116 = vector.extract_strided_slice %48 {offsets = [0, 48], sizes = [17, 16], strides = [1, 1]} : vector<17x64xbf16> to vector<17x16xbf16>
    %cst_36 = arith.constant dense<0.000000e+00> : vector<17x16xf32>
    %117 = tpu.matmul %115, %116, %cst_36 {dimension_numbers = #tpu.dot_dimension_numbers<[1], [0], [0], [1], [0, 0, 1, 1], [], []>} : vector<17x17xbf16>, vector<17x16xbf16>, vector<17x16xf32> -> vector<17x16xf32>
    %118 = tpu.concatenate %66, %83, %100, %117 in 1 : vector<17x16xf32>, vector<17x16xf32>, vector<17x16xf32>, vector<17x16xf32> -> vector<17x64xf32>
    %cst_37 = arith.constant 2.500000e-01 : f32
    %119 = vector.broadcast %cst_37 : f32 to vector<17x17xf32>
    %120 = arith.mulf %114, %119 : vector<17x17xf32>
    %c0_38 = arith.constant 0 : index
    %c0_39 = arith.constant 0 : index
    %c0_40 = arith.constant 0 : index
    %c0_41 = arith.constant 0 : index
    %121 = vector.load %arg16[%c0_38, %c0_39, %c0_40, %c0_41] : memref<1x2x17x17xf32, #tpu.memory_space<vmem>>, vector<1x1x17x17xf32>
    %122 = vector.shape_cast %121 : vector<1x1x17x17xf32> to vector<17x17xf32>
    %123 = vector.shape_cast %120 : vector<17x17xf32> to vector<1x1x17x17xf32>
    tpu.vector_store %arg16[%c0_38, %c0_39, %c0_40, %c0_41], %123 {strides = array<i32>} : memref<1x2x17x17xf32, #tpu.memory_space<vmem>>, vector<1x1x17x17xf32>,
    %124 = vector.extract_strided_slice %40 {offsets = [17, 0], sizes = [17, 64], strides = [1, 1]} : vector<34x64xf32> to vector<17x64xf32>
    %125 = vector.extract_strided_slice %41 {offsets = [17, 0], sizes = [17, 64], strides = [1, 1]} : vector<34x64xf32> to vector<17x64xf32>
    %126 = vector.extract_strided_slice %42 {offsets = [17, 0], sizes = [17, 64], strides = [1, 1]} : vector<34x64xf32> to vector<17x64xf32>
    %127 = arith.truncf %124 : vector<17x64xf32> to vector<17x64xbf16>
    %128 = arith.truncf %125 : vector<17x64xf32> to vector<17x64xbf16>
    %129 = arith.truncf %126 : vector<17x64xf32> to vector<17x64xbf16>
    %cst_42 = arith.constant 0.000000e+00 : f32
    %130 = vector.broadcast %cst_42 : f32 to vector<17x17xf32>
    %131 = vector.extract_strided_slice %127 {offsets = [0, 0], sizes = [17, 16], strides = [1, 1]} : vector<17x64xbf16> to vector<17x16xbf16>
    %132 = vector.extract_strided_slice %128 {offsets = [0, 0], sizes = [17, 16], strides = [1, 1]} : vector<17x64xbf16> to vector<17x16xbf16>
    %cst_43 = arith.constant dense<0.000000e+00> : vector<17x17xf32>
    %133 = tpu.matmul %131, %132, %cst_43 {dimension_numbers = #tpu.dot_dimension_numbers<[1], [1], [0], [0], [0, 0, 1, 0], [], []>} : vector<17x16xbf16>, vector<17x16xbf16>, vector<17x17xf32> -> vector<17x17xf32>
    %cst_44 = arith.constant dense<0xFF800000> : vector<17xf32>
    %134 = vector.multi_reduction <maximumf>, %133, %cst_44 [1] : vector<17x17xf32> to vector<17xf32>
    %135 = vector.shape_cast %134 : vector<17xf32> to vector<17x1xf32>
    %136 = vector.broadcast %135 : vector<17x1xf32> to vector<17x17xf32>
    %137 = arith.subf %133, %136 : vector<17x17xf32>
    %138 = math.exp %137 : vector<17x17xf32>
    %cst_45 = arith.constant dense<0.000000e+00> : vector<17xf32>
    %139 = vector.multi_reduction <add>, %138, %cst_45 [1] : vector<17x17xf32> to vector<17xf32>
    %140 = vector.shape_cast %139 : vector<17xf32> to vector<17x1xf32>
    %141 = tpu.reciprocal %140 {approx = true} : vector<17x1xf32> -> vector<17x1xf32>
    %142 = vector.broadcast %141 : vector<17x1xf32> to vector<17x17xf32>
    %143 = arith.mulf %138, %142 : vector<17x17xf32>
    %144 = arith.addf %130, %143 : vector<17x17xf32>
    %145 = arith.truncf %143 : vector<17x17xf32> to vector<17x17xbf16>
    %146 = vector.extract_strided_slice %129 {offsets = [0, 0], sizes = [17, 16], strides = [1, 1]} : vector<17x64xbf16> to vector<17x16xbf16>
    %cst_46 = arith.constant dense<0.000000e+00> : vector<17x16xf32>
    %147 = tpu.matmul %145, %146, %cst_46 {dimension_numbers = #tpu.dot_dimension_numbers<[1], [0], [0], [1], [0, 0, 1, 1], [], []>} : vector<17x17xbf16>, vector<17x16xbf16>, vector<17x16xf32> -> vector<17x16xf32>
    %148 = vector.extract_strided_slice %127 {offsets = [0, 16], sizes = [17, 16], strides = [1, 1]} : vector<17x64xbf16> to vector<17x16xbf16>
    %149 = vector.extract_strided_slice %128 {offsets = [0, 16], sizes = [17, 16], strides = [1, 1]} : vector<17x64xbf16> to vector<17x16xbf16>
    %cst_47 = arith.constant dense<0.000000e+00> : vector<17x17xf32>
    %150 = tpu.matmul %148, %149, %cst_47 {dimension_numbers = #tpu.dot_dimension_numbers<[1], [1], [0], [0], [0, 0, 1, 0], [], []>} : vector<17x16xbf16>, vector<17x16xbf16>, vector<17x17xf32> -> vector<17x17xf32>
    %cst_48 = arith.constant dense<0xFF800000> : vector<17xf32>
    %151 = vector.multi_reduction <maximumf>, %150, %cst_48 [1] : vector<17x17xf32> to vector<17xf32>
    %152 = vector.shape_cast %151 : vector<17xf32> to vector<17x1xf32>
    %153 = vector.broadcast %152 : vector<17x1xf32> to vector<17x17xf32>
    %154 = arith.subf %150, %153 : vector<17x17xf32>
    %155 = math.exp %154 : vector<17x17xf32>
    %cst_49 = arith.constant dense<0.000000e+00> : vector<17xf32>
    %156 = vector.multi_reduction <add>, %155, %cst_49 [1] : vector<17x17xf32> to vector<17xf32>
    %157 = vector.shape_cast %156 : vector<17xf32> to vector<17x1xf32>
    %158 = tpu.reciprocal %157 {approx = true} : vector<17x1xf32> -> vector<17x1xf32>
    %159 = vector.broadcast %158 : vector<17x1xf32> to vector<17x17xf32>
    %160 = arith.mulf %155, %159 : vector<17x17xf32>
    %161 = arith.addf %144, %160 : vector<17x17xf32>
    %162 = arith.truncf %160 : vector<17x17xf32> to vector<17x17xbf16>
    %163 = vector.extract_strided_slice %129 {offsets = [0, 16], sizes = [17, 16], strides = [1, 1]} : vector<17x64xbf16> to vector<17x16xbf16>
    %cst_50 = arith.constant dense<0.000000e+00> : vector<17x16xf32>
    %164 = tpu.matmul %162, %163, %cst_50 {dimension_numbers = #tpu.dot_dimension_numbers<[1], [0], [0], [1], [0, 0, 1, 1], [], []>} : vector<17x17xbf16>, vector<17x16xbf16>, vector<17x16xf32> -> vector<17x16xf32>
    %165 = vector.extract_strided_slice %127 {offsets = [0, 32], sizes = [17, 16], strides = [1, 1]} : vector<17x64xbf16> to vector<17x16xbf16>
    %166 = vector.extract_strided_slice %128 {offsets = [0, 32], sizes = [17, 16], strides = [1, 1]} : vector<17x64xbf16> to vector<17x16xbf16>
    %cst_51 = arith.constant dense<0.000000e+00> : vector<17x17xf32>
    %167 = tpu.matmul %165, %166, %cst_51 {dimension_numbers = #tpu.dot_dimension_numbers<[1], [1], [0], [0], [0, 0, 1, 0], [], []>} : vector<17x16xbf16>, vector<17x16xbf16>, vector<17x17xf32> -> vector<17x17xf32>
    %cst_52 = arith.constant dense<0xFF800000> : vector<17xf32>
    %168 = vector.multi_reduction <maximumf>, %167, %cst_52 [1] : vector<17x17xf32> to vector<17xf32>
    %169 = vector.shape_cast %168 : vector<17xf32> to vector<17x1xf32>
    %170 = vector.broadcast %169 : vector<17x1xf32> to vector<17x17xf32>
    %171 = arith.subf %167, %170 : vector<17x17xf32>
    %172 = math.exp %171 : vector<17x17xf32>
    %cst_53 = arith.constant dense<0.000000e+00> : vector<17xf32>
    %173 = vector.multi_reduction <add>, %172, %cst_53 [1] : vector<17x17xf32> to vector<17xf32>
    %174 = vector.shape_cast %173 : vector<17xf32> to vector<17x1xf32>
    %175 = tpu.reciprocal %174 {approx = true} : vector<17x1xf32> -> vector<17x1xf32>
    %176 = vector.broadcast %175 : vector<17x1xf32> to vector<17x17xf32>
    %177 = arith.mulf %172, %176 : vector<17x17xf32>
    %178 = arith.addf %161, %177 : vector<17x17xf32>
    %179 = arith.truncf %177 : vector<17x17xf32> to vector<17x17xbf16>
    %180 = vector.extract_strided_slice %129 {offsets = [0, 32], sizes = [17, 16], strides = [1, 1]} : vector<17x64xbf16> to vector<17x16xbf16>
    %cst_54 = arith.constant dense<0.000000e+00> : vector<17x16xf32>
    %181 = tpu.matmul %179, %180, %cst_54 {dimension_numbers = #tpu.dot_dimension_numbers<[1], [0], [0], [1], [0, 0, 1, 1], [], []>} : vector<17x17xbf16>, vector<17x16xbf16>, vector<17x16xf32> -> vector<17x16xf32>
    %182 = vector.extract_strided_slice %127 {offsets = [0, 48], sizes = [17, 16], strides = [1, 1]} : vector<17x64xbf16> to vector<17x16xbf16>
    %183 = vector.extract_strided_slice %128 {offsets = [0, 48], sizes = [17, 16], strides = [1, 1]} : vector<17x64xbf16> to vector<17x16xbf16>
    %cst_55 = arith.constant dense<0.000000e+00> : vector<17x17xf32>
    %184 = tpu.matmul %182, %183, %cst_55 {dimension_numbers = #tpu.dot_dimension_numbers<[1], [1], [0], [0], [0, 0, 1, 0], [], []>} : vector<17x16xbf16>, vector<17x16xbf16>, vector<17x17xf32> -> vector<17x17xf32>
    %cst_56 = arith.constant dense<0xFF800000> : vector<17xf32>
    %185 = vector.multi_reduction <maximumf>, %184, %cst_56 [1] : vector<17x17xf32> to vector<17xf32>
    %186 = vector.shape_cast %185 : vector<17xf32> to vector<17x1xf32>
    %187 = vector.broadcast %186 : vector<17x1xf32> to vector<17x17xf32>
    %188 = arith.subf %184, %187 : vector<17x17xf32>
    %189 = math.exp %188 : vector<17x17xf32>
    %cst_57 = arith.constant dense<0.000000e+00> : vector<17xf32>
    %190 = vector.multi_reduction <add>, %189, %cst_57 [1] : vector<17x17xf32> to vector<17xf32>
    %191 = vector.shape_cast %190 : vector<17xf32> to vector<17x1xf32>
    %192 = tpu.reciprocal %191 {approx = true} : vector<17x1xf32> -> vector<17x1xf32>
    %193 = vector.broadcast %192 : vector<17x1xf32> to vector<17x17xf32>
    %194 = arith.mulf %189, %193 : vector<17x17xf32>
    %195 = arith.addf %178, %194 : vector<17x17xf32>
    %196 = arith.truncf %194 : vector<17x17xf32> to vector<17x17xbf16>
    %197 = vector.extract_strided_slice %129 {offsets = [0, 48], sizes = [17, 16], strides = [1, 1]} : vector<17x64xbf16> to vector<17x16xbf16>
    %cst_58 = arith.constant dense<0.000000e+00> : vector<17x16xf32>
    %198 = tpu.matmul %196, %197, %cst_58 {dimension_numbers = #tpu.dot_dimension_numbers<[1], [0], [0], [1], [0, 0, 1, 1], [], []>} : vector<17x17xbf16>, vector<17x16xbf16>, vector<17x16xf32> -> vector<17x16xf32>
    %199 = tpu.concatenate %147, %164, %181, %198 in 1 : vector<17x16xf32>, vector<17x16xf32>, vector<17x16xf32>, vector<17x16xf32> -> vector<17x64xf32>
    %cst_59 = arith.constant 2.500000e-01 : f32
    %200 = vector.broadcast %cst_59 : f32 to vector<17x17xf32>
    %201 = arith.mulf %195, %200 : vector<17x17xf32>
    %c0_60 = arith.constant 0 : index
    %c1 = arith.constant 1 : index
    %c0_61 = arith.constant 0 : index
    %c0_62 = arith.constant 0 : index
    %202 = vector.load %arg16[%c0_60, %c1, %c0_61, %c0_62] : memref<1x2x17x17xf32, #tpu.memory_space<vmem>>, vector<1x1x17x17xf32>
    %203 = vector.shape_cast %202 : vector<1x1x17x17xf32> to vector<17x17xf32>
    %204 = vector.shape_cast %201 : vector<17x17xf32> to vector<1x1x17x17xf32>
    tpu.vector_store %arg16[%c0_60, %c1, %c0_61, %c0_62], %204 {strides = array<i32>} : memref<1x2x17x17xf32, #tpu.memory_space<vmem>>, vector<1x1x17x17xf32>,
    %205 = tpu.concatenate %118, %199 in 0 : vector<17x64xf32>, vector<17x64xf32> -> vector<34x64xf32>
    %206 = arith.truncf %205 : vector<34x64xf32> to vector<34x64xbf16>
    %c0_63 = arith.constant 0 : index
    %c0_64 = arith.constant 0 : index
    %c0_65 = arith.constant 0 : index
    %207 = vector.load %arg6[%c0_63, %c0_64, %c0_65] : memref<1x64x64xbf16, #tpu.memory_space<vmem>>, vector<1x64x64xbf16>
    %208 = vector.shape_cast %207 : vector<1x64x64xbf16> to vector<64x64xbf16>
    %cst_66 = arith.constant dense<0.000000e+00> : vector<34x64xf32>
    %209 = tpu.matmul %206, %208, %cst_66 {dimension_numbers = #tpu.dot_dimension_numbers<[1], [0], [0], [1], [0, 0, 1, 1], [], []>} : vector<34x64xbf16>, vector<64x64xbf16>, vector<34x64xf32> -> vector<34x64xf32>
    %210 = arith.addf %3, %209 : vector<34x64xf32>
    %c0_67 = arith.constant 0 : index
    %c0_68 = arith.constant 0 : index
    %c0_69 = arith.constant 0 : index
    %211 = vector.load %arg7[%c0_67, %c0_68, %c0_69] : memref<1x1x64xf32, #tpu.memory_space<vmem>>, vector<1x1x64xf32>
    %212 = vector.shape_cast %211 : vector<1x1x64xf32> to vector<1x64xf32>
    %213 = vector.broadcast %212 : vector<1x64xf32> to vector<34x64xf32>
    %214 = arith.addf %210, %213 : vector<34x64xf32>
    %c0_70 = arith.constant 0 : index
    %c0_71 = arith.constant 0 : index
    %c0_72 = arith.constant 0 : index
    %215 = vector.load %arg8[%c0_70, %c0_71, %c0_72] : memref<1x1x64xf32, #tpu.memory_space<vmem>>, vector<1x1x64xf32>
    %216 = vector.shape_cast %215 : vector<1x1x64xf32> to vector<1x64xf32>
    %c0_73 = arith.constant 0 : index
    %c0_74 = arith.constant 0 : index
    %c0_75 = arith.constant 0 : index
    %217 = vector.load %arg9[%c0_73, %c0_74, %c0_75] : memref<1x1x64xf32, #tpu.memory_space<vmem>>, vector<1x1x64xf32>
    %218 = vector.shape_cast %217 : vector<1x1x64xf32> to vector<1x64xf32>
    %cst_76 = arith.constant dense<0.000000e+00> : vector<34xf32>
    %219 = vector.multi_reduction <add>, %214, %cst_76 [1] : vector<34x64xf32> to vector<34xf32>
    %220 = vector.shape_cast %219 : vector<34xf32> to vector<34x1xf32>
    %cst_77 = arith.constant 6.400000e+01 : f32
    %221 = vector.broadcast %cst_77 : f32 to vector<34x1xf32>
    %222 = arith.divf %220, %221 : vector<34x1xf32>
    %223 = vector.broadcast %222 : vector<34x1xf32> to vector<34x64xf32>
    %224 = arith.subf %214, %223 : vector<34x64xf32>
    %225 = arith.mulf %224, %224 : vector<34x64xf32>
    %cst_78 = arith.constant dense<0.000000e+00> : vector<34xf32>
    %226 = vector.multi_reduction <add>, %225, %cst_78 [1] : vector<34x64xf32> to vector<34xf32>
    %227 = vector.shape_cast %226 : vector<34xf32> to vector<34x1xf32>
    %cst_79 = arith.constant 6.400000e+01 : f32
    %228 = vector.broadcast %cst_79 : f32 to vector<34x1xf32>
    %229 = arith.divf %227, %228 : vector<34x1xf32>
    %230 = vector.broadcast %222 : vector<34x1xf32> to vector<34x64xf32>
    %231 = arith.subf %214, %230 : vector<34x64xf32>
    %cst_80 = arith.constant 9.99999974E-6 : f32
    %232 = vector.broadcast %cst_80 : f32 to vector<34x1xf32>
    %233 = arith.addf %229, %232 : vector<34x1xf32>
    %234 = math.rsqrt %233 : vector<34x1xf32>
    %235 = vector.broadcast %234 : vector<34x1xf32> to vector<34x64xf32>
    %236 = arith.mulf %231, %235 : vector<34x64xf32>
    %237 = vector.broadcast %216 : vector<1x64xf32> to vector<34x64xf32>
    %238 = arith.mulf %236, %237 : vector<34x64xf32>
    %239 = vector.broadcast %218 : vector<1x64xf32> to vector<34x64xf32>
    %240 = arith.addf %238, %239 : vector<34x64xf32>
    %241 = arith.truncf %240 : vector<34x64xf32> to vector<34x64xbf16>
    %c0_81 = arith.constant 0 : index
    %c0_82 = arith.constant 0 : index
    %c0_83 = arith.constant 0 : index
    %242 = vector.load %arg10[%c0_81, %c0_82, %c0_83] : memref<1x64x256xbf16, #tpu.memory_space<vmem>>, vector<1x64x256xbf16>
    %243 = vector.shape_cast %242 : vector<1x64x256xbf16> to vector<64x256xbf16>
    %cst_84 = arith.constant dense<0.000000e+00> : vector<34x256xf32>
    %244 = tpu.matmul %241, %243, %cst_84 {dimension_numbers = #tpu.dot_dimension_numbers<[1], [0], [0], [1], [0, 0, 1, 1], [], []>} : vector<34x64xbf16>, vector<64x256xbf16>, vector<34x256xf32> -> vector<34x256xf32>
    %c0_85 = arith.constant 0 : index
    %c0_86 = arith.constant 0 : index
    %c0_87 = arith.constant 0 : index
    %245 = vector.load %arg11[%c0_85, %c0_86, %c0_87] : memref<1x1x256xf32, #tpu.memory_space<vmem>>, vector<1x1x256xf32>
    %246 = vector.shape_cast %245 : vector<1x1x256xf32> to vector<1x256xf32>
    %247 = vector.broadcast %246 : vector<1x256xf32> to vector<34x256xf32>
    %248 = arith.addf %244, %247 : vector<34x256xf32>
    %249 = arith.mulf %248, %248 : vector<34x256xf32>
    %250 = arith.mulf %248, %249 : vector<34x256xf32>
    %cst_88 = arith.constant 4.471500e-02 : f32
    %251 = vector.broadcast %cst_88 : f32 to vector<34x256xf32>
    %252 = arith.mulf %251, %250 : vector<34x256xf32>
    %253 = arith.addf %248, %252 : vector<34x256xf32>
    %cst_89 = arith.constant 0.797884583 : f32
    %254 = vector.broadcast %cst_89 : f32 to vector<34x256xf32>
    %255 = arith.mulf %254, %253 : vector<34x256xf32>
    %256 = math.tanh %255 : vector<34x256xf32>
    %cst_90 = arith.constant 1.000000e+00 : f32
    %257 = vector.broadcast %cst_90 : f32 to vector<34x256xf32>
    %258 = arith.addf %257, %256 : vector<34x256xf32>
    %cst_91 = arith.constant 5.000000e-01 : f32
    %259 = vector.broadcast %cst_91 : f32 to vector<34x256xf32>
    %260 = arith.mulf %259, %258 : vector<34x256xf32>
    %261 = arith.mulf %248, %260 : vector<34x256xf32>
    %262 = arith.truncf %261 : vector<34x256xf32> to vector<34x256xbf16>
    %c0_92 = arith.constant 0 : index
    %c0_93 = arith.constant 0 : index
    %c0_94 = arith.constant 0 : index
    %263 = vector.load %arg12[%c0_92, %c0_93, %c0_94] : memref<1x256x64xbf16, #tpu.memory_space<vmem>>, vector<1x256x64xbf16>
    %264 = vector.shape_cast %263 : vector<1x256x64xbf16> to vector<256x64xbf16>
    %cst_95 = arith.constant dense<0.000000e+00> : vector<34x64xf32>
    %265 = tpu.matmul %262, %264, %cst_95 {dimension_numbers = #tpu.dot_dimension_numbers<[1], [0], [0], [1], [0, 0, 1, 1], [], []>} : vector<34x256xbf16>, vector<256x64xbf16>, vector<34x64xf32> -> vector<34x64xf32>
    %266 = arith.addf %214, %265 : vector<34x64xf32>
    %c0_96 = arith.constant 0 : index
    %c0_97 = arith.constant 0 : index
    %c0_98 = arith.constant 0 : index
    %267 = vector.load %arg13[%c0_96, %c0_97, %c0_98] : memref<1x1x64xf32, #tpu.memory_space<vmem>>, vector<1x1x64xf32>
    %268 = vector.shape_cast %267 : vector<1x1x64xf32> to vector<1x64xf32>
    %269 = vector.broadcast %268 : vector<1x64xf32> to vector<34x64xf32>
    %270 = arith.addf %266, %269 : vector<34x64xf32>
    %c0_99 = arith.constant 0 : index
    %c0_100 = arith.constant 0 : index
    %271 = vector.load %arg17[%c0_99, %c0_100] : memref<34x64xf32, #tpu.memory_space<vmem>>, vector<34x64xf32>
    tpu.vector_store %arg17[%c0_99, %c0_100], %270 {strides = array<i32>} : memref<34x64xf32, #tpu.memory_space<vmem>>, vector<34x64xf32>,
    %272 = vector.extract_strided_slice %270 {offsets = [0, 0], sizes = [1, 64], strides = [1, 1]} : vector<34x64xf32> to vector<1x64xf32>
    %273 = vector.extract_strided_slice %270 {offsets = [17, 0], sizes = [1, 64], strides = [1, 1]} : vector<34x64xf32> to vector<1x64xf32>
    %274 = tpu.concatenate %272, %273 in 0 : vector<1x64xf32>, vector<1x64xf32> -> vector<2x64xf32>
    %c0_101 = arith.constant 0 : index
    %c0_102 = arith.constant 0 : index
    %c0_103 = arith.constant 0 : index
    %275 = vector.load %arg15[%c0_101, %c0_102, %c0_103] : memref<1x2x64xf32, #tpu.memory_space<vmem>>, vector<1x2x64xf32>
    %276 = vector.shape_cast %275 : vector<1x2x64xf32> to vector<2x64xf32>
    %277 = vector.shape_cast %274 : vector<2x64xf32> to vector<1x2x64xf32>
    tpu.vector_store %arg15[%c0_101, %c0_102, %c0_103], %277 {strides = array<i32>} : memref<1x2x64xf32, #tpu.memory_space<vmem>>, vector<1x2x64xf32>,
    %c2_i32 = arith.constant 2 : i32
    %278 = arith.cmpi eq, %arg0, %c2_i32 : i32
    %279 = arith.extui %278 : i1 to i32
    %c0_i32_104 = arith.constant 0 : i32
    %280 = arith.cmpi ne, %279, %c0_i32_104 : i32
    scf.if %280 {
      %c0_105 = arith.constant 0 : index
      %c0_106 = arith.constant 0 : index
      %281 = vector.load %arg14[%c0_105, %c0_106] : memref<34x64xf32, #tpu.memory_space<vmem>>, vector<34x64xf32>
      tpu.vector_store %arg14[%c0_105, %c0_106], %270 {strides = array<i32>} : memref<34x64xf32, #tpu.memory_space<vmem>>, vector<34x64xf32>,
    } else {
    }
    return
  }
  func.func @transform_0(%arg0: i32) -> (i32, i32) {
    %c0_i32 = arith.constant 0 : i32
    %c0_i32_0 = arith.constant 0 : i32
    %c0_i32_1 = arith.constant 0 : i32
    return %c0_i32, %c0_i32_0 : i32, i32
  }
  func.func @transform_1(%arg0: i32) -> (i32, i32, i32) {
    %c0_i32 = arith.constant 0 : i32
    %c0_i32_0 = arith.constant 0 : i32
    %c0_i32_1 = arith.constant 0 : i32
    return %arg0, %c0_i32, %c0_i32_0 : i32, i32, i32
  }
  func.func @transform_2(%arg0: i32) -> (i32, i32, i32) {
    %c0_i32 = arith.constant 0 : i32
    %c0_i32_0 = arith.constant 0 : i32
    %c0_i32_1 = arith.constant 0 : i32
    return %arg0, %c0_i32, %c0_i32_0 : i32, i32, i32
  }
  func.func @transform_3(%arg0: i32) -> (i32, i32, i32) {
    %c0_i32 = arith.constant 0 : i32
    %c0_i32_0 = arith.constant 0 : i32
    %c0_i32_1 = arith.constant 0 : i32
    return %arg0, %c0_i32, %c0_i32_0 : i32, i32, i32
  }
  func.func @transform_4(%arg0: i32) -> (i32, i32, i32) {
    %c0_i32 = arith.constant 0 : i32
    %c0_i32_0 = arith.constant 0 : i32
    %c0_i32_1 = arith.constant 0 : i32
    return %arg0, %c0_i32, %c0_i32_0 : i32, i32, i32
  }
  func.func @transform_5(%arg0: i32) -> (i32, i32, i32) {
    %c0_i32 = arith.constant 0 : i32
    %c0_i32_0 = arith.constant 0 : i32
    %c0_i32_1 = arith.constant 0 : i32
    return %arg0, %c0_i32, %c0_i32_0 : i32, i32, i32
  }
  func.func @transform_6(%arg0: i32) -> (i32, i32, i32) {
    %c0_i32 = arith.constant 0 : i32
    %c0_i32_0 = arith.constant 0 : i32
    %c0_i32_1 = arith.constant 0 : i32
    return %arg0, %c0_i32, %c0_i32_0 : i32, i32, i32
  }
  func.func @transform_7(%arg0: i32) -> (i32, i32, i32) {
    %c0_i32 = arith.constant 0 : i32
    %c0_i32_0 = arith.constant 0 : i32
    %c0_i32_1 = arith.constant 0 : i32
    return %arg0, %c0_i32, %c0_i32_0 : i32, i32, i32
  }
  func.func @transform_8(%arg0: i32) -> (i32, i32, i32) {
    %c0_i32 = arith.constant 0 : i32
    %c0_i32_0 = arith.constant 0 : i32
    %c0_i32_1 = arith.constant 0 : i32
    return %arg0, %c0_i32, %c0_i32_0 : i32, i32, i32
  }
  func.func @transform_9(%arg0: i32) -> (i32, i32, i32) {
    %c0_i32 = arith.constant 0 : i32
    %c0_i32_0 = arith.constant 0 : i32
    %c0_i32_1 = arith.constant 0 : i32
    return %arg0, %c0_i32, %c0_i32_0 : i32, i32, i32
  }
  func.func @transform_10(%arg0: i32) -> (i32, i32, i32) {
    %c0_i32 = arith.constant 0 : i32
    %c0_i32_0 = arith.constant 0 : i32
    %c0_i32_1 = arith.constant 0 : i32
    return %arg0, %c0_i32, %c0_i32_0 : i32, i32, i32
  }
  func.func @transform_11(%arg0: i32) -> (i32, i32, i32) {
    %c0_i32 = arith.constant 0 : i32
    %c0_i32_0 = arith.constant 0 : i32
    %c0_i32_1 = arith.constant 0 : i32
    return %arg0, %c0_i32, %c0_i32_0 : i32, i32, i32
  }
  func.func @transform_12(%arg0: i32) -> (i32, i32, i32) {
    %c0_i32 = arith.constant 0 : i32
    %c0_i32_0 = arith.constant 0 : i32
    %c0_i32_1 = arith.constant 0 : i32
    return %arg0, %c0_i32, %c0_i32_0 : i32, i32, i32
  }
  func.func @transform_13(%arg0: i32) -> (i32, i32) {
    %c0_i32 = arith.constant 0 : i32
    %c0_i32_0 = arith.constant 0 : i32
    %c0_i32_1 = arith.constant 0 : i32
    return %c0_i32, %c0_i32_0 : i32, i32
  }
  func.func @transform_14(%arg0: i32) -> (i32, i32, i32) {
    %c0_i32 = arith.constant 0 : i32
    %c0_i32_0 = arith.constant 0 : i32
    %c0_i32_1 = arith.constant 0 : i32
    return %arg0, %c0_i32, %c0_i32_0 : i32, i32, i32
  }
  func.func @transform_15(%arg0: i32) -> (i32, i32, i32, i32) {
    %c0_i32 = arith.constant 0 : i32
    %c0_i32_0 = arith.constant 0 : i32
    %c0_i32_1 = arith.constant 0 : i32
    %c0_i32_2 = arith.constant 0 : i32
    return %arg0, %c0_i32, %c0_i32_0, %c0_i32_1 : i32, i32, i32, i32
  }
}

module attributes {stable_mosaic.version = 11 : i64} {
  func.func @_part_kernel(%arg0: i32, %arg1: memref<1x2x64xf32, #tpu.memory_space<vmem>>, %arg2: memref<32x64xf32, #tpu.memory_space<vmem>>, %arg3: memref<1x6x64xf32, #tpu.memory_space<vmem>>, %arg4: memref<1x1x6xf32, #tpu.memory_space<vmem>>, %arg5: memref<1x1x64xf32, #tpu.memory_space<vmem>>, %arg6: memref<1x1x64xf32, #tpu.memory_space<vmem>>, %arg7: memref<1x1x64xf32, #tpu.memory_space<vmem>>, %arg8: memref<1x1x64xf32, #tpu.memory_space<vmem>>, %arg9: memref<1x64x64xbf16, #tpu.memory_space<vmem>>, %arg10: memref<1x1x64xf32, #tpu.memory_space<vmem>>, %arg11: memref<1x64x128xbf16, #tpu.memory_space<vmem>>, %arg12: memref<1x1x128xf32, #tpu.memory_space<vmem>>, %arg13: memref<1x64x64xbf16, #tpu.memory_space<vmem>>, %arg14: memref<1x1x64xf32, #tpu.memory_space<vmem>>, %arg15: memref<1x1x64xf32, #tpu.memory_space<vmem>>, %arg16: memref<1x1x64xf32, #tpu.memory_space<vmem>>, %arg17: memref<1x64x256xbf16, #tpu.memory_space<vmem>>, %arg18: memref<1x1x256xf32, #tpu.memory_space<vmem>>, %arg19: memref<1x256x64xbf16, #tpu.memory_space<vmem>>, %arg20: memref<1x1x64xf32, #tpu.memory_space<vmem>>, %arg21: memref<1x1x64xf32, #tpu.memory_space<vmem>>, %arg22: memref<1x1x64xf32, #tpu.memory_space<vmem>>, %arg23: memref<1x1x64xf32, #tpu.memory_space<vmem>>, %arg24: memref<1x1x64xf32, #tpu.memory_space<vmem>>, %arg25: memref<1x1x64xf32, #tpu.memory_space<vmem>>, %arg26: memref<1x1x64xf32, #tpu.memory_space<vmem>>, %arg27: memref<1x64x64xbf16, #tpu.memory_space<vmem>>, %arg28: memref<1x1x64xf32, #tpu.memory_space<vmem>>, %arg29: memref<1x64x128xbf16, #tpu.memory_space<vmem>>, %arg30: memref<1x1x128xf32, #tpu.memory_space<vmem>>, %arg31: memref<1x64x64xbf16, #tpu.memory_space<vmem>>, %arg32: memref<1x1x64xf32, #tpu.memory_space<vmem>>, %arg33: memref<1x1x64xf32, #tpu.memory_space<vmem>>, %arg34: memref<1x1x64xf32, #tpu.memory_space<vmem>>, %arg35: memref<1x64x256xbf16, #tpu.memory_space<vmem>>, %arg36: memref<1x1x256xf32, #tpu.memory_space<vmem>>, %arg37: memref<1x256x64xbf16, #tpu.memory_space<vmem>>, %arg38: memref<1x1x64xf32, #tpu.memory_space<vmem>>, %arg39: memref<1x1x64xf32, #tpu.memory_space<vmem>>, %arg40: memref<1x1x64xf32, #tpu.memory_space<vmem>>, %arg41: memref<1x2x128xf32, #tpu.memory_space<vmem>>) attributes {dimension_semantics = [#tpu.dimension_semantics<parallel>], iteration_bounds = array<i64: 8>, scalar_prefetch = 0 : i64, scratch_operands = 0 : i64, tpu.core_type = #tpu.core_type<tc>, window_params = [{transform_indices = @transform_0, window_bounds = array<i64: 1, 2, 64>}, {pipeline_mode = #tpu.pipeline_mode<synchronous>, transform_indices = @transform_1, window_bounds = array<i64: 32, 64>}, {transform_indices = @transform_2, window_bounds = array<i64: 1, 6, 64>}, {transform_indices = @transform_3, window_bounds = array<i64: 1, 1, 6>}, {transform_indices = @transform_4, window_bounds = array<i64: 1, 1, 64>}, {transform_indices = @transform_5, window_bounds = array<i64: 1, 1, 64>}, {transform_indices = @transform_6, window_bounds = array<i64: 1, 1, 64>}, {transform_indices = @transform_7, window_bounds = array<i64: 1, 1, 64>}, {transform_indices = @transform_8, window_bounds = array<i64: 1, 64, 64>}, {transform_indices = @transform_9, window_bounds = array<i64: 1, 1, 64>}, {transform_indices = @transform_10, window_bounds = array<i64: 1, 64, 128>}, {transform_indices = @transform_11, window_bounds = array<i64: 1, 1, 128>}, {transform_indices = @transform_12, window_bounds = array<i64: 1, 64, 64>}, {transform_indices = @transform_13, window_bounds = array<i64: 1, 1, 64>}, {transform_indices = @transform_14, window_bounds = array<i64: 1, 1, 64>}, {transform_indices = @transform_15, window_bounds = array<i64: 1, 1, 64>}, {transform_indices = @transform_16, window_bounds = array<i64: 1, 64, 256>}, {transform_indices = @transform_17, window_bounds = array<i64: 1, 1, 256>}, {transform_indices = @transform_18, window_bounds = array<i64: 1, 256, 64>}, {transform_indices = @transform_19, window_bounds = array<i64: 1, 1, 64>}, {transform_indices = @transform_20, window_bounds = array<i64: 1, 1, 64>}, {transform_indices = @transform_21, window_bounds = array<i64: 1, 1, 64>}, {transform_indices = @transform_22, window_bounds = array<i64: 1, 1, 64>}, {transform_indices = @transform_23, window_bounds = array<i64: 1, 1, 64>}, {transform_indices = @transform_24, window_bounds = array<i64: 1, 1, 64>}, {transform_indices = @transform_25, window_bounds = array<i64: 1, 1, 64>}, {transform_indices = @transform_26, window_bounds = array<i64: 1, 64, 64>}, {transform_indices = @transform_27, window_bounds = array<i64: 1, 1, 64>}, {transform_indices = @transform_28, window_bounds = array<i64: 1, 64, 128>}, {transform_indices = @transform_29, window_bounds = array<i64: 1, 1, 128>}, {transform_indices = @transform_30, window_bounds = array<i64: 1, 64, 64>}, {transform_indices = @transform_31, window_bounds = array<i64: 1, 1, 64>}, {transform_indices = @transform_32, window_bounds = array<i64: 1, 1, 64>}, {transform_indices = @transform_33, window_bounds = array<i64: 1, 1, 64>}, {transform_indices = @transform_34, window_bounds = array<i64: 1, 64, 256>}, {transform_indices = @transform_35, window_bounds = array<i64: 1, 1, 256>}, {transform_indices = @transform_36, window_bounds = array<i64: 1, 256, 64>}, {transform_indices = @transform_37, window_bounds = array<i64: 1, 1, 64>}, {transform_indices = @transform_38, window_bounds = array<i64: 1, 1, 64>}, {transform_indices = @transform_39, window_bounds = array<i64: 1, 1, 64>}, {transform_indices = @transform_40, window_bounds = array<i64: 1, 2, 128>}]} {
    %c0 = arith.constant 0 : index
    %c0_0 = arith.constant 0 : index
    %c0_1 = arith.constant 0 : index
    %0 = vector.load %arg1[%c0, %c0_0, %c0_1] : memref<1x2x64xf32, #tpu.memory_space<vmem>>, vector<1x2x64xf32>
    %1 = vector.shape_cast %0 : vector<1x2x64xf32> to vector<2x64xf32>
    %c0_2 = arith.constant 0 : index
    %c0_3 = arith.constant 0 : index
    %2 = vector.load %arg2[%c0_2, %c0_3] : memref<32x64xf32, #tpu.memory_space<vmem>>, vector<32x64xf32>
    %c0_4 = arith.constant 0 : index
    %c0_5 = arith.constant 0 : index
    %c0_6 = arith.constant 0 : index
    %3 = vector.load %arg3[%c0_4, %c0_5, %c0_6] : memref<1x6x64xf32, #tpu.memory_space<vmem>>, vector<1x6x64xf32>
    %4 = vector.shape_cast %3 : vector<1x6x64xf32> to vector<6x64xf32>
    %c0_7 = arith.constant 0 : index
    %c0_8 = arith.constant 0 : index
    %c0_9 = arith.constant 0 : index
    %5 = vector.load %arg4[%c0_7, %c0_8, %c0_9] : memref<1x1x6xf32, #tpu.memory_space<vmem>>, vector<1x1x6xf32>
    %6 = vector.shape_cast %5 : vector<1x1x6xf32> to vector<1x6xf32>
    %c0_10 = arith.constant 0 : index
    %c0_11 = arith.constant 0 : index
    %c0_12 = arith.constant 0 : index
    %7 = vector.load %arg5[%c0_10, %c0_11, %c0_12] : memref<1x1x64xf32, #tpu.memory_space<vmem>>, vector<1x1x64xf32>
    %8 = vector.shape_cast %7 : vector<1x1x64xf32> to vector<1x64xf32>
    %c0_13 = arith.constant 0 : index
    %c0_14 = arith.constant 0 : index
    %c0_15 = arith.constant 0 : index
    %9 = vector.load %arg6[%c0_13, %c0_14, %c0_15] : memref<1x1x64xf32, #tpu.memory_space<vmem>>, vector<1x1x64xf32>
    %10 = vector.shape_cast %9 : vector<1x1x64xf32> to vector<1x64xf32>
    %cst = arith.constant dense<0.000000e+00> : vector<2xf32>
    %11 = vector.multi_reduction <add>, %1, %cst [1] : vector<2x64xf32> to vector<2xf32>
    %12 = vector.shape_cast %11 : vector<2xf32> to vector<2x1xf32>
    %cst_16 = arith.constant 6.400000e+01 : f32
    %13 = vector.broadcast %cst_16 : f32 to vector<2x1xf32>
    %14 = arith.divf %12, %13 : vector<2x1xf32>
    %15 = vector.broadcast %14 : vector<2x1xf32> to vector<2x64xf32>
    %16 = arith.subf %1, %15 : vector<2x64xf32>
    %17 = arith.mulf %16, %16 : vector<2x64xf32>
    %cst_17 = arith.constant dense<0.000000e+00> : vector<2xf32>
    %18 = vector.multi_reduction <add>, %17, %cst_17 [1] : vector<2x64xf32> to vector<2xf32>
    %19 = vector.shape_cast %18 : vector<2xf32> to vector<2x1xf32>
    %cst_18 = arith.constant 6.400000e+01 : f32
    %20 = vector.broadcast %cst_18 : f32 to vector<2x1xf32>
    %21 = arith.divf %19, %20 : vector<2x1xf32>
    %22 = vector.broadcast %14 : vector<2x1xf32> to vector<2x64xf32>
    %23 = arith.subf %1, %22 : vector<2x64xf32>
    %cst_19 = arith.constant 9.99999974E-6 : f32
    %24 = vector.broadcast %cst_19 : f32 to vector<2x1xf32>
    %25 = arith.addf %21, %24 : vector<2x1xf32>
    %26 = math.rsqrt %25 : vector<2x1xf32>
    %27 = vector.broadcast %26 : vector<2x1xf32> to vector<2x64xf32>
    %28 = arith.mulf %23, %27 : vector<2x64xf32>
    %29 = vector.broadcast %8 : vector<1x64xf32> to vector<2x64xf32>
    %30 = arith.mulf %28, %29 : vector<2x64xf32>
    %31 = vector.broadcast %10 : vector<1x64xf32> to vector<2x64xf32>
    %32 = arith.addf %30, %31 : vector<2x64xf32>
    %c0_20 = arith.constant 0 : index
    %c0_21 = arith.constant 0 : index
    %c0_22 = arith.constant 0 : index
    %33 = vector.load %arg7[%c0_20, %c0_21, %c0_22] : memref<1x1x64xf32, #tpu.memory_space<vmem>>, vector<1x1x64xf32>
    %34 = vector.shape_cast %33 : vector<1x1x64xf32> to vector<1x64xf32>
    %c0_23 = arith.constant 0 : index
    %c0_24 = arith.constant 0 : index
    %c0_25 = arith.constant 0 : index
    %35 = vector.load %arg8[%c0_23, %c0_24, %c0_25] : memref<1x1x64xf32, #tpu.memory_space<vmem>>, vector<1x1x64xf32>
    %36 = vector.shape_cast %35 : vector<1x1x64xf32> to vector<1x64xf32>
    %cst_26 = arith.constant dense<0.000000e+00> : vector<32xf32>
    %37 = vector.multi_reduction <add>, %2, %cst_26 [1] : vector<32x64xf32> to vector<32xf32>
    %38 = vector.shape_cast %37 : vector<32xf32> to vector<32x1xf32>
    %cst_27 = arith.constant 6.400000e+01 : f32
    %39 = vector.broadcast %cst_27 : f32 to vector<32x1xf32>
    %40 = arith.divf %38, %39 : vector<32x1xf32>
    %41 = vector.broadcast %40 : vector<32x1xf32> to vector<32x64xf32>
    %42 = arith.subf %2, %41 : vector<32x64xf32>
    %43 = arith.mulf %42, %42 : vector<32x64xf32>
    %cst_28 = arith.constant dense<0.000000e+00> : vector<32xf32>
    %44 = vector.multi_reduction <add>, %43, %cst_28 [1] : vector<32x64xf32> to vector<32xf32>
    %45 = vector.shape_cast %44 : vector<32xf32> to vector<32x1xf32>
    %cst_29 = arith.constant 6.400000e+01 : f32
    %46 = vector.broadcast %cst_29 : f32 to vector<32x1xf32>
    %47 = arith.divf %45, %46 : vector<32x1xf32>
    %48 = vector.broadcast %40 : vector<32x1xf32> to vector<32x64xf32>
    %49 = arith.subf %2, %48 : vector<32x64xf32>
    %cst_30 = arith.constant 9.99999974E-6 : f32
    %50 = vector.broadcast %cst_30 : f32 to vector<32x1xf32>
    %51 = arith.addf %47, %50 : vector<32x1xf32>
    %52 = math.rsqrt %51 : vector<32x1xf32>
    %53 = vector.broadcast %52 : vector<32x1xf32> to vector<32x64xf32>
    %54 = arith.mulf %49, %53 : vector<32x64xf32>
    %55 = vector.broadcast %34 : vector<1x64xf32> to vector<32x64xf32>
    %56 = arith.mulf %54, %55 : vector<32x64xf32>
    %57 = vector.broadcast %36 : vector<1x64xf32> to vector<32x64xf32>
    %58 = arith.addf %56, %57 : vector<32x64xf32>
    %59 = arith.truncf %32 : vector<2x64xf32> to vector<2x64xbf16>
    %c0_31 = arith.constant 0 : index
    %c0_32 = arith.constant 0 : index
    %c0_33 = arith.constant 0 : index
    %60 = vector.load %arg9[%c0_31, %c0_32, %c0_33] : memref<1x64x64xbf16, #tpu.memory_space<vmem>>, vector<1x64x64xbf16>
    %61 = vector.shape_cast %60 : vector<1x64x64xbf16> to vector<64x64xbf16>
    %cst_34 = arith.constant dense<0.000000e+00> : vector<2x64xf32>
    %62 = tpu.matmul %59, %61, %cst_34 {dimension_numbers = #tpu.dot_dimension_numbers<[1], [0], [0], [1], [0, 0, 1, 1], [], []>} : vector<2x64xbf16>, vector<64x64xbf16>, vector<2x64xf32> -> vector<2x64xf32>
    %c0_35 = arith.constant 0 : index
    %c0_36 = arith.constant 0 : index
    %c0_37 = arith.constant 0 : index
    %63 = vector.load %arg10[%c0_35, %c0_36, %c0_37] : memref<1x1x64xf32, #tpu.memory_space<vmem>>, vector<1x1x64xf32>
    %64 = vector.shape_cast %63 : vector<1x1x64xf32> to vector<1x64xf32>
    %65 = vector.broadcast %64 : vector<1x64xf32> to vector<2x64xf32>
    %66 = arith.addf %62, %65 : vector<2x64xf32>
    %cst_38 = arith.constant 2.500000e-01 : f32
    %67 = vector.broadcast %cst_38 : f32 to vector<2x64xf32>
    %68 = arith.mulf %66, %67 : vector<2x64xf32>
    %69 = arith.truncf %58 : vector<32x64xf32> to vector<32x64xbf16>
    %c0_39 = arith.constant 0 : index
    %c0_40 = arith.constant 0 : index
    %c0_41 = arith.constant 0 : index
    %70 = vector.load %arg11[%c0_39, %c0_40, %c0_41] : memref<1x64x128xbf16, #tpu.memory_space<vmem>>, vector<1x64x128xbf16>
    %71 = vector.shape_cast %70 : vector<1x64x128xbf16> to vector<64x128xbf16>
    %cst_42 = arith.constant dense<0.000000e+00> : vector<32x128xf32>
    %72 = tpu.matmul %69, %71, %cst_42 {dimension_numbers = #tpu.dot_dimension_numbers<[1], [0], [0], [1], [0, 0, 1, 1], [], []>} : vector<32x64xbf16>, vector<64x128xbf16>, vector<32x128xf32> -> vector<32x128xf32>
    %c0_43 = arith.constant 0 : index
    %c0_44 = arith.constant 0 : index
    %c0_45 = arith.constant 0 : index
    %73 = vector.load %arg12[%c0_43, %c0_44, %c0_45] : memref<1x1x128xf32, #tpu.memory_space<vmem>>, vector<1x1x128xf32>
    %74 = vector.shape_cast %73 : vector<1x1x128xf32> to vector<1x128xf32>
    %75 = vector.broadcast %74 : vector<1x128xf32> to vector<32x128xf32>
    %76 = arith.addf %72, %75 : vector<32x128xf32>
    %77 = vector.extract_strided_slice %76 {offsets = [0, 0], sizes = [32, 64], strides = [1, 1]} : vector<32x128xf32> to vector<32x64xf32>
    %78 = vector.extract_strided_slice %76 {offsets = [0, 64], sizes = [32, 64], strides = [1, 1]} : vector<32x128xf32> to vector<32x64xf32>
    %79 = vector.extract_strided_slice %68 {offsets = [0, 0], sizes = [1, 64], strides = [1, 1]} : vector<2x64xf32> to vector<1x64xf32>
    %80 = vector.extract_strided_slice %77 {offsets = [0, 0], sizes = [16, 64], strides = [1, 1]} : vector<32x64xf32> to vector<16x64xf32>
    %81 = vector.extract_strided_slice %78 {offsets = [0, 0], sizes = [16, 64], strides = [1, 1]} : vector<32x64xf32> to vector<16x64xf32>
    %82 = arith.truncf %79 : vector<1x64xf32> to vector<1x64xbf16>
    %83 = arith.truncf %80 : vector<16x64xf32> to vector<16x64xbf16>
    %84 = arith.truncf %81 : vector<16x64xf32> to vector<16x64xbf16>
    %cst_46 = arith.constant 0.000000e+00 : f32
    %85 = vector.broadcast %cst_46 : f32 to vector<1x16xf32>
    %86 = vector.extract_strided_slice %82 {offsets = [0, 0], sizes = [1, 16], strides = [1, 1]} : vector<1x64xbf16> to vector<1x16xbf16>
    %87 = vector.extract_strided_slice %83 {offsets = [0, 0], sizes = [16, 16], strides = [1, 1]} : vector<16x64xbf16> to vector<16x16xbf16>
    %cst_47 = arith.constant dense<0.000000e+00> : vector<1x16xf32>
    %88 = tpu.matmul %86, %87, %cst_47 {dimension_numbers = #tpu.dot_dimension_numbers<[1], [1], [0], [0], [0, 0, 1, 0], [], []>} : vector<1x16xbf16>, vector<16x16xbf16>, vector<1x16xf32> -> vector<1x16xf32>
    %cst_48 = arith.constant dense<0xFF800000> : vector<1xf32>
    %89 = vector.multi_reduction <maximumf>, %88, %cst_48 [1] : vector<1x16xf32> to vector<1xf32>
    %90 = vector.shape_cast %89 : vector<1xf32> to vector<1x1xf32>
    %91 = vector.broadcast %90 : vector<1x1xf32> to vector<1x16xf32>
    %92 = arith.subf %88, %91 : vector<1x16xf32>
    %93 = math.exp %92 : vector<1x16xf32>
    %cst_49 = arith.constant dense<0.000000e+00> : vector<1xf32>
    %94 = vector.multi_reduction <add>, %93, %cst_49 [1] : vector<1x16xf32> to vector<1xf32>
    %95 = vector.shape_cast %94 : vector<1xf32> to vector<1x1xf32>
    %96 = tpu.reciprocal %95 {approx = true} : vector<1x1xf32> -> vector<1x1xf32>
    %97 = vector.broadcast %96 : vector<1x1xf32> to vector<1x16xf32>
    %98 = arith.mulf %93, %97 : vector<1x16xf32>
    %99 = arith.addf %85, %98 : vector<1x16xf32>
    %100 = arith.truncf %98 : vector<1x16xf32> to vector<1x16xbf16>
    %101 = vector.extract_strided_slice %84 {offsets = [0, 0], sizes = [16, 16], strides = [1, 1]} : vector<16x64xbf16> to vector<16x16xbf16>
    %cst_50 = arith.constant dense<0.000000e+00> : vector<1x16xf32>
    %102 = tpu.matmul %100, %101, %cst_50 {dimension_numbers = #tpu.dot_dimension_numbers<[1], [0], [0], [1], [0, 0, 1, 1], [], []>} : vector<1x16xbf16>, vector<16x16xbf16>, vector<1x16xf32> -> vector<1x16xf32>
    %103 = vector.extract_strided_slice %82 {offsets = [0, 16], sizes = [1, 16], strides = [1, 1]} : vector<1x64xbf16> to vector<1x16xbf16>
    %104 = vector.extract_strided_slice %83 {offsets = [0, 16], sizes = [16, 16], strides = [1, 1]} : vector<16x64xbf16> to vector<16x16xbf16>
    %cst_51 = arith.constant dense<0.000000e+00> : vector<1x16xf32>
    %105 = tpu.matmul %103, %104, %cst_51 {dimension_numbers = #tpu.dot_dimension_numbers<[1], [1], [0], [0], [0, 0, 1, 0], [], []>} : vector<1x16xbf16>, vector<16x16xbf16>, vector<1x16xf32> -> vector<1x16xf32>
    %cst_52 = arith.constant dense<0xFF800000> : vector<1xf32>
    %106 = vector.multi_reduction <maximumf>, %105, %cst_52 [1] : vector<1x16xf32> to vector<1xf32>
    %107 = vector.shape_cast %106 : vector<1xf32> to vector<1x1xf32>
    %108 = vector.broadcast %107 : vector<1x1xf32> to vector<1x16xf32>
    %109 = arith.subf %105, %108 : vector<1x16xf32>
    %110 = math.exp %109 : vector<1x16xf32>
    %cst_53 = arith.constant dense<0.000000e+00> : vector<1xf32>
    %111 = vector.multi_reduction <add>, %110, %cst_53 [1] : vector<1x16xf32> to vector<1xf32>
    %112 = vector.shape_cast %111 : vector<1xf32> to vector<1x1xf32>
    %113 = tpu.reciprocal %112 {approx = true} : vector<1x1xf32> -> vector<1x1xf32>
    %114 = vector.broadcast %113 : vector<1x1xf32> to vector<1x16xf32>
    %115 = arith.mulf %110, %114 : vector<1x16xf32>
    %116 = arith.addf %99, %115 : vector<1x16xf32>
    %117 = arith.truncf %115 : vector<1x16xf32> to vector<1x16xbf16>
    %118 = vector.extract_strided_slice %84 {offsets = [0, 16], sizes = [16, 16], strides = [1, 1]} : vector<16x64xbf16> to vector<16x16xbf16>
    %cst_54 = arith.constant dense<0.000000e+00> : vector<1x16xf32>
    %119 = tpu.matmul %117, %118, %cst_54 {dimension_numbers = #tpu.dot_dimension_numbers<[1], [0], [0], [1], [0, 0, 1, 1], [], []>} : vector<1x16xbf16>, vector<16x16xbf16>, vector<1x16xf32> -> vector<1x16xf32>
    %120 = vector.extract_strided_slice %82 {offsets = [0, 32], sizes = [1, 16], strides = [1, 1]} : vector<1x64xbf16> to vector<1x16xbf16>
    %121 = vector.extract_strided_slice %83 {offsets = [0, 32], sizes = [16, 16], strides = [1, 1]} : vector<16x64xbf16> to vector<16x16xbf16>
    %cst_55 = arith.constant dense<0.000000e+00> : vector<1x16xf32>
    %122 = tpu.matmul %120, %121, %cst_55 {dimension_numbers = #tpu.dot_dimension_numbers<[1], [1], [0], [0], [0, 0, 1, 0], [], []>} : vector<1x16xbf16>, vector<16x16xbf16>, vector<1x16xf32> -> vector<1x16xf32>
    %cst_56 = arith.constant dense<0xFF800000> : vector<1xf32>
    %123 = vector.multi_reduction <maximumf>, %122, %cst_56 [1] : vector<1x16xf32> to vector<1xf32>
    %124 = vector.shape_cast %123 : vector<1xf32> to vector<1x1xf32>
    %125 = vector.broadcast %124 : vector<1x1xf32> to vector<1x16xf32>
    %126 = arith.subf %122, %125 : vector<1x16xf32>
    %127 = math.exp %126 : vector<1x16xf32>
    %cst_57 = arith.constant dense<0.000000e+00> : vector<1xf32>
    %128 = vector.multi_reduction <add>, %127, %cst_57 [1] : vector<1x16xf32> to vector<1xf32>
    %129 = vector.shape_cast %128 : vector<1xf32> to vector<1x1xf32>
    %130 = tpu.reciprocal %129 {approx = true} : vector<1x1xf32> -> vector<1x1xf32>
    %131 = vector.broadcast %130 : vector<1x1xf32> to vector<1x16xf32>
    %132 = arith.mulf %127, %131 : vector<1x16xf32>
    %133 = arith.addf %116, %132 : vector<1x16xf32>
    %134 = arith.truncf %132 : vector<1x16xf32> to vector<1x16xbf16>
    %135 = vector.extract_strided_slice %84 {offsets = [0, 32], sizes = [16, 16], strides = [1, 1]} : vector<16x64xbf16> to vector<16x16xbf16>
    %cst_58 = arith.constant dense<0.000000e+00> : vector<1x16xf32>
    %136 = tpu.matmul %134, %135, %cst_58 {dimension_numbers = #tpu.dot_dimension_numbers<[1], [0], [0], [1], [0, 0, 1, 1], [], []>} : vector<1x16xbf16>, vector<16x16xbf16>, vector<1x16xf32> -> vector<1x16xf32>
    %137 = vector.extract_strided_slice %82 {offsets = [0, 48], sizes = [1, 16], strides = [1, 1]} : vector<1x64xbf16> to vector<1x16xbf16>
    %138 = vector.extract_strided_slice %83 {offsets = [0, 48], sizes = [16, 16], strides = [1, 1]} : vector<16x64xbf16> to vector<16x16xbf16>
    %cst_59 = arith.constant dense<0.000000e+00> : vector<1x16xf32>
    %139 = tpu.matmul %137, %138, %cst_59 {dimension_numbers = #tpu.dot_dimension_numbers<[1], [1], [0], [0], [0, 0, 1, 0], [], []>} : vector<1x16xbf16>, vector<16x16xbf16>, vector<1x16xf32> -> vector<1x16xf32>
    %cst_60 = arith.constant dense<0xFF800000> : vector<1xf32>
    %140 = vector.multi_reduction <maximumf>, %139, %cst_60 [1] : vector<1x16xf32> to vector<1xf32>
    %141 = vector.shape_cast %140 : vector<1xf32> to vector<1x1xf32>
    %142 = vector.broadcast %141 : vector<1x1xf32> to vector<1x16xf32>
    %143 = arith.subf %139, %142 : vector<1x16xf32>
    %144 = math.exp %143 : vector<1x16xf32>
    %cst_61 = arith.constant dense<0.000000e+00> : vector<1xf32>
    %145 = vector.multi_reduction <add>, %144, %cst_61 [1] : vector<1x16xf32> to vector<1xf32>
    %146 = vector.shape_cast %145 : vector<1xf32> to vector<1x1xf32>
    %147 = tpu.reciprocal %146 {approx = true} : vector<1x1xf32> -> vector<1x1xf32>
    %148 = vector.broadcast %147 : vector<1x1xf32> to vector<1x16xf32>
    %149 = arith.mulf %144, %148 : vector<1x16xf32>
    %150 = arith.addf %133, %149 : vector<1x16xf32>
    %151 = arith.truncf %149 : vector<1x16xf32> to vector<1x16xbf16>
    %152 = vector.extract_strided_slice %84 {offsets = [0, 48], sizes = [16, 16], strides = [1, 1]} : vector<16x64xbf16> to vector<16x16xbf16>
    %cst_62 = arith.constant dense<0.000000e+00> : vector<1x16xf32>
    %153 = tpu.matmul %151, %152, %cst_62 {dimension_numbers = #tpu.dot_dimension_numbers<[1], [0], [0], [1], [0, 0, 1, 1], [], []>} : vector<1x16xbf16>, vector<16x16xbf16>, vector<1x16xf32> -> vector<1x16xf32>
    %154 = tpu.concatenate %102, %119, %136, %153 in 1 : vector<1x16xf32>, vector<1x16xf32>, vector<1x16xf32>, vector<1x16xf32> -> vector<1x64xf32>
    %cst_63 = arith.constant 2.500000e-01 : f32
    %155 = vector.broadcast %cst_63 : f32 to vector<1x16xf32>
    %156 = arith.mulf %150, %155 : vector<1x16xf32>
    %157 = vector.extract_strided_slice %68 {offsets = [1, 0], sizes = [1, 64], strides = [1, 1]} : vector<2x64xf32> to vector<1x64xf32>
    %158 = vector.extract_strided_slice %77 {offsets = [16, 0], sizes = [16, 64], strides = [1, 1]} : vector<32x64xf32> to vector<16x64xf32>
    %159 = vector.extract_strided_slice %78 {offsets = [16, 0], sizes = [16, 64], strides = [1, 1]} : vector<32x64xf32> to vector<16x64xf32>
    %160 = arith.truncf %157 : vector<1x64xf32> to vector<1x64xbf16>
    %161 = arith.truncf %158 : vector<16x64xf32> to vector<16x64xbf16>
    %162 = arith.truncf %159 : vector<16x64xf32> to vector<16x64xbf16>
    %cst_64 = arith.constant 0.000000e+00 : f32
    %163 = vector.broadcast %cst_64 : f32 to vector<1x16xf32>
    %164 = vector.extract_strided_slice %160 {offsets = [0, 0], sizes = [1, 16], strides = [1, 1]} : vector<1x64xbf16> to vector<1x16xbf16>
    %165 = vector.extract_strided_slice %161 {offsets = [0, 0], sizes = [16, 16], strides = [1, 1]} : vector<16x64xbf16> to vector<16x16xbf16>
    %cst_65 = arith.constant dense<0.000000e+00> : vector<1x16xf32>
    %166 = tpu.matmul %164, %165, %cst_65 {dimension_numbers = #tpu.dot_dimension_numbers<[1], [1], [0], [0], [0, 0, 1, 0], [], []>} : vector<1x16xbf16>, vector<16x16xbf16>, vector<1x16xf32> -> vector<1x16xf32>
    %cst_66 = arith.constant dense<0xFF800000> : vector<1xf32>
    %167 = vector.multi_reduction <maximumf>, %166, %cst_66 [1] : vector<1x16xf32> to vector<1xf32>
    %168 = vector.shape_cast %167 : vector<1xf32> to vector<1x1xf32>
    %169 = vector.broadcast %168 : vector<1x1xf32> to vector<1x16xf32>
    %170 = arith.subf %166, %169 : vector<1x16xf32>
    %171 = math.exp %170 : vector<1x16xf32>
    %cst_67 = arith.constant dense<0.000000e+00> : vector<1xf32>
    %172 = vector.multi_reduction <add>, %171, %cst_67 [1] : vector<1x16xf32> to vector<1xf32>
    %173 = vector.shape_cast %172 : vector<1xf32> to vector<1x1xf32>
    %174 = tpu.reciprocal %173 {approx = true} : vector<1x1xf32> -> vector<1x1xf32>
    %175 = vector.broadcast %174 : vector<1x1xf32> to vector<1x16xf32>
    %176 = arith.mulf %171, %175 : vector<1x16xf32>
    %177 = arith.addf %163, %176 : vector<1x16xf32>
    %178 = arith.truncf %176 : vector<1x16xf32> to vector<1x16xbf16>
    %179 = vector.extract_strided_slice %162 {offsets = [0, 0], sizes = [16, 16], strides = [1, 1]} : vector<16x64xbf16> to vector<16x16xbf16>
    %cst_68 = arith.constant dense<0.000000e+00> : vector<1x16xf32>
    %180 = tpu.matmul %178, %179, %cst_68 {dimension_numbers = #tpu.dot_dimension_numbers<[1], [0], [0], [1], [0, 0, 1, 1], [], []>} : vector<1x16xbf16>, vector<16x16xbf16>, vector<1x16xf32> -> vector<1x16xf32>
    %181 = vector.extract_strided_slice %160 {offsets = [0, 16], sizes = [1, 16], strides = [1, 1]} : vector<1x64xbf16> to vector<1x16xbf16>
    %182 = vector.extract_strided_slice %161 {offsets = [0, 16], sizes = [16, 16], strides = [1, 1]} : vector<16x64xbf16> to vector<16x16xbf16>
    %cst_69 = arith.constant dense<0.000000e+00> : vector<1x16xf32>
    %183 = tpu.matmul %181, %182, %cst_69 {dimension_numbers = #tpu.dot_dimension_numbers<[1], [1], [0], [0], [0, 0, 1, 0], [], []>} : vector<1x16xbf16>, vector<16x16xbf16>, vector<1x16xf32> -> vector<1x16xf32>
    %cst_70 = arith.constant dense<0xFF800000> : vector<1xf32>
    %184 = vector.multi_reduction <maximumf>, %183, %cst_70 [1] : vector<1x16xf32> to vector<1xf32>
    %185 = vector.shape_cast %184 : vector<1xf32> to vector<1x1xf32>
    %186 = vector.broadcast %185 : vector<1x1xf32> to vector<1x16xf32>
    %187 = arith.subf %183, %186 : vector<1x16xf32>
    %188 = math.exp %187 : vector<1x16xf32>
    %cst_71 = arith.constant dense<0.000000e+00> : vector<1xf32>
    %189 = vector.multi_reduction <add>, %188, %cst_71 [1] : vector<1x16xf32> to vector<1xf32>
    %190 = vector.shape_cast %189 : vector<1xf32> to vector<1x1xf32>
    %191 = tpu.reciprocal %190 {approx = true} : vector<1x1xf32> -> vector<1x1xf32>
    %192 = vector.broadcast %191 : vector<1x1xf32> to vector<1x16xf32>
    %193 = arith.mulf %188, %192 : vector<1x16xf32>
    %194 = arith.addf %177, %193 : vector<1x16xf32>
    %195 = arith.truncf %193 : vector<1x16xf32> to vector<1x16xbf16>
    %196 = vector.extract_strided_slice %162 {offsets = [0, 16], sizes = [16, 16], strides = [1, 1]} : vector<16x64xbf16> to vector<16x16xbf16>
    %cst_72 = arith.constant dense<0.000000e+00> : vector<1x16xf32>
    %197 = tpu.matmul %195, %196, %cst_72 {dimension_numbers = #tpu.dot_dimension_numbers<[1], [0], [0], [1], [0, 0, 1, 1], [], []>} : vector<1x16xbf16>, vector<16x16xbf16>, vector<1x16xf32> -> vector<1x16xf32>
    %198 = vector.extract_strided_slice %160 {offsets = [0, 32], sizes = [1, 16], strides = [1, 1]} : vector<1x64xbf16> to vector<1x16xbf16>
    %199 = vector.extract_strided_slice %161 {offsets = [0, 32], sizes = [16, 16], strides = [1, 1]} : vector<16x64xbf16> to vector<16x16xbf16>
    %cst_73 = arith.constant dense<0.000000e+00> : vector<1x16xf32>
    %200 = tpu.matmul %198, %199, %cst_73 {dimension_numbers = #tpu.dot_dimension_numbers<[1], [1], [0], [0], [0, 0, 1, 0], [], []>} : vector<1x16xbf16>, vector<16x16xbf16>, vector<1x16xf32> -> vector<1x16xf32>
    %cst_74 = arith.constant dense<0xFF800000> : vector<1xf32>
    %201 = vector.multi_reduction <maximumf>, %200, %cst_74 [1] : vector<1x16xf32> to vector<1xf32>
    %202 = vector.shape_cast %201 : vector<1xf32> to vector<1x1xf32>
    %203 = vector.broadcast %202 : vector<1x1xf32> to vector<1x16xf32>
    %204 = arith.subf %200, %203 : vector<1x16xf32>
    %205 = math.exp %204 : vector<1x16xf32>
    %cst_75 = arith.constant dense<0.000000e+00> : vector<1xf32>
    %206 = vector.multi_reduction <add>, %205, %cst_75 [1] : vector<1x16xf32> to vector<1xf32>
    %207 = vector.shape_cast %206 : vector<1xf32> to vector<1x1xf32>
    %208 = tpu.reciprocal %207 {approx = true} : vector<1x1xf32> -> vector<1x1xf32>
    %209 = vector.broadcast %208 : vector<1x1xf32> to vector<1x16xf32>
    %210 = arith.mulf %205, %209 : vector<1x16xf32>
    %211 = arith.addf %194, %210 : vector<1x16xf32>
    %212 = arith.truncf %210 : vector<1x16xf32> to vector<1x16xbf16>
    %213 = vector.extract_strided_slice %162 {offsets = [0, 32], sizes = [16, 16], strides = [1, 1]} : vector<16x64xbf16> to vector<16x16xbf16>
    %cst_76 = arith.constant dense<0.000000e+00> : vector<1x16xf32>
    %214 = tpu.matmul %212, %213, %cst_76 {dimension_numbers = #tpu.dot_dimension_numbers<[1], [0], [0], [1], [0, 0, 1, 1], [], []>} : vector<1x16xbf16>, vector<16x16xbf16>, vector<1x16xf32> -> vector<1x16xf32>
    %215 = vector.extract_strided_slice %160 {offsets = [0, 48], sizes = [1, 16], strides = [1, 1]} : vector<1x64xbf16> to vector<1x16xbf16>
    %216 = vector.extract_strided_slice %161 {offsets = [0, 48], sizes = [16, 16], strides = [1, 1]} : vector<16x64xbf16> to vector<16x16xbf16>
    %cst_77 = arith.constant dense<0.000000e+00> : vector<1x16xf32>
    %217 = tpu.matmul %215, %216, %cst_77 {dimension_numbers = #tpu.dot_dimension_numbers<[1], [1], [0], [0], [0, 0, 1, 0], [], []>} : vector<1x16xbf16>, vector<16x16xbf16>, vector<1x16xf32> -> vector<1x16xf32>
    %cst_78 = arith.constant dense<0xFF800000> : vector<1xf32>
    %218 = vector.multi_reduction <maximumf>, %217, %cst_78 [1] : vector<1x16xf32> to vector<1xf32>
    %219 = vector.shape_cast %218 : vector<1xf32> to vector<1x1xf32>
    %220 = vector.broadcast %219 : vector<1x1xf32> to vector<1x16xf32>
    %221 = arith.subf %217, %220 : vector<1x16xf32>
    %222 = math.exp %221 : vector<1x16xf32>
    %cst_79 = arith.constant dense<0.000000e+00> : vector<1xf32>
    %223 = vector.multi_reduction <add>, %222, %cst_79 [1] : vector<1x16xf32> to vector<1xf32>
    %224 = vector.shape_cast %223 : vector<1xf32> to vector<1x1xf32>
    %225 = tpu.reciprocal %224 {approx = true} : vector<1x1xf32> -> vector<1x1xf32>
    %226 = vector.broadcast %225 : vector<1x1xf32> to vector<1x16xf32>
    %227 = arith.mulf %222, %226 : vector<1x16xf32>
    %228 = arith.addf %211, %227 : vector<1x16xf32>
    %229 = arith.truncf %227 : vector<1x16xf32> to vector<1x16xbf16>
    %230 = vector.extract_strided_slice %162 {offsets = [0, 48], sizes = [16, 16], strides = [1, 1]} : vector<16x64xbf16> to vector<16x16xbf16>
    %cst_80 = arith.constant dense<0.000000e+00> : vector<1x16xf32>
    %231 = tpu.matmul %229, %230, %cst_80 {dimension_numbers = #tpu.dot_dimension_numbers<[1], [0], [0], [1], [0, 0, 1, 1], [], []>} : vector<1x16xbf16>, vector<16x16xbf16>, vector<1x16xf32> -> vector<1x16xf32>
    %232 = tpu.concatenate %180, %197, %214, %231 in 1 : vector<1x16xf32>, vector<1x16xf32>, vector<1x16xf32>, vector<1x16xf32> -> vector<1x64xf32>
    %cst_81 = arith.constant 2.500000e-01 : f32
    %233 = vector.broadcast %cst_81 : f32 to vector<1x16xf32>
    %234 = arith.mulf %228, %233 : vector<1x16xf32>
    %235 = tpu.concatenate %154, %232 in 0 : vector<1x64xf32>, vector<1x64xf32> -> vector<2x64xf32>
    %236 = arith.truncf %235 : vector<2x64xf32> to vector<2x64xbf16>
    %c0_82 = arith.constant 0 : index
    %c0_83 = arith.constant 0 : index
    %c0_84 = arith.constant 0 : index
    %237 = vector.load %arg13[%c0_82, %c0_83, %c0_84] : memref<1x64x64xbf16, #tpu.memory_space<vmem>>, vector<1x64x64xbf16>
    %238 = vector.shape_cast %237 : vector<1x64x64xbf16> to vector<64x64xbf16>
    %cst_85 = arith.constant dense<0.000000e+00> : vector<2x64xf32>
    %239 = tpu.matmul %236, %238, %cst_85 {dimension_numbers = #tpu.dot_dimension_numbers<[1], [0], [0], [1], [0, 0, 1, 1], [], []>} : vector<2x64xbf16>, vector<64x64xbf16>, vector<2x64xf32> -> vector<2x64xf32>
    %240 = arith.addf %1, %239 : vector<2x64xf32>
    %c0_86 = arith.constant 0 : index
    %c0_87 = arith.constant 0 : index
    %c0_88 = arith.constant 0 : index
    %241 = vector.load %arg14[%c0_86, %c0_87, %c0_88] : memref<1x1x64xf32, #tpu.memory_space<vmem>>, vector<1x1x64xf32>
    %242 = vector.shape_cast %241 : vector<1x1x64xf32> to vector<1x64xf32>
    %243 = vector.broadcast %242 : vector<1x64xf32> to vector<2x64xf32>
    %244 = arith.addf %240, %243 : vector<2x64xf32>
    %c0_89 = arith.constant 0 : index
    %c0_90 = arith.constant 0 : index
    %c0_91 = arith.constant 0 : index
    %245 = vector.load %arg15[%c0_89, %c0_90, %c0_91] : memref<1x1x64xf32, #tpu.memory_space<vmem>>, vector<1x1x64xf32>
    %246 = vector.shape_cast %245 : vector<1x1x64xf32> to vector<1x64xf32>
    %c0_92 = arith.constant 0 : index
    %c0_93 = arith.constant 0 : index
    %c0_94 = arith.constant 0 : index
    %247 = vector.load %arg16[%c0_92, %c0_93, %c0_94] : memref<1x1x64xf32, #tpu.memory_space<vmem>>, vector<1x1x64xf32>
    %248 = vector.shape_cast %247 : vector<1x1x64xf32> to vector<1x64xf32>
    %cst_95 = arith.constant dense<0.000000e+00> : vector<2xf32>
    %249 = vector.multi_reduction <add>, %244, %cst_95 [1] : vector<2x64xf32> to vector<2xf32>
    %250 = vector.shape_cast %249 : vector<2xf32> to vector<2x1xf32>
    %cst_96 = arith.constant 6.400000e+01 : f32
    %251 = vector.broadcast %cst_96 : f32 to vector<2x1xf32>
    %252 = arith.divf %250, %251 : vector<2x1xf32>
    %253 = vector.broadcast %252 : vector<2x1xf32> to vector<2x64xf32>
    %254 = arith.subf %244, %253 : vector<2x64xf32>
    %255 = arith.mulf %254, %254 : vector<2x64xf32>
    %cst_97 = arith.constant dense<0.000000e+00> : vector<2xf32>
    %256 = vector.multi_reduction <add>, %255, %cst_97 [1] : vector<2x64xf32> to vector<2xf32>
    %257 = vector.shape_cast %256 : vector<2xf32> to vector<2x1xf32>
    %cst_98 = arith.constant 6.400000e+01 : f32
    %258 = vector.broadcast %cst_98 : f32 to vector<2x1xf32>
    %259 = arith.divf %257, %258 : vector<2x1xf32>
    %260 = vector.broadcast %252 : vector<2x1xf32> to vector<2x64xf32>
    %261 = arith.subf %244, %260 : vector<2x64xf32>
    %cst_99 = arith.constant 9.99999974E-6 : f32
    %262 = vector.broadcast %cst_99 : f32 to vector<2x1xf32>
    %263 = arith.addf %259, %262 : vector<2x1xf32>
    %264 = math.rsqrt %263 : vector<2x1xf32>
    %265 = vector.broadcast %264 : vector<2x1xf32> to vector<2x64xf32>
    %266 = arith.mulf %261, %265 : vector<2x64xf32>
    %267 = vector.broadcast %246 : vector<1x64xf32> to vector<2x64xf32>
    %268 = arith.mulf %266, %267 : vector<2x64xf32>
    %269 = vector.broadcast %248 : vector<1x64xf32> to vector<2x64xf32>
    %270 = arith.addf %268, %269 : vector<2x64xf32>
    %271 = arith.truncf %270 : vector<2x64xf32> to vector<2x64xbf16>
    %c0_100 = arith.constant 0 : index
    %c0_101 = arith.constant 0 : index
    %c0_102 = arith.constant 0 : index
    %272 = vector.load %arg17[%c0_100, %c0_101, %c0_102] : memref<1x64x256xbf16, #tpu.memory_space<vmem>>, vector<1x64x256xbf16>
    %273 = vector.shape_cast %272 : vector<1x64x256xbf16> to vector<64x256xbf16>
    %cst_103 = arith.constant dense<0.000000e+00> : vector<2x256xf32>
    %274 = tpu.matmul %271, %273, %cst_103 {dimension_numbers = #tpu.dot_dimension_numbers<[1], [0], [0], [1], [0, 0, 1, 1], [], []>} : vector<2x64xbf16>, vector<64x256xbf16>, vector<2x256xf32> -> vector<2x256xf32>
    %c0_104 = arith.constant 0 : index
    %c0_105 = arith.constant 0 : index
    %c0_106 = arith.constant 0 : index
    %275 = vector.load %arg18[%c0_104, %c0_105, %c0_106] : memref<1x1x256xf32, #tpu.memory_space<vmem>>, vector<1x1x256xf32>
    %276 = vector.shape_cast %275 : vector<1x1x256xf32> to vector<1x256xf32>
    %277 = vector.broadcast %276 : vector<1x256xf32> to vector<2x256xf32>
    %278 = arith.addf %274, %277 : vector<2x256xf32>
    %279 = arith.mulf %278, %278 : vector<2x256xf32>
    %280 = arith.mulf %278, %279 : vector<2x256xf32>
    %cst_107 = arith.constant 4.471500e-02 : f32
    %281 = vector.broadcast %cst_107 : f32 to vector<2x256xf32>
    %282 = arith.mulf %281, %280 : vector<2x256xf32>
    %283 = arith.addf %278, %282 : vector<2x256xf32>
    %cst_108 = arith.constant 0.797884583 : f32
    %284 = vector.broadcast %cst_108 : f32 to vector<2x256xf32>
    %285 = arith.mulf %284, %283 : vector<2x256xf32>
    %286 = math.tanh %285 : vector<2x256xf32>
    %cst_109 = arith.constant 1.000000e+00 : f32
    %287 = vector.broadcast %cst_109 : f32 to vector<2x256xf32>
    %288 = arith.addf %287, %286 : vector<2x256xf32>
    %cst_110 = arith.constant 5.000000e-01 : f32
    %289 = vector.broadcast %cst_110 : f32 to vector<2x256xf32>
    %290 = arith.mulf %289, %288 : vector<2x256xf32>
    %291 = arith.mulf %278, %290 : vector<2x256xf32>
    %292 = arith.truncf %291 : vector<2x256xf32> to vector<2x256xbf16>
    %c0_111 = arith.constant 0 : index
    %c0_112 = arith.constant 0 : index
    %c0_113 = arith.constant 0 : index
    %293 = vector.load %arg19[%c0_111, %c0_112, %c0_113] : memref<1x256x64xbf16, #tpu.memory_space<vmem>>, vector<1x256x64xbf16>
    %294 = vector.shape_cast %293 : vector<1x256x64xbf16> to vector<256x64xbf16>
    %cst_114 = arith.constant dense<0.000000e+00> : vector<2x64xf32>
    %295 = tpu.matmul %292, %294, %cst_114 {dimension_numbers = #tpu.dot_dimension_numbers<[1], [0], [0], [1], [0, 0, 1, 1], [], []>} : vector<2x256xbf16>, vector<256x64xbf16>, vector<2x64xf32> -> vector<2x64xf32>
    %296 = arith.addf %244, %295 : vector<2x64xf32>
    %c0_115 = arith.constant 0 : index
    %c0_116 = arith.constant 0 : index
    %c0_117 = arith.constant 0 : index
    %297 = vector.load %arg20[%c0_115, %c0_116, %c0_117] : memref<1x1x64xf32, #tpu.memory_space<vmem>>, vector<1x1x64xf32>
    %298 = vector.shape_cast %297 : vector<1x1x64xf32> to vector<1x64xf32>
    %299 = vector.broadcast %298 : vector<1x64xf32> to vector<2x64xf32>
    %300 = arith.addf %296, %299 : vector<2x64xf32>
    %c0_118 = arith.constant 0 : index
    %c0_119 = arith.constant 0 : index
    %c0_120 = arith.constant 0 : index
    %301 = vector.load %arg21[%c0_118, %c0_119, %c0_120] : memref<1x1x64xf32, #tpu.memory_space<vmem>>, vector<1x1x64xf32>
    %302 = vector.shape_cast %301 : vector<1x1x64xf32> to vector<1x64xf32>
    %c0_121 = arith.constant 0 : index
    %c0_122 = arith.constant 0 : index
    %c0_123 = arith.constant 0 : index
    %303 = vector.load %arg22[%c0_121, %c0_122, %c0_123] : memref<1x1x64xf32, #tpu.memory_space<vmem>>, vector<1x1x64xf32>
    %304 = vector.shape_cast %303 : vector<1x1x64xf32> to vector<1x64xf32>
    %cst_124 = arith.constant dense<0.000000e+00> : vector<2xf32>
    %305 = vector.multi_reduction <add>, %300, %cst_124 [1] : vector<2x64xf32> to vector<2xf32>
    %306 = vector.shape_cast %305 : vector<2xf32> to vector<2x1xf32>
    %cst_125 = arith.constant 6.400000e+01 : f32
    %307 = vector.broadcast %cst_125 : f32 to vector<2x1xf32>
    %308 = arith.divf %306, %307 : vector<2x1xf32>
    %309 = vector.broadcast %308 : vector<2x1xf32> to vector<2x64xf32>
    %310 = arith.subf %300, %309 : vector<2x64xf32>
    %311 = arith.mulf %310, %310 : vector<2x64xf32>
    %cst_126 = arith.constant dense<0.000000e+00> : vector<2xf32>
    %312 = vector.multi_reduction <add>, %311, %cst_126 [1] : vector<2x64xf32> to vector<2xf32>
    %313 = vector.shape_cast %312 : vector<2xf32> to vector<2x1xf32>
    %cst_127 = arith.constant 6.400000e+01 : f32
    %314 = vector.broadcast %cst_127 : f32 to vector<2x1xf32>
    %315 = arith.divf %313, %314 : vector<2x1xf32>
    %316 = vector.broadcast %308 : vector<2x1xf32> to vector<2x64xf32>
    %317 = arith.subf %300, %316 : vector<2x64xf32>
    %cst_128 = arith.constant 9.99999974E-6 : f32
    %318 = vector.broadcast %cst_128 : f32 to vector<2x1xf32>
    %319 = arith.addf %315, %318 : vector<2x1xf32>
    %320 = math.rsqrt %319 : vector<2x1xf32>
    %321 = vector.broadcast %320 : vector<2x1xf32> to vector<2x64xf32>
    %322 = arith.mulf %317, %321 : vector<2x64xf32>
    %323 = vector.broadcast %302 : vector<1x64xf32> to vector<2x64xf32>
    %324 = arith.mulf %322, %323 : vector<2x64xf32>
    %325 = vector.broadcast %304 : vector<1x64xf32> to vector<2x64xf32>
    %326 = arith.addf %324, %325 : vector<2x64xf32>
    %327 = vector.extract_strided_slice %2 {offsets = [0, 0], sizes = [16, 64], strides = [1, 1]} : vector<32x64xf32> to vector<16x64xf32>
    %cst_129 = arith.constant dense<0.000000e+00> : vector<1x64xf32>
    %328 = tpu.matmul %156, %327, %cst_129 {dimension_numbers = #tpu.dot_dimension_numbers<[1], [0], [0], [1], [0, 0, 1, 1], [], []>} : vector<1x16xf32>, vector<16x64xf32>, vector<1x64xf32> -> vector<1x64xf32>
    %329 = vector.extract_strided_slice %2 {offsets = [16, 0], sizes = [16, 64], strides = [1, 1]} : vector<32x64xf32> to vector<16x64xf32>
    %cst_130 = arith.constant dense<0.000000e+00> : vector<1x64xf32>
    %330 = tpu.matmul %234, %329, %cst_130 {dimension_numbers = #tpu.dot_dimension_numbers<[1], [0], [0], [1], [0, 0, 1, 1], [], []>} : vector<1x16xf32>, vector<16x64xf32>, vector<1x64xf32> -> vector<1x64xf32>
    %331 = tpu.concatenate %328, %330 in 0 : vector<1x64xf32>, vector<1x64xf32> -> vector<2x64xf32>
    %c0_131 = arith.constant 0 : index
    %c0_132 = arith.constant 0 : index
    %c0_133 = arith.constant 0 : index
    %332 = vector.load %arg23[%c0_131, %c0_132, %c0_133] : memref<1x1x64xf32, #tpu.memory_space<vmem>>, vector<1x1x64xf32>
    %333 = vector.shape_cast %332 : vector<1x1x64xf32> to vector<1x64xf32>
    %c0_134 = arith.constant 0 : index
    %c0_135 = arith.constant 0 : index
    %c0_136 = arith.constant 0 : index
    %334 = vector.load %arg24[%c0_134, %c0_135, %c0_136] : memref<1x1x64xf32, #tpu.memory_space<vmem>>, vector<1x1x64xf32>
    %335 = vector.shape_cast %334 : vector<1x1x64xf32> to vector<1x64xf32>
    %cst_137 = arith.constant dense<0.000000e+00> : vector<2xf32>
    %336 = vector.multi_reduction <add>, %331, %cst_137 [1] : vector<2x64xf32> to vector<2xf32>
    %337 = vector.shape_cast %336 : vector<2xf32> to vector<2x1xf32>
    %cst_138 = arith.constant 6.400000e+01 : f32
    %338 = vector.broadcast %cst_138 : f32 to vector<2x1xf32>
    %339 = arith.divf %337, %338 : vector<2x1xf32>
    %340 = vector.broadcast %339 : vector<2x1xf32> to vector<2x64xf32>
    %341 = arith.subf %331, %340 : vector<2x64xf32>
    %342 = arith.mulf %341, %341 : vector<2x64xf32>
    %cst_139 = arith.constant dense<0.000000e+00> : vector<2xf32>
    %343 = vector.multi_reduction <add>, %342, %cst_139 [1] : vector<2x64xf32> to vector<2xf32>
    %344 = vector.shape_cast %343 : vector<2xf32> to vector<2x1xf32>
    %cst_140 = arith.constant 6.400000e+01 : f32
    %345 = vector.broadcast %cst_140 : f32 to vector<2x1xf32>
    %346 = arith.divf %344, %345 : vector<2x1xf32>
    %347 = vector.broadcast %339 : vector<2x1xf32> to vector<2x64xf32>
    %348 = arith.subf %331, %347 : vector<2x64xf32>
    %cst_141 = arith.constant 9.99999974E-6 : f32
    %349 = vector.broadcast %cst_141 : f32 to vector<2x1xf32>
    %350 = arith.addf %346, %349 : vector<2x1xf32>
    %351 = math.rsqrt %350 : vector<2x1xf32>
    %352 = vector.broadcast %351 : vector<2x1xf32> to vector<2x64xf32>
    %353 = arith.mulf %348, %352 : vector<2x64xf32>
    %354 = vector.broadcast %333 : vector<1x64xf32> to vector<2x64xf32>
    %355 = arith.mulf %353, %354 : vector<2x64xf32>
    %356 = vector.broadcast %335 : vector<1x64xf32> to vector<2x64xf32>
    %357 = arith.addf %355, %356 : vector<2x64xf32>
    %c0_142 = arith.constant 0 : index
    %c0_143 = arith.constant 0 : index
    %c0_144 = arith.constant 0 : index
    %358 = vector.load %arg25[%c0_142, %c0_143, %c0_144] : memref<1x1x64xf32, #tpu.memory_space<vmem>>, vector<1x1x64xf32>
    %359 = vector.shape_cast %358 : vector<1x1x64xf32> to vector<1x64xf32>
    %c0_145 = arith.constant 0 : index
    %c0_146 = arith.constant 0 : index
    %c0_147 = arith.constant 0 : index
    %360 = vector.load %arg26[%c0_145, %c0_146, %c0_147] : memref<1x1x64xf32, #tpu.memory_space<vmem>>, vector<1x1x64xf32>
    %361 = vector.shape_cast %360 : vector<1x1x64xf32> to vector<1x64xf32>
    %cst_148 = arith.constant dense<0.000000e+00> : vector<6xf32>
    %362 = vector.multi_reduction <add>, %4, %cst_148 [1] : vector<6x64xf32> to vector<6xf32>
    %363 = vector.shape_cast %362 : vector<6xf32> to vector<6x1xf32>
    %cst_149 = arith.constant 6.400000e+01 : f32
    %364 = vector.broadcast %cst_149 : f32 to vector<6x1xf32>
    %365 = arith.divf %363, %364 : vector<6x1xf32>
    %366 = vector.broadcast %365 : vector<6x1xf32> to vector<6x64xf32>
    %367 = arith.subf %4, %366 : vector<6x64xf32>
    %368 = arith.mulf %367, %367 : vector<6x64xf32>
    %cst_150 = arith.constant dense<0.000000e+00> : vector<6xf32>
    %369 = vector.multi_reduction <add>, %368, %cst_150 [1] : vector<6x64xf32> to vector<6xf32>
    %370 = vector.shape_cast %369 : vector<6xf32> to vector<6x1xf32>
    %cst_151 = arith.constant 6.400000e+01 : f32
    %371 = vector.broadcast %cst_151 : f32 to vector<6x1xf32>
    %372 = arith.divf %370, %371 : vector<6x1xf32>
    %373 = vector.broadcast %365 : vector<6x1xf32> to vector<6x64xf32>
    %374 = arith.subf %4, %373 : vector<6x64xf32>
    %cst_152 = arith.constant 9.99999974E-6 : f32
    %375 = vector.broadcast %cst_152 : f32 to vector<6x1xf32>
    %376 = arith.addf %372, %375 : vector<6x1xf32>
    %377 = math.rsqrt %376 : vector<6x1xf32>
    %378 = vector.broadcast %377 : vector<6x1xf32> to vector<6x64xf32>
    %379 = arith.mulf %374, %378 : vector<6x64xf32>
    %380 = vector.broadcast %359 : vector<1x64xf32> to vector<6x64xf32>
    %381 = arith.mulf %379, %380 : vector<6x64xf32>
    %382 = vector.broadcast %361 : vector<1x64xf32> to vector<6x64xf32>
    %383 = arith.addf %381, %382 : vector<6x64xf32>
    %384 = arith.truncf %357 : vector<2x64xf32> to vector<2x64xbf16>
    %c0_153 = arith.constant 0 : index
    %c0_154 = arith.constant 0 : index
    %c0_155 = arith.constant 0 : index
    %385 = vector.load %arg27[%c0_153, %c0_154, %c0_155] : memref<1x64x64xbf16, #tpu.memory_space<vmem>>, vector<1x64x64xbf16>
    %386 = vector.shape_cast %385 : vector<1x64x64xbf16> to vector<64x64xbf16>
    %cst_156 = arith.constant dense<0.000000e+00> : vector<2x64xf32>
    %387 = tpu.matmul %384, %386, %cst_156 {dimension_numbers = #tpu.dot_dimension_numbers<[1], [0], [0], [1], [0, 0, 1, 1], [], []>} : vector<2x64xbf16>, vector<64x64xbf16>, vector<2x64xf32> -> vector<2x64xf32>
    %c0_157 = arith.constant 0 : index
    %c0_158 = arith.constant 0 : index
    %c0_159 = arith.constant 0 : index
    %388 = vector.load %arg28[%c0_157, %c0_158, %c0_159] : memref<1x1x64xf32, #tpu.memory_space<vmem>>, vector<1x1x64xf32>
    %389 = vector.shape_cast %388 : vector<1x1x64xf32> to vector<1x64xf32>
    %390 = vector.broadcast %389 : vector<1x64xf32> to vector<2x64xf32>
    %391 = arith.addf %387, %390 : vector<2x64xf32>
    %cst_160 = arith.constant 2.500000e-01 : f32
    %392 = vector.broadcast %cst_160 : f32 to vector<2x64xf32>
    %393 = arith.mulf %391, %392 : vector<2x64xf32>
    %394 = arith.truncf %383 : vector<6x64xf32> to vector<6x64xbf16>
    %c0_161 = arith.constant 0 : index
    %c0_162 = arith.constant 0 : index
    %c0_163 = arith.constant 0 : index
    %395 = vector.load %arg29[%c0_161, %c0_162, %c0_163] : memref<1x64x128xbf16, #tpu.memory_space<vmem>>, vector<1x64x128xbf16>
    %396 = vector.shape_cast %395 : vector<1x64x128xbf16> to vector<64x128xbf16>
    %cst_164 = arith.constant dense<0.000000e+00> : vector<6x128xf32>
    %397 = tpu.matmul %394, %396, %cst_164 {dimension_numbers = #tpu.dot_dimension_numbers<[1], [0], [0], [1], [0, 0, 1, 1], [], []>} : vector<6x64xbf16>, vector<64x128xbf16>, vector<6x128xf32> -> vector<6x128xf32>
    %c0_165 = arith.constant 0 : index
    %c0_166 = arith.constant 0 : index
    %c0_167 = arith.constant 0 : index
    %398 = vector.load %arg30[%c0_165, %c0_166, %c0_167] : memref<1x1x128xf32, #tpu.memory_space<vmem>>, vector<1x1x128xf32>
    %399 = vector.shape_cast %398 : vector<1x1x128xf32> to vector<1x128xf32>
    %400 = vector.broadcast %399 : vector<1x128xf32> to vector<6x128xf32>
    %401 = arith.addf %397, %400 : vector<6x128xf32>
    %402 = vector.extract_strided_slice %401 {offsets = [0, 0], sizes = [6, 64], strides = [1, 1]} : vector<6x128xf32> to vector<6x64xf32>
    %403 = vector.extract_strided_slice %401 {offsets = [0, 64], sizes = [6, 64], strides = [1, 1]} : vector<6x128xf32> to vector<6x64xf32>
    %404 = arith.truncf %393 : vector<2x64xf32> to vector<2x64xbf16>
    %405 = arith.truncf %402 : vector<6x64xf32> to vector<6x64xbf16>
    %406 = arith.truncf %403 : vector<6x64xf32> to vector<6x64xbf16>
    %407 = vector.extract_strided_slice %404 {offsets = [0, 0], sizes = [2, 16], strides = [1, 1]} : vector<2x64xbf16> to vector<2x16xbf16>
    %408 = vector.extract_strided_slice %405 {offsets = [0, 0], sizes = [6, 16], strides = [1, 1]} : vector<6x64xbf16> to vector<6x16xbf16>
    %cst_168 = arith.constant dense<0.000000e+00> : vector<2x6xf32>
    %409 = tpu.matmul %407, %408, %cst_168 {dimension_numbers = #tpu.dot_dimension_numbers<[1], [1], [0], [0], [0, 0, 1, 0], [], []>} : vector<2x16xbf16>, vector<6x16xbf16>, vector<2x6xf32> -> vector<2x6xf32>
    %410 = vector.broadcast %6 : vector<1x6xf32> to vector<2x6xf32>
    %411 = arith.addf %409, %410 : vector<2x6xf32>
    %cst_169 = arith.constant dense<0xFF800000> : vector<2xf32>
    %412 = vector.multi_reduction <maximumf>, %411, %cst_169 [1] : vector<2x6xf32> to vector<2xf32>
    %413 = vector.shape_cast %412 : vector<2xf32> to vector<2x1xf32>
    %414 = vector.broadcast %413 : vector<2x1xf32> to vector<2x6xf32>
    %415 = arith.subf %411, %414 : vector<2x6xf32>
    %416 = math.exp %415 : vector<2x6xf32>
    %cst_170 = arith.constant dense<0.000000e+00> : vector<2xf32>
    %417 = vector.multi_reduction <add>, %416, %cst_170 [1] : vector<2x6xf32> to vector<2xf32>
    %418 = vector.shape_cast %417 : vector<2xf32> to vector<2x1xf32>
    %419 = tpu.reciprocal %418 {approx = true} : vector<2x1xf32> -> vector<2x1xf32>
    %420 = vector.broadcast %419 : vector<2x1xf32> to vector<2x6xf32>
    %421 = arith.mulf %416, %420 : vector<2x6xf32>
    %422 = arith.truncf %421 : vector<2x6xf32> to vector<2x6xbf16>
    %423 = vector.extract_strided_slice %406 {offsets = [0, 0], sizes = [6, 16], strides = [1, 1]} : vector<6x64xbf16> to vector<6x16xbf16>
    %cst_171 = arith.constant dense<0.000000e+00> : vector<2x16xf32>
    %424 = tpu.matmul %422, %423, %cst_171 {dimension_numbers = #tpu.dot_dimension_numbers<[1], [0], [0], [1], [0, 0, 1, 1], [], []>} : vector<2x6xbf16>, vector<6x16xbf16>, vector<2x16xf32> -> vector<2x16xf32>
    %425 = vector.extract_strided_slice %404 {offsets = [0, 16], sizes = [2, 16], strides = [1, 1]} : vector<2x64xbf16> to vector<2x16xbf16>
    %426 = vector.extract_strided_slice %405 {offsets = [0, 16], sizes = [6, 16], strides = [1, 1]} : vector<6x64xbf16> to vector<6x16xbf16>
    %cst_172 = arith.constant dense<0.000000e+00> : vector<2x6xf32>
    %427 = tpu.matmul %425, %426, %cst_172 {dimension_numbers = #tpu.dot_dimension_numbers<[1], [1], [0], [0], [0, 0, 1, 0], [], []>} : vector<2x16xbf16>, vector<6x16xbf16>, vector<2x6xf32> -> vector<2x6xf32>
    %428 = vector.broadcast %6 : vector<1x6xf32> to vector<2x6xf32>
    %429 = arith.addf %427, %428 : vector<2x6xf32>
    %cst_173 = arith.constant dense<0xFF800000> : vector<2xf32>
    %430 = vector.multi_reduction <maximumf>, %429, %cst_173 [1] : vector<2x6xf32> to vector<2xf32>
    %431 = vector.shape_cast %430 : vector<2xf32> to vector<2x1xf32>
    %432 = vector.broadcast %431 : vector<2x1xf32> to vector<2x6xf32>
    %433 = arith.subf %429, %432 : vector<2x6xf32>
    %434 = math.exp %433 : vector<2x6xf32>
    %cst_174 = arith.constant dense<0.000000e+00> : vector<2xf32>
    %435 = vector.multi_reduction <add>, %434, %cst_174 [1] : vector<2x6xf32> to vector<2xf32>
    %436 = vector.shape_cast %435 : vector<2xf32> to vector<2x1xf32>
    %437 = tpu.reciprocal %436 {approx = true} : vector<2x1xf32> -> vector<2x1xf32>
    %438 = vector.broadcast %437 : vector<2x1xf32> to vector<2x6xf32>
    %439 = arith.mulf %434, %438 : vector<2x6xf32>
    %440 = arith.truncf %439 : vector<2x6xf32> to vector<2x6xbf16>
    %441 = vector.extract_strided_slice %406 {offsets = [0, 16], sizes = [6, 16], strides = [1, 1]} : vector<6x64xbf16> to vector<6x16xbf16>
    %cst_175 = arith.constant dense<0.000000e+00> : vector<2x16xf32>
    %442 = tpu.matmul %440, %441, %cst_175 {dimension_numbers = #tpu.dot_dimension_numbers<[1], [0], [0], [1], [0, 0, 1, 1], [], []>} : vector<2x6xbf16>, vector<6x16xbf16>, vector<2x16xf32> -> vector<2x16xf32>
    %443 = vector.extract_strided_slice %404 {offsets = [0, 32], sizes = [2, 16], strides = [1, 1]} : vector<2x64xbf16> to vector<2x16xbf16>
    %444 = vector.extract_strided_slice %405 {offsets = [0, 32], sizes = [6, 16], strides = [1, 1]} : vector<6x64xbf16> to vector<6x16xbf16>
    %cst_176 = arith.constant dense<0.000000e+00> : vector<2x6xf32>
    %445 = tpu.matmul %443, %444, %cst_176 {dimension_numbers = #tpu.dot_dimension_numbers<[1], [1], [0], [0], [0, 0, 1, 0], [], []>} : vector<2x16xbf16>, vector<6x16xbf16>, vector<2x6xf32> -> vector<2x6xf32>
    %446 = vector.broadcast %6 : vector<1x6xf32> to vector<2x6xf32>
    %447 = arith.addf %445, %446 : vector<2x6xf32>
    %cst_177 = arith.constant dense<0xFF800000> : vector<2xf32>
    %448 = vector.multi_reduction <maximumf>, %447, %cst_177 [1] : vector<2x6xf32> to vector<2xf32>
    %449 = vector.shape_cast %448 : vector<2xf32> to vector<2x1xf32>
    %450 = vector.broadcast %449 : vector<2x1xf32> to vector<2x6xf32>
    %451 = arith.subf %447, %450 : vector<2x6xf32>
    %452 = math.exp %451 : vector<2x6xf32>
    %cst_178 = arith.constant dense<0.000000e+00> : vector<2xf32>
    %453 = vector.multi_reduction <add>, %452, %cst_178 [1] : vector<2x6xf32> to vector<2xf32>
    %454 = vector.shape_cast %453 : vector<2xf32> to vector<2x1xf32>
    %455 = tpu.reciprocal %454 {approx = true} : vector<2x1xf32> -> vector<2x1xf32>
    %456 = vector.broadcast %455 : vector<2x1xf32> to vector<2x6xf32>
    %457 = arith.mulf %452, %456 : vector<2x6xf32>
    %458 = arith.truncf %457 : vector<2x6xf32> to vector<2x6xbf16>
    %459 = vector.extract_strided_slice %406 {offsets = [0, 32], sizes = [6, 16], strides = [1, 1]} : vector<6x64xbf16> to vector<6x16xbf16>
    %cst_179 = arith.constant dense<0.000000e+00> : vector<2x16xf32>
    %460 = tpu.matmul %458, %459, %cst_179 {dimension_numbers = #tpu.dot_dimension_numbers<[1], [0], [0], [1], [0, 0, 1, 1], [], []>} : vector<2x6xbf16>, vector<6x16xbf16>, vector<2x16xf32> -> vector<2x16xf32>
    %461 = vector.extract_strided_slice %404 {offsets = [0, 48], sizes = [2, 16], strides = [1, 1]} : vector<2x64xbf16> to vector<2x16xbf16>
    %462 = vector.extract_strided_slice %405 {offsets = [0, 48], sizes = [6, 16], strides = [1, 1]} : vector<6x64xbf16> to vector<6x16xbf16>
    %cst_180 = arith.constant dense<0.000000e+00> : vector<2x6xf32>
    %463 = tpu.matmul %461, %462, %cst_180 {dimension_numbers = #tpu.dot_dimension_numbers<[1], [1], [0], [0], [0, 0, 1, 0], [], []>} : vector<2x16xbf16>, vector<6x16xbf16>, vector<2x6xf32> -> vector<2x6xf32>
    %464 = vector.broadcast %6 : vector<1x6xf32> to vector<2x6xf32>
    %465 = arith.addf %463, %464 : vector<2x6xf32>
    %cst_181 = arith.constant dense<0xFF800000> : vector<2xf32>
    %466 = vector.multi_reduction <maximumf>, %465, %cst_181 [1] : vector<2x6xf32> to vector<2xf32>
    %467 = vector.shape_cast %466 : vector<2xf32> to vector<2x1xf32>
    %468 = vector.broadcast %467 : vector<2x1xf32> to vector<2x6xf32>
    %469 = arith.subf %465, %468 : vector<2x6xf32>
    %470 = math.exp %469 : vector<2x6xf32>
    %cst_182 = arith.constant dense<0.000000e+00> : vector<2xf32>
    %471 = vector.multi_reduction <add>, %470, %cst_182 [1] : vector<2x6xf32> to vector<2xf32>
    %472 = vector.shape_cast %471 : vector<2xf32> to vector<2x1xf32>
    %473 = tpu.reciprocal %472 {approx = true} : vector<2x1xf32> -> vector<2x1xf32>
    %474 = vector.broadcast %473 : vector<2x1xf32> to vector<2x6xf32>
    %475 = arith.mulf %470, %474 : vector<2x6xf32>
    %476 = arith.truncf %475 : vector<2x6xf32> to vector<2x6xbf16>
    %477 = vector.extract_strided_slice %406 {offsets = [0, 48], sizes = [6, 16], strides = [1, 1]} : vector<6x64xbf16> to vector<6x16xbf16>
    %cst_183 = arith.constant dense<0.000000e+00> : vector<2x16xf32>
    %478 = tpu.matmul %476, %477, %cst_183 {dimension_numbers = #tpu.dot_dimension_numbers<[1], [0], [0], [1], [0, 0, 1, 1], [], []>} : vector<2x6xbf16>, vector<6x16xbf16>, vector<2x16xf32> -> vector<2x16xf32>
    %479 = tpu.concatenate %424, %442, %460, %478 in 1 : vector<2x16xf32>, vector<2x16xf32>, vector<2x16xf32>, vector<2x16xf32> -> vector<2x64xf32>
    %480 = arith.truncf %479 : vector<2x64xf32> to vector<2x64xbf16>
    %c0_184 = arith.constant 0 : index
    %c0_185 = arith.constant 0 : index
    %c0_186 = arith.constant 0 : index
    %481 = vector.load %arg31[%c0_184, %c0_185, %c0_186] : memref<1x64x64xbf16, #tpu.memory_space<vmem>>, vector<1x64x64xbf16>
    %482 = vector.shape_cast %481 : vector<1x64x64xbf16> to vector<64x64xbf16>
    %cst_187 = arith.constant dense<0.000000e+00> : vector<2x64xf32>
    %483 = tpu.matmul %480, %482, %cst_187 {dimension_numbers = #tpu.dot_dimension_numbers<[1], [0], [0], [1], [0, 0, 1, 1], [], []>} : vector<2x64xbf16>, vector<64x64xbf16>, vector<2x64xf32> -> vector<2x64xf32>
    %484 = arith.addf %331, %483 : vector<2x64xf32>
    %c0_188 = arith.constant 0 : index
    %c0_189 = arith.constant 0 : index
    %c0_190 = arith.constant 0 : index
    %485 = vector.load %arg32[%c0_188, %c0_189, %c0_190] : memref<1x1x64xf32, #tpu.memory_space<vmem>>, vector<1x1x64xf32>
    %486 = vector.shape_cast %485 : vector<1x1x64xf32> to vector<1x64xf32>
    %487 = vector.broadcast %486 : vector<1x64xf32> to vector<2x64xf32>
    %488 = arith.addf %484, %487 : vector<2x64xf32>
    %c0_191 = arith.constant 0 : index
    %c0_192 = arith.constant 0 : index
    %c0_193 = arith.constant 0 : index
    %489 = vector.load %arg33[%c0_191, %c0_192, %c0_193] : memref<1x1x64xf32, #tpu.memory_space<vmem>>, vector<1x1x64xf32>
    %490 = vector.shape_cast %489 : vector<1x1x64xf32> to vector<1x64xf32>
    %c0_194 = arith.constant 0 : index
    %c0_195 = arith.constant 0 : index
    %c0_196 = arith.constant 0 : index
    %491 = vector.load %arg34[%c0_194, %c0_195, %c0_196] : memref<1x1x64xf32, #tpu.memory_space<vmem>>, vector<1x1x64xf32>
    %492 = vector.shape_cast %491 : vector<1x1x64xf32> to vector<1x64xf32>
    %cst_197 = arith.constant dense<0.000000e+00> : vector<2xf32>
    %493 = vector.multi_reduction <add>, %488, %cst_197 [1] : vector<2x64xf32> to vector<2xf32>
    %494 = vector.shape_cast %493 : vector<2xf32> to vector<2x1xf32>
    %cst_198 = arith.constant 6.400000e+01 : f32
    %495 = vector.broadcast %cst_198 : f32 to vector<2x1xf32>
    %496 = arith.divf %494, %495 : vector<2x1xf32>
    %497 = vector.broadcast %496 : vector<2x1xf32> to vector<2x64xf32>
    %498 = arith.subf %488, %497 : vector<2x64xf32>
    %499 = arith.mulf %498, %498 : vector<2x64xf32>
    %cst_199 = arith.constant dense<0.000000e+00> : vector<2xf32>
    %500 = vector.multi_reduction <add>, %499, %cst_199 [1] : vector<2x64xf32> to vector<2xf32>
    %501 = vector.shape_cast %500 : vector<2xf32> to vector<2x1xf32>
    %cst_200 = arith.constant 6.400000e+01 : f32
    %502 = vector.broadcast %cst_200 : f32 to vector<2x1xf32>
    %503 = arith.divf %501, %502 : vector<2x1xf32>
    %504 = vector.broadcast %496 : vector<2x1xf32> to vector<2x64xf32>
    %505 = arith.subf %488, %504 : vector<2x64xf32>
    %cst_201 = arith.constant 9.99999974E-6 : f32
    %506 = vector.broadcast %cst_201 : f32 to vector<2x1xf32>
    %507 = arith.addf %503, %506 : vector<2x1xf32>
    %508 = math.rsqrt %507 : vector<2x1xf32>
    %509 = vector.broadcast %508 : vector<2x1xf32> to vector<2x64xf32>
    %510 = arith.mulf %505, %509 : vector<2x64xf32>
    %511 = vector.broadcast %490 : vector<1x64xf32> to vector<2x64xf32>
    %512 = arith.mulf %510, %511 : vector<2x64xf32>
    %513 = vector.broadcast %492 : vector<1x64xf32> to vector<2x64xf32>
    %514 = arith.addf %512, %513 : vector<2x64xf32>
    %515 = arith.truncf %514 : vector<2x64xf32> to vector<2x64xbf16>
    %c0_202 = arith.constant 0 : index
    %c0_203 = arith.constant 0 : index
    %c0_204 = arith.constant 0 : index
    %516 = vector.load %arg35[%c0_202, %c0_203, %c0_204] : memref<1x64x256xbf16, #tpu.memory_space<vmem>>, vector<1x64x256xbf16>
    %517 = vector.shape_cast %516 : vector<1x64x256xbf16> to vector<64x256xbf16>
    %cst_205 = arith.constant dense<0.000000e+00> : vector<2x256xf32>
    %518 = tpu.matmul %515, %517, %cst_205 {dimension_numbers = #tpu.dot_dimension_numbers<[1], [0], [0], [1], [0, 0, 1, 1], [], []>} : vector<2x64xbf16>, vector<64x256xbf16>, vector<2x256xf32> -> vector<2x256xf32>
    %c0_206 = arith.constant 0 : index
    %c0_207 = arith.constant 0 : index
    %c0_208 = arith.constant 0 : index
    %519 = vector.load %arg36[%c0_206, %c0_207, %c0_208] : memref<1x1x256xf32, #tpu.memory_space<vmem>>, vector<1x1x256xf32>
    %520 = vector.shape_cast %519 : vector<1x1x256xf32> to vector<1x256xf32>
    %521 = vector.broadcast %520 : vector<1x256xf32> to vector<2x256xf32>
    %522 = arith.addf %518, %521 : vector<2x256xf32>
    %523 = arith.mulf %522, %522 : vector<2x256xf32>
    %524 = arith.mulf %522, %523 : vector<2x256xf32>
    %cst_209 = arith.constant 4.471500e-02 : f32
    %525 = vector.broadcast %cst_209 : f32 to vector<2x256xf32>
    %526 = arith.mulf %525, %524 : vector<2x256xf32>
    %527 = arith.addf %522, %526 : vector<2x256xf32>
    %cst_210 = arith.constant 0.797884583 : f32
    %528 = vector.broadcast %cst_210 : f32 to vector<2x256xf32>
    %529 = arith.mulf %528, %527 : vector<2x256xf32>
    %530 = math.tanh %529 : vector<2x256xf32>
    %cst_211 = arith.constant 1.000000e+00 : f32
    %531 = vector.broadcast %cst_211 : f32 to vector<2x256xf32>
    %532 = arith.addf %531, %530 : vector<2x256xf32>
    %cst_212 = arith.constant 5.000000e-01 : f32
    %533 = vector.broadcast %cst_212 : f32 to vector<2x256xf32>
    %534 = arith.mulf %533, %532 : vector<2x256xf32>
    %535 = arith.mulf %522, %534 : vector<2x256xf32>
    %536 = arith.truncf %535 : vector<2x256xf32> to vector<2x256xbf16>
    %c0_213 = arith.constant 0 : index
    %c0_214 = arith.constant 0 : index
    %c0_215 = arith.constant 0 : index
    %537 = vector.load %arg37[%c0_213, %c0_214, %c0_215] : memref<1x256x64xbf16, #tpu.memory_space<vmem>>, vector<1x256x64xbf16>
    %538 = vector.shape_cast %537 : vector<1x256x64xbf16> to vector<256x64xbf16>
    %cst_216 = arith.constant dense<0.000000e+00> : vector<2x64xf32>
    %539 = tpu.matmul %536, %538, %cst_216 {dimension_numbers = #tpu.dot_dimension_numbers<[1], [0], [0], [1], [0, 0, 1, 1], [], []>} : vector<2x256xbf16>, vector<256x64xbf16>, vector<2x64xf32> -> vector<2x64xf32>
    %540 = arith.addf %488, %539 : vector<2x64xf32>
    %c0_217 = arith.constant 0 : index
    %c0_218 = arith.constant 0 : index
    %c0_219 = arith.constant 0 : index
    %541 = vector.load %arg38[%c0_217, %c0_218, %c0_219] : memref<1x1x64xf32, #tpu.memory_space<vmem>>, vector<1x1x64xf32>
    %542 = vector.shape_cast %541 : vector<1x1x64xf32> to vector<1x64xf32>
    %543 = vector.broadcast %542 : vector<1x64xf32> to vector<2x64xf32>
    %544 = arith.addf %540, %543 : vector<2x64xf32>
    %c0_220 = arith.constant 0 : index
    %c0_221 = arith.constant 0 : index
    %c0_222 = arith.constant 0 : index
    %545 = vector.load %arg39[%c0_220, %c0_221, %c0_222] : memref<1x1x64xf32, #tpu.memory_space<vmem>>, vector<1x1x64xf32>
    %546 = vector.shape_cast %545 : vector<1x1x64xf32> to vector<1x64xf32>
    %c0_223 = arith.constant 0 : index
    %c0_224 = arith.constant 0 : index
    %c0_225 = arith.constant 0 : index
    %547 = vector.load %arg40[%c0_223, %c0_224, %c0_225] : memref<1x1x64xf32, #tpu.memory_space<vmem>>, vector<1x1x64xf32>
    %548 = vector.shape_cast %547 : vector<1x1x64xf32> to vector<1x64xf32>
    %cst_226 = arith.constant dense<0.000000e+00> : vector<2xf32>
    %549 = vector.multi_reduction <add>, %544, %cst_226 [1] : vector<2x64xf32> to vector<2xf32>
    %550 = vector.shape_cast %549 : vector<2xf32> to vector<2x1xf32>
    %cst_227 = arith.constant 6.400000e+01 : f32
    %551 = vector.broadcast %cst_227 : f32 to vector<2x1xf32>
    %552 = arith.divf %550, %551 : vector<2x1xf32>
    %553 = vector.broadcast %552 : vector<2x1xf32> to vector<2x64xf32>
    %554 = arith.subf %544, %553 : vector<2x64xf32>
    %555 = arith.mulf %554, %554 : vector<2x64xf32>
    %cst_228 = arith.constant dense<0.000000e+00> : vector<2xf32>
    %556 = vector.multi_reduction <add>, %555, %cst_228 [1] : vector<2x64xf32> to vector<2xf32>
    %557 = vector.shape_cast %556 : vector<2xf32> to vector<2x1xf32>
    %cst_229 = arith.constant 6.400000e+01 : f32
    %558 = vector.broadcast %cst_229 : f32 to vector<2x1xf32>
    %559 = arith.divf %557, %558 : vector<2x1xf32>
    %560 = vector.broadcast %552 : vector<2x1xf32> to vector<2x64xf32>
    %561 = arith.subf %544, %560 : vector<2x64xf32>
    %cst_230 = arith.constant 9.99999974E-6 : f32
    %562 = vector.broadcast %cst_230 : f32 to vector<2x1xf32>
    %563 = arith.addf %559, %562 : vector<2x1xf32>
    %564 = math.rsqrt %563 : vector<2x1xf32>
    %565 = vector.broadcast %564 : vector<2x1xf32> to vector<2x64xf32>
    %566 = arith.mulf %561, %565 : vector<2x64xf32>
    %567 = vector.broadcast %546 : vector<1x64xf32> to vector<2x64xf32>
    %568 = arith.mulf %566, %567 : vector<2x64xf32>
    %569 = vector.broadcast %548 : vector<1x64xf32> to vector<2x64xf32>
    %570 = arith.addf %568, %569 : vector<2x64xf32>
    %571 = tpu.concatenate %326, %570 in 1 : vector<2x64xf32>, vector<2x64xf32> -> vector<2x128xf32>
    %c0_231 = arith.constant 0 : index
    %c0_232 = arith.constant 0 : index
    %c0_233 = arith.constant 0 : index
    %572 = vector.load %arg41[%c0_231, %c0_232, %c0_233] : memref<1x2x128xf32, #tpu.memory_space<vmem>>, vector<1x2x128xf32>
    %573 = vector.shape_cast %572 : vector<1x2x128xf32> to vector<2x128xf32>
    %574 = vector.shape_cast %571 : vector<2x128xf32> to vector<1x2x128xf32>
    tpu.vector_store %arg41[%c0_231, %c0_232, %c0_233], %574 {strides = array<i32>} : memref<1x2x128xf32, #tpu.memory_space<vmem>>, vector<1x2x128xf32>,
    return
  }
  func.func @transform_0(%arg0: i32) -> (i32, i32, i32) {
    %c0_i32 = arith.constant 0 : i32
    %c0_i32_0 = arith.constant 0 : i32
    %c0_i32_1 = arith.constant 0 : i32
    return %arg0, %c0_i32, %c0_i32_0 : i32, i32, i32
  }
  func.func @transform_1(%arg0: i32) -> (i32, i32) {
    %c0_i32 = arith.constant 0 : i32
    %c0_i32_0 = arith.constant 0 : i32
    %c0_i32_1 = arith.constant 0 : i32
    return %c0_i32, %c0_i32_0 : i32, i32
  }
  func.func @transform_2(%arg0: i32) -> (i32, i32, i32) {
    %c0_i32 = arith.constant 0 : i32
    %c0_i32_0 = arith.constant 0 : i32
    %c0_i32_1 = arith.constant 0 : i32
    return %arg0, %c0_i32, %c0_i32_0 : i32, i32, i32
  }
  func.func @transform_3(%arg0: i32) -> (i32, i32, i32) {
    %c0_i32 = arith.constant 0 : i32
    %c0_i32_0 = arith.constant 0 : i32
    %c0_i32_1 = arith.constant 0 : i32
    return %arg0, %c0_i32, %c0_i32_0 : i32, i32, i32
  }
  func.func @transform_4(%arg0: i32) -> (i32, i32, i32) {
    %c0_i32 = arith.constant 0 : i32
    %c0_i32_0 = arith.constant 0 : i32
    %c0_i32_1 = arith.constant 0 : i32
    return %arg0, %c0_i32, %c0_i32_0 : i32, i32, i32
  }
  func.func @transform_5(%arg0: i32) -> (i32, i32, i32) {
    %c0_i32 = arith.constant 0 : i32
    %c0_i32_0 = arith.constant 0 : i32
    %c0_i32_1 = arith.constant 0 : i32
    return %arg0, %c0_i32, %c0_i32_0 : i32, i32, i32
  }
  func.func @transform_6(%arg0: i32) -> (i32, i32, i32) {
    %c0_i32 = arith.constant 0 : i32
    %c0_i32_0 = arith.constant 0 : i32
    %c0_i32_1 = arith.constant 0 : i32
    return %arg0, %c0_i32, %c0_i32_0 : i32, i32, i32
  }
  func.func @transform_7(%arg0: i32) -> (i32, i32, i32) {
    %c0_i32 = arith.constant 0 : i32
    %c0_i32_0 = arith.constant 0 : i32
    %c0_i32_1 = arith.constant 0 : i32
    return %arg0, %c0_i32, %c0_i32_0 : i32, i32, i32
  }
  func.func @transform_8(%arg0: i32) -> (i32, i32, i32) {
    %c0_i32 = arith.constant 0 : i32
    %c0_i32_0 = arith.constant 0 : i32
    %c0_i32_1 = arith.constant 0 : i32
    return %arg0, %c0_i32, %c0_i32_0 : i32, i32, i32
  }
  func.func @transform_9(%arg0: i32) -> (i32, i32, i32) {
    %c0_i32 = arith.constant 0 : i32
    %c0_i32_0 = arith.constant 0 : i32
    %c0_i32_1 = arith.constant 0 : i32
    return %arg0, %c0_i32, %c0_i32_0 : i32, i32, i32
  }
  func.func @transform_10(%arg0: i32) -> (i32, i32, i32) {
    %c0_i32 = arith.constant 0 : i32
    %c0_i32_0 = arith.constant 0 : i32
    %c0_i32_1 = arith.constant 0 : i32
    return %arg0, %c0_i32, %c0_i32_0 : i32, i32, i32
  }
  func.func @transform_11(%arg0: i32) -> (i32, i32, i32) {
    %c0_i32 = arith.constant 0 : i32
    %c0_i32_0 = arith.constant 0 : i32
    %c0_i32_1 = arith.constant 0 : i32
    return %arg0, %c0_i32, %c0_i32_0 : i32, i32, i32
  }
  func.func @transform_12(%arg0: i32) -> (i32, i32, i32) {
    %c0_i32 = arith.constant 0 : i32
    %c0_i32_0 = arith.constant 0 : i32
    %c0_i32_1 = arith.constant 0 : i32
    return %arg0, %c0_i32, %c0_i32_0 : i32, i32, i32
  }
  func.func @transform_13(%arg0: i32) -> (i32, i32, i32) {
    %c0_i32 = arith.constant 0 : i32
    %c0_i32_0 = arith.constant 0 : i32
    %c0_i32_1 = arith.constant 0 : i32
    return %arg0, %c0_i32, %c0_i32_0 : i32, i32, i32
  }
  func.func @transform_14(%arg0: i32) -> (i32, i32, i32) {
    %c0_i32 = arith.constant 0 : i32
    %c0_i32_0 = arith.constant 0 : i32
    %c0_i32_1 = arith.constant 0 : i32
    return %arg0, %c0_i32, %c0_i32_0 : i32, i32, i32
  }
  func.func @transform_15(%arg0: i32) -> (i32, i32, i32) {
    %c0_i32 = arith.constant 0 : i32
    %c0_i32_0 = arith.constant 0 : i32
    %c0_i32_1 = arith.constant 0 : i32
    return %arg0, %c0_i32, %c0_i32_0 : i32, i32, i32
  }
  func.func @transform_16(%arg0: i32) -> (i32, i32, i32) {
    %c0_i32 = arith.constant 0 : i32
    %c0_i32_0 = arith.constant 0 : i32
    %c0_i32_1 = arith.constant 0 : i32
    return %arg0, %c0_i32, %c0_i32_0 : i32, i32, i32
  }
  func.func @transform_17(%arg0: i32) -> (i32, i32, i32) {
    %c0_i32 = arith.constant 0 : i32
    %c0_i32_0 = arith.constant 0 : i32
    %c0_i32_1 = arith.constant 0 : i32
    return %arg0, %c0_i32, %c0_i32_0 : i32, i32, i32
  }
  func.func @transform_18(%arg0: i32) -> (i32, i32, i32) {
    %c0_i32 = arith.constant 0 : i32
    %c0_i32_0 = arith.constant 0 : i32
    %c0_i32_1 = arith.constant 0 : i32
    return %arg0, %c0_i32, %c0_i32_0 : i32, i32, i32
  }
  func.func @transform_19(%arg0: i32) -> (i32, i32, i32) {
    %c0_i32 = arith.constant 0 : i32
    %c0_i32_0 = arith.constant 0 : i32
    %c0_i32_1 = arith.constant 0 : i32
    return %arg0, %c0_i32, %c0_i32_0 : i32, i32, i32
  }
  func.func @transform_20(%arg0: i32) -> (i32, i32, i32) {
    %c0_i32 = arith.constant 0 : i32
    %c0_i32_0 = arith.constant 0 : i32
    %c0_i32_1 = arith.constant 0 : i32
    return %arg0, %c0_i32, %c0_i32_0 : i32, i32, i32
  }
  func.func @transform_21(%arg0: i32) -> (i32, i32, i32) {
    %c0_i32 = arith.constant 0 : i32
    %c0_i32_0 = arith.constant 0 : i32
    %c0_i32_1 = arith.constant 0 : i32
    return %arg0, %c0_i32, %c0_i32_0 : i32, i32, i32
  }
  func.func @transform_22(%arg0: i32) -> (i32, i32, i32) {
    %c0_i32 = arith.constant 0 : i32
    %c0_i32_0 = arith.constant 0 : i32
    %c0_i32_1 = arith.constant 0 : i32
    return %arg0, %c0_i32, %c0_i32_0 : i32, i32, i32
  }
  func.func @transform_23(%arg0: i32) -> (i32, i32, i32) {
    %c0_i32 = arith.constant 0 : i32
    %c0_i32_0 = arith.constant 0 : i32
    %c0_i32_1 = arith.constant 0 : i32
    return %arg0, %c0_i32, %c0_i32_0 : i32, i32, i32
  }
  func.func @transform_24(%arg0: i32) -> (i32, i32, i32) {
    %c0_i32 = arith.constant 0 : i32
    %c0_i32_0 = arith.constant 0 : i32
    %c0_i32_1 = arith.constant 0 : i32
    return %arg0, %c0_i32, %c0_i32_0 : i32, i32, i32
  }
  func.func @transform_25(%arg0: i32) -> (i32, i32, i32) {
    %c0_i32 = arith.constant 0 : i32
    %c0_i32_0 = arith.constant 0 : i32
    %c0_i32_1 = arith.constant 0 : i32
    return %arg0, %c0_i32, %c0_i32_0 : i32, i32, i32
  }
  func.func @transform_26(%arg0: i32) -> (i32, i32, i32) {
    %c0_i32 = arith.constant 0 : i32
    %c0_i32_0 = arith.constant 0 : i32
    %c0_i32_1 = arith.constant 0 : i32
    return %arg0, %c0_i32, %c0_i32_0 : i32, i32, i32
  }
  func.func @transform_27(%arg0: i32) -> (i32, i32, i32) {
    %c0_i32 = arith.constant 0 : i32
    %c0_i32_0 = arith.constant 0 : i32
    %c0_i32_1 = arith.constant 0 : i32
    return %arg0, %c0_i32, %c0_i32_0 : i32, i32, i32
  }
  func.func @transform_28(%arg0: i32) -> (i32, i32, i32) {
    %c0_i32 = arith.constant 0 : i32
    %c0_i32_0 = arith.constant 0 : i32
    %c0_i32_1 = arith.constant 0 : i32
    return %arg0, %c0_i32, %c0_i32_0 : i32, i32, i32
  }
  func.func @transform_29(%arg0: i32) -> (i32, i32, i32) {
    %c0_i32 = arith.constant 0 : i32
    %c0_i32_0 = arith.constant 0 : i32
    %c0_i32_1 = arith.constant 0 : i32
    return %arg0, %c0_i32, %c0_i32_0 : i32, i32, i32
  }
  func.func @transform_30(%arg0: i32) -> (i32, i32, i32) {
    %c0_i32 = arith.constant 0 : i32
    %c0_i32_0 = arith.constant 0 : i32
    %c0_i32_1 = arith.constant 0 : i32
    return %arg0, %c0_i32, %c0_i32_0 : i32, i32, i32
  }
  func.func @transform_31(%arg0: i32) -> (i32, i32, i32) {
    %c0_i32 = arith.constant 0 : i32
    %c0_i32_0 = arith.constant 0 : i32
    %c0_i32_1 = arith.constant 0 : i32
    return %arg0, %c0_i32, %c0_i32_0 : i32, i32, i32
  }
  func.func @transform_32(%arg0: i32) -> (i32, i32, i32) {
    %c0_i32 = arith.constant 0 : i32
    %c0_i32_0 = arith.constant 0 : i32
    %c0_i32_1 = arith.constant 0 : i32
    return %arg0, %c0_i32, %c0_i32_0 : i32, i32, i32
  }
  func.func @transform_33(%arg0: i32) -> (i32, i32, i32) {
    %c0_i32 = arith.constant 0 : i32
    %c0_i32_0 = arith.constant 0 : i32
    %c0_i32_1 = arith.constant 0 : i32
    return %arg0, %c0_i32, %c0_i32_0 : i32, i32, i32
  }
  func.func @transform_34(%arg0: i32) -> (i32, i32, i32) {
    %c0_i32 = arith.constant 0 : i32
    %c0_i32_0 = arith.constant 0 : i32
    %c0_i32_1 = arith.constant 0 : i32
    return %arg0, %c0_i32, %c0_i32_0 : i32, i32, i32
  }
  func.func @transform_35(%arg0: i32) -> (i32, i32, i32) {
    %c0_i32 = arith.constant 0 : i32
    %c0_i32_0 = arith.constant 0 : i32
    %c0_i32_1 = arith.constant 0 : i32
    return %arg0, %c0_i32, %c0_i32_0 : i32, i32, i32
  }
  func.func @transform_36(%arg0: i32) -> (i32, i32, i32) {
    %c0_i32 = arith.constant 0 : i32
    %c0_i32_0 = arith.constant 0 : i32
    %c0_i32_1 = arith.constant 0 : i32
    return %arg0, %c0_i32, %c0_i32_0 : i32, i32, i32
  }
  func.func @transform_37(%arg0: i32) -> (i32, i32, i32) {
    %c0_i32 = arith.constant 0 : i32
    %c0_i32_0 = arith.constant 0 : i32
    %c0_i32_1 = arith.constant 0 : i32
    return %arg0, %c0_i32, %c0_i32_0 : i32, i32, i32
  }
  func.func @transform_38(%arg0: i32) -> (i32, i32, i32) {
    %c0_i32 = arith.constant 0 : i32
    %c0_i32_0 = arith.constant 0 : i32
    %c0_i32_1 = arith.constant 0 : i32
    return %arg0, %c0_i32, %c0_i32_0 : i32, i32, i32
  }
  func.func @transform_39(%arg0: i32) -> (i32, i32, i32) {
    %c0_i32 = arith.constant 0 : i32
    %c0_i32_0 = arith.constant 0 : i32
    %c0_i32_1 = arith.constant 0 : i32
    return %arg0, %c0_i32, %c0_i32_0 : i32, i32, i32
  }
  func.func @transform_40(%arg0: i32) -> (i32, i32, i32) {
    %c0_i32 = arith.constant 0 : i32
    %c0_i32_0 = arith.constant 0 : i32
    %c0_i32_1 = arith.constant 0 : i32
    return %arg0, %c0_i32, %c0_i32_0 : i32, i32, i32
  }
}

module attributes {stable_mosaic.version = 11 : i64} {
  func.func @_cam_text_kernel(%arg0: memref<3x2x17x17xf32, #tpu.memory_space<vmem>>, %arg1: memref<34x64xf32, #tpu.memory_space<vmem>>, %arg2: memref<26x64xf32, #tpu.memory_space<vmem>>, %arg3: memref<1x64xf32, #tpu.memory_space<vmem>>, %arg4: memref<1x64xf32, #tpu.memory_space<vmem>>, %arg5: memref<1x64xf32, #tpu.memory_space<vmem>>, %arg6: memref<1x64xf32, #tpu.memory_space<vmem>>, %arg7: memref<64x64xbf16, #tpu.memory_space<vmem>>, %arg8: memref<1x64xf32, #tpu.memory_space<vmem>>, %arg9: memref<64x128xbf16, #tpu.memory_space<vmem>>, %arg10: memref<1x128xf32, #tpu.memory_space<vmem>>, %arg11: memref<64x64xbf16, #tpu.memory_space<vmem>>, %arg12: memref<1x64xf32, #tpu.memory_space<vmem>>, %arg13: memref<1x64xf32, #tpu.memory_space<vmem>>, %arg14: memref<1x64xf32, #tpu.memory_space<vmem>>, %arg15: memref<64x256xbf16, #tpu.memory_space<vmem>>, %arg16: memref<1x256xf32, #tpu.memory_space<vmem>>, %arg17: memref<256x64xbf16, #tpu.memory_space<vmem>>, %arg18: memref<1x64xf32, #tpu.memory_space<vmem>>, %arg19: memref<2x64xf32, #tpu.memory_space<vmem>>) attributes {dimension_semantics = [], scalar_prefetch = 0 : i64, scratch_operands = 0 : i64, tpu.core_type = #tpu.core_type<tc>} {
    %c2 = arith.constant 2 : index
    %c0 = arith.constant 0 : index
    %c0_0 = arith.constant 0 : index
    %c0_1 = arith.constant 0 : index
    %0 = vector.load %arg0[%c2, %c0, %c0_0, %c0_1] : memref<3x2x17x17xf32, #tpu.memory_space<vmem>>, vector<1x1x17x17xf32>
    %1 = vector.shape_cast %0 : vector<1x1x17x17xf32> to vector<17x17xf32>
    %2 = vector.extract_strided_slice %1 {offsets = [0, 0], sizes = [1, 17], strides = [1, 1]} : vector<17x17xf32> to vector<1x17xf32>
    %c1 = arith.constant 1 : index
    %c0_2 = arith.constant 0 : index
    %c0_3 = arith.constant 0 : index
    %c0_4 = arith.constant 0 : index
    %3 = vector.load %arg0[%c1, %c0_2, %c0_3, %c0_4] : memref<3x2x17x17xf32, #tpu.memory_space<vmem>>, vector<1x1x17x17xf32>
    %4 = vector.shape_cast %3 : vector<1x1x17x17xf32> to vector<17x17xf32>
    %cst = arith.constant dense<0.000000e+00> : vector<1x17xf32>
    %5 = tpu.matmul %2, %4, %cst {dimension_numbers = #tpu.dot_dimension_numbers<[1], [0], [0], [1], [0, 0, 1, 1], [], []>} : vector<1x17xf32>, vector<17x17xf32>, vector<1x17xf32> -> vector<1x17xf32>
    %c0_5 = arith.constant 0 : index
    %c0_6 = arith.constant 0 : index
    %c0_7 = arith.constant 0 : index
    %c0_8 = arith.constant 0 : index
    %6 = vector.load %arg0[%c0_5, %c0_6, %c0_7, %c0_8] : memref<3x2x17x17xf32, #tpu.memory_space<vmem>>, vector<1x1x17x17xf32>
    %7 = vector.shape_cast %6 : vector<1x1x17x17xf32> to vector<17x17xf32>
    %cst_9 = arith.constant dense<0.000000e+00> : vector<1x17xf32>
    %8 = tpu.matmul %5, %7, %cst_9 {dimension_numbers = #tpu.dot_dimension_numbers<[1], [0], [0], [1], [0, 0, 1, 1], [], []>} : vector<1x17xf32>, vector<17x17xf32>, vector<1x17xf32> -> vector<1x17xf32>
    %c1_10 = arith.constant 1 : index
    %c0_11 = arith.constant 0 : index
    %9 = vector.load %arg1[%c1_10, %c0_11] : memref<34x64xf32, #tpu.memory_space<vmem>>, vector<16x64xf32>
    %cst_12 = arith.constant 0.000000e+00 : f32
    %10 = vector.broadcast %cst_12 : f32 to vector<16x64xf32>
    %11 = arith.maximumf %9, %10 : vector<16x64xf32>
    %12 = vector.extract_strided_slice %8 {offsets = [0, 1], sizes = [1, 16], strides = [1, 1]} : vector<1x17xf32> to vector<1x16xf32>
    %cst_13 = arith.constant dense<0.000000e+00> : vector<1x64xf32>
    %13 = tpu.matmul %12, %11, %cst_13 {dimension_numbers = #tpu.dot_dimension_numbers<[1], [0], [0], [1], [0, 0, 1, 1], [], []>} : vector<1x16xf32>, vector<16x64xf32>, vector<1x64xf32> -> vector<1x64xf32>
    %c2_14 = arith.constant 2 : index
    %c1_15 = arith.constant 1 : index
    %c0_16 = arith.constant 0 : index
    %c0_17 = arith.constant 0 : index
    %14 = vector.load %arg0[%c2_14, %c1_15, %c0_16, %c0_17] : memref<3x2x17x17xf32, #tpu.memory_space<vmem>>, vector<1x1x17x17xf32>
    %15 = vector.shape_cast %14 : vector<1x1x17x17xf32> to vector<17x17xf32>
    %16 = vector.extract_strided_slice %15 {offsets = [0, 0], sizes = [1, 17], strides = [1, 1]} : vector<17x17xf32> to vector<1x17xf32>
    %c1_18 = arith.constant 1 : index
    %c1_19 = arith.constant 1 : index
    %c0_20 = arith.constant 0 : index
    %c0_21 = arith.constant 0 : index
    %17 = vector.load %arg0[%c1_18, %c1_19, %c0_20, %c0_21] : memref<3x2x17x17xf32, #tpu.memory_space<vmem>>, vector<1x1x17x17xf32>
    %18 = vector.shape_cast %17 : vector<1x1x17x17xf32> to vector<17x17xf32>
    %cst_22 = arith.constant dense<0.000000e+00> : vector<1x17xf32>
    %19 = tpu.matmul %16, %18, %cst_22 {dimension_numbers = #tpu.dot_dimension_numbers<[1], [0], [0], [1], [0, 0, 1, 1], [], []>} : vector<1x17xf32>, vector<17x17xf32>, vector<1x17xf32> -> vector<1x17xf32>
    %c0_23 = arith.constant 0 : index
    %c1_24 = arith.constant 1 : index
    %c0_25 = arith.constant 0 : index
    %c0_26 = arith.constant 0 : index
    %20 = vector.load %arg0[%c0_23, %c1_24, %c0_25, %c0_26] : memref<3x2x17x17xf32, #tpu.memory_space<vmem>>, vector<1x1x17x17xf32>
    %21 = vector.shape_cast %20 : vector<1x1x17x17xf32> to vector<17x17xf32>
    %cst_27 = arith.constant dense<0.000000e+00> : vector<1x17xf32>
    %22 = tpu.matmul %19, %21, %cst_27 {dimension_numbers = #tpu.dot_dimension_numbers<[1], [0], [0], [1], [0, 0, 1, 1], [], []>} : vector<1x17xf32>, vector<17x17xf32>, vector<1x17xf32> -> vector<1x17xf32>
    %c18 = arith.constant 18 : index
    %c0_28 = arith.constant 0 : index
    %23 = vector.load %arg1[%c18, %c0_28] : memref<34x64xf32, #tpu.memory_space<vmem>>, vector<16x64xf32>
    %cst_29 = arith.constant 0.000000e+00 : f32
    %24 = vector.broadcast %cst_29 : f32 to vector<16x64xf32>
    %25 = arith.maximumf %23, %24 : vector<16x64xf32>
    %26 = vector.extract_strided_slice %22 {offsets = [0, 1], sizes = [1, 16], strides = [1, 1]} : vector<1x17xf32> to vector<1x16xf32>
    %cst_30 = arith.constant dense<0.000000e+00> : vector<1x64xf32>
    %27 = tpu.matmul %26, %25, %cst_30 {dimension_numbers = #tpu.dot_dimension_numbers<[1], [0], [0], [1], [0, 0, 1, 1], [], []>} : vector<1x16xf32>, vector<16x64xf32>, vector<1x64xf32> -> vector<1x64xf32>
    %28 = tpu.concatenate %13, %27 in 0 : vector<1x64xf32>, vector<1x64xf32> -> vector<2x64xf32>
    %c0_31 = arith.constant 0 : index
    %c0_32 = arith.constant 0 : index
    %29 = vector.load %arg2[%c0_31, %c0_32] : memref<26x64xf32, #tpu.memory_space<vmem>>, vector<26x64xf32>
    %c0_33 = arith.constant 0 : index
    %c0_34 = arith.constant 0 : index
    %30 = vector.load %arg3[%c0_33, %c0_34] : memref<1x64xf32, #tpu.memory_space<vmem>>, vector<1x64xf32>
    %c0_35 = arith.constant 0 : index
    %c0_36 = arith.constant 0 : index
    %31 = vector.load %arg4[%c0_35, %c0_36] : memref<1x64xf32, #tpu.memory_space<vmem>>, vector<1x64xf32>
    %cst_37 = arith.constant dense<0.000000e+00> : vector<2xf32>
    %32 = vector.multi_reduction <add>, %28, %cst_37 [1] : vector<2x64xf32> to vector<2xf32>
    %33 = vector.shape_cast %32 : vector<2xf32> to vector<2x1xf32>
    %cst_38 = arith.constant 6.400000e+01 : f32
    %34 = vector.broadcast %cst_38 : f32 to vector<2x1xf32>
    %35 = arith.divf %33, %34 : vector<2x1xf32>
    %36 = vector.broadcast %35 : vector<2x1xf32> to vector<2x64xf32>
    %37 = arith.subf %28, %36 : vector<2x64xf32>
    %38 = arith.mulf %37, %37 : vector<2x64xf32>
    %cst_39 = arith.constant dense<0.000000e+00> : vector<2xf32>
    %39 = vector.multi_reduction <add>, %38, %cst_39 [1] : vector<2x64xf32> to vector<2xf32>
    %40 = vector.shape_cast %39 : vector<2xf32> to vector<2x1xf32>
    %cst_40 = arith.constant 6.400000e+01 : f32
    %41 = vector.broadcast %cst_40 : f32 to vector<2x1xf32>
    %42 = arith.divf %40, %41 : vector<2x1xf32>
    %43 = vector.broadcast %35 : vector<2x1xf32> to vector<2x64xf32>
    %44 = arith.subf %28, %43 : vector<2x64xf32>
    %cst_41 = arith.constant 9.99999974E-6 : f32
    %45 = vector.broadcast %cst_41 : f32 to vector<2x1xf32>
    %46 = arith.addf %42, %45 : vector<2x1xf32>
    %47 = math.rsqrt %46 : vector<2x1xf32>
    %48 = vector.broadcast %47 : vector<2x1xf32> to vector<2x64xf32>
    %49 = arith.mulf %44, %48 : vector<2x64xf32>
    %50 = vector.broadcast %30 : vector<1x64xf32> to vector<2x64xf32>
    %51 = arith.mulf %49, %50 : vector<2x64xf32>
    %52 = vector.broadcast %31 : vector<1x64xf32> to vector<2x64xf32>
    %53 = arith.addf %51, %52 : vector<2x64xf32>
    %c0_42 = arith.constant 0 : index
    %c0_43 = arith.constant 0 : index
    %54 = vector.load %arg5[%c0_42, %c0_43] : memref<1x64xf32, #tpu.memory_space<vmem>>, vector<1x64xf32>
    %c0_44 = arith.constant 0 : index
    %c0_45 = arith.constant 0 : index
    %55 = vector.load %arg6[%c0_44, %c0_45] : memref<1x64xf32, #tpu.memory_space<vmem>>, vector<1x64xf32>
    %cst_46 = arith.constant dense<0.000000e+00> : vector<26xf32>
    %56 = vector.multi_reduction <add>, %29, %cst_46 [1] : vector<26x64xf32> to vector<26xf32>
    %57 = vector.shape_cast %56 : vector<26xf32> to vector<26x1xf32>
    %cst_47 = arith.constant 6.400000e+01 : f32
    %58 = vector.broadcast %cst_47 : f32 to vector<26x1xf32>
    %59 = arith.divf %57, %58 : vector<26x1xf32>
    %60 = vector.broadcast %59 : vector<26x1xf32> to vector<26x64xf32>
    %61 = arith.subf %29, %60 : vector<26x64xf32>
    %62 = arith.mulf %61, %61 : vector<26x64xf32>
    %cst_48 = arith.constant dense<0.000000e+00> : vector<26xf32>
    %63 = vector.multi_reduction <add>, %62, %cst_48 [1] : vector<26x64xf32> to vector<26xf32>
    %64 = vector.shape_cast %63 : vector<26xf32> to vector<26x1xf32>
    %cst_49 = arith.constant 6.400000e+01 : f32
    %65 = vector.broadcast %cst_49 : f32 to vector<26x1xf32>
    %66 = arith.divf %64, %65 : vector<26x1xf32>
    %67 = vector.broadcast %59 : vector<26x1xf32> to vector<26x64xf32>
    %68 = arith.subf %29, %67 : vector<26x64xf32>
    %cst_50 = arith.constant 9.99999974E-6 : f32
    %69 = vector.broadcast %cst_50 : f32 to vector<26x1xf32>
    %70 = arith.addf %66, %69 : vector<26x1xf32>
    %71 = math.rsqrt %70 : vector<26x1xf32>
    %72 = vector.broadcast %71 : vector<26x1xf32> to vector<26x64xf32>
    %73 = arith.mulf %68, %72 : vector<26x64xf32>
    %74 = vector.broadcast %54 : vector<1x64xf32> to vector<26x64xf32>
    %75 = arith.mulf %73, %74 : vector<26x64xf32>
    %76 = vector.broadcast %55 : vector<1x64xf32> to vector<26x64xf32>
    %77 = arith.addf %75, %76 : vector<26x64xf32>
    %78 = arith.truncf %53 : vector<2x64xf32> to vector<2x64xbf16>
    %c0_51 = arith.constant 0 : index
    %c0_52 = arith.constant 0 : index
    %79 = vector.load %arg7[%c0_51, %c0_52] : memref<64x64xbf16, #tpu.memory_space<vmem>>, vector<64x64xbf16>
    %cst_53 = arith.constant dense<0.000000e+00> : vector<2x64xf32>
    %80 = tpu.matmul %78, %79, %cst_53 {dimension_numbers = #tpu.dot_dimension_numbers<[1], [0], [0], [1], [0, 0, 1, 1], [], []>} : vector<2x64xbf16>, vector<64x64xbf16>, vector<2x64xf32> -> vector<2x64xf32>
    %c0_54 = arith.constant 0 : index
    %c0_55 = arith.constant 0 : index
    %81 = vector.load %arg8[%c0_54, %c0_55] : memref<1x64xf32, #tpu.memory_space<vmem>>, vector<1x64xf32>
    %82 = vector.broadcast %81 : vector<1x64xf32> to vector<2x64xf32>
    %83 = arith.addf %80, %82 : vector<2x64xf32>
    %cst_56 = arith.constant 2.500000e-01 : f32
    %84 = vector.broadcast %cst_56 : f32 to vector<2x64xf32>
    %85 = arith.mulf %83, %84 : vector<2x64xf32>
    %86 = arith.truncf %77 : vector<26x64xf32> to vector<26x64xbf16>
    %c0_57 = arith.constant 0 : index
    %c0_58 = arith.constant 0 : index
    %87 = vector.load %arg9[%c0_57, %c0_58] : memref<64x128xbf16, #tpu.memory_space<vmem>>, vector<64x128xbf16>
    %cst_59 = arith.constant dense<0.000000e+00> : vector<26x128xf32>
    %88 = tpu.matmul %86, %87, %cst_59 {dimension_numbers = #tpu.dot_dimension_numbers<[1], [0], [0], [1], [0, 0, 1, 1], [], []>} : vector<26x64xbf16>, vector<64x128xbf16>, vector<26x128xf32> -> vector<26x128xf32>
    %c0_60 = arith.constant 0 : index
    %c0_61 = arith.constant 0 : index
    %89 = vector.load %arg10[%c0_60, %c0_61] : memref<1x128xf32, #tpu.memory_space<vmem>>, vector<1x128xf32>
    %90 = vector.broadcast %89 : vector<1x128xf32> to vector<26x128xf32>
    %91 = arith.addf %88, %90 : vector<26x128xf32>
    %92 = vector.extract_strided_slice %91 {offsets = [0, 0], sizes = [26, 64], strides = [1, 1]} : vector<26x128xf32> to vector<26x64xf32>
    %93 = vector.extract_strided_slice %91 {offsets = [0, 64], sizes = [26, 64], strides = [1, 1]} : vector<26x128xf32> to vector<26x64xf32>
    %94 = arith.truncf %85 : vector<2x64xf32> to vector<2x64xbf16>
    %95 = arith.truncf %92 : vector<26x64xf32> to vector<26x64xbf16>
    %96 = arith.truncf %93 : vector<26x64xf32> to vector<26x64xbf16>
    %97 = vector.extract_strided_slice %94 {offsets = [0, 0], sizes = [2, 16], strides = [1, 1]} : vector<2x64xbf16> to vector<2x16xbf16>
    %98 = vector.extract_strided_slice %95 {offsets = [0, 0], sizes = [26, 16], strides = [1, 1]} : vector<26x64xbf16> to vector<26x16xbf16>
    %cst_62 = arith.constant dense<0.000000e+00> : vector<2x26xf32>
    %99 = tpu.matmul %97, %98, %cst_62 {dimension_numbers = #tpu.dot_dimension_numbers<[1], [1], [0], [0], [0, 0, 1, 0], [], []>} : vector<2x16xbf16>, vector<26x16xbf16>, vector<2x26xf32> -> vector<2x26xf32>
    %cst_63 = arith.constant dense<0xFF800000> : vector<2xf32>
    %100 = vector.multi_reduction <maximumf>, %99, %cst_63 [1] : vector<2x26xf32> to vector<2xf32>
    %101 = vector.shape_cast %100 : vector<2xf32> to vector<2x1xf32>
    %102 = vector.broadcast %101 : vector<2x1xf32> to vector<2x26xf32>
    %103 = arith.subf %99, %102 : vector<2x26xf32>
    %104 = math.exp %103 : vector<2x26xf32>
    %cst_64 = arith.constant dense<0.000000e+00> : vector<2xf32>
    %105 = vector.multi_reduction <add>, %104, %cst_64 [1] : vector<2x26xf32> to vector<2xf32>
    %106 = vector.shape_cast %105 : vector<2xf32> to vector<2x1xf32>
    %107 = tpu.reciprocal %106 {approx = true} : vector<2x1xf32> -> vector<2x1xf32>
    %108 = vector.broadcast %107 : vector<2x1xf32> to vector<2x26xf32>
    %109 = arith.mulf %104, %108 : vector<2x26xf32>
    %110 = arith.truncf %109 : vector<2x26xf32> to vector<2x26xbf16>
    %111 = vector.extract_strided_slice %96 {offsets = [0, 0], sizes = [26, 16], strides = [1, 1]} : vector<26x64xbf16> to vector<26x16xbf16>
    %cst_65 = arith.constant dense<0.000000e+00> : vector<2x16xf32>
    %112 = tpu.matmul %110, %111, %cst_65 {dimension_numbers = #tpu.dot_dimension_numbers<[1], [0], [0], [1], [0, 0, 1, 1], [], []>} : vector<2x26xbf16>, vector<26x16xbf16>, vector<2x16xf32> -> vector<2x16xf32>
    %113 = vector.extract_strided_slice %94 {offsets = [0, 16], sizes = [2, 16], strides = [1, 1]} : vector<2x64xbf16> to vector<2x16xbf16>
    %114 = vector.extract_strided_slice %95 {offsets = [0, 16], sizes = [26, 16], strides = [1, 1]} : vector<26x64xbf16> to vector<26x16xbf16>
    %cst_66 = arith.constant dense<0.000000e+00> : vector<2x26xf32>
    %115 = tpu.matmul %113, %114, %cst_66 {dimension_numbers = #tpu.dot_dimension_numbers<[1], [1], [0], [0], [0, 0, 1, 0], [], []>} : vector<2x16xbf16>, vector<26x16xbf16>, vector<2x26xf32> -> vector<2x26xf32>
    %cst_67 = arith.constant dense<0xFF800000> : vector<2xf32>
    %116 = vector.multi_reduction <maximumf>, %115, %cst_67 [1] : vector<2x26xf32> to vector<2xf32>
    %117 = vector.shape_cast %116 : vector<2xf32> to vector<2x1xf32>
    %118 = vector.broadcast %117 : vector<2x1xf32> to vector<2x26xf32>
    %119 = arith.subf %115, %118 : vector<2x26xf32>
    %120 = math.exp %119 : vector<2x26xf32>
    %cst_68 = arith.constant dense<0.000000e+00> : vector<2xf32>
    %121 = vector.multi_reduction <add>, %120, %cst_68 [1] : vector<2x26xf32> to vector<2xf32>
    %122 = vector.shape_cast %121 : vector<2xf32> to vector<2x1xf32>
    %123 = tpu.reciprocal %122 {approx = true} : vector<2x1xf32> -> vector<2x1xf32>
    %124 = vector.broadcast %123 : vector<2x1xf32> to vector<2x26xf32>
    %125 = arith.mulf %120, %124 : vector<2x26xf32>
    %126 = arith.truncf %125 : vector<2x26xf32> to vector<2x26xbf16>
    %127 = vector.extract_strided_slice %96 {offsets = [0, 16], sizes = [26, 16], strides = [1, 1]} : vector<26x64xbf16> to vector<26x16xbf16>
    %cst_69 = arith.constant dense<0.000000e+00> : vector<2x16xf32>
    %128 = tpu.matmul %126, %127, %cst_69 {dimension_numbers = #tpu.dot_dimension_numbers<[1], [0], [0], [1], [0, 0, 1, 1], [], []>} : vector<2x26xbf16>, vector<26x16xbf16>, vector<2x16xf32> -> vector<2x16xf32>
    %129 = vector.extract_strided_slice %94 {offsets = [0, 32], sizes = [2, 16], strides = [1, 1]} : vector<2x64xbf16> to vector<2x16xbf16>
    %130 = vector.extract_strided_slice %95 {offsets = [0, 32], sizes = [26, 16], strides = [1, 1]} : vector<26x64xbf16> to vector<26x16xbf16>
    %cst_70 = arith.constant dense<0.000000e+00> : vector<2x26xf32>
    %131 = tpu.matmul %129, %130, %cst_70 {dimension_numbers = #tpu.dot_dimension_numbers<[1], [1], [0], [0], [0, 0, 1, 0], [], []>} : vector<2x16xbf16>, vector<26x16xbf16>, vector<2x26xf32> -> vector<2x26xf32>
    %cst_71 = arith.constant dense<0xFF800000> : vector<2xf32>
    %132 = vector.multi_reduction <maximumf>, %131, %cst_71 [1] : vector<2x26xf32> to vector<2xf32>
    %133 = vector.shape_cast %132 : vector<2xf32> to vector<2x1xf32>
    %134 = vector.broadcast %133 : vector<2x1xf32> to vector<2x26xf32>
    %135 = arith.subf %131, %134 : vector<2x26xf32>
    %136 = math.exp %135 : vector<2x26xf32>
    %cst_72 = arith.constant dense<0.000000e+00> : vector<2xf32>
    %137 = vector.multi_reduction <add>, %136, %cst_72 [1] : vector<2x26xf32> to vector<2xf32>
    %138 = vector.shape_cast %137 : vector<2xf32> to vector<2x1xf32>
    %139 = tpu.reciprocal %138 {approx = true} : vector<2x1xf32> -> vector<2x1xf32>
    %140 = vector.broadcast %139 : vector<2x1xf32> to vector<2x26xf32>
    %141 = arith.mulf %136, %140 : vector<2x26xf32>
    %142 = arith.truncf %141 : vector<2x26xf32> to vector<2x26xbf16>
    %143 = vector.extract_strided_slice %96 {offsets = [0, 32], sizes = [26, 16], strides = [1, 1]} : vector<26x64xbf16> to vector<26x16xbf16>
    %cst_73 = arith.constant dense<0.000000e+00> : vector<2x16xf32>
    %144 = tpu.matmul %142, %143, %cst_73 {dimension_numbers = #tpu.dot_dimension_numbers<[1], [0], [0], [1], [0, 0, 1, 1], [], []>} : vector<2x26xbf16>, vector<26x16xbf16>, vector<2x16xf32> -> vector<2x16xf32>
    %145 = vector.extract_strided_slice %94 {offsets = [0, 48], sizes = [2, 16], strides = [1, 1]} : vector<2x64xbf16> to vector<2x16xbf16>
    %146 = vector.extract_strided_slice %95 {offsets = [0, 48], sizes = [26, 16], strides = [1, 1]} : vector<26x64xbf16> to vector<26x16xbf16>
    %cst_74 = arith.constant dense<0.000000e+00> : vector<2x26xf32>
    %147 = tpu.matmul %145, %146, %cst_74 {dimension_numbers = #tpu.dot_dimension_numbers<[1], [1], [0], [0], [0, 0, 1, 0], [], []>} : vector<2x16xbf16>, vector<26x16xbf16>, vector<2x26xf32> -> vector<2x26xf32>
    %cst_75 = arith.constant dense<0xFF800000> : vector<2xf32>
    %148 = vector.multi_reduction <maximumf>, %147, %cst_75 [1] : vector<2x26xf32> to vector<2xf32>
    %149 = vector.shape_cast %148 : vector<2xf32> to vector<2x1xf32>
    %150 = vector.broadcast %149 : vector<2x1xf32> to vector<2x26xf32>
    %151 = arith.subf %147, %150 : vector<2x26xf32>
    %152 = math.exp %151 : vector<2x26xf32>
    %cst_76 = arith.constant dense<0.000000e+00> : vector<2xf32>
    %153 = vector.multi_reduction <add>, %152, %cst_76 [1] : vector<2x26xf32> to vector<2xf32>
    %154 = vector.shape_cast %153 : vector<2xf32> to vector<2x1xf32>
    %155 = tpu.reciprocal %154 {approx = true} : vector<2x1xf32> -> vector<2x1xf32>
    %156 = vector.broadcast %155 : vector<2x1xf32> to vector<2x26xf32>
    %157 = arith.mulf %152, %156 : vector<2x26xf32>
    %158 = arith.truncf %157 : vector<2x26xf32> to vector<2x26xbf16>
    %159 = vector.extract_strided_slice %96 {offsets = [0, 48], sizes = [26, 16], strides = [1, 1]} : vector<26x64xbf16> to vector<26x16xbf16>
    %cst_77 = arith.constant dense<0.000000e+00> : vector<2x16xf32>
    %160 = tpu.matmul %158, %159, %cst_77 {dimension_numbers = #tpu.dot_dimension_numbers<[1], [0], [0], [1], [0, 0, 1, 1], [], []>} : vector<2x26xbf16>, vector<26x16xbf16>, vector<2x16xf32> -> vector<2x16xf32>
    %161 = tpu.concatenate %112, %128, %144, %160 in 1 : vector<2x16xf32>, vector<2x16xf32>, vector<2x16xf32>, vector<2x16xf32> -> vector<2x64xf32>
    %162 = arith.truncf %161 : vector<2x64xf32> to vector<2x64xbf16>
    %c0_78 = arith.constant 0 : index
    %c0_79 = arith.constant 0 : index
    %163 = vector.load %arg11[%c0_78, %c0_79] : memref<64x64xbf16, #tpu.memory_space<vmem>>, vector<64x64xbf16>
    %cst_80 = arith.constant dense<0.000000e+00> : vector<2x64xf32>
    %164 = tpu.matmul %162, %163, %cst_80 {dimension_numbers = #tpu.dot_dimension_numbers<[1], [0], [0], [1], [0, 0, 1, 1], [], []>} : vector<2x64xbf16>, vector<64x64xbf16>, vector<2x64xf32> -> vector<2x64xf32>
    %165 = arith.addf %28, %164 : vector<2x64xf32>
    %c0_81 = arith.constant 0 : index
    %c0_82 = arith.constant 0 : index
    %166 = vector.load %arg12[%c0_81, %c0_82] : memref<1x64xf32, #tpu.memory_space<vmem>>, vector<1x64xf32>
    %167 = vector.broadcast %166 : vector<1x64xf32> to vector<2x64xf32>
    %168 = arith.addf %165, %167 : vector<2x64xf32>
    %c0_83 = arith.constant 0 : index
    %c0_84 = arith.constant 0 : index
    %169 = vector.load %arg13[%c0_83, %c0_84] : memref<1x64xf32, #tpu.memory_space<vmem>>, vector<1x64xf32>
    %c0_85 = arith.constant 0 : index
    %c0_86 = arith.constant 0 : index
    %170 = vector.load %arg14[%c0_85, %c0_86] : memref<1x64xf32, #tpu.memory_space<vmem>>, vector<1x64xf32>
    %cst_87 = arith.constant dense<0.000000e+00> : vector<2xf32>
    %171 = vector.multi_reduction <add>, %168, %cst_87 [1] : vector<2x64xf32> to vector<2xf32>
    %172 = vector.shape_cast %171 : vector<2xf32> to vector<2x1xf32>
    %cst_88 = arith.constant 6.400000e+01 : f32
    %173 = vector.broadcast %cst_88 : f32 to vector<2x1xf32>
    %174 = arith.divf %172, %173 : vector<2x1xf32>
    %175 = vector.broadcast %174 : vector<2x1xf32> to vector<2x64xf32>
    %176 = arith.subf %168, %175 : vector<2x64xf32>
    %177 = arith.mulf %176, %176 : vector<2x64xf32>
    %cst_89 = arith.constant dense<0.000000e+00> : vector<2xf32>
    %178 = vector.multi_reduction <add>, %177, %cst_89 [1] : vector<2x64xf32> to vector<2xf32>
    %179 = vector.shape_cast %178 : vector<2xf32> to vector<2x1xf32>
    %cst_90 = arith.constant 6.400000e+01 : f32
    %180 = vector.broadcast %cst_90 : f32 to vector<2x1xf32>
    %181 = arith.divf %179, %180 : vector<2x1xf32>
    %182 = vector.broadcast %174 : vector<2x1xf32> to vector<2x64xf32>
    %183 = arith.subf %168, %182 : vector<2x64xf32>
    %cst_91 = arith.constant 9.99999974E-6 : f32
    %184 = vector.broadcast %cst_91 : f32 to vector<2x1xf32>
    %185 = arith.addf %181, %184 : vector<2x1xf32>
    %186 = math.rsqrt %185 : vector<2x1xf32>
    %187 = vector.broadcast %186 : vector<2x1xf32> to vector<2x64xf32>
    %188 = arith.mulf %183, %187 : vector<2x64xf32>
    %189 = vector.broadcast %169 : vector<1x64xf32> to vector<2x64xf32>
    %190 = arith.mulf %188, %189 : vector<2x64xf32>
    %191 = vector.broadcast %170 : vector<1x64xf32> to vector<2x64xf32>
    %192 = arith.addf %190, %191 : vector<2x64xf32>
    %193 = arith.truncf %192 : vector<2x64xf32> to vector<2x64xbf16>
    %c0_92 = arith.constant 0 : index
    %c0_93 = arith.constant 0 : index
    %194 = vector.load %arg15[%c0_92, %c0_93] : memref<64x256xbf16, #tpu.memory_space<vmem>>, vector<64x256xbf16>
    %cst_94 = arith.constant dense<0.000000e+00> : vector<2x256xf32>
    %195 = tpu.matmul %193, %194, %cst_94 {dimension_numbers = #tpu.dot_dimension_numbers<[1], [0], [0], [1], [0, 0, 1, 1], [], []>} : vector<2x64xbf16>, vector<64x256xbf16>, vector<2x256xf32> -> vector<2x256xf32>
    %c0_95 = arith.constant 0 : index
    %c0_96 = arith.constant 0 : index
    %196 = vector.load %arg16[%c0_95, %c0_96] : memref<1x256xf32, #tpu.memory_space<vmem>>, vector<1x256xf32>
    %197 = vector.broadcast %196 : vector<1x256xf32> to vector<2x256xf32>
    %198 = arith.addf %195, %197 : vector<2x256xf32>
    %199 = arith.mulf %198, %198 : vector<2x256xf32>
    %200 = arith.mulf %198, %199 : vector<2x256xf32>
    %cst_97 = arith.constant 4.471500e-02 : f32
    %201 = vector.broadcast %cst_97 : f32 to vector<2x256xf32>
    %202 = arith.mulf %201, %200 : vector<2x256xf32>
    %203 = arith.addf %198, %202 : vector<2x256xf32>
    %cst_98 = arith.constant 0.797884583 : f32
    %204 = vector.broadcast %cst_98 : f32 to vector<2x256xf32>
    %205 = arith.mulf %204, %203 : vector<2x256xf32>
    %206 = math.tanh %205 : vector<2x256xf32>
    %cst_99 = arith.constant 1.000000e+00 : f32
    %207 = vector.broadcast %cst_99 : f32 to vector<2x256xf32>
    %208 = arith.addf %207, %206 : vector<2x256xf32>
    %cst_100 = arith.constant 5.000000e-01 : f32
    %209 = vector.broadcast %cst_100 : f32 to vector<2x256xf32>
    %210 = arith.mulf %209, %208 : vector<2x256xf32>
    %211 = arith.mulf %198, %210 : vector<2x256xf32>
    %212 = arith.truncf %211 : vector<2x256xf32> to vector<2x256xbf16>
    %c0_101 = arith.constant 0 : index
    %c0_102 = arith.constant 0 : index
    %213 = vector.load %arg17[%c0_101, %c0_102] : memref<256x64xbf16, #tpu.memory_space<vmem>>, vector<256x64xbf16>
    %cst_103 = arith.constant dense<0.000000e+00> : vector<2x64xf32>
    %214 = tpu.matmul %212, %213, %cst_103 {dimension_numbers = #tpu.dot_dimension_numbers<[1], [0], [0], [1], [0, 0, 1, 1], [], []>} : vector<2x256xbf16>, vector<256x64xbf16>, vector<2x64xf32> -> vector<2x64xf32>
    %215 = arith.addf %168, %214 : vector<2x64xf32>
    %c0_104 = arith.constant 0 : index
    %c0_105 = arith.constant 0 : index
    %216 = vector.load %arg18[%c0_104, %c0_105] : memref<1x64xf32, #tpu.memory_space<vmem>>, vector<1x64xf32>
    %217 = vector.broadcast %216 : vector<1x64xf32> to vector<2x64xf32>
    %218 = arith.addf %215, %217 : vector<2x64xf32>
    %c0_106 = arith.constant 0 : index
    %c0_107 = arith.constant 0 : index
    %219 = vector.load %arg19[%c0_106, %c0_107] : memref<2x64xf32, #tpu.memory_space<vmem>>, vector<2x64xf32>
    tpu.vector_store %arg19[%c0_106, %c0_107], %218 {strides = array<i32>} : memref<2x64xf32, #tpu.memory_space<vmem>>, vector<2x64xf32>,
    return
  }
}

</mosaic_0001>

<bundles_post_ra>
// kernel: transformer_classifier_forward.3
= control target key start
LH: loop header
LB: loop body
LE: loop exit
PB: predicated region body
PF: predicated region fallthrough
CT: control target
= control target key end

     0   :  { %s5236_s0 = inlined_call_operand.vmem [shape: f32[34,64], index: 0, kind: input, shape index: {}]   ;;  %s5237_s1 = inlined_call_operand.vmem [shape: f32[3,1,64], index: 1, kind: input, shape index: {}, may-alias: {1,7}]   ;;  %s5238_s2 = inlined_call_operand.vmem [shape: f32[3,1,64], index: 2, kind: input, shape index: {}, may-alias: {2,6,8,12}]   ;;  %s5239_s3 = inlined_call_operand.hbm [shape: bf16[3,64,192], index: 3, kind: input, shape index: {}]   ;;  %s5240_s4 = inlined_call_operand.vmem [shape: f32[3,1,192], index: 4, kind: input, shape index: {}]   ;;  %s5241_s5 = inlined_call_operand.hbm [shape: bf16[3,64,64], index: 5, kind: input, shape index: {}]   ;;  %s5242_s6 = inlined_call_operand.vmem [shape: f32[3,1,64], index: 6, kind: input, shape index: {}, may-alias: {2,6,8,12}]   ;;  %s5243_s7 = inlined_call_operand.vmem [shape: f32[3,1,64], index: 7, kind: input, shape index: {}, may-alias: {1,7}]   ;;  %s5244_s8 = inlined_call_operand.vmem [shape: f32[3,1,64], index: 8, kind: input, shape index: {}, may-alias: {2,6,8,12}]   ;;  %s5245_s9 = inlined_call_operand.hbm [shape: bf16[3,64,256], index: 9, kind: input, shape index: {}]   ;;  %s5246_s10 = inlined_call_operand.vmem [shape: f32[3,1,256], index: 10, kind: input, shape index: {}]   ;;  %s5247_s11 = inlined_call_operand.vmem [shape: bf16[3,256,64], index: 11, kind: input, shape index: {}]   ;;  %s5248_s12 = inlined_call_operand.vmem [shape: f32[3,1,64], index: 12, kind: input, shape index: {}, may-alias: {2,6,8,12}]   ;;  %s5249_s13 = inlined_call_operand.vmem [shape: f32[34,64], index: 13, kind: output, shape index: {0}]   ;;  %s5250_s14 = inlined_call_operand.vmem [shape: f32[3,2,64], index: 14, kind: output, shape index: {1}]   ;;  %s5251_s15 = inlined_call_operand.vmem [shape: f32[3,2,17,17], index: 15, kind: output, shape index: {2}]  }
   0x1   :  { %5260 = sst [smem:[#allocation14_spill]] %s5236_s0 }
   0x2   :  { %5261 = sst [smem:[#allocation15_spill]] %s5239_s3 }
   0x3   :  { %5262 = sst [smem:[#allocation16_spill]] %s5241_s5 }
   0x4   :  { %5263 = sst [smem:[#allocation17_spill]] %s5243_s7 }
   0x5   :  { %5264 = sst [smem:[#allocation18_spill]] %s5244_s8 }
   0x6   :  { %5265 = sst [smem:[#allocation19_spill]] %s5245_s9 }
   0x7   :  { %5266 = sst [smem:[#allocation20_spill]] %s5247_s11 }
   0x8   :  { %5267 = sst [smem:[#allocation21_spill]] %s5248_s12 }
   0x9   :  { %5268 = sst [smem:[#allocation22_spill]] %s5249_s13 }
   0xa   :  { %5269 = sst [smem:[#allocation23_spill]] %s5250_s14 }
   0xb   :  { %5270 = sst [smem:[#allocation24_spill]] %s5251_s15 }
   0xc   :  { %21 = vsyncpa [#allocation4], 0 }
   0xd   :  { %23 = vsyncpa [#allocation4 + $0x1], 0 }
   0xe   :  { %24 = vsyncpa [#allocation6], 0 }
   0xf   :  { %26 = vsyncpa [#allocation6 + $0x1], 0  ;;  %s4275_s18 = smov 0   ;;  %s4277_s19 = smov 0  }
  0x10   :  { %s4279_s20 = smov 0   ;;  %s4281_s21 = smov 0  }
  0x11 LB: > { %5271 = sst [smem:[#allocation10_spill]] %s4168_s19  ;;  %s4294_s22 = sadd.s32 4294967295, %s4176_s21   ;;  %s4176_s21 = sphi %s4281_s21, %s5304_s21   ;;  %s4172_s20 = sphi %s4279_s20, %s5307_s20   ;;  %s4168_s19 = sphi %s4277_s19, %s5306_s19   ;;  %s4164_s18 = sphi %s4275_s18, %s5305_s18  }
  0x12   : > { %5272 = sst [smem:[#allocation11_spill]] %s4172_s20  ;;  %s4297_s23 = sadd.s32 1, %s4176_s21  }
  0x13   : > { %5273 = sst [smem:[#allocation12_spill]] %s4297_s23  ;;  %s109_s24 = ssub.s32 %s4176_s21, %s4297_s23 }
  0x14   : > { %s112_s25 = sadd.s32 1, %s4172_s20  ;;  %p110_p0 = scmp.eq.s32.totalorder %s109_s24, 0 }
  0x15   : > { %p119_p1 = scmp.ne.s32.totalorder %s4172_s20, %s4168_s19  ;;  %p120_p2 = scmp.eq.s32.totalorder %s4176_s21, 0 }
  0x16   : > { %p125_p3 = scmp.ne.s32.totalorder %s4168_s19, %s4164_s18  ;;  %p126_p5 = scmp.eq.s32.totalorder %s4294_s22, 0 }
  0x17   : > { %s4307_s26 = scalar_select %p110_p0, %s4172_s20, %s112_s25  }
  0x18   : > { %p121_p4 = por %p120_p2, %p119_p1  ;;  %p3792_p6 = scmp.lt.s32.totalorder %s4176_s21, 3 }
  0x19   : > { %5274 = sst [smem:[#allocation13_spill]] %s4307_s26  ;;  %p4311_p7 = por %p126_p5, %p125_p3 }
  0x1a   : > { %s4316_s28 = sand.u32 1, %s4172_s20   ;;  %p4318_p8 = pnand %p3792_p6, %p121_p4 }
  0x1b   : > { %s5275_s27 = scalar_select %p4311_p7, 1, 0 }
  0x1c   : > { %s499_s30 = sand.u32 1, %s4176_s21   ;;  %s3396_s16 = sshll.u32 %s4316_s28, 5 }
  0x1d   : > { %s3503_s17 = sshll.u32 %s4176_s21, 9  ;;  %s503_s18 = scalar_lea.vmem [#allocation5], %s3396_s16 }
  0x1e   : > { %s510_s24 = sshll.u32 %s503_s18, 4  ;;  %s5277_s5 = sld [smem:[#allocation16_spill]]  ;;  %s4330_s24 = int_to_ptr.vmem [resolvable:$true] %s510_s24 }
  0x1f   : > { %s4332_s20 = scalar_lea.sflag [#allocation6], %s499_s30  ;;  %p4338_p10 = pneg %p4318_p8 }
  0x24   : > { %s4328_s23 = scalar_lea.hbm %s5277_s5, %s3503_s17  ;;  %s4059_s17 = scalar_lea.hbm %s5277_s5, 1536 }
  0x25   : > { %s4054_s13 = scalar_lea.hbm %s4328_s23, 512  ;;  %p4060_p13 = scmp.lt.s32.totalorder %s4328_s23, %s5277_s5 }
  0x26   : > { %p4055_p9 = scmp.ne.s32.totalorder %s4328_s23, %s4054_s13  ;;  %p4061_p0 = scmp.lt.s32.totalorder %s4059_s17, %s4054_s13 }
  0x28   : > { %p4057_p11 = pnand %p4338_p10, %p4055_p9  ;;  %p4062_p1 = por %p4061_p0, %p4060_p13 }
  0x2a   : > { %p4058_p12 = pneg %p4057_p11 }
  0x2c   : > { %p4063_p2 = pnand %p4062_p1, %p4058_p12 }
  0x2e   : > { %4066 = shalt.err (!%p4063_p2)
}
  0x2f   : > { %s4067_s30 = scalar_lea.vmem %s4330_s24, 512  ;;  %s4178_s15 = smov [#allocation5]  }
  0x30   : > { %p4068_p3 = scmp.ne.s32.totalorder %s4330_s24, %s4067_s30  ;;  %s4072_s26 = sshll.u32 %s4178_s15, 4  ;;  %s4073_s26 = int_to_ptr.vmem [resolvable:$false] %s4072_s26 }
  0x31   : > { %s4074_s16 = scalar_lea.vmem %s4073_s26, 1024  ;;  %p4075_p6 = scmp.lt.s32.totalorder %s4330_s24, %s4073_s26 }
  0x32   : > { %p4070_p4 = pnand %p4068_p3, %p4338_p10  ;;  %p4076_p9 = scmp.lt.s32.totalorder %s4074_s16, %s4067_s30 }
  0x34   : > { %p4071_p5 = pneg %p4070_p4  ;;  %p4077_p11 = por %p4076_p9, %p4075_p6 }
  0x36   : > { %p4078_p7 = pnand %p4077_p11, %p4071_p5 }
  0x38   : > { %4081 = shalt.err (!%p4078_p7)
}
  0x39   : > { %s4179_s13 = smov 64   ;;  %s4180_s15 = smov 4  }
  0x3a   : > { %3788 = dma.hbm_to_vmem [thread:$0]  (!%p4318_p8), %s4328_s23, 512, %s4330_s24, %s4332_s20, %s4179_s13, %s4179_s13, %s4180_s15  }
  0x3b   : > { %p3402_p12 = scmp.ge.s32.totalorder %s4176_s21, 1  ;;  %p578_p13 = scmp.lt.s32.totalorder %s4176_s21, 4 }
  0x3c   : > { %s5258_s17 = sshll.u32 %s4316_s28, 6  ;;  %s3502_s25 = sshll.u32 %s4176_s21, 10 }
  0x3d   : > { %p4364_p7 = pnand %p3402_p12, %p578_p13  ;;  %s475_s30 = scalar_lea.vmem [#allocation3], %s5258_s17 }
  0x3e   : > { %s482_s26 = sshll.u32 %s475_s30, 4  ;;  %s5280_s3 = sld [smem:[#allocation15_spill]]  ;;  %s4378_s26 = int_to_ptr.vmem [resolvable:$true] %s482_s26 }
  0x3f   : > { %s5279_s18 = scalar_select %p4364_p7, 1, 0 }
  0x40   : > { %s472_s23 = scalar_lea.sflag [#allocation4], %s4316_s28 }
  0x44   : > { %s4376_s14 = scalar_lea.hbm %s5280_s3, %s3502_s25  ;;  %s4087_s30 = scalar_lea.hbm %s5280_s3, 3072 }
  0x45   : > { %s4082_s24 = scalar_lea.hbm %s4376_s14, 1024  ;;  %p4088_p3 = scmp.lt.s32.totalorder %s4376_s14, %s5280_s3 }
  0x46   : > { %p4083_p0 = scmp.ne.s32.totalorder %s4376_s14, %s4082_s24  ;;  %p4089_p4 = scmp.lt.s32.totalorder %s4087_s30, %s4082_s24 }
  0x48   : > { %p4085_p1 = pnand %p4083_p0, %p4338_p10  ;;  %p4090_p5 = por %p4089_p4, %p4088_p3 }
  0x4a   : > { %p4086_p2 = pneg %p4085_p1 }
  0x4c   : > { %p4091_p6 = pnand %p4090_p5, %p4086_p2 }
  0x4e   : > { %4094 = shalt.err (!%p4091_p6)
}
  0x4f   : > { %s4095_s5 = scalar_lea.vmem %s4378_s26, 1024  ;;  %s4181_s16 = smov [#allocation3]  }
  0x50   : > { %p4096_p9 = scmp.ne.s32.totalorder %s4378_s26, %s4095_s5  ;;  %s4100_s13 = sshll.u32 %s4181_s16, 4  ;;  %s4101_s13 = int_to_ptr.vmem [resolvable:$false] %s4100_s13 }
  0x51   : > { %s4102_s15 = scalar_lea.vmem %s4101_s13, 2048  ;;  %p4103_p13 = scmp.lt.s32.totalorder %s4378_s26, %s4101_s13 }
  0x52   : > { %p4098_p11 = pnand %p4096_p9, %p4338_p10  ;;  %p4104_p0 = scmp.lt.s32.totalorder %s4102_s15, %s4095_s5 }
  0x54   : > { %p4099_p12 = pneg %p4098_p11  ;;  %p4105_p1 = por %p4104_p0, %p4103_p13 }
  0x56   : > { %p4106_p7 = pnand %p4105_p1, %p4099_p12 }
  0x58   : > { %4109 = shalt.err (!%p4106_p7)
}
  0x59   : > { %s4182_s11 = smov 128   ;;  %s4183_s17 = smov 8  }
  0x5a   : > { %3785 = dma.hbm_to_vmem [thread:$0]  (!%p4318_p8), %s4376_s14, 1024, %s4378_s26, %s472_s23, %s4182_s11, %s4182_s11, %s4183_s17  }
  0x5b   : > { %s5281_s9 = sld [smem:[#allocation19_spill]]  ;;  %s5282_s16 = sshll.u32 %s4316_s28, 6 }
  0x5c   : > { %s542_s13 = scalar_lea.vmem [#allocation7], %s5282_s16 }
  0x5d   : > { %s549_s15 = sshll.u32 %s542_s13, 4  ;;  %s550_s15 = int_to_ptr.vmem [resolvable:$true] %s549_s15 }
  0x61   : > { %s4411_s5 = scalar_lea.hbm %s5281_s9, %s3502_s25  ;;  %s4115_s21 = scalar_lea.hbm %s5281_s9, 3072 }
  0x62   : > { %s4110_s3 = scalar_lea.hbm %s4411_s5, 1024  ;;  %p4116_p4 = scmp.lt.s32.totalorder %s4411_s5, %s5281_s9 }
  0x63   : > { %p4111_p7 = scmp.ne.s32.totalorder %s4411_s5, %s4110_s3  ;;  %p4117_p5 = scmp.lt.s32.totalorder %s4115_s21, %s4110_s3 }
  0x65   : > { %p4113_p2 = pnand %p4111_p7, %p4338_p10  ;;  %p4118_p6 = por %p4117_p5, %p4116_p4 }
  0x67   : > { %p4114_p3 = pneg %p4113_p2 }
  0x69   : > { %p4119_p9 = pnand %p4118_p6, %p4114_p3 }
  0x6b   : > { %4122 = shalt.err (!%p4119_p9)
}
  0x6c   : > { %s4123_s28 = scalar_lea.vmem %s550_s15, 1024  ;;  %s4184_s25 = smov [#allocation7]  }
  0x6d   : > { %p4124_p11 = scmp.ne.s32.totalorder %s550_s15, %s4123_s28  ;;  %s4128_s24 = sshll.u32 %s4184_s25, 4  ;;  %s4129_s24 = int_to_ptr.vmem [resolvable:$false] %s4128_s24 }
  0x6e   : > { %s4130_s30 = scalar_lea.vmem %s4129_s24, 2048  ;;  %p4131_p0 = scmp.lt.s32.totalorder %s550_s15, %s4129_s24 }
  0x6f   : > { %p4126_p12 = pnand %p4124_p11, %p4338_p10  ;;  %p4132_p1 = scmp.lt.s32.totalorder %s4130_s30, %s4123_s28 }
  0x71   : > { %p4127_p13 = pneg %p4126_p12  ;;  %p4133_p7 = por %p4132_p1, %p4131_p0 }
  0x73   : > { %p4134_p2 = pnand %p4133_p7, %p4127_p13 }
  0x75   : > { %4137 = shalt.err (!%p4134_p2)
}
  0x76   : > { %3791 = dma.hbm_to_vmem [thread:$0]  (!%p4318_p8), %s4411_s5, 1024, %s550_s15, %s4332_s20, %s4182_s11, %s4182_s11, %s4183_s17  }
  0x77   : > { %p5283_p10 = scmp.ne.s32.totalorder %s5279_s18, 0 }
  0x78   : > { %s584_s0 = sand.u32 (!%p5283_p10), 1, %s4168_s19   ;;  %p5284_p3 = scmp.ne.s32.totalorder (!%p5283_p10), %s5275_s27, 0 }
  0x79   : > { %582 = sbr.rel (%p5283_p10) target bundleno = 5800 (0x16a8), region = 72  ;;  %s3403_s3 = sshll.u32 (!%p5283_p10), %s584_s0, 6 }
  0x7a   : > { %s585_s12 = scalar_lea.sflag (!%p5283_p10), [#allocation4], %s584_s0  ;;  %s4438_s16 = scalar_lea.vmem (!%p5283_p10), [#allocation3], %s3403_s3 }
  0x7e   : > { %4155 = dma.done.wait (%p5284_p3), %s585_s12, 1024  }
  0x7f   : > { %4157 = vsyncadd (%p5284_p3), %s585_s12, 4294966272  ;;  %s593_s29 = sand.u32 1, %s4294_s22   ;;  %s3404_s13 = sshll.u32 %s584_s0, 5 }
  0x80   : > { %s594_s20 = scalar_lea.sflag [#allocation6], %s593_s29  ;;  %s4445_s11 = scalar_lea.vmem [#allocation5], %s3404_s13 }
  0x81   : > { %4159 = dma.done.wait (%p5284_p3), %s594_s20, 1536  }
  0x82   : > { %4161 = vsyncadd (%p5284_p3), %s594_s20, 4294965760  ;;  %p698_p8 = scmp.lt.s32.totalorder %s4294_s22, 2  ;;  %s5287_s25 = sld [smem:[#allocation21_spill]] }
  0x83   : > { %s5288_s30 = sld [smem:[#allocation20_spill]]  ;;  %s4506_s14 = scalar_lea.vmem [#allocation7], %s3403_s3 }
  0x84   : > { %s4453_s18 = scalar_select %p698_p8, %s4294_s22, 2 }
  0x85   : > { %s5289_s13 = sld [smem:[#allocation23_spill]]  ;;  %p3412_p4 = scmp.ne.s32.totalorder %s4294_s22, 0 }
  0x86   : > { %s4464_s26 = sshll.u32 %s4453_s18, 1  ;;  %s3505_s28 = sshll.u32 %s4453_s18, 7 }
  0x87   : > { %s720_s23 = scalar_lea.vmem %s5246_s10, %s4464_s26  ;;  %s3775_s20 = smul.u32 48, %s4453_s18 }
  0x88   : > { %s728_s9 = scalar_lea.vmem %s5287_s25, %s4453_s18  ;;  %s5290_s8 = sld [smem:[#allocation24_spill]] }
  0x89   : > { %s4494_s0 = scalar_lea.vmem %s5288_s30, %s3505_s28  ;;  %s5291_s19 = sld [smem:[#allocation14_spill]] (!%p3412_p4) }
  0x8a   : > { %742 = sbr.rel (%p3412_p4) target bundleno = 148 (0x94), region = 88 }
  0x8b   : > { %s732_s7 = scalar_lea.vmem %s5289_s13, %s4464_s26 }
  0x8e   : > { %s4504_s27 = scalar_lea.vmem %s5290_s8, %s3775_s20 }
  0x8f   : > { %s5292_s25 = smov %s5291_s19  ;;  %v743_v0 = vld [vmem:[%s5291_s19] sm:$0xff]  ;;  %vm748_vm0 = vcmask 523264   ;;  %vm753_vm1 = vcmask 517120  }
  0x90   : > { %v744_v1 = vld [vmem:[%s5292_s25 + $0x8] sm:$0xff]  ;;  %v745_v2 = vld [vmem:[%s5292_s25 + $0x10] sm:$0xff]  ;;  %749 = vst.msk [vmem:[#allocation2] sm:$0xff] %vm748_vm0, %v743_v0  ;;  %v746_v3 = vld [vmem:[%s5292_s25 + $0x18] sm:$0xff] }
  0x91   : > { %750 = vst.msk [vmem:[#allocation2 + $0x8] sm:$0xff] %vm748_vm0, %v744_v1  ;;  %751 = vst.msk [vmem:[#allocation2 + $0x10] sm:$0xff] %vm748_vm0, %v745_v2  ;;  %v747_v4 = vld [vmem:[%s5292_s25 + $0x20] sm:$0x3] }
  0x92   : > { %752 = vst.msk [vmem:[#allocation2 + $0x18] sm:$0xff] %vm748_vm0, %v746_v3 }
  0x93   : > { %754 = vst.msk [vmem:[#allocation2 + $0x20] sm:$0x3] %vm753_vm1, %v747_v4 }
  0x94 PF: > { %vm762_vm2 = vcmask 523264   ;;  %vm775_vm3 = vcmask 517120   ;;  %v3869_v35 = vld [vmem:[%s4438_s16 + $0x34] ss:$8 sps:$4 sm:$0xff]   ;;  %v3871_v36 = vld [vmem:[%s4438_s16 + $0x30] ss:$8 sps:$4 sm:$0xff]   ;;  %s5293_s20 = scalar_lea.vmem %s5237_s1, %s4453_s18  ;;  %s5294_s21 = scalar_lea.vmem %s5238_s2, %s4453_s18 }
  0x95   : > { %932 = vmatprep.subr.bf16.mxu0 %v3869_v35  ;;  %v3872_v37 = vld [vmem:[%s4438_s16 + $0x24] ss:$8 sps:$4 sm:$0xff]   ;;  %v3874_v38 = vld [vmem:[%s4438_s16 + $0x20] ss:$8 sps:$4 sm:$0xff]   ;;  %v3875_v39 = vld [vmem:[%s4438_s16 + $0x14] ss:$8 sps:$4 sm:$0xff]   ;;  %s5295_s24 = scalar_lea.vmem %s5240_s4, %s4464_s26  ;;  %s5296_s29 = scalar_lea.vmem %s5242_s6, %s4453_s18 }
  0x96   : > { %933 = vmatpush1.bf16.msra.mxu0 %v3871_v36  ;;  %v4185_v40 = vmov 0   ;;  %v3877_v41 = vld [vmem:[%s4438_s16 + $0x10] ss:$8 sps:$4 sm:$0xff]   ;;  %v3878_v42 = vld [vmem:[%s4438_s16 + $0x4] ss:$8 sps:$4 sm:$0xff]   ;;  %vm1002_vm4 = vcmask 130048  }
  0x97   : > { %v755_v5 = vld [vmem:[#allocation2] sm:$0xff]  ;;  %934 = vmatprep.subr.bf16.mxu0 %v3872_v37  ;;  %956 = vmatprep.mubr.bf16.mxu0 %v4185_v40  ;;  %v3880_v43 = vld [vmem:[%s4438_s16] ss:$8 sps:$4 sm:$0xff]   ;;  %s4186_s13 = smov 64   ;;  %vm1109_vm5 = vcmask 1040384   ;;  %s4187_s30 = smov 48  }
  0x98   : > { %v757_v6 = vld [vmem:[#allocation2 + $0x10] sm:$0xff]  ;;  %v756_v7 = vld [vmem:[#allocation2 + $0x8] sm:$0xff]  ;;  %v763_v8 = vsel %vm762_vm2, %v755_v5, 0.0  ;;  %v3413_v63 = vld [vmem:[%s5293_s20] ss:$0 sm:$0xff]  ;;  %s4188_s8 = smov 112  }
  0x99   : > { %v769_v9 = vsel %vm762_vm2, %v757_v6, 0.0  ;;  %v758_v10 = vld [vmem:[#allocation2 + $0x18] sm:$0xff]  ;;  %764 = vadd.xlane.f32.xlu0 %v763_v8  ;;  %v766_v11 = vsel %vm762_vm2, %v756_v7, 0.0  ;;  %v3414_v4 = vld [vmem:[%s5294_s21] ss:$0 sm:$0xff]  ;;  %vm1063_vm7 = vcmask 138240  }
  0x9a   : > { %770 = vadd.xlane.f32.xlu1 %v769_v9  ;;  %v772_v12 = vsel %vm762_vm2, %v758_v10, 0.0  ;;  %v759_v31 = vld [vmem:[#allocation2 + $0x20] sm:$0x3]  ;;  %935 = vmatpush1.bf16.msra.mxu0 %v3874_v38  ;;  %vm1730_vm6 = vsmask.f32 7424  ;;  %vm1070_vm8 = vcmask 131072  }
  0x9b   : > { %v776_v33 = vsel %vm775_vm3, %v759_v31, 0.0  ;;  %936 = vmatprep.subr.bf16.mxu0 %v3875_v39  ;;  %s4189_s3 = smov 32   ;;  %s4190_s5 = smov 96   ;;  %vm4194_vm9 = vmmov 0   ;;  %vm1710_vm10 = vcmask 261120   ;;  %vm1714_vm11 = vcmask 392192  }
  0x9c   : > { %s4191_s12 = smov 16   ;;  %s4192_s16 = smov 80  }
  0x9d   : > { %767 = vadd.xlane.f32.xlu0 %v766_v11  ;;  %s5297_s17 = sld [smem:[#allocation17_spill]]  ;;  %p3499_p5 = scmp.ne.s32.totalorder %s4294_s22, 2 }
  0x9e   : > { %773 = vadd.xlane.f32.xlu1 %v772_v12  ;;  %937 = vmatpush1.bf16.msra.mxu0 %v3877_v41  ;;  %s5299_s28 = sld [smem:[#allocation18_spill]] }
  0x9f   : > { %938 = vmatprep.subr.bf16.mxu0 %v3878_v42  ;;  %s5303_s26 = sld [smem:[#allocation22_spill]] (!%p3499_p5) }
  0xa2   : > { %939 = vmatpush1.bf16.msra.mxu0 %v3880_v43 }
  0xa3   : > { %s5298_s15 = scalar_lea.vmem %s5297_s17, %s4453_s18 }
 0x122   : > { %v765_v13 = vpop.xlane.xlu0 %764 }
 0x123   : > { %v771_v14 = vpop.xlane.xlu1 %770  ;;  %v780_v15 = vmul.f32 0.015625, %v765_v13 }
 0x124   : > { %v782_v16 = vmul.f32 0.015625, %v771_v14 }
 0x125   : > { %v4528_v17 = vsub.f32 %v755_v5, %v780_v15 }
 0x126   : > { %v4530_v18 = vsub.f32 %v757_v6, %v782_v16  ;;  %v768_v19 = vpop.xlane.xlu0 %767 }
 0x127   : > { %v774_v20 = vpop.xlane.xlu1 %773  ;;  %v781_v21 = vmul.f32 0.015625, %v768_v19  ;;  %v790_v23 = vmul.f32 %v4528_v17, %v4528_v17 }
 0x128   : > { %v783_v22 = vmul.f32 0.015625, %v774_v20  ;;  %v792_v24 = vmul.f32 %v4530_v18, %v4530_v18 }
 0x129   : > { %v786_v25 = vsub.f32 %v756_v7, %v781_v21  ;;  %v795_v27 = vsel %vm762_vm2, %v790_v23, 0.0 }
 0x12a   : > { %v4536_v26 = vsub.f32 %v758_v10, %v783_v22  ;;  %796 = vadd.xlane.f32.xlu0 %v795_v27  ;;  %v801_v28 = vsel %vm762_vm2, %v792_v24, 0.0 }
 0x12b   : > { %v791_v29 = vmul.f32 %v786_v25, %v786_v25 }
 0x12c   : > { %v793_v30 = vmul.f32 %v4536_v26, %v4536_v26 }
 0x12d   : > { %v798_v32 = vsel %vm762_vm2, %v791_v29, 0.0 }
 0x12e   : > { %802 = vadd.xlane.f32.xlu0 %v801_v28  ;;  %799 = vadd.xlane.f32.xlu1 %v798_v32  ;;  %v804_v34 = vsel %vm762_vm2, %v793_v30, 0.0  ;;  %v863_v28 = vld [vmem:[%s5295_s24] sm:$0x3]  ;;  %s5300_s24 = scalar_lea.vmem %s5299_s28, %s4453_s18 }
 0x132   : > { %777 = vadd.xlane.f32.xlu0 %v776_v33  ;;  %805 = vadd.xlane.f32.xlu1 %v804_v34 }
 0x1b3   : > { %v797_v44 = vpop.xlane.xlu0 %796 }
 0x1b4   : > { %v810_v45 = vmul.f32 0.015625, %v797_v44 }
 0x1b6   : > { %v815_v46 = vadd.f32 1e-05, %v810_v45 }
 0x1b7   : > { %v800_v47 = vpop.xlane.xlu1 %799  ;;  %v803_v48 = vpop.xlane.xlu0 %802 }
 0x1b8   : > { %3913 = vrsqrt.f32 %v815_v46  ;;  %v811_v49 = vmul.f32 0.015625, %v800_v47  ;;  %v812_v50 = vmul.f32 0.015625, %v803_v48 }
 0x1ba   : > { %v816_v51 = vadd.f32 1e-05, %v811_v49  ;;  %v817_v52 = vadd.f32 1e-05, %v812_v50  ;;  %v4606_v49 = vsel %vm1109_vm5, 65535, %v4185_v40 }
 0x1bb   : > { %v806_v53 = vpop.xlane.xlu1 %805  ;;  %v778_v54 = vpop.xlane.xlu0 %777 }
 0x1bc   : > { %3915 = vrsqrt.f32 %v816_v51  ;;  %v813_v55 = vmul.f32 0.015625, %v806_v53  ;;  %v784_v56 = vmul.f32 0.015625, %v778_v54 }
 0x1bd   : > { %3917 = vrsqrt.f32 %v817_v52 }
 0x1be   : > { %v818_v57 = vadd.f32 1e-05, %v813_v55  ;;  %v789_v58 = vsub.f32 %v759_v31, %v784_v56 }
 0x1c0   : > { %3919 = vrsqrt.f32 %v818_v57  ;;  %v794_v59 = vmul.f32 %v789_v58, %v789_v58 }
 0x1c2   : > { %v807_v60 = vsel %vm775_vm3, %v794_v59, 0.0 }
 0x1c3   : > { %808 = vadd.xlane.f32.xlu1 %v807_v60 }
 0x1c5   : > { %v3914_v61 = vpop.eup %3913 }
 0x1c6   : > { %v825_v62 = vmul.f32 %v3914_v61, %v4528_v17 }
 0x1c8   : > { %v836_v2 = vmul.f32 %v3413_v63, %v825_v62 }
 0x1c9   : > { %v3916_v0 = vpop.eup %3915 }
 0x1ca   : > { %v826_v1 = vmul.f32 %v3916_v0, %v786_v25  ;;  %v3918_v3 = vpop.eup %3917  ;;  %v847_v7 = vadd.f32 %v3414_v4, %v836_v2  ;;  %v865_v25 = vlaneseq }
 0x1cb   : > { %v827_v9 = vmul.f32 %v3918_v3, %v4530_v18 }
 0x1cc   : > { %v837_v5 = vmul.f32 %v3413_v63, %v826_v1 }
 0x1cd   : > { %v3920_v6 = vpop.eup %3919  ;;  %v838_v13 = vmul.f32 %v3413_v63, %v827_v9 }
 0x1ce   : > { %v848_v8 = vadd.f32 %v3414_v4, %v837_v5  ;;  %v828_v10 = vmul.f32 %v3920_v6, %v4536_v26  ;;  %v4573_v26 = vshrl.u32 %v865_v25, 7 }
 0x1cf   : > { %v849_v15 = vadd.f32 %v3414_v4, %v838_v13 }
 0x1d0   : > { %v852_v11 = vpack.c.bf16 %v848_v8, %v847_v7  ;;  %v839_v12 = vmul.f32 %v3413_v63, %v828_v10  ;;  %v867_v27 = vsub.s32 0, %v4573_v26  ;;  %v871_v34 = vsub.s32 1, %v4573_v26 }
 0x1d2   : > { %3423 = vmatmul.mubr.msk.bf16.vlgmr.msra.gmra.mxu0 %vm762_vm2, %v852_v11  ;;  %v850_v14 = vadd.f32 %v3414_v4, %v839_v12  ;;  %v4583_v29 = vrot.slane %v863_v28, %v867_v27  ;;  %v4592_v42 = vrot.slane %v863_v28, %v871_v34 }
 0x1d3   : > { %966 = vmatprep.mubr.bf16.mxu0 %v4185_v40 }
 0x1d4   : > { %v853_v16 = vpack.c.bf16 %v850_v14, %v849_v15 }
 0x1da   : > { %3424 = vmatmul.mubr.msk.bf16.gmra.mxu0 %vm762_vm2, %v853_v16 }
 0x1db   : > { %976 = vmatprep.mubr.bf16.mxu0 %v4185_v40 }
 0x24c   : > { %v809_v17 = vpop.xlane.xlu1 %808 }
 0x24d   : > { %v814_v19 = vmul.f32 0.015625, %v809_v17 }
 0x24f   : > { %v819_v18 = vadd.f32 1e-05, %v814_v19 }
 0x251   : > { %3921 = vrsqrt.f32 %v819_v18 }
 0x25e   : > { %v3922_v20 = vpop.eup %3921 }
 0x25f   : > { %v829_v21 = vmul.f32 %v3922_v20, %v789_v58 }
 0x261   : > { %v840_v22 = vmul.f32 %v3413_v63, %v829_v21 }
 0x263   : > { %v851_v23 = vadd.f32 %v3414_v4, %v840_v22 }
 0x265   : > { %v854_v24 = vpack.c.bf16 %v851_v23, %v851_v23 }
 0x267   : > { %3425 = vmatmul.mubr.msk.bf16.gmra.mxu0 %vm762_vm2, %v854_v24 }
 0x292   : > { %v958_v30 = vpop.f32.mrf.mxu0 }
 0x293   : > { %v959_v32 = vadd.f32 %v958_v30, %v4583_v29 }
 0x294   : > { %v960_v31 = vpop.f32.mrf.mxu0 }
 0x295   : > { %v985_v37 = vmul.f32 0.25, %v959_v32  ;;  %v961_v53 = vadd.f32 %v960_v31, %v4592_v42 }
 0x296   : > { %v962_v33 = vpop.f32.mrf.mxu0 }
 0x297   : > { %v963_v35 = vadd.f32 %v962_v33, %v4583_v29 }
 0x298   : > { %v964_v36 = vpop.f32.mrf.mxu0 }
 0x299   : > { %v986_v38 = vmul.f32 0.25, %v963_v35  ;;  %v4588_v39 = vpack.c.bf16 %v963_v35, %v959_v32  ;;  %v965_v50 = vadd.f32 %v964_v36, %v4592_v42 }
 0x29a   : > { %v968_v41 = vpop.f32.mrf.mxu0 }
 0x29b   : > { %v4594_v43 = vpack.c.bf16 %v986_v38, %v985_v37  ;;  %v969_v44 = vadd.f32 %v968_v41, %v4583_v29  ;;  %998 = vrot.lane.b32.xlu1 %v4588_v39, %s4186_s13  ;;  %v4619_v58 = vpack.c.bf16 %v965_v50, %v961_v53 }
 0x29c   : > { %v970_v45 = vpop.f32.mrf.mxu0 }
 0x29d   : > { %v4599_v46 = vpack.c.bf16 %v969_v44, %v969_v44  ;;  %v971_v47 = vadd.f32 %v970_v45, %v4592_v42  ;;  %3615 = vmatprep.mubr.msk.bf16.mxu0 %vm1002_vm4, %v4594_v43  ;;  %v987_v54 = vmul.f32 0.25, %v969_v44 }
 0x29e   : > { %v972_v48 = vpop.f32.mrf.mxu0 }
 0x29f   : > { %v4609_v51 = vpack.c.bf16 %v971_v47, %v971_v47  ;;  %v973_v52 = vadd.f32 %v972_v48, %v4583_v29  ;;  %1000 = vrot.lane.b32.xlu0 %v4599_v46, %s4186_s13  ;;  %1171 = vrot.lane.b32.xlu1 %v4599_v46, %s4187_s30  ;;  %v4626_v60 = vpack.c.bf16 %v987_v54, %v987_v54 }
 0x2a0   : > { %v974_v2 = vpop.f32.mrf.mxu0 }
 0x2a1   : > { %v988_v55 = vmul.f32 0.25, %v973_v52  ;;  %v1726_v56 = vpack.c.bf16 %v973_v52, %v969_v44  ;;  %v1113_v57 = vand.u32 %v4606_v49, %v4609_v51  ;;  %v975_v3 = vadd.f32 %v974_v2, %v4592_v42 }
 0x2a3   : > { %v1724_v59 = vpack.c.bf16 %v988_v55, %v987_v54  ;;  %3619 = vmatprep.subr.bf16.mxu1 %v1113_v57  ;;  %1165 = vrot.lane.b32.xlu0 %v4594_v43, %s4188_s8  ;;  %v1728_v7 = vpack.c.bf16 %v975_v3, %v971_v47  ;;  %v1748_v8 = vshll.u32 %v1726_v56, 16  ;;  %v1746_v20 = vshrl.u32 %v1726_v56, 16 }
 0x2a4   : > { %1169 = vrot.lane.b32.xlu1 %v4588_v39, %s4187_s30  ;;  %3620 = vmatpush3.bf16.msra.mxu1 %v1113_v57 }
 0x2a5   : > { %3621 = vmatprep.subr.bf16.mxu1 %v4619_v58  ;;  %v1734_v9 = vshll.u32 %v1724_v59, 16  ;;  %v1864_v11 = vshll.u32 %v1728_v7, 16  ;;  %v1750_v13 = vrot.slane %v1748_v8, 1  ;;  %v1732_v28 = vshrl.u32 %v1724_v59, 16 }
 0x2a7   : > { %v1736_v18 = vrot.slane %v1734_v9, 1  ;;  %v1866_v22 = vrot.slane %v1864_v11, 1  ;;  %v1751_v31 = vor.u32 %v1750_v13, %v1746_v20 }
 0x2a8   : > { %1167 = vrot.lane.b32.xlu1 %v4626_v60, %s4188_s8  ;;  %3622 = vmatpush3.bf16.msra.mxu1 %v4619_v58 }
 0x2a9   : > { %v1737_v36 = vor.u32 %v1736_v18, %v1732_v28 }
 0x30d   : > { %v999_v63 = vpop.permute.xlu1 %998 }
 0x30e   : > { %v1010_v0 = vsel %vm1002_vm4, %v999_v63, 0 }
 0x311   : > { %v1001_v61 = vpop.permute.xlu0 %1000  ;;  %v1172_v1 = vpop.permute.xlu1 %1171 }
 0x312   : > { %3759 = vmatprep.subr.msk.bf16.mxu0 %vm1002_vm4, %v1001_v61  ;;  %v1013_v62 = vsel %vm1002_vm4, %v1001_v61, 0  ;;  %v1183_v5 = vsel %vm1002_vm4, %v1172_v1, 0 }
 0x313   : > { %3612 = vmatpush3.bf16.xpose.msra.mxu0 %v1013_v62 }
 0x314   : > { %3760 = vmatprep.subr.msk.bf16.mxu0 %vm1002_vm4, %v999_v63 }
 0x315   : > { %v1166_v4 = vpop.permute.xlu0 %1165 }
 0x316   : > { %v1170_v6 = vpop.permute.xlu1 %1169 }
 0x317   : > { %v1180_v19 = vsel %vm1002_vm4, %v1170_v6, 0 }
 0x31a   : > { %v1168_v44 = vpop.permute.xlu1 %1167 }
 0x31b   : > { %3614 = vmatpush3.bf16.xpose.msra.mxu0 %v1010_v0 }
 0x31c   : > { %3761 = vmatprep.subr.msk.bf16.mxu0 %vm1002_vm4, %v1172_v1 }
 0x322   : > { %3616 = vmatmul.mubr.msk.bf16.vlgmr.msra.gmra.mxu0 %vm1002_vm4, %v4626_v60 }
 0x323   : > { %3628 = vmatpush3.bf16.xpose.msra.mxu0 %v1183_v5  ;;  %3631 = vmatprep.mubr.msk.bf16.mxu0 %vm1002_vm4, %v1166_v4 }
 0x324   : > { %3762 = vmatprep.subr.msk.bf16.mxu0 %vm1002_vm4, %v1170_v6 }
 0x327   : > { %v978_v10 = vpop.f32.mrf.mxu0 }
 0x328   : > { %v979_v12 = vadd.f32 %v978_v10, %v4583_v29  ;;  %v1862_v29 = vshrl.u32 %v1728_v7, 16 }
 0x329   : > { %v980_v14 = vpop.f32.mrf.mxu0 }
 0x32a   : > { %v989_v15 = vmul.f32 0.25, %v979_v12  ;;  %v4643_v16 = vpack.c.bf16 %v979_v12, %v979_v12  ;;  %v981_v17 = vadd.f32 %v980_v14, %v4592_v42  ;;  %v1867_v37 = vor.u32 %v1866_v22, %v1862_v29 }
 0x32b   : > { %3630 = vmatpush3.bf16.xpose.msra.mxu0 %v1180_v19  ;;  %v982_v21 = vpop.f32.mrf.mxu0 }
 0x32c   : > { %v4647_v23 = vpack.c.bf16 %v989_v15, %v989_v15  ;;  %v1753_v24 = vshll.u32 %v4643_v16, 16  ;;  %v4650_v25 = vpack.c.bf16 %v981_v17, %v981_v17 }
 0x32d   : > { %v983_v30 = vpop.f32.mrf.mxu0 }
 0x32e   : > { %v1739_v32 = vshll.u32 %v4647_v23, 16  ;;  %v1755_v33 = vrot.slane %v1753_v24, 1  ;;  %v1869_v35 = vshll.u32 %v4650_v25, 16 }
 0x330   : > { %v1741_v38 = vrot.slane %v1739_v32, 1  ;;  %v1871_v41 = vrot.slane %v1869_v35, 1  ;;  %v4654_v42 = vsel %vm1730_vm6, %v1751_v31, %v1755_v33 }
 0x332   : > { %3632 = vmatmul.mubr.msk.bf16.vlgmr.msra.gmra.mxu0 %vm1002_vm4, %v1168_v44  ;;  %v4657_v45 = vsel %vm1730_vm6, %v1867_v37, %v1871_v41  ;;  %v4659_v47 = vsel %vm1730_vm6, %v1737_v36, %v1741_v38 }
 0x3e2   : > { %v3617_v48 = vpop.f32.mrf.mxu0 }
 0x3e3   : > { %v1071_v55 = vsel %vm1070_vm8, %v3617_v48, -inf }
 0x3e4   : > { %v1049_v50 = vpop.f32.mrf.mxu0 }
 0x3e5   : > { %v1064_v52 = vsel %vm1063_vm7, %v1049_v50, -inf }
 0x3e6   : > { %1065 = vmax.xlane.f32.xlu0 %v1064_v52  ;;  %v3618_v53 = vpop.f32.mrf.mxu0 }
 0x3e8   : > { %v1052_v54 = vpop.f32.mrf.mxu0 }
 0x3e9   : > { %v1067_v56 = vsel %vm1063_vm7, %v1052_v54, -inf }
 0x3ea   : > { %1072 = vmax.xlane.f32.xlu0 %v1071_v55  ;;  %1068 = vmax.xlane.f32.xlu1 %v1067_v56 }
 0x3f2   : > { %v3633_v57 = vpop.f32.mrf.mxu0 }
 0x3f3   : > { %v1239_v59 = vsel %vm1070_vm8, %v3633_v57, -inf }
 0x3f4   : > { %1240 = vmax.xlane.f32.xlu1 %v1239_v59  ;;  %v1219_v61 = vpop.f32.mrf.mxu0 }
 0x3f5   : > { %v1233_v62 = vsel %vm1063_vm7, %v1219_v61, -inf }
 0x3f6   : > { %1234 = vmax.xlane.f32.xlu0 %v1233_v62  ;;  %v3634_v63 = vpop.f32.mrf.mxu0 }
 0x3f8   : > { %v1222_v0 = vpop.f32.mrf.mxu0 }
 0x3f9   : > { %v1236_v1 = vsel %vm1063_vm7, %v1222_v0, -inf }
 0x3fa   : > { %1237 = vmax.xlane.f32.xlu0 %v1236_v1 }
 0x46f   : > { %v1066_v2 = vpop.xlane.xlu0 %1065 }
 0x470   : > { %v1074_v3 = vsub.f32 %v1049_v50, %v1066_v2 }
 0x472   : > { %v1077_v10 = vmul.f32 1.442695, %v1074_v3 }
 0x473   : > { %v1069_v4 = vpop.xlane.xlu1 %1068  ;;  %v1073_v5 = vpop.xlane.xlu0 %1072 }
 0x474   : > { %v1075_v6 = vsub.f32 %v1052_v54, %v1069_v4  ;;  %v1076_v7 = vsub.f32 %v3617_v48, %v1073_v5 }
 0x476   : > { %v1079_v8 = vmul.f32 1.442695, %v1075_v6  ;;  %v1081_v9 = vmul.f32 1.442695, %v1076_v7 }
 0x478   : > { %3923 = vpow2.f32 %v1079_v8 }
 0x479   : > { %3925 = vpow2.f32 %v1081_v9 }
 0x47a   : > { %3927 = vpow2.f32 %v1077_v10 }
 0x47d   : > { %v1241_v11 = vpop.xlane.xlu1 %1240 }
 0x47e   : > { %v1244_v12 = vsub.f32 %v3633_v57, %v1241_v11 }
 0x47f   : > { %v1235_v13 = vpop.xlane.xlu0 %1234 }
 0x480   : > { %v1249_v14 = vmul.f32 1.442695, %v1244_v12  ;;  %v1242_v15 = vsub.f32 %v1219_v61, %v1235_v13 }
 0x482   : > { %3929 = vpow2.f32 %v1249_v14  ;;  %v1245_v17 = vmul.f32 1.442695, %v1242_v15 }
 0x483   : > { %v1238_v19 = vpop.xlane.xlu0 %1237 }
 0x484   : > { %3931 = vpow2.f32 %v1245_v17  ;;  %v1243_v18 = vsub.f32 %v1222_v0, %v1238_v19 }
 0x485   : > { %v3924_v20 = vpop.eup %3923 }
 0x486   : > { %v3926_v21 = vpop.eup %3925  ;;  %v1247_v22 = vmul.f32 1.442695, %v1243_v18  ;;  %v1086_v24 = vsel %vm1063_vm7, %v3924_v20, 0.0 }
 0x487   : > { %1087 = vadd.xlane.f32.xlu1 %v1086_v24  ;;  %v1089_v28 = vsel %vm1070_vm8, %v3926_v21, 0.0  ;;  %v3928_v29 = vpop.eup %3927 }
 0x488   : > { %3933 = vpow2.f32 %v1247_v22  ;;  %1090 = vadd.xlane.f32.xlu0 %v1089_v28  ;;  %v1083_v30 = vsel %vm1063_vm7, %v3928_v29, 0.0 }
 0x48c   : > { %1084 = vadd.xlane.f32.xlu0 %v1083_v30 }
 0x48f   : > { %v3930_v31 = vpop.eup %3929 }
 0x490   : > { %v1257_v32 = vsel %vm1070_vm8, %v3930_v31, 0.0 }
 0x491   : > { %v3932_v33 = vpop.eup %3931  ;;  %1258 = vadd.xlane.f32.xlu1 %v1257_v32 }
 0x492   : > { %v1251_v35 = vsel %vm1063_vm7, %v3932_v33, 0.0 }
 0x495   : > { %v3934_v36 = vpop.eup %3933  ;;  %1252 = vadd.xlane.f32.xlu1 %v1251_v35 }
 0x496   : > { %v1254_v37 = vsel %vm1063_vm7, %v3934_v36, 0.0 }
 0x497   : > { %1255 = vadd.xlane.f32.xlu0 %v1254_v37 }
 0x4a6   : > { %1273 = vrot.lane.b32.xlu1 %v4619_v58, %s4188_s8 }
 0x4aa   : > { %1341 = vrot.lane.b32.xlu1 %v4599_v46, %s4189_s3 }
 0x4ad   : > { %1275 = vrot.lane.b32.xlu0 %v4609_v51, %s4188_s8 }
 0x4ae   : > { %1339 = vrot.lane.b32.xlu1 %v4588_v39, %s4189_s3 }
 0x4b1   : > { %1335 = vrot.lane.b32.xlu0 %v4594_v43, %s4190_s5 }
 0x4b2   : > { %1337 = vrot.lane.b32.xlu1 %v4626_v60, %s4190_s5 }
 0x510   : > { %v1088_v38 = vpop.xlane.xlu1 %1087 }
 0x511   : > { %v1091_v41 = vpop.xlane.xlu0 %1090 }
 0x512   : > { %3935 = vrcp.f32 %v1091_v41 }
 0x513   : > { %3937 = vrcp.f32 %v1088_v38 }
 0x515   : > { %v1085_v44 = vpop.xlane.xlu0 %1084 }
 0x516   : > { %3939 = vrcp.f32 %v1085_v44 }
 0x51a   : > { %v1259_v48 = vpop.xlane.xlu1 %1258 }
 0x51b   : > { %3941 = vrcp.f32 %v1259_v48 }
 0x51e   : > { %v1253_v50 = vpop.xlane.xlu1 %1252 }
 0x51f   : > { %3943 = vrcp.f32 %v1253_v50  ;;  %v3936_v52 = vpop.eup %3935 }
 0x520   : > { %v1256_v53 = vpop.xlane.xlu0 %1255  ;;  %v3938_v54 = vpop.eup %3937  ;;  %v1097_v56 = vmul.f32 %v3936_v52, %v3926_v21 }
 0x521   : > { %3945 = vrcp.f32 %v1256_v53  ;;  %v1096_v61 = vmul.f32 %v3938_v54, %v3924_v20 }
 0x522   : > { %v1102_v0 = vpack.c.bf16 %v1097_v56, %v1097_v56  ;;  %v1274_v2 = vpop.permute.xlu1 %1273 }
 0x523   : > { %v3940_v55 = vpop.eup %3939 }
 0x524   : > { %v1276_v57 = vpop.permute.xlu0 %1275  ;;  %v1095_v59 = vmul.f32 %v3940_v55, %v3928_v29 }
 0x525   : > { %v1285_v62 = vand.u32 %v1276_v57, %v4606_v49 }
 0x526   : > { %v1101_v63 = vpack.c.bf16 %v1096_v61, %v1095_v59  ;;  %v1342_v8 = vpop.permute.xlu1 %1341 }
 0x527   : > { %3635 = vmatprep.subr.bf16.mxu1 %v1285_v62  ;;  %v1353_v14 = vsel %vm1002_vm4, %v1342_v8, 0 }
 0x528   : > { %v3942_v1 = vpop.eup %3941  ;;  %3623 = vmatprep.mubr.msk.bf16.mxu1 %vm1063_vm7, %v1101_v63  ;;  %v1336_v15 = vpop.permute.xlu0 %1335 }
 0x529   : > { %3624 = vmatmul.mubr.msk.bf16.vlgmr.msra.gmra.mxu1 %vm1063_vm7, %v1102_v0  ;;  %v1265_v3 = vmul.f32 %v3942_v1, %v3930_v31 }
 0x52a   : > { %3636 = vmatpush3.bf16.msra.mxu1 %v1285_v62  ;;  %v1340_v17 = vpop.permute.xlu1 %1339 }
 0x52b   : > { %v4688_v4 = vadd.f32 %v1265_v3, %v1097_v56  ;;  %3637 = vmatprep.subr.bf16.mxu1 %v1274_v2  ;;  %v1270_v13 = vpack.c.bf16 %v1265_v3, %v1265_v3  ;;  %v1350_v19 = vsel %vm1002_vm4, %v1340_v17, 0 }
 0x52c   : > { %v3944_v5 = vpop.eup %3943 }
 0x52d   : > { %v1263_v6 = vmul.f32 %v3944_v5, %v3932_v33 }
 0x52e   : > { %v3946_v7 = vpop.eup %3945  ;;  %3638 = vmatpush3.bf16.msra.mxu1 %v1274_v2  ;;  %v1338_v18 = vpop.permute.xlu1 %1337 }
 0x52f   : > { %v1264_v9 = vmul.f32 %v3946_v7, %v3934_v36  ;;  %v4690_v10 = vadd.f32 %v1263_v6, %v1095_v59  ;;  %3763 = vmatprep.subr.msk.bf16.mxu1 %vm1002_vm4, %v1342_v8 }
 0x531   : > { %v4693_v11 = vadd.f32 %v1264_v9, %v1096_v61  ;;  %v1269_v12 = vpack.c.bf16 %v1264_v9, %v1263_v6 }
 0x533   : > { %3639 = vmatprep.mubr.msk.bf16.mxu1 %vm1063_vm7, %v1269_v12 }
 0x534   : > { %3640 = vmatmul.mubr.msk.bf16.vlgmr.msra.gmra.mxu1 %vm1063_vm7, %v1270_v13 }
 0x535   : > { %3644 = vmatpush3.bf16.xpose.msra.mxu1 %v1353_v14  ;;  %3647 = vmatprep.mubr.msk.bf16.mxu1 %vm1002_vm4, %v1336_v15 }
 0x536   : > { %3764 = vmatprep.subr.msk.bf16.mxu1 %vm1002_vm4, %v1340_v17 }
 0x53d   : > { %3646 = vmatpush3.bf16.xpose.msra.mxu1 %v1350_v19 }
 0x544   : > { %3648 = vmatmul.mubr.msk.bf16.vlgmr.msra.gmra.mxu1 %vm1002_vm4, %v1338_v18 }
 0x5e9   : > { %v4702_v20 = vpop.f32.mrf.mxu1 }
 0x5eb   : > { %v4704_v21 = vpop.f32.mrf.mxu1 }
 0x5ed   : > { %v3626_v22 = vpop.f32.mrf.mxu1 }
 0x5ef   : > { %v4706_v24 = vpop.f32.mrf.mxu1 }
 0x5f4   : > { %v4708_v28 = vpop.f32.mrf.mxu1 }
 0x5f6   : > { %v4710_v29 = vpop.f32.mrf.mxu1 }
 0x5f8   : > { %v3642_v30 = vpop.f32.mrf.mxu1 }
 0x5fa   : > { %v4712_v31 = vpop.f32.mrf.mxu1 }
 0x5fb   : > { %v3839_v32 = vpack.i.bf16 %v4712_v31, %v4710_v29 }
 0x604   : > { %v3649_v33 = vpop.f32.mrf.mxu1 }
 0x605   : > { %v1409_v41 = vsel %vm1070_vm8, %v3649_v33, -inf }
 0x606   : > { %v1389_v35 = vpop.f32.mrf.mxu1 }
 0x607   : > { %v1403_v36 = vsel %vm1063_vm7, %v1389_v35, -inf }
 0x608   : > { %1404 = vmax.xlane.f32.xlu0 %v1403_v36  ;;  %v3650_v37 = vpop.f32.mrf.mxu1 }
 0x60a   : > { %v1392_v38 = vpop.f32.mrf.mxu1 }
 0x60b   : > { %v1406_v44 = vsel %vm1063_vm7, %v1392_v38, -inf }
 0x60c   : > { %1410 = vmax.xlane.f32.xlu0 %v1409_v41  ;;  %1407 = vmax.xlane.f32.xlu1 %v1406_v44 }
 0x691   : > { %v1405_v48 = vpop.xlane.xlu0 %1404 }
 0x692   : > { %v1412_v50 = vsub.f32 %v1389_v35, %v1405_v48 }
 0x694   : > { %v1415_v52 = vmul.f32 1.442695, %v1412_v50 }
 0x695   : > { %v1411_v53 = vpop.xlane.xlu0 %1410  ;;  %v1408_v54 = vpop.xlane.xlu1 %1407 }
 0x696   : > { %3947 = vpow2.f32 %v1415_v52  ;;  %v1414_v55 = vsub.f32 %v3649_v33, %v1411_v53  ;;  %v1413_v56 = vsub.f32 %v1392_v38, %v1408_v54 }
 0x698   : > { %v1419_v57 = vmul.f32 1.442695, %v1414_v55  ;;  %v1417_v59 = vmul.f32 1.442695, %v1413_v56 }
 0x69a   : > { %3949 = vpow2.f32 %v1419_v57 }
 0x69b   : > { %3951 = vpow2.f32 %v1417_v59 }
 0x6a3   : > { %v3948_v61 = vpop.eup %3947 }
 0x6a4   : > { %v1421_v62 = vsel %vm1063_vm7, %v3948_v61, 0.0 }
 0x6a5   : > { %1422 = vadd.xlane.f32.xlu0 %v1421_v62 }
 0x6a7   : > { %v3950_v63 = vpop.eup %3949 }
 0x6a8   : > { %v3952_v0 = vpop.eup %3951  ;;  %v1427_v1 = vsel %vm1070_vm8, %v3950_v63, 0.0 }
 0x6a9   : > { %1428 = vadd.xlane.f32.xlu1 %v1427_v1  ;;  %v1424_v2 = vsel %vm1063_vm7, %v3952_v0, 0.0 }
 0x6aa   : > { %1425 = vadd.xlane.f32.xlu0 %v1424_v2 }
 0x6ba   : > { %1441 = vrot.lane.b32.xlu1 %v4619_v58, %s4190_s5 }
 0x6be   : > { %1509 = vrot.lane.b32.xlu1 %v4599_v46, %s4191_s12 }
 0x6c0   : > { %1443 = vrot.lane.b32.xlu0 %v4609_v51, %s4190_s5 }
 0x6c2   : > { %1507 = vrot.lane.b32.xlu1 %v4588_v39, %s4191_s12 }
 0x6c4   : > { %1503 = vrot.lane.b32.xlu0 %v4594_v43, %s4192_s16 }
 0x6c6   : > { %1505 = vrot.lane.b32.xlu1 %v4626_v60, %s4192_s16 }
 0x72e   : > { %v1423_v3 = vpop.xlane.xlu0 %1422 }
 0x72f   : > { %3953 = vrcp.f32 %v1423_v3 }
 0x732   : > { %v1429_v5 = vpop.xlane.xlu1 %1428 }
 0x733   : > { %v1426_v6 = vpop.xlane.xlu0 %1425  ;;  %3955 = vrcp.f32 %v1429_v5 }
 0x734   : > { %3957 = vrcp.f32 %v1426_v6 }
 0x736   : > { %v1442_v8 = vpop.permute.xlu1 %1441 }
 0x737   : > { %v1444_v46 = vpop.permute.xlu0 %1443 }
 0x738   : > { %v1453_v7 = vand.u32 %v1444_v46, %v4606_v49 }
 0x73a   : > { %3651 = vmatprep.subr.bf16.mxu0 %v1453_v7  ;;  %v1510_v12 = vpop.permute.xlu1 %1509 }
 0x73b   : > { %3652 = vmatpush3.bf16.msra.mxu0 %v1453_v7  ;;  %v1504_v30 = vpop.permute.xlu0 %1503 }
 0x73c   : > { %v3954_v39 = vpop.eup %3953  ;;  %3653 = vmatprep.subr.bf16.mxu0 %v1442_v8 }
 0x73d   : > { %v1433_v9 = vmul.f32 %v3954_v39, %v3948_v61 }
 0x73e   : > { %v1508_v33 = vpop.permute.xlu1 %1507 }
 0x73f   : > { %3654 = vmatpush3.bf16.msra.mxu0 %v1442_v8  ;;  %v4736_v43 = vadd.f32 %v1433_v9, %v4690_v10  ;;  %v1521_v10 = vsel %vm1002_vm4, %v1510_v12, 0 }
 0x740   : > { %v3956_v60 = vpop.eup %3955  ;;  %3765 = vmatprep.subr.msk.bf16.mxu0 %vm1002_vm4, %v1510_v12 }
 0x741   : > { %v3958_v13 = vpop.eup %3957  ;;  %v1435_v14 = vmul.f32 %v3956_v60, %v3950_v63 }
 0x742   : > { %v1434_v15 = vmul.f32 %v3958_v13, %v3952_v0  ;;  %v1506_v36 = vpop.permute.xlu1 %1505 }
 0x743   : > { %v4740_v17 = vadd.f32 %v1435_v14, %v4688_v4  ;;  %v1440_v19 = vpack.c.bf16 %v1435_v14, %v1435_v14  ;;  %v4751_v4 = vshrl.u32 %v4650_v25, 16 }
 0x744   : > { %v4743_v18 = vadd.f32 %v1434_v15, %v4693_v11  ;;  %v1439_v22 = vpack.c.bf16 %v1434_v15, %v1433_v9  ;;  %v1518_v11 = vsel %vm1002_vm4, %v1508_v33, 0  ;;  %v4776_v9 = vshrl.u32 %v4643_v16, 16 }
 0x745   : > { %v1883_v35 = vand.u32 %v4751_v4, %v4606_v49 }
 0x746   : > { %3655 = vmatprep.mubr.msk.bf16.mxu0 %vm1063_vm7, %v1439_v22 }
 0x747   : > { %3656 = vmatmul.mubr.msk.bf16.vlgmr.msra.gmra.mxu0 %vm1063_vm7, %v1440_v19 }
 0x748   : > { %3660 = vmatpush3.bf16.xpose.msra.mxu0 %v1521_v10  ;;  %3663 = vmatprep.mubr.msk.bf16.mxu0 %vm1002_vm4, %v1504_v30 }
 0x749   : > { %3766 = vmatprep.subr.msk.bf16.mxu0 %vm1002_vm4, %v1508_v33 }
 0x750   : > { %3662 = vmatpush3.bf16.xpose.msra.mxu0 %v1518_v11 }
 0x751   : > { %3683 = vmatprep.subr.bf16.mxu0 %v1883_v35 }
 0x757   : > { %3664 = vmatmul.mubr.msk.bf16.vlgmr.msra.gmra.mxu0 %vm1002_vm4, %v1506_v36 }
 0x758   : > { %3684 = vmatpush3.bf16.msra.mxu0 %v1883_v35 }
 0x759   : > { %3685 = vmatprep.subr.bf16.mxu0 %v4657_v45 }
 0x75c   : > { %3686 = vmatpush3.bf16.msra.mxu0 %v4657_v45 }
 0x807   : > { %v4759_v37 = vpop.f32.mrf.mxu0 }
 0x809   : > { %v4761_v38 = vpop.f32.mrf.mxu0 }
 0x80b   : > { %v3658_v25 = vpop.f32.mrf.mxu0 }
 0x80d   : > { %v4763_v41 = vpop.f32.mrf.mxu0 }
 0x80e   : > { %v3844_v44 = vpack.i.bf16 %v4763_v41, %v4761_v38 }
 0x817   : > { %v3665_v48 = vpop.f32.mrf.mxu0 }
 0x818   : > { %v1577_v55 = vsel %vm1070_vm8, %v3665_v48, -inf }
 0x819   : > { %v1557_v50 = vpop.f32.mrf.mxu0 }
 0x81a   : > { %v1571_v52 = vsel %vm1063_vm7, %v1557_v50, -inf }
 0x81b   : > { %1572 = vmax.xlane.f32.xlu0 %v1571_v52  ;;  %v3666_v53 = vpop.f32.mrf.mxu0 }
 0x81d   : > { %v1560_v54 = vpop.f32.mrf.mxu0 }
 0x81e   : > { %v1574_v56 = vsel %vm1063_vm7, %v1560_v54, -inf }
 0x81f   : > { %1578 = vmax.xlane.f32.xlu0 %v1577_v55  ;;  %1575 = vmax.xlane.f32.xlu1 %v1574_v56 }
 0x8a4   : > { %v1573_v57 = vpop.xlane.xlu0 %1572 }
 0x8a5   : > { %v1580_v59 = vsub.f32 %v1557_v50, %v1573_v57 }
 0x8a7   : > { %v1583_v61 = vmul.f32 1.442695, %v1580_v59 }
 0x8a8   : > { %v1579_v62 = vpop.xlane.xlu0 %1578  ;;  %v1576_v63 = vpop.xlane.xlu1 %1575 }
 0x8a9   : > { %3959 = vpow2.f32 %v1583_v61  ;;  %v1582_v0 = vsub.f32 %v3665_v48, %v1579_v62  ;;  %v1581_v1 = vsub.f32 %v1560_v54, %v1576_v63 }
 0x8ab   : > { %v1587_v2 = vmul.f32 1.442695, %v1582_v0  ;;  %v1585_v3 = vmul.f32 1.442695, %v1581_v1 }
 0x8ad   : > { %3961 = vpow2.f32 %v1587_v2 }
 0x8ae   : > { %3963 = vpow2.f32 %v1585_v3 }
 0x8b6   : > { %v3960_v5 = vpop.eup %3959 }
 0x8b7   : > { %v1589_v6 = vsel %vm1063_vm7, %v3960_v5, 0.0 }
 0x8b8   : > { %1590 = vadd.xlane.f32.xlu0 %v1589_v6 }
 0x8ba   : > { %v3962_v46 = vpop.eup %3961 }
 0x8bb   : > { %v3964_v7 = vpop.eup %3963  ;;  %v1595_v8 = vsel %vm1070_vm8, %v3962_v46, 0.0 }
 0x8bc   : > { %1596 = vadd.xlane.f32.xlu1 %v1595_v8  ;;  %v1592_v39 = vsel %vm1063_vm7, %v3964_v7, 0.0 }
 0x8bd   : > { %1593 = vadd.xlane.f32.xlu0 %v1592_v39 }
 0x8cd   : > { %1609 = vrot.lane.b32.xlu1 %v4619_v58, %s4192_s16 }
 0x8d1   : > { %1761 = vrot.lane.b32.xlu1 %v4776_v9, %s4186_s13 }
 0x8d3   : > { %1611 = vrot.lane.b32.xlu0 %v4609_v51, %s4192_s16 }
 0x8d5   : > { %1759 = vrot.lane.b32.xlu1 %v4654_v42, %s4186_s13 }
 0x941   : > { %v1591_v12 = vpop.xlane.xlu0 %1590 }
 0x942   : > { %3965 = vrcp.f32 %v1591_v12 }
 0x945   : > { %v1597_v60 = vpop.xlane.xlu1 %1596 }
 0x946   : > { %v1594_v13 = vpop.xlane.xlu0 %1593  ;;  %3967 = vrcp.f32 %v1597_v60 }
 0x947   : > { %3969 = vrcp.f32 %v1594_v13 }
 0x949   : > { %v1610_v16 = vpop.permute.xlu1 %1609 }
 0x94a   : > { %v1612_v14 = vpop.permute.xlu0 %1611 }
 0x94b   : > { %v1621_v58 = vand.u32 %v1612_v14, %v4606_v49 }
 0x94d   : > { %3667 = vmatprep.subr.bf16.mxu1 %v1621_v58  ;;  %v1762_v51 = vpop.permute.xlu1 %1761 }
 0x94e   : > { %3668 = vmatpush3.bf16.msra.mxu1 %v1621_v58  ;;  %v1773_v53 = vsel %vm1002_vm4, %v1762_v51, 0 }
 0x94f   : > { %v3966_v15 = vpop.eup %3965  ;;  %3669 = vmatprep.subr.bf16.mxu1 %v1610_v16 }
 0x950   : > { %v1601_v19 = vmul.f32 %v3966_v15, %v3960_v5 }
 0x951   : > { %v1760_v54 = vpop.permute.xlu1 %1759 }
 0x952   : > { %3670 = vmatpush3.bf16.msra.mxu1 %v1610_v16  ;;  %v1604_v22 = vadd.f32 %v1601_v19, %v4736_v43 }
 0x953   : > { %v3968_v30 = vpop.eup %3967  ;;  %3767 = vmatprep.subr.msk.bf16.mxu1 %vm1002_vm4, %v1762_v51 }
 0x954   : > { %v3970_v10 = vpop.eup %3969  ;;  %v1718_v33 = vmul.f32 0.25, %v1604_v22  ;;  %v1603_v11 = vmul.f32 %v3968_v30, %v3962_v46 }
 0x955   : > { %v1602_v35 = vmul.f32 %v3970_v10, %v3964_v7 }
 0x956   : > { %1721 = vst.msk [vmem:[%s4504_s27] sm:$0xff] %vm1063_vm7, %v1718_v33  ;;  %v1606_v36 = vadd.f32 %v1603_v11, %v4740_v17  ;;  %v1608_v25 = vpack.c.bf16 %v1603_v11, %v1603_v11  ;;  %v1770_v17 = vsel %vm1002_vm4, %v1760_v54, 0 }
 0x957   : > { %v1605_v48 = vadd.f32 %v1602_v35, %v4743_v18  ;;  %v1607_v50 = vpack.c.bf16 %v1602_v35, %v1601_v19  ;;  %v4803_v18 = vshrl.u32 %v4647_v23, 16 }
 0x958   : > { %v1720_v52 = vmul.f32 0.25, %v1606_v36 }
 0x959   : > { %3671 = vmatprep.mubr.msk.bf16.mxu1 %vm1063_vm7, %v1607_v50  ;;  %v1719_v43 = vmul.f32 0.25, %v1605_v48 }
 0x95a   : > { %3672 = vmatmul.mubr.msk.bf16.vlgmr.msra.gmra.mxu1 %vm1063_vm7, %v1608_v25  ;;  %1723 = vst.msk [vmem:[%s4504_s27 + $0x10] sm:$0x1] %vm1070_vm8, %v1720_v52 }
 0x95b   : > { %1722 = vst.msk [vmem:[%s4504_s27 + $0x8] sm:$0xff] %vm1063_vm7, %v1719_v43  ;;  %3676 = vmatpush3.bf16.xpose.msra.mxu1 %v1773_v53  ;;  %3679 = vmatprep.mubr.msk.bf16.mxu1 %vm1002_vm4, %v4659_v47 }
 0x95c   : > { %3768 = vmatprep.subr.msk.bf16.mxu1 %vm1002_vm4, %v1760_v54 }
 0x963   : > { %3678 = vmatpush3.bf16.xpose.msra.mxu1 %v1770_v17 }
 0x96a   : > { %3680 = vmatmul.mubr.msk.bf16.vlgmr.msra.gmra.mxu1 %vm1002_vm4, %v4803_v18 }
 0xa1a   : > { %v4807_v55 = vpop.f32.mrf.mxu1 }
 0xa1c   : > { %v4809_v56 = vpop.f32.mrf.mxu1 }
 0xa1e   : > { %v3674_v57 = vpop.f32.mrf.mxu1 }
 0xa20   : > { %v4811_v59 = vpop.f32.mrf.mxu1 }
 0xa21   : > { %v3849_v61 = vpack.i.bf16 %v4811_v59, %v4809_v56  ;;  %v4193_v56 = vmov 0.0  }
 0xa2a   : > { %v3681_v62 = vpop.f32.mrf.mxu1 }
 0xa2b   : > { %v1829_v2 = vsel %vm1070_vm8, %v3681_v62, -inf }
 0xa2c   : > { %v1809_v63 = vpop.f32.mrf.mxu1 }
 0xa2d   : > { %v1823_v0 = vsel %vm1063_vm7, %v1809_v63, -inf }
 0xa2e   : > { %1824 = vmax.xlane.f32.xlu0 %v1823_v0  ;;  %v3682_v23 = vpop.f32.mrf.mxu1 }
 0xa30   : > { %v1812_v1 = vpop.f32.mrf.mxu1 }
 0xa31   : > { %v1826_v3 = vsel %vm1063_vm7, %v1812_v1, -inf }
 0xa32   : > { %1830 = vmax.xlane.f32.xlu0 %v1829_v2  ;;  %1827 = vmax.xlane.f32.xlu1 %v1826_v3 }
 0xab7   : > { %v1825_v5 = vpop.xlane.xlu0 %1824 }
 0xab8   : > { %v1832_v6 = vsub.f32 %v1809_v63, %v1825_v5 }
 0xaba   : > { %v1835_v46 = vmul.f32 1.442695, %v1832_v6 }
 0xabb   : > { %v1831_v7 = vpop.xlane.xlu0 %1830  ;;  %v1828_v8 = vpop.xlane.xlu1 %1827 }
 0xabc   : > { %3971 = vpow2.f32 %v1835_v46  ;;  %v1834_v39 = vsub.f32 %v3681_v62, %v1831_v7  ;;  %v1833_v12 = vsub.f32 %v1812_v1, %v1828_v8 }
 0xabe   : > { %v1839_v60 = vmul.f32 1.442695, %v1834_v39  ;;  %v1837_v13 = vmul.f32 1.442695, %v1833_v12 }
 0xac0   : > { %3973 = vpow2.f32 %v1839_v60 }
 0xac1   : > { %3975 = vpow2.f32 %v1837_v13 }
 0xac9   : > { %v3972_v14 = vpop.eup %3971 }
 0xaca   : > { %v1841_v58 = vsel %vm1063_vm7, %v3972_v14, 0.0 }
 0xacb   : > { %1842 = vadd.xlane.f32.xlu0 %v1841_v58 }
 0xacd   : > { %v3974_v16 = vpop.eup %3973 }
 0xace   : > { %v3976_v15 = vpop.eup %3975  ;;  %v1847_v19 = vsel %vm1070_vm8, %v3974_v16, 0.0 }
 0xacf   : > { %1848 = vadd.xlane.f32.xlu1 %v1847_v19  ;;  %v1844_v51 = vsel %vm1063_vm7, %v3976_v15, 0.0 }
 0xad0   : > { %1845 = vadd.xlane.f32.xlu0 %v1844_v51 }
 0xae0   : > { %1937 = vrot.lane.b32.xlu1 %v4654_v42, %s4187_s30 }
 0xae4   : > { %1933 = vrot.lane.b32.xlu1 %v4659_v47, %s4188_s8 }
 0xae6   : > { %1939 = vrot.lane.b32.xlu0 %v4776_v9, %s4187_s30 }
 0xae8   : > { %1935 = vrot.lane.b32.xlu1 %v4803_v18, %s4188_s8 }
 0xb54   : > { %v1843_v22 = vpop.xlane.xlu0 %1842 }
 0xb55   : > { %3977 = vrcp.f32 %v1843_v22 }
 0xb58   : > { %v1849_v30 = vpop.xlane.xlu1 %1848 }
 0xb59   : > { %v1846_v10 = vpop.xlane.xlu0 %1845  ;;  %3979 = vrcp.f32 %v1849_v30 }
 0xb5a   : > { %3981 = vrcp.f32 %v1846_v10 }
 0xb5c   : > { %v1938_v25 = vpop.permute.xlu1 %1937 }
 0xb5d   : > { %v1940_v33 = vpop.permute.xlu0 %1939  ;;  %v1948_v57 = vsel %vm1002_vm4, %v1938_v25, 0 }
 0xb5e   : > { %3769 = vmatprep.subr.msk.bf16.mxu0 %vm1002_vm4, %v1940_v33  ;;  %v1951_v54 = vsel %vm1002_vm4, %v1940_v33, 0 }
 0xb60   : > { %v1934_v17 = vpop.permute.xlu1 %1933 }
 0xb62   : > { %v3978_v11 = vpop.eup %3977 }
 0xb63   : > { %v4832_v50 = vmul.f32 %v3978_v11, %v3972_v14 }
 0xb64   : > { %v1936_v62 = vpop.permute.xlu1 %1935 }
 0xb66   : > { %v3980_v35 = vpop.eup %3979 }
 0xb67   : > { %v3982_v36 = vpop.eup %3981  ;;  %v4830_v48 = vmul.f32 %v3980_v35, %v3974_v16 }
 0xb68   : > { %v4834_v52 = vmul.f32 %v3982_v36, %v3976_v15 }
 0xb69   : > { %v1860_v43 = vpack.c.bf16 %v4830_v48, %v4830_v48 }
 0xb6a   : > { %v1859_v53 = vpack.c.bf16 %v4834_v52, %v4832_v50 }
 0xb6c   : > { %3687 = vmatprep.mubr.msk.bf16.mxu0 %vm1063_vm7, %v1859_v53 }
 0xb6d   : > { %3688 = vmatmul.mubr.msk.bf16.vlgmr.msra.gmra.mxu0 %vm1063_vm7, %v1860_v43 }
 0xb6e   : > { %3692 = vmatpush3.bf16.xpose.msra.mxu0 %v1951_v54  ;;  %3695 = vmatprep.mubr.msk.bf16.mxu0 %vm1002_vm4, %v1934_v17 }
 0xb6f   : > { %3770 = vmatprep.subr.msk.bf16.mxu0 %vm1002_vm4, %v1938_v25 }
 0xb76   : > { %3694 = vmatpush3.bf16.xpose.msra.mxu0 %v1948_v57 }
 0xb7d   : > { %3696 = vmatmul.mubr.msk.bf16.vlgmr.msra.gmra.mxu0 %vm1002_vm4, %v1936_v62 }
 0xc2d   : > { %v4847_v63 = vpop.f32.mrf.mxu0 }
 0xc2f   : > { %v4849_v0 = vpop.f32.mrf.mxu0 }
 0xc31   : > { %v3690_v23 = vpop.f32.mrf.mxu0 }
 0xc33   : > { %v4851_v1 = vpop.f32.mrf.mxu0 }
 0xc3d   : > { %v3697_v2 = vpop.f32.mrf.mxu0 }
 0xc3e   : > { %v2007_v7 = vsel %vm1070_vm8, %v3697_v2, -inf }
 0xc3f   : > { %v1987_v3 = vpop.f32.mrf.mxu0 }
 0xc40   : > { %v2001_v5 = vsel %vm1063_vm7, %v1987_v3, -inf }
 0xc41   : > { %2002 = vmax.xlane.f32.xlu0 %v2001_v5  ;;  %v3698_v6 = vpop.f32.mrf.mxu0 }
 0xc43   : > { %v1990_v46 = vpop.f32.mrf.mxu0 }
 0xc44   : > { %v2004_v8 = vsel %vm1063_vm7, %v1990_v46, -inf }
 0xc45   : > { %2008 = vmax.xlane.f32.xlu0 %v2007_v7  ;;  %2005 = vmax.xlane.f32.xlu1 %v2004_v8 }
 0xcca   : > { %v2003_v39 = vpop.xlane.xlu0 %2002 }
 0xccb   : > { %v2010_v12 = vsub.f32 %v1987_v3, %v2003_v39 }
 0xccd   : > { %v2013_v60 = vmul.f32 1.442695, %v2010_v12 }
 0xcce   : > { %v2009_v13 = vpop.xlane.xlu0 %2008  ;;  %v2006_v14 = vpop.xlane.xlu1 %2005 }
 0xccf   : > { %3983 = vpow2.f32 %v2013_v60  ;;  %v2012_v58 = vsub.f32 %v3697_v2, %v2009_v13  ;;  %v2011_v16 = vsub.f32 %v1990_v46, %v2006_v14 }
 0xcd1   : > { %v2017_v15 = vmul.f32 1.442695, %v2012_v58  ;;  %v2015_v19 = vmul.f32 1.442695, %v2011_v16 }
 0xcd3   : > { %3985 = vpow2.f32 %v2017_v15 }
 0xcd4   : > { %3987 = vpow2.f32 %v2015_v19 }
 0xcdc   : > { %v3984_v51 = vpop.eup %3983 }
 0xcdd   : > { %v2019_v22 = vsel %vm1063_vm7, %v3984_v51, 0.0 }
 0xcde   : > { %2020 = vadd.xlane.f32.xlu0 %v2019_v22 }
 0xce0   : > { %v3986_v30 = vpop.eup %3985 }
 0xce1   : > { %v3988_v10 = vpop.eup %3987  ;;  %v2025_v33 = vsel %vm1070_vm8, %v3986_v30, 0.0 }
 0xce2   : > { %2026 = vadd.xlane.f32.xlu1 %v2025_v33  ;;  %v2022_v11 = vsel %vm1063_vm7, %v3988_v10, 0.0 }
 0xce3   : > { %2023 = vadd.xlane.f32.xlu0 %v2022_v11 }
 0xcf3   : > { %2039 = vrot.lane.b32.xlu1 %v4657_v45, %s4188_s8 }
 0xcf7   : > { %2107 = vrot.lane.b32.xlu1 %v4776_v9, %s4189_s3 }
 0xcf9   : > { %2041 = vrot.lane.b32.xlu0 %v4751_v4, %s4188_s8 }
 0xcfb   : > { %2105 = vrot.lane.b32.xlu1 %v4654_v42, %s4189_s3 }
 0xcfd   : > { %2101 = vrot.lane.b32.xlu0 %v4659_v47, %s4190_s5 }
 0xcff   : > { %2103 = vrot.lane.b32.xlu1 %v4803_v18, %s4190_s5 }
 0xd67   : > { %v2021_v35 = vpop.xlane.xlu0 %2020 }
 0xd68   : > { %3989 = vrcp.f32 %v2021_v35 }
 0xd6b   : > { %v2027_v36 = vpop.xlane.xlu1 %2026 }
 0xd6c   : > { %v2024_v25 = vpop.xlane.xlu0 %2023  ;;  %3991 = vrcp.f32 %v2027_v36 }
 0xd6d   : > { %3993 = vrcp.f32 %v2024_v25 }
 0xd6f   : > { %v2040_v54 = vpop.permute.xlu1 %2039 }
 0xd70   : > { %v2042_v43 = vpop.permute.xlu0 %2041 }
 0xd71   : > { %v2051_v53 = vand.u32 %v2042_v43, %v4606_v49 }
 0xd73   : > { %3699 = vmatprep.subr.bf16.mxu1 %v2051_v53  ;;  %v2108_v57 = vpop.permute.xlu1 %2107 }
 0xd74   : > { %3700 = vmatpush3.bf16.msra.mxu1 %v2051_v53  ;;  %v2102_v7 = vpop.permute.xlu0 %2101  ;;  %v2119_v8 = vsel %vm1002_vm4, %v2108_v57, 0 }
 0xd75   : > { %3701 = vmatprep.subr.bf16.mxu1 %v2040_v54  ;;  %v3990_v17 = vpop.eup %3989 }
 0xd76   : > { %v4875_v3 = vmul.f32 %v3990_v17, %v3984_v51 }
 0xd77   : > { %v2106_v39 = vpop.permute.xlu1 %2105 }
 0xd78   : > { %3702 = vmatpush3.bf16.msra.mxu1 %v2040_v54  ;;  %v2116_v12 = vsel %vm1002_vm4, %v2106_v39, 0 }
 0xd79   : > { %v3992_v62 = vpop.eup %3991  ;;  %3771 = vmatprep.subr.msk.bf16.mxu1 %vm1002_vm4, %v2108_v57 }
 0xd7a   : > { %v3994_v23 = vpop.eup %3993  ;;  %v4873_v2 = vmul.f32 %v3992_v62, %v3986_v30 }
 0xd7b   : > { %v4877_v5 = vmul.f32 %v3994_v23, %v3988_v10  ;;  %v2104_v60 = vpop.permute.xlu1 %2103 }
 0xd7c   : > { %v2038_v6 = vpack.c.bf16 %v4873_v2, %v4873_v2 }
 0xd7d   : > { %v2037_v46 = vpack.c.bf16 %v4877_v5, %v4875_v3 }
 0xd7f   : > { %3703 = vmatprep.mubr.msk.bf16.mxu1 %vm1063_vm7, %v2037_v46 }
 0xd80   : > { %3704 = vmatmul.mubr.msk.bf16.vlgmr.msra.gmra.mxu1 %vm1063_vm7, %v2038_v6 }
 0xd81   : > { %3708 = vmatpush3.bf16.xpose.msra.mxu1 %v2119_v8  ;;  %3711 = vmatprep.mubr.msk.bf16.mxu1 %vm1002_vm4, %v2102_v7 }
 0xd82   : > { %3772 = vmatprep.subr.msk.bf16.mxu1 %vm1002_vm4, %v2106_v39 }
 0xd89   : > { %3710 = vmatpush3.bf16.xpose.msra.mxu1 %v2116_v12 }
 0xd90   : > { %3712 = vmatmul.mubr.msk.bf16.vlgmr.msra.gmra.mxu1 %vm1002_vm4, %v2104_v60 }
 0xe40   : > { %v4890_v13 = vpop.f32.mrf.mxu1 }
 0xe42   : > { %v4892_v14 = vpop.f32.mrf.mxu1 }
 0xe44   : > { %v3706_v58 = vpop.f32.mrf.mxu1 }
 0xe46   : > { %v4894_v16 = vpop.f32.mrf.mxu1 }
 0xe47   : > { %v3854_v15 = vpack.i.bf16 %v4894_v16, %v4892_v14 }
 0xe50   : > { %v3713_v19 = vpop.f32.mrf.mxu1 }
 0xe51   : > { %v2175_v33 = vsel %vm1070_vm8, %v3713_v19, -inf }
 0xe52   : > { %v2155_v51 = vpop.f32.mrf.mxu1 }
 0xe53   : > { %v2169_v22 = vsel %vm1063_vm7, %v2155_v51, -inf }
 0xe54   : > { %2170 = vmax.xlane.f32.xlu0 %v2169_v22  ;;  %v3714_v30 = vpop.f32.mrf.mxu1 }
 0xe56   : > { %v2158_v10 = vpop.f32.mrf.mxu1 }
 0xe57   : > { %v2172_v11 = vsel %vm1063_vm7, %v2158_v10, -inf }
 0xe58   : > { %2176 = vmax.xlane.f32.xlu0 %v2175_v33  ;;  %2173 = vmax.xlane.f32.xlu1 %v2172_v11  ;;  %v2036_v11 = vadd.f32 %v4873_v2, %v4830_v48 }
 0xedd   : > { %v2171_v35 = vpop.xlane.xlu0 %2170 }
 0xede   : > { %v2178_v36 = vsub.f32 %v2155_v51, %v2171_v35 }
 0xee0   : > { %v2181_v25 = vmul.f32 1.442695, %v2178_v36  ;;  %v2035_v36 = vadd.f32 %v4877_v5, %v4834_v52 }
 0xee1   : > { %v2177_v43 = vpop.xlane.xlu0 %2176  ;;  %v2174_v53 = vpop.xlane.xlu1 %2173 }
 0xee2   : > { %3995 = vpow2.f32 %v2181_v25  ;;  %v2180_v54 = vsub.f32 %v3713_v19, %v2177_v43  ;;  %v2179_v17 = vsub.f32 %v2158_v10, %v2174_v53 }
 0xee4   : > { %v2185_v57 = vmul.f32 1.442695, %v2180_v54  ;;  %v2183_v62 = vmul.f32 1.442695, %v2179_v17 }
 0xee6   : > { %3997 = vpow2.f32 %v2185_v57 }
 0xee7   : > { %3999 = vpow2.f32 %v2183_v62 }
 0xeef   : > { %v3996_v23 = vpop.eup %3995 }
 0xef0   : > { %v2187_v6 = vsel %vm1063_vm7, %v3996_v23, 0.0 }
 0xef1   : > { %2188 = vadd.xlane.f32.xlu0 %v2187_v6 }
 0xef3   : > { %v3998_v46 = vpop.eup %3997 }
 0xef4   : > { %v4000_v7 = vpop.eup %3999  ;;  %v2193_v8 = vsel %vm1070_vm8, %v3998_v46, 0.0 }
 0xef5   : > { %2194 = vadd.xlane.f32.xlu1 %v2193_v8  ;;  %v2190_v39 = vsel %vm1063_vm7, %v4000_v7, 0.0 }
 0xef6   : > { %2191 = vadd.xlane.f32.xlu0 %v2190_v39 }
 0xf06   : > { %2207 = vrot.lane.b32.xlu1 %v4657_v45, %s4190_s5 }
 0xf0a   : > { %2275 = vrot.lane.b32.xlu1 %v4776_v9, %s4191_s12 }
 0xf0c   : > { %2209 = vrot.lane.b32.xlu0 %v4751_v4, %s4190_s5 }
 0xf0e   : > { %2273 = vrot.lane.b32.xlu1 %v4654_v42, %s4191_s12  ;;  %v2034_v42 = vadd.f32 %v4875_v3, %v4832_v50 }
 0xf10   : > { %2269 = vrot.lane.b32.xlu0 %v4659_v47, %s4192_s16 }
 0xf12   : > { %2271 = vrot.lane.b32.xlu1 %v4803_v18, %s4192_s16 }
 0xf7a   : > { %v2189_v12 = vpop.xlane.xlu0 %2188 }
 0xf7b   : > { %4001 = vrcp.f32 %v2189_v12 }
 0xf7e   : > { %v2195_v60 = vpop.xlane.xlu1 %2194 }
 0xf7f   : > { %v2192_v58 = vpop.xlane.xlu0 %2191  ;;  %4003 = vrcp.f32 %v2195_v60 }
 0xf80   : > { %4005 = vrcp.f32 %v2192_v58 }
 0xf82   : > { %v2208_v51 = vpop.permute.xlu1 %2207 }
 0xf83   : > { %v2210_v19 = vpop.permute.xlu0 %2209 }
 0xf84   : > { %v2219_v9 = vand.u32 %v2210_v19, %v4606_v49 }
 0xf86   : > { %3715 = vmatprep.subr.bf16.mxu0 %v2219_v9  ;;  %v2276_v30 = vpop.permute.xlu1 %2275 }
 0xf87   : > { %3716 = vmatpush3.bf16.msra.mxu0 %v2219_v9  ;;  %v2270_v54 = vpop.permute.xlu0 %2269  ;;  %v2287_v17 = vsel %vm1002_vm4, %v2276_v30, 0 }
 0xf88   : > { %v4002_v22 = vpop.eup %4001  ;;  %3717 = vmatprep.subr.bf16.mxu0 %v2208_v51 }
 0xf89   : > { %v2199_v47 = vmul.f32 %v4002_v22, %v3996_v23 }
 0xf8a   : > { %v2274_v57 = vpop.permute.xlu1 %2273 }
 0xf8b   : > { %3718 = vmatpush3.bf16.msra.mxu0 %v2208_v51  ;;  %v4919_v18 = vadd.f32 %v2199_v47, %v2034_v42  ;;  %v2284_v48 = vsel %vm1002_vm4, %v2274_v57, 0 }
 0xf8c   : > { %v4004_v10 = vpop.eup %4003  ;;  %3773 = vmatprep.subr.msk.bf16.mxu0 %vm1002_vm4, %v2276_v30 }
 0xf8d   : > { %v4006_v33 = vpop.eup %4005  ;;  %v2201_v35 = vmul.f32 %v4004_v10, %v3998_v46 }
 0xf8e   : > { %v2200_v25 = vmul.f32 %v4006_v33, %v4000_v7  ;;  %v2272_v52 = vpop.permute.xlu1 %2271 }
 0xf8f   : > { %v4926_v43 = vadd.f32 %v2201_v35, %v2036_v11  ;;  %v2206_v50 = vpack.c.bf16 %v2201_v35, %v2201_v35 }
 0xf90   : > { %v4928_v3 = vadd.f32 %v2200_v25, %v2035_v36  ;;  %v2205_v53 = vpack.c.bf16 %v2200_v25, %v2199_v47 }
 0xf92   : > { %3719 = vmatprep.mubr.msk.bf16.mxu0 %vm1063_vm7, %v2205_v53 }
 0xf93   : > { %3720 = vmatmul.mubr.msk.bf16.vlgmr.msra.gmra.mxu0 %vm1063_vm7, %v2206_v50 }
 0xf94   : > { %3724 = vmatpush3.bf16.xpose.msra.mxu0 %v2287_v17  ;;  %3727 = vmatprep.mubr.msk.bf16.mxu0 %vm1002_vm4, %v2270_v54  ;;  %v3881_v17 = vld [vmem:[%s4445_s11 + $0x18] sm:$0xff]  }
 0xf95   : > { %3774 = vmatprep.subr.msk.bf16.mxu0 %vm1002_vm4, %v2274_v57 }
 0xf9c   : > { %3726 = vmatpush3.bf16.xpose.msra.mxu0 %v2284_v48 }
 0xfa3   : > { %3728 = vmatmul.mubr.msk.bf16.vlgmr.msra.gmra.mxu0 %vm1002_vm4, %v2272_v52 }
 0xfa4   : > { %2811 = vmatprep.mubr.bf16.mxu0 %v4185_v40 }
0x1053   : > { %v4938_v2 = vpop.f32.mrf.mxu0 }
0x1055   : > { %v2255_v5 = vpop.f32.mrf.mxu0 }
0x1057   : > { %v3722_v62 = vpop.f32.mrf.mxu0 }
0x1059   : > { %v2258_v23 = vpop.f32.mrf.mxu0 }
0x105a   : > { %v3859_v6 = vpack.i.bf16 %v2258_v23, %v2255_v5  ;;  %v3882_v5 = vld [vmem:[%s4445_s11 + $0x10] sm:$0xff]  }
0x1063   : > { %v3729_v46 = vpop.f32.mrf.mxu0 }
0x1064   : > { %v2343_v60 = vsel %vm1070_vm8, %v3729_v46, -inf }
0x1065   : > { %v2323_v7 = vpop.f32.mrf.mxu0 }
0x1066   : > { %v2337_v8 = vsel %vm1063_vm7, %v2323_v7, -inf }
0x1067   : > { %2338 = vmax.xlane.f32.xlu0 %v2337_v8  ;;  %v3730_v39 = vpop.f32.mrf.mxu0 }
0x1069   : > { %v2326_v12 = vpop.f32.mrf.mxu0 }
0x106a   : > { %v2340_v58 = vsel %vm1063_vm7, %v2326_v12, -inf }
0x106b   : > { %2344 = vmax.xlane.f32.xlu0 %v2343_v60  ;;  %2341 = vmax.xlane.f32.xlu1 %v2340_v58 }
0x10f0   : > { %v2339_v19 = vpop.xlane.xlu0 %2338 }
0x10f1   : > { %v2346_v9 = vsub.f32 %v2323_v7, %v2339_v19  ;;  %v3884_v19 = vld [vmem:[%s4445_s11] sm:$0xff]  }
0x10f3   : > { %v2349_v51 = vmul.f32 1.442695, %v2346_v9 }
0x10f4   : > { %v2345_v22 = vpop.xlane.xlu0 %2344  ;;  %v2342_v42 = vpop.xlane.xlu1 %2341 }
0x10f5   : > { %4007 = vpow2.f32 %v2349_v51  ;;  %v2348_v47 = vsub.f32 %v3729_v46, %v2345_v22  ;;  %v2347_v30 = vsub.f32 %v2326_v12, %v2342_v42 }
0x10f7   : > { %v2353_v10 = vmul.f32 1.442695, %v2348_v47  ;;  %v2351_v33 = vmul.f32 1.442695, %v2347_v30 }
0x10f9   : > { %4009 = vpow2.f32 %v2353_v10 }
0x10fa   : > { %4011 = vpow2.f32 %v2351_v33 }
0x1102   : > { %v4008_v11 = vpop.eup %4007 }
0x1103   : > { %v2355_v35 = vsel %vm1063_vm7, %v4008_v11, 0.0 }
0x1104   : > { %2356 = vadd.xlane.f32.xlu0 %v2355_v35 }
0x1106   : > { %v4010_v36 = vpop.eup %4009 }
0x1107   : > { %v4012_v25 = vpop.eup %4011  ;;  %v2361_v50 = vsel %vm1070_vm8, %v4010_v36, 0.0 }
0x1108   : > { %2362 = vadd.xlane.f32.xlu1 %v2361_v50  ;;  %v2358_v53 = vsel %vm1063_vm7, %v4012_v25, 0.0  ;;  %v5017_v50 = vld [vmem:[%s5296_s29] ss:$0 sm:$0xff] }
0x1109   : > { %2359 = vadd.xlane.f32.xlu0 %v2358_v53 }
0x1119   : > { %2375 = vrot.lane.b32.xlu1 %v4657_v45, %s4192_s16 }
0x111d   : > { %3840 = vrot.lane.b32.xlu1 %v3839_v32, %s4191_s12 }
0x111f   : > { %2377 = vrot.lane.b32.xlu0 %v4751_v4, %s4192_s16 }
0x1121   : > { %3845 = vrot.lane.b32.xlu1 %v3844_v44, %s4189_s3 }
0x1123   : > { %3850 = vrot.lane.b32.xlu0 %v3849_v61, %s4187_s30 }
0x1125   : > { %3855 = vrot.lane.b32.xlu1 %v3854_v15, %s4191_s12 }
0x1127   : > { %3860 = vrot.lane.b32.xlu0 %v3859_v6, %s4189_s3  ;;  %v3883_v6 = vld [vmem:[%s4445_s11 + $0x8] sm:$0xff]  }
0x1129   : > { %1678 = vrot.lane.b32.xlu1 %v4708_v28, %s4191_s12 }
0x112d   : > { %1690 = vrot.lane.b32.xlu1 %v4759_v37, %s4189_s3 }
0x1131   : > { %2444 = vrot.lane.b32.xlu1 %v4890_v13, %s4191_s12 }
0x118d   : > { %v2357_v45 = vpop.xlane.xlu0 %2356 }
0x118e   : > { %4013 = vrcp.f32 %v2357_v45  ;;  %v4050_v45 = vld [vmem:[#allocation2] sm:$0xff] }
0x1191   : > { %v2363_v29 = vpop.xlane.xlu1 %2362 }
0x1192   : > { %v2360_v31 = vpop.xlane.xlu0 %2359  ;;  %4015 = vrcp.f32 %v2363_v29 }
0x1193   : > { %4017 = vrcp.f32 %v2360_v31 }
0x1195   : > { %v2376_v38 = vpop.permute.xlu1 %2375 }
0x1196   : > { %v2378_v32 = vpop.permute.xlu0 %2377 }
0x1197   : > { %v2387_v4 = vand.u32 %v2378_v32, %v4606_v49 }
0x1199   : > { %3731 = vmatprep.subr.bf16.mxu1 %v2387_v4  ;;  %v3841_v13 = vpop.permute.xlu1 %3840 }
0x119a   : > { %3732 = vmatpush3.bf16.msra.mxu1 %v2387_v4  ;;  %v3851_v46 = vpop.permute.xlu0 %3850 }
0x119b   : > { %v4014_v28 = vpop.eup %4013  ;;  %3733 = vmatprep.subr.bf16.mxu1 %v2376_v38  ;;  %v3853_v60 = vunpack.i.h.bf16 %v3851_v46  ;;  %v3852_v58 = vunpack.i.l.bf16 %v3851_v46 }
0x119c   : > { %v2367_v41 = vmul.f32 %v4014_v28, %v4008_v11 }
0x119d   : > { %v3846_v52 = vpop.permute.xlu1 %3845 }
0x119e   : > { %3734 = vmatpush3.bf16.msra.mxu1 %v2376_v38  ;;  %v2370_v37 = vadd.f32 %v2367_v41, %v4919_v18  ;;  %v3848_v62 = vunpack.i.h.bf16 %v3846_v52  ;;  %v3847_v23 = vunpack.i.l.bf16 %v3846_v52 }
0x119f   : > { %v4016_v44 = vpop.eup %4015  ;;  %3739 = vmatprep.subr.bf16.mxu1 %v4193_v56 }
0x11a0   : > { %v4018_v59 = vpop.eup %4017  ;;  %v2482_v61 = vmul.f32 0.25, %v2370_v37  ;;  %v2369_v49 = vmul.f32 %v4016_v44, %v4010_v36  ;;  %v4049_v36 = vld [vmem:[#allocation2 + $0x8] sm:$0xff] }
0x11a1   : > { %v2368_v14 = vmul.f32 %v4018_v59, %v4012_v25  ;;  %v3856_v32 = vpop.permute.xlu1 %3855 }
0x11a2   : > { %3458 = vst.msk [vmem:[%s4504_s27 + $0x18] sm:$0xff] %vm1063_vm7, %v2482_v61  ;;  %v2372_v16 = vadd.f32 %v2369_v49, %v4926_v43  ;;  %v2374_v18 = vpack.c.bf16 %v2369_v49, %v2369_v49  ;;  %v3843_v43 = vunpack.i.h.bf16 %v3841_v13  ;;  %v3858_v38 = vunpack.i.h.bf16 %v3856_v32 }
0x11a3   : > { %v2371_v15 = vadd.f32 %v2368_v14, %v4928_v3  ;;  %v2373_v54 = vpack.c.bf16 %v2368_v14, %v2367_v41  ;;  %v3842_v3 = vunpack.i.l.bf16 %v3841_v13  ;;  %v3857_v28 = vunpack.i.l.bf16 %v3856_v32  ;;  %v3861_v41 = vpop.permute.xlu0 %3860 }
0x11a4   : > { %v2484_v57 = vmul.f32 0.25, %v2372_v16  ;;  %v1708_v7 = vsel %vm1002_vm4, %v4706_v24, %v3843_v43  ;;  %v2474_v37 = vsel %vm1002_vm4, %v4851_v1, %v3858_v38  ;;  %v3863_v61 = vunpack.i.h.bf16 %v3861_v41 }
0x11a5   : > { %3735 = vmatprep.mubr.msk.bf16.mxu1 %vm1063_vm7, %v2373_v54  ;;  %v2483_v48 = vmul.f32 0.25, %v2371_v15  ;;  %v1707_v8 = vsel %vm1002_vm4, %v4704_v21, %v3842_v3  ;;  %v1712_v12 = vsel %vm1710_vm10, %v1708_v7, %v3848_v62  ;;  %v1679_v4 = vpop.permute.xlu1 %1678  ;;  %v2473_v44 = vsel %vm1002_vm4, %v4849_v0, %v3857_v28 }
0x11a6   : > { %3736 = vmatmul.mubr.msk.bf16.vlgmr.msra.gmra.mxu1 %vm1063_vm7, %v2374_v18  ;;  %3460 = vst.msk [vmem:[%s4504_s27 + $0x28] sm:$0x1] %vm1070_vm8, %v2484_v57  ;;  %v1711_v39 = vsel %vm1710_vm10, %v1707_v8, %v3847_v23  ;;  %v1716_v51 = vsel %vm1714_vm11, %v1712_v12, %v3853_v60  ;;  %v3862_v49 = vunpack.i.l.bf16 %v3861_v41  ;;  %v2477_v54 = vsel %vm1710_vm10, %v2474_v37, %v3863_v61  ;;  %v3887_v61 = vld [vmem:[%s4506_s14 + $0x34] ss:$8 sps:$4 sm:$0xff]  }
0x11a7   : > { %3459 = vst.msk [vmem:[%s4504_s27 + $0x20] sm:$0xff] %vm1063_vm7, %v2483_v48  ;;  %3740 = vmatpush3.bf16.msra.mxu1 %v3881_v17  ;;  %3747 = vmatprep.mubr.msk.bf16.mxu1 %vm4194_vm9, %v4193_v56  ;;  %v1715_v9 = vsel %vm1714_vm11, %v1711_v39, %v3852_v58  ;;  %v1709_v18 = vsel %vm1002_vm4, %v4702_v20, %v1679_v4 }
0x11a8   : > { %3741 = vmatprep.subr.bf16.mxu1 %v4193_v56  ;;  %v2501_v24 = vpack.c.bf16 %v1716_v51, %v1715_v9  ;;  %v2476_v15 = vsel %vm1710_vm10, %v2473_v44, %v3862_v49  ;;  %v3885_v49 = vld [vmem:[%s4506_s14 + $0x30] ss:$8 sps:$4 sm:$0xff]   ;;  %2787 = vmatprep.subr.bf16.mxu0 %v3887_v61 }
0x11a9   : > { %v1691_v59 = vpop.permute.xlu1 %1690  ;;  %2788 = vmatpush1.bf16.msra.mxu0 %v3885_v49  ;;  %v3912_v61 = vld [vmem:[%s4494_s0] sm:$0xff]  }
0x11aa   : > { %v1713_v57 = vsel %vm1710_vm10, %v1709_v18, %v1691_v59 }
0x11ab   : > { %3742 = vmatpush3.bf16.msra.mxu1 %v3882_v5 }
0x11ac   : > { %3743 = vmatprep.subr.bf16.mxu1 %v4193_v56 }
0x11ad   : > { %v2445_v5 = vpop.permute.xlu1 %2444 }
0x11ae   : > { %v2475_v20 = vsel %vm1002_vm4, %v4847_v63, %v2445_v5 }
0x11af   : > { %3744 = vmatpush3.bf16.msra.mxu1 %v3883_v6 }
0x11b0   : > { %3745 = vmatprep.subr.bf16.mxu1 %v4193_v56 }
0x11b3   : > { %3746 = vmatpush3.bf16.msra.mxu1 %v3884_v19 }
0x11b6   : > { %3748 = vmatmul.mubr.msk.bf16.vlgmr.msra.gmra.mxu1 %vm762_vm2, %v2501_v24 }
0x11b7   : > { %3751 = vmatprep.mubr.msk.bf16.mxu1 %vm4194_vm9, %v4193_v56 }
0x1266   : > { %v3737_v21 = vpop.f32.mrf.mxu1 }
0x1267   : > { %2468 = vrot.lane.b32.xlu1 %v3737_v21, %s4187_s30  ;;  %v4051_v21 = vld [vmem:[#allocation2 + $0x10] sm:$0xff] }
0x1268   : > { %v2423_v22 = vpop.f32.mrf.mxu1 }
0x126a   : > { %v3738_v42 = vpop.f32.mrf.mxu1 }
0x126c   : > { %v2426_v47 = vpop.f32.mrf.mxu1 }
0x126d   : > { %v3864_v30 = vpack.i.bf16 %v2426_v47, %v2423_v22 }
0x126f   : > { %3865 = vrot.lane.b32.xlu0 %v3864_v30, %s4187_s30 }
0x1273   : > { %1702 = vrot.lane.b32.xlu0 %v4807_v55, %s4187_s30 }
0x1276   : > { %v2579_v10 = vpop.f32.mrf.mxu1 }
0x1277   : > { %2456 = vrot.lane.b32.xlu0 %v4938_v2, %s4189_s3  ;;  %v2601_v2 = vadd.f32 %v4050_v45, %v2579_v10 }
0x1278   : > { %v3749_v33 = vpop.f32.mrf.mxu1 }
0x1279   : > { %v5025_v29 = vadd.f32 %v5017_v50, %v2601_v2  ;;  %v4052_v33 = vld [vmem:[#allocation2 + $0x18] sm:$0xff]  ;;  %v4053_v2 = vld [vmem:[#allocation2 + $0x20] sm:$0x3] }
0x127a   : > { %v2582_v11 = vpop.f32.mrf.mxu1 }
0x127b   : > { %v2602_v25 = vadd.f32 %v4049_v36, %v2582_v11  ;;  %v2620_v31 = vsel %vm762_vm2, %v5025_v29, 0.0 }
0x127c   : > { %v3750_v35 = vpop.f32.mrf.mxu1 }
0x127d   : > { %v5020_v53 = vadd.f32 %v5017_v50, %v2602_v25 }
0x127f   : > { %v2623_v55 = vsel %vm762_vm2, %v5020_v53, 0.0 }
0x128b   : > { %2624 = vadd.xlane.f32.xlu1 %v2623_v55 }
0x1296   : > { %2621 = vadd.xlane.f32.xlu0 %v2620_v31 }
0x12d9   : > { %v2469_v46 = vpop.permute.xlu1 %2468 }
0x12e1   : > { %v3866_v13 = vpop.permute.xlu0 %3865 }
0x12e2   : > { %v3868_v14 = vunpack.i.h.bf16 %v3866_v13  ;;  %v3867_v16 = vunpack.i.l.bf16 %v3866_v13  ;;  %v3888_v13 = vld [vmem:[%s4506_s14 + $0x20] ss:$8 sps:$4 sm:$0xff]  }
0x12e4   : > { %v2479_v17 = vsel %vm1714_vm11, %v2476_v15, %v3867_v16  ;;  %v2480_v1 = vsel %vm1714_vm11, %v2477_v54, %v3868_v14  ;;  %v3893_v14 = vld [vmem:[%s4506_s14 + $0x14] ss:$8 sps:$4 sm:$0xff]   ;;  %v3891_v16 = vld [vmem:[%s4506_s14 + $0x10] ss:$8 sps:$4 sm:$0xff]   ;;  %v3896_v15 = vld [vmem:[%s4506_s14 + $0x4] ss:$8 sps:$4 sm:$0xff]  }
0x12e5   : > { %v2492_v0 = vrot.slane %v2479_v17, 7  ;;  %v2493_v48 = vrot.slane %v2480_v1, 7  ;;  %v1703_v52 = vpop.permute.xlu0 %1702  ;;  %v3894_v54 = vld [vmem:[%s4506_s14] ss:$8 sps:$4 sm:$0xff]  }
0x12e6   : > { %v1717_v43 = vsel %vm1714_vm11, %v1713_v57, %v1703_v52 }
0x12e7   : > { %v2494_v3 = vsel %vm1109_vm5, %v2492_v0, %v2493_v48  ;;  %v2500_v62 = vsel %vm1109_vm5, %v1717_v43, %v2492_v0 }
0x12e8   : > { %v2502_v23 = vpack.c.bf16 %v2494_v3, %v2500_v62 }
0x12e9   : > { %v2457_v6 = vpop.permute.xlu0 %2456 }
0x12ea   : > { %v2478_v7 = vsel %vm1710_vm10, %v2475_v20, %v2457_v6  ;;  %3752 = vmatmul.mubr.msk.bf16.gmra.mxu1 %vm762_vm2, %v2502_v23 }
0x12eb   : > { %v2481_v8 = vsel %vm1714_vm11, %v2478_v7, %v2469_v46  ;;  %3755 = vmatprep.mubr.msk.bf16.mxu1 %vm4194_vm9, %v4193_v56 }
0x12ec   : > { %v2495_v39 = vrot.slane %v2481_v8, 7 }
0x12ee   : > { %v2496_v12 = vsel %vm1109_vm5, %v2493_v48, %v2495_v39 }
0x12ef   : > { %v2503_v60 = vpack.c.bf16 %v2496_v12, %v2496_v12 }
0x12f2   : > { %3756 = vmatmul.mubr.msk.bf16.gmra.mxu1 %vm762_vm2, %v2503_v60 }
0x1314   : > { %v2625_v22 = vpop.xlane.xlu1 %2624 }
0x1315   : > { %v2636_v10 = vmul.f32 0.015625, %v2625_v22  ;;  %v5115_v22 = vld [vmem:[%s5300_s24] ss:$0 sm:$0xff] }
0x1317   : > { %v2641_v45 = vsub.f32 %v5020_v53, %v2636_v10 }
0x1319   : > { %v2646_v37 = vmul.f32 %v2641_v45, %v2641_v45 }
0x131b   : > { %v2653_v59 = vsel %vm762_vm2, %v2646_v37, 0.0  ;;  %v3909_v37 = vld [vmem:[%s4494_s0 + $0x48] sm:$0xff]  }
0x131f   : > { %v2622_v58 = vpop.xlane.xlu0 %2621 }
0x1320   : > { %v2635_v19 = vmul.f32 0.015625, %v2622_v58 }
0x1322   : > { %v5053_v63 = vsub.f32 %v5025_v29, %v2635_v19 }
0x1324   : > { %v2645_v9 = vmul.f32 %v5053_v63, %v5053_v63 }
0x1326   : > { %v2650_v51 = vsel %vm762_vm2, %v2645_v9, 0.0 }
0x1327   : > { %2651 = vadd.xlane.f32.xlu1 %v2650_v51  ;;  %v5107_v51 = vld [vmem:[%s5298_s15] ss:$0 sm:$0xff] }
0x13aa   : > { %v2587_v24 = vpop.f32.mrf.mxu1 }
0x13ab   : > { %v2603_v56 = vadd.f32 %v4051_v21, %v2587_v24 }
0x13ac   : > { %v3753_v42 = vpop.f32.mrf.mxu1 }
0x13ad   : > { %v5059_v47 = vadd.f32 %v5017_v50, %v2603_v56 }
0x13ae   : > { %v2590_v30 = vpop.f32.mrf.mxu1 }
0x13af   : > { %v2604_v11 = vadd.f32 %v4052_v33, %v2590_v30  ;;  %v2626_v35 = vsel %vm762_vm2, %v5059_v47, 0.0  ;;  %v3897_v33 = vld [vmem:[%s4494_s0 + $0x78] sm:$0xff]  }
0x13b0   : > { %2627 = vadd.xlane.f32.xlu0 %v2626_v35  ;;  %v3754_v36 = vpop.f32.mrf.mxu1  ;;  %v2652_v18 = vpop.xlane.xlu1 %2651  ;;  %3577 = vmatprep.subr.bf16.mxu1 %v3897_v33  ;;  %v3899_v35 = vld [vmem:[%s4494_s0 + $0x70] sm:$0xff]  }
0x13b1   : > { %v5064_v25 = vadd.f32 %v5017_v50, %v2604_v11  ;;  %v2665_v57 = vmul.f32 0.015625, %v2652_v18  ;;  %v3898_v11 = vld [vmem:[%s4494_s0 + $0x38] sm:$0xff]   ;;  %v3900_v36 = vld [vmem:[%s4494_s0 + $0x30] sm:$0xff]  }
0x13b2   : > { %v2595_v55 = vpop.f32.mrf.mxu1  ;;  %3578 = vmatpush3.bf16.msra.mxu1 %v3898_v11 }
0x13b3   : > { %v2605_v31 = vadd.f32 %v4053_v2, %v2595_v55  ;;  %v2629_v32 = vsel %vm762_vm2, %v5064_v25, 0.0  ;;  %v2670_v43 = vadd.f32 1e-05, %v2665_v57  ;;  %3579 = vmatprep.subr.bf16.mxu1 %v3899_v35  ;;  %v3901_v55 = vld [vmem:[%s4494_s0 + $0x68] sm:$0xff]   ;;  %v3903_v2 = vld [vmem:[%s4494_s0 + $0x60] sm:$0xff]  }
0x13b4   : > { %2630 = vadd.xlane.f32.xlu0 %v2629_v32  ;;  %v3757_v4 = vpop.f32.mrf.mxu1  ;;  %v3905_v32 = vld [vmem:[%s4494_s0 + $0x58] sm:$0xff]  }
0x13b5   : > { %v5070_v38 = vadd.f32 %v5017_v50, %v2605_v31  ;;  %v3890_v50 = vld [vmem:[%s4506_s14 + $0x24] ss:$8 sps:$4 sm:$0xff]   ;;  %4019 = vrsqrt.f32 %v2670_v43  ;;  %v3904_v31 = vld [vmem:[%s4494_s0 + $0x20] sm:$0xff]   ;;  %v3906_v4 = vld [vmem:[%s4494_s0 + $0x18] sm:$0xff]  }
0x13b6   : > { %v2598_v28 = vpop.f32.mrf.mxu1  ;;  %2789 = vmatprep.subr.bf16.mxu0 %v3890_v50  ;;  %3580 = vmatpush3.bf16.msra.mxu1 %v3900_v36 }
0x13b7   : > { %v2632_v41 = vsel %vm775_vm3, %v5070_v38, 0.0  ;;  %2790 = vmatpush1.bf16.msra.mxu0 %v3888_v13  ;;  %3581 = vmatprep.subr.bf16.mxu1 %v3901_v55  ;;  %v3907_v28 = vld [vmem:[%s4494_s0 + $0x50] sm:$0xff]  }
0x13b8   : > { %2633 = vadd.xlane.f32.xlu0 %v2632_v41  ;;  %v3758_v44 = vpop.f32.mrf.mxu1  ;;  %2791 = vmatprep.subr.bf16.mxu0 %v3893_v14  ;;  %v3908_v41 = vld [vmem:[%s4494_s0 + $0x10] sm:$0xff]  }
0x13b9   : > { %v3910_v44 = vld [vmem:[%s4494_s0 + $0x8] sm:$0xff]  }
0x13bb   : > { %2792 = vmatpush1.bf16.msra.mxu0 %v3891_v16 }
0x13bc   : > { %2654 = vadd.xlane.f32.xlu0 %v2653_v59  ;;  %2793 = vmatprep.subr.bf16.mxu0 %v3896_v15  ;;  %v3911_v59 = vld [vmem:[%s4494_s0 + $0x40] sm:$0xff]  }
0x13bf   : > { %2794 = vmatpush1.bf16.msra.mxu0 %v3894_v54 }
0x13c2   : > { %v4020_v19 = vpop.eup %4019 }
0x13c3   : > { %v2680_v9 = vmul.f32 %v4020_v19, %v5053_v63 }
0x13c5   : > { %v2691_v56 = vmul.f32 %v5107_v51, %v2680_v9 }
0x13c7   : > { %v2702_v42 = vadd.f32 %v5115_v22, %v2691_v56 }
0x1439   : > { %v2628_v17 = vpop.xlane.xlu0 %2627 }
0x143a   : > { %v2637_v1 = vmul.f32 0.015625, %v2628_v17 }
0x143c   : > { %v5084_v0 = vsub.f32 %v5059_v47, %v2637_v1 }
0x143d   : > { %v2631_v48 = vpop.xlane.xlu0 %2630 }
0x143e   : > { %v2638_v52 = vmul.f32 0.015625, %v2631_v48  ;;  %v2647_v5 = vmul.f32 %v5084_v0, %v5084_v0 }
0x1440   : > { %v5089_v3 = vsub.f32 %v5064_v25, %v2638_v52  ;;  %v2656_v62 = vsel %vm762_vm2, %v2647_v5, 0.0 }
0x1441   : > { %2657 = vadd.xlane.f32.xlu1 %v2656_v62  ;;  %v2634_v23 = vpop.xlane.xlu0 %2633 }
0x1442   : > { %v2639_v20 = vmul.f32 0.015625, %v2634_v23  ;;  %v2648_v6 = vmul.f32 %v5089_v3, %v5089_v3 }
0x1444   : > { %v5095_v46 = vsub.f32 %v5070_v38, %v2639_v20  ;;  %v2659_v7 = vsel %vm762_vm2, %v2648_v6, 0.0 }
0x1445   : > { %2660 = vadd.xlane.f32.xlu0 %v2659_v7  ;;  %v2655_v8 = vpop.xlane.xlu0 %2654 }
0x1446   : > { %v2666_v39 = vmul.f32 0.015625, %v2655_v8  ;;  %v2649_v12 = vmul.f32 %v5095_v46, %v5095_v46 }
0x1448   : > { %v2671_v60 = vadd.f32 1e-05, %v2666_v39  ;;  %v2662_v58 = vsel %vm775_vm3, %v2649_v12, 0.0  ;;  %v2718_v39 = vld [vmem:[%s720_s23] sm:$0x3] }
0x1449   : > { %2663 = vadd.xlane.f32.xlu1 %v2662_v58  ;;  %v5161_v12 = vrot.slane %v2718_v39, %v871_v34 }
0x144a   : > { %4021 = vrsqrt.f32 %v2671_v60 }
0x1457   : > { %v4022_v24 = vpop.eup %4021 }
0x1458   : > { %v2681_v21 = vmul.f32 %v4022_v24, %v2641_v45  ;;  %v3902_v45 = vld [vmem:[%s4494_s0 + $0x28] sm:$0xff]  }
0x1459   : > { %3582 = vmatpush3.bf16.msra.mxu1 %v3902_v45 }
0x145a   : > { %v2692_v63 = vmul.f32 %v5107_v51, %v2681_v21  ;;  %3583 = vmatprep.subr.bf16.mxu1 %v3903_v2 }
0x145c   : > { %v2703_v30 = vadd.f32 %v5115_v22, %v2692_v63 }
0x145d   : > { %3584 = vmatpush3.bf16.msra.mxu1 %v3904_v31 }
0x145e   : > { %v2707_v10 = vpack.c.bf16 %v2703_v30, %v2702_v42  ;;  %3585 = vmatprep.subr.bf16.mxu1 %v3905_v32 }
0x1460   : > { %3479 = vmatmul.mubr.msk.bf16.vlgmr.msra.gmra.mxu0 %vm762_vm2, %v2707_v10 }
0x1461   : > { %2821 = vmatprep.mubr.bf16.mxu0 %v4185_v40  ;;  %3586 = vmatpush3.bf16.msra.mxu1 %v3906_v4 }
0x1462   : > { %3587 = vmatprep.subr.bf16.mxu1 %v3907_v28 }
0x1465   : > { %3588 = vmatpush3.bf16.msra.mxu1 %v3908_v41 }
0x1466   : > { %3589 = vmatprep.subr.bf16.mxu1 %v3909_v37 }
0x1469   : > { %3590 = vmatpush3.bf16.msra.mxu1 %v3910_v44 }
0x146a   : > { %3591 = vmatprep.subr.bf16.mxu1 %v3911_v59 }
0x146d   : > { %3592 = vmatpush3.bf16.msra.mxu1 %v3912_v61 }
0x14ca   : > { %v2658_v49 = vpop.xlane.xlu1 %2657 }
0x14cb   : > { %v2667_v50 = vmul.f32 0.015625, %v2658_v49 }
0x14cd   : > { %v2672_v13 = vadd.f32 1e-05, %v2667_v50 }
0x14ce   : > { %v2661_v14 = vpop.xlane.xlu0 %2660 }
0x14cf   : > { %4023 = vrsqrt.f32 %v2672_v13  ;;  %v2668_v16 = vmul.f32 0.015625, %v2661_v14 }
0x14d1   : > { %v2673_v15 = vadd.f32 1e-05, %v2668_v16 }
0x14d2   : > { %v2664_v54 = vpop.xlane.xlu1 %2663 }
0x14d3   : > { %4025 = vrsqrt.f32 %v2673_v15  ;;  %v2669_v18 = vmul.f32 0.015625, %v2664_v54 }
0x14d5   : > { %v2674_v17 = vadd.f32 1e-05, %v2669_v18 }
0x14d7   : > { %4027 = vrsqrt.f32 %v2674_v17 }
0x14dc   : > { %v4024_v1 = vpop.eup %4023 }
0x14dd   : > { %v2682_v57 = vmul.f32 %v4024_v1, %v5084_v0 }
0x14df   : > { %v2693_v5 = vmul.f32 %v5107_v51, %v2682_v57 }
0x14e0   : > { %v4026_v48 = vpop.eup %4025 }
0x14e1   : > { %v2683_v52 = vmul.f32 %v4026_v48, %v5089_v3  ;;  %v2704_v23 = vadd.f32 %v5115_v22, %v2693_v5 }
0x14e3   : > { %v2694_v43 = vmul.f32 %v5107_v51, %v2683_v52 }
0x14e4   : > { %v4028_v62 = vpop.eup %4027 }
0x14e5   : > { %v2705_v20 = vadd.f32 %v5115_v22, %v2694_v43  ;;  %v2684_v6 = vmul.f32 %v4028_v62, %v5095_v46  ;;  %v5157_v46 = vrot.slane %v2718_v39, %v867_v27 }
0x14e7   : > { %v2708_v7 = vpack.c.bf16 %v2705_v20, %v2704_v23  ;;  %v2695_v8 = vmul.f32 %v5107_v51, %v2684_v6 }
0x14e9   : > { %3480 = vmatmul.mubr.msk.bf16.gmra.mxu0 %vm762_vm2, %v2708_v7  ;;  %v2706_v0 = vadd.f32 %v5115_v22, %v2695_v8 }
0x14ea   : > { %2831 = vmatprep.mubr.bf16.mxu0 %v4185_v40 }
0x14eb   : > { %v2709_v3 = vpack.c.bf16 %v2706_v0, %v2706_v0 }
0x14f1   : > { %3481 = vmatmul.mubr.msk.bf16.gmra.mxu0 %vm762_vm2, %v2709_v3 }
0x1520   : > { %v2813_v60 = vpop.f32.mrf.mxu0 }
0x1521   : > { %v2814_v40 = vadd.f32 %v2813_v60, %v5157_v46 }
0x1522   : > { %v2815_v58 = vpop.f32.mrf.mxu0 }
0x1523   : > { %v2840_v19 = vmul.f32 %v2814_v40, %v2814_v40  ;;  %v2816_v9 = vadd.f32 %v2815_v58, %v5161_v12 }
0x1524   : > { %v2817_v51 = vpop.f32.mrf.mxu0 }
0x1525   : > { %v2850_v24 = vmul.f32 %v2840_v19, %v2814_v40  ;;  %v2841_v21 = vmul.f32 %v2816_v9, %v2816_v9  ;;  %v2818_v56 = vadd.f32 %v2817_v51, %v5157_v46 }
0x1526   : > { %v2819_v22 = vpop.f32.mrf.mxu0 }
0x1527   : > { %v2860_v63 = vmul.f32 0.044715, %v2850_v24  ;;  %v2851_v27 = vmul.f32 %v2841_v21, %v2816_v9  ;;  %v2842_v42 = vmul.f32 %v2818_v56, %v2818_v56  ;;  %v2820_v26 = vadd.f32 %v2819_v22, %v5161_v12 }
0x1529   : > { %v2870_v34 = vadd.f32 %v2860_v63, %v2814_v40  ;;  %v2861_v30 = vmul.f32 0.044715, %v2851_v27  ;;  %v2852_v10 = vmul.f32 %v2842_v42, %v2818_v56  ;;  %v2843_v33 = vmul.f32 %v2820_v26, %v2820_v26 }
0x152b   : > { %v2880_v11 = vmul.f32 0.7978846, %v2870_v34  ;;  %v2871_v35 = vadd.f32 %v2861_v30, %v2816_v9  ;;  %v2862_v36 = vmul.f32 0.044715, %v2852_v10  ;;  %v2853_v55 = vmul.f32 %v2843_v33, %v2820_v26 }
0x152d   : > { %v2881_v45 = vmul.f32 0.7978846, %v2871_v35  ;;  %v2872_v2 = vadd.f32 %v2862_v36, %v2818_v56  ;;  %v2863_v31 = vmul.f32 0.044715, %v2853_v55  ;;  %4029 = vtanh.f32 %v2880_v11 }
0x152f   : > { %4031 = vtanh.f32 %v2881_v45  ;;  %v2882_v32 = vmul.f32 0.7978846, %v2872_v2  ;;  %v2873_v4 = vadd.f32 %v2863_v31, %v2820_v26 }
0x1531   : > { %4033 = vtanh.f32 %v2882_v32  ;;  %v2883_v28 = vmul.f32 0.7978846, %v2873_v4 }
0x1533   : > { %4035 = vtanh.f32 %v2883_v28 }
0x153a   : > { %v4030_v41 = vpop.eup %4029 }
0x153b   : > { %v2900_v61 = vadd.f32 1.0, %v4030_v41 }
0x153c   : > { %v4032_v37 = vpop.eup %4031 }
0x153d   : > { %v2901_v44 = vadd.f32 1.0, %v4032_v37  ;;  %v2910_v15 = vmul.f32 0.5, %v2900_v61 }
0x153e   : > { %v4034_v59 = vpop.eup %4033 }
0x153f   : > { %v2902_v49 = vadd.f32 1.0, %v4034_v59  ;;  %v2911_v16 = vmul.f32 0.5, %v2901_v44  ;;  %v2920_v57 = vmul.f32 %v2910_v15, %v2814_v40 }
0x1540   : > { %v4036_v50 = vpop.eup %4035 }
0x1541   : > { %v2912_v13 = vmul.f32 0.5, %v2902_v49  ;;  %v2903_v14 = vadd.f32 1.0, %v4036_v50  ;;  %v2921_v17 = vmul.f32 %v2911_v16, %v2816_v9 }
0x1543   : > { %v2913_v54 = vmul.f32 0.5, %v2903_v14  ;;  %v2922_v18 = vmul.f32 %v2912_v13, %v2818_v56 }
0x1545   : > { %v2923_v1 = vmul.f32 %v2913_v54, %v2820_v26  ;;  %v2930_v52 = vpack.c.bf16 %v2922_v18, %v2920_v57 }
0x1547   : > { %v2931_v48 = vpack.c.bf16 %v2923_v1, %v2921_v17 }
0x1549   : > { %3096 = vmatprep.mubr.bf16.mxu1 %v2931_v48 }
0x154a   : > { %3097 = vmatmul.mubr.bf16.vlgmr.msra.gmra.mxu1 %v2930_v52 }
0x15a9   : > { %v2823_v5 = vpop.f32.mrf.mxu0 }
0x15aa   : > { %v5168_v43 = vadd.f32 %v2823_v5, %v5157_v46 }
0x15ab   : > { %v2825_v62 = vpop.f32.mrf.mxu0 }
0x15ac   : > { %v2844_v23 = vmul.f32 %v5168_v43, %v5168_v43  ;;  %v2826_v20 = vadd.f32 %v2825_v62, %v5161_v12 }
0x15ad   : > { %v2827_v6 = vpop.f32.mrf.mxu0 }
0x15ae   : > { %v2854_v7 = vmul.f32 %v2844_v23, %v5168_v43  ;;  %v2845_v8 = vmul.f32 %v2826_v20, %v2826_v20  ;;  %v2828_v0 = vadd.f32 %v2827_v6, %v5157_v46 }
0x15af   : > { %v2829_v3 = vpop.f32.mrf.mxu0 }
0x15b0   : > { %v2864_v39 = vmul.f32 0.044715, %v2854_v7  ;;  %v2855_v60 = vmul.f32 %v2845_v8, %v2826_v20  ;;  %v2846_v40 = vmul.f32 %v2828_v0, %v2828_v0  ;;  %v2830_v58 = vadd.f32 %v2829_v3, %v5161_v12 }
0x15b1   : > { %v2833_v19 = vpop.f32.mrf.mxu0 }
0x15b2   : > { %v2874_v9 = vadd.f32 %v2864_v39, %v5168_v43  ;;  %v2865_v51 = vmul.f32 0.044715, %v2855_v60  ;;  %v2856_v24 = vmul.f32 %v2846_v40, %v2828_v0  ;;  %v2847_v21 = vmul.f32 %v2830_v58, %v2830_v58 }
0x15b3   : > { %v2834_v56 = vadd.f32 %v2833_v19, %v5157_v46  ;;  %v2835_v22 = vpop.f32.mrf.mxu0 }
0x15b4   : > { %v2884_v63 = vmul.f32 0.7978846, %v2874_v9  ;;  %v2875_v27 = vadd.f32 %v2865_v51, %v2826_v20  ;;  %v2866_v42 = vmul.f32 0.044715, %v2856_v24  ;;  %v2857_v26 = vmul.f32 %v2847_v21, %v2830_v58 }
0x15b5   : > { %v2848_v34 = vmul.f32 %v2834_v56, %v2834_v56  ;;  %v2836_v30 = vadd.f32 %v2835_v22, %v5161_v12  ;;  %v2837_v10 = vpop.f32.mrf.mxu0 }
0x15b6   : > { %v2885_v33 = vmul.f32 0.7978846, %v2875_v27  ;;  %v2876_v11 = vadd.f32 %v2866_v42, %v2828_v0  ;;  %v2867_v35 = vmul.f32 0.044715, %v2857_v26  ;;  %4037 = vtanh.f32 %v2884_v63 }
0x15b7   : > { %v2858_v36 = vmul.f32 %v2848_v34, %v2834_v56  ;;  %v2849_v55 = vmul.f32 %v2836_v30, %v2836_v30  ;;  %v2838_v45 = vpop.f32.mrf.mxu0 }
0x15b8   : > { %4039 = vtanh.f32 %v2885_v33  ;;  %v2886_v2 = vmul.f32 0.7978846, %v2876_v11  ;;  %v2877_v31 = vadd.f32 %v2867_v35, %v2830_v58 }
0x15b9   : > { %v2868_v46 = vmul.f32 0.044715, %v2858_v36  ;;  %v2859_v32 = vmul.f32 %v2849_v55, %v2836_v30 }
0x15ba   : > { %4041 = vtanh.f32 %v2886_v2  ;;  %v2887_v4 = vmul.f32 0.7978846, %v2877_v31 }
0x15bb   : > { %v2878_v28 = vadd.f32 %v2868_v46, %v2834_v56  ;;  %v2869_v41 = vmul.f32 0.044715, %v2859_v32 }
0x15bc   : > { %4043 = vtanh.f32 %v2887_v4 }
0x15bd   : > { %v2888_v37 = vmul.f32 0.7978846, %v2878_v28  ;;  %v2879_v12 = vadd.f32 %v2869_v41, %v2836_v30 }
0x15bf   : > { %4045 = vtanh.f32 %v2888_v37  ;;  %v2889_v44 = vmul.f32 0.7978846, %v2879_v12 }
0x15c1   : > { %4047 = vtanh.f32 %v2889_v44 }
0x15c3   : > { %v4038_v59 = vpop.eup %4037 }
0x15c4   : > { %v2904_v13 = vadd.f32 1.0, %v4038_v59 }
0x15c5   : > { %v4040_v61 = vpop.eup %4039 }
0x15c6   : > { %v2905_v49 = vadd.f32 1.0, %v4040_v61  ;;  %v2914_v17 = vmul.f32 0.5, %v2904_v13 }
0x15c7   : > { %v4042_v50 = vpop.eup %4041 }
0x15c8   : > { %v2906_v14 = vadd.f32 1.0, %v4042_v50  ;;  %v2915_v54 = vmul.f32 0.5, %v2905_v49  ;;  %v2924_v6 = vmul.f32 %v2914_v17, %v5168_v43  ;;  %v3498_v43 = vld [vmem:[%s728_s9] ss:$0 sm:$0xff] }
0x15c9   : > { %v4044_v16 = vpop.eup %4043 }
0x15ca   : > { %v2907_v15 = vadd.f32 1.0, %v4044_v16  ;;  %v2916_v18 = vmul.f32 0.5, %v2906_v14  ;;  %v2925_v62 = vmul.f32 %v2915_v54, %v2826_v20 }
0x15cc   : > { %v4046_v1 = vpop.eup %4045  ;;  %v2917_v57 = vmul.f32 0.5, %v2907_v15  ;;  %v2926_v48 = vmul.f32 %v2916_v18, %v2828_v0 }
0x15cd   : > { %v2908_v52 = vadd.f32 1.0, %v4046_v1 }
0x15ce   : > { %v4048_v5 = vpop.eup %4047  ;;  %v2927_v23 = vmul.f32 %v2917_v57, %v2830_v58  ;;  %v2932_v3 = vpack.c.bf16 %v2926_v48, %v2924_v6 }
0x15cf   : > { %v2909_v7 = vadd.f32 1.0, %v4048_v5  ;;  %v2918_v60 = vmul.f32 0.5, %v2908_v52 }
0x15d0   : > { %v2933_v8 = vpack.c.bf16 %v2927_v23, %v2925_v62 }
0x15d1   : > { %v2919_v39 = vmul.f32 0.5, %v2909_v7  ;;  %v2928_v9 = vmul.f32 %v2918_v60, %v2834_v56 }
0x15d2   : > { %3104 = vmatprep.mubr.bf16.mxu1 %v2933_v8 }
0x15d3   : > { %3105 = vmatmul.mubr.bf16.gmra.mxu1 %v2932_v3  ;;  %v2929_v40 = vmul.f32 %v2919_v39, %v2836_v30  ;;  %v2934_v51 = vpack.c.bf16 %v2928_v9, %v2928_v9 }
0x15d5   : > { %v2935_v19 = vpack.c.bf16 %v2929_v40, %v2929_v40 }
0x15d7   : > { %3112 = vmatprep.mubr.bf16.mxu1 %v2935_v19 }
0x15db   : > { %3113 = vmatmul.mubr.bf16.gmra.mxu1 %v2934_v51 }
0x160a   : > { %v3593_v0 = vpop.f32.mrf.mxu1 }
0x160c   : > { %v3594_v24 = vpop.f32.mrf.mxu1 }
0x160d   : > { %v3595_v20 = vadd.f32 %v3594_v24, %v3593_v0 }
0x160e   : > { %v3596_v58 = vpop.f32.mrf.mxu1 }
0x160f   : > { %v3120_v21 = vadd.f32 %v3595_v20, %v5025_v29 }
0x1610   : > { %v3597_v22 = vpop.f32.mrf.mxu1 }
0x1611   : > { %v3132_v63 = vadd.f32 %v3498_v43, %v3120_v21  ;;  %v3598_v27 = vadd.f32 %v3597_v22, %v3596_v58 }
0x1613   : > { %3137 = vst.msk [vmem:[#allocation2] sm:$0xff] %vm762_vm2, %v3132_v63  ;;  %v3121_v56 = vadd.f32 %v3598_v27, %v5020_v53 }
0x1615   : > { %v3133_v42 = vadd.f32 %v3498_v43, %v3121_v56 }
0x1617   : > { %3138 = vst.msk [vmem:[#allocation2 + $0x8] sm:$0xff] %vm762_vm2, %v3133_v42 }
0x1693   : > { %v3599_v26 = vpop.f32.mrf.mxu1 }
0x1695   : > { %v3600_v34 = vpop.f32.mrf.mxu1 }
0x1696   : > { %v3601_v30 = vadd.f32 %v3600_v34, %v3599_v26 }
0x1697   : > { %v3602_v10 = vpop.f32.mrf.mxu1 }
0x1698   : > { %v3122_v33 = vadd.f32 %v3601_v30, %v5059_v47 }
0x1699   : > { %v3603_v11 = vpop.f32.mrf.mxu1 }
0x169a   : > { %v3134_v35 = vadd.f32 %v3498_v43, %v3122_v33  ;;  %v3604_v29 = vadd.f32 %v3603_v11, %v3602_v10 }
0x169b   : > { %v3605_v36 = vpop.f32.mrf.mxu1 }
0x169c   : > { %3139 = vst.msk [vmem:[#allocation2 + $0x10] sm:$0xff] %vm762_vm2, %v3134_v35  ;;  %v3142_v55 = vsel %vm1109_vm5, %v3132_v63, %v3134_v35  ;;  %v3123_v45 = vadd.f32 %v3604_v29, %v5064_v25 }
0x169d   : > { %3143 = vst.msk [vmem:[%s732_s7] sm:$0x3] %vm775_vm3, %v3142_v55  ;;  %v3606_v53 = vpop.f32.mrf.mxu1 }
0x169e   : > { %v3135_v2 = vadd.f32 %v3498_v43, %v3123_v45  ;;  %v3607_v31 = vadd.f32 %v3606_v53, %v3605_v36 }
0x169f   : > { %v3608_v47 = vpop.f32.mrf.mxu1 }
0x16a0   : > { %3140 = vst.msk [vmem:[#allocation2 + $0x18] sm:$0xff] %vm762_vm2, %v3135_v2  ;;  %v3124_v46 = vadd.f32 %v3607_v31, %v5070_v38  ;;  %3147 = sbr.rel (%p3499_p5) target bundleno = 5800 (0x16a8), region = 92 }
0x16a1   : > { %v3609_v32 = vpop.f32.mrf.mxu1 }
0x16a2   : > { %v3136_v4 = vadd.f32 %v3498_v43, %v3124_v46 }
0x16a4   : > { %3141 = vst.msk [vmem:[#allocation2 + $0x20] sm:$0x3] %vm775_vm3, %v3136_v4 }
0x16a5   : > { %3148 = vst.msk [vmem:[%s5303_s26] sm:$0xff] %vm762_vm2, %v3132_v63  ;;  %3149 = vst.msk [vmem:[%s5303_s26 + $0x8] sm:$0xff] %vm762_vm2, %v3133_v42 }
0x16a6   : > { %3150 = vst.msk [vmem:[%s5303_s26 + $0x10] sm:$0xff] %vm762_vm2, %v3134_v35  ;;  %3151 = vst.msk [vmem:[%s5303_s26 + $0x18] sm:$0xff] %vm762_vm2, %v3135_v2 }
0x16a7   : > { %3152 = vst.msk [vmem:[%s5303_s26 + $0x20] sm:$0x3] %vm775_vm3, %v3136_v4 }
0x16a8 PF: > { %s5304_s21 = sld [smem:[#allocation12_spill]] }
0x16a9   : > { %s5305_s18 = sld [smem:[#allocation10_spill]] }
0x16aa   : > { %s5306_s19 = sld [smem:[#allocation11_spill]] }
0x16ab   : > { %s5307_s20 = sld [smem:[#allocation13_spill]] }
0x16ae   : > { %p29_p6 = scmp.ge.s32.totalorder %s5304_s21, 5  }
0x16b0   :  { %31 = sbr.rel (!%p29_p6) target bundleno = 17 (0x11), region = 192 }
0x16b5   :  { %3194 = vsyncpa [#allocation4], 1 }
0x16b6   :  { %3196 = vsyncpa [#allocation4 + $0x1], 1 }
0x16b7   :  { %3197 = vsyncpa [#allocation6], 1 }
0x16b8   :  { %3199 = vsyncpa [#allocation6 + $0x1], 1 }

// kernel: transformer_classifier_forward.4
= control target key start
LH: loop header
LB: loop body
LE: loop exit
PB: predicated region body
PF: predicated region fallthrough
CT: control target
= control target key end

     0   :  { %vm73_vm0 = vcmask 1040384   ;;  %v2151_v0 = vmov 0.0   ;;  %vm2152_vm1 = vmmov 0   ;;  %vm69_vm2 = vcmask 138240   ;;  %s2153_s29 = smov 127   ;;  %s2156_s28 = smov 48   ;;  %s2674_s0 = inlined_call_operand.vmem [shape: f32[3,2,17,17], index: 0, kind: input, shape index: {}]   ;;  %s2675_s1 = inlined_call_operand.vmem [shape: f32[34,64], index: 1, kind: input, shape index: {}]   ;;  %s2676_s2 = inlined_call_operand.vmem [shape: f32[26,64], index: 2, kind: input, shape index: {}]   ;;  %s2677_s7 = inlined_call_operand.vmem [shape: bf16[64,64], index: 7, kind: input, shape index: {}]   ;;  %s2678_s9 = inlined_call_operand.vmem [shape: bf16[64,128], index: 9, kind: input, shape index: {}]   ;;  %s2679_s3 = inlined_call_operand.vmem [shape: f32[1,64], index: 3, kind: input, shape index: {}, may-alias: {3,5,13}]   ;;  %s2680_s4 = inlined_call_operand.vmem [shape: f32[1,64], index: 4, kind: input, shape index: {}, may-alias: {4,6,8,12,14,18}]   ;;  %s2681_s5 = inlined_call_operand.vmem [shape: f32[1,64], index: 5, kind: input, shape index: {}, may-alias: {3,5,13}]   ;;  %s2682_s6 = inlined_call_operand.vmem [shape: f32[1,64], index: 6, kind: input, shape index: {}, may-alias: {4,6,8,12,14,18}]   ;;  %s2683_s10 = inlined_call_operand.vmem [shape: f32[1,128], index: 10, kind: input, shape index: {}]   ;;  %s2684_s8 = inlined_call_operand.vmem [shape: f32[1,64], index: 8, kind: input, shape index: {}, may-alias: {4,6,8,12,14,18}]   ;;  %s2685_s11 = inlined_call_operand.vmem [shape: bf16[64,64], index: 11, kind: input, shape index: {}]   ;;  %s2686_s12 = inlined_call_operand.vmem [shape: f32[1,64], index: 12, kind: input, shape index: {}, may-alias: {4,6,8,12,14,18}]   ;;  %s2687_s15 = inlined_call_operand.vmem [shape: bf16[64,256], index: 15, kind: input, shape index: {}]   ;;  %s2688_s13 = inlined_call_operand.vmem [shape: f32[1,64], index: 13, kind: input, shape index: {}, may-alias: {3,5,13}]   ;;  %s2689_s14 = inlined_call_operand.vmem [shape: f32[1,64], index: 14, kind: input, shape index: {}, may-alias: {4,6,8,12,14,18}]   ;;  %s2690_s17 = inlined_call_operand.vmem [shape: bf16[256,64], index: 17, kind: input, shape index: {}]   ;;  %s2691_s16 = inlined_call_operand.vmem [shape: f32[1,256], index: 16, kind: input, shape index: {}]   ;;  %s2692_s18 = inlined_call_operand.vmem [shape: f32[1,64], index: 18, kind: input, shape index: {}, may-alias: {4,6,8,12,14,18}]   ;;  %s2693_s19 = inlined_call_operand.vmem [shape: f32[2,64], index: 19, kind: output, shape index: {}]  }
   0x1   :  { %2698 = sst [smem:[#allocation2_spill]] %s2674_s0  ;;  %1918 = vmatprep.subr.mxu0 %v2151_v0  ;;  %1924 = vmatprep.mubr.msk.f32.mxu0 %vm2152_vm1, %v2151_v0  ;;  %vm233_vm3 = vcmask 130048   ;;  %vm588_vm4 = vcmask 523264   ;;  %vm557_vm5 = vcmask 517120   ;;  %vm893_vm6 = vcmask 205824   ;;  %s2158_s0 = smov 32  }
   0x2   :  { %2699 = sst [smem:[#allocation3_spill]] %s2675_s1  ;;  %1927 = vmatprep.subr.mxu1 %v2151_v0  ;;  %1933 = vmatprep.mubr.msk.f32.mxu1 %vm2152_vm1, %v2151_v0  ;;  %vm917_vm7 = vcmask 1044480   ;;  %vm913_vm8 = vcmask 211968   ;;  %s2159_s30 = smov 80   ;;  %vm1329_vm9 = vcmask 261120   ;;  %vm1331_vm10 = vcmask 392192  }
   0x3   :  { %2700 = sst [smem:[#allocation4_spill]] %s2676_s2  ;;  %s2160_s21 = smov 16  }
   0x4   :  { %2701 = sst [smem:[#allocation5_spill]] %s2677_s7 }
   0x5   :  { %s2702_s20 = sld [smem:[#allocation2_spill]] }
   0x6   :  { %s2703_s26 = sld [smem:[#allocation3_spill]] }
   0x7   :  { %s2704_s27 = sld [smem:[#allocation4_spill]] }
   0x8   :  { %s2705_s23 = sld [smem:[#allocation5_spill]] }
   0xb   :  { %v1757_v1 = vld [vmem:[%s2702_s20 + $0x40] sm:$0x1]  ;;  %v1756_v2 = vld [vmem:[%s2702_s20 + $0x38] sm:$0xff]  ;;  %v149_v3 = vld [vmem:[%s2702_s20 + $0x10] sm:$0x1] }
   0xc   :  { %1919 = vmatpush3.msk.msra.mxu0 %vm73_vm0, %v1757_v1  ;;  %v148_v4 = vld [vmem:[%s2702_s20 + $0x8] sm:$0xff]  ;;  %v1755_v5 = vld [vmem:[%s2702_s20 + $0x30] sm:$0xff]  ;;  %1928 = vmatpush3.msk.msra.mxu1 %vm73_vm0, %v149_v3  ;;  %v1754_v6 = vld [vmem:[%s2702_s20 + $0x60] sm:$0xff] }
   0xd   :  { %1920 = vmatprep.subr.mxu0 %v2151_v0  ;;  %1929 = vmatprep.subr.mxu1 %v2151_v0  ;;  %v147_v7 = vld [vmem:[%s2702_s20] sm:$0xff]  ;;  %v1766_v8 = vld [vmem:[%s2702_s20 + $0x58] sm:$0x1]  ;;  %v1765_v10 = vld [vmem:[%s2702_s20 + $0x50] sm:$0xff] }
   0xe   :  { %1921 = vmatpush3.msra.mxu0 %v1756_v2  ;;  %1930 = vmatpush3.msra.mxu1 %v148_v4  ;;  %v1764_v12 = vld [vmem:[%s2702_s20 + $0x48] sm:$0xff]  ;;  %v1763_v13 = vld [vmem:[%s2702_s20 + $0x78] sm:$0xff]  ;;  %v1770_v24 = vld [vmem:[%s2702_s20 + $0x20] sm:$0xff] }
   0xf   :  { %1922 = vmatprep.subr.mxu0 %v2151_v0  ;;  %1931 = vmatprep.subr.mxu1 %v2151_v0  ;;  %v227_v14 = vld [vmem:[%s2703_s26 + $0x9] sm:$0xff]  ;;  %v226_v15 = vld [vmem:[%s2703_s26 + $0x1] sm:$0xff]  ;;  %v1769_v25 = vld [vmem:[%s2702_s20 + $0x18] sm:$0xff] }
  0x10   :  { %1923 = vmatpush3.msra.mxu0 %v1755_v5  ;;  %1932 = vmatpush3.msra.mxu1 %v147_v7  ;;  %v229_v16 = vmax.f32 %v227_v14, 0.0  ;;  %v228_v17 = vmax.f32 %v226_v15, 0.0  ;;  %v1771_v22 = vld [vmem:[%s2702_s20 + $0x28] sm:$0x1]  ;;  %v469_v26 = vld [vmem:[%s2703_s26 + $0x1a] sm:$0xff]  ;;  %v468_v27 = vld [vmem:[%s2703_s26 + $0x12] sm:$0xff] }
  0x11   :  { %1925 = vmatmul.mubr.msk.f32.vlgmr.msra.gmra.mxu0 %vm69_vm2, %v1754_v6  ;;  %1936 = vmatprep.subr.mxu0 %v2151_v0  ;;  %v471_v28 = vmax.f32 %v469_v26, 0.0  ;;  %v470_v29 = vmax.f32 %v468_v27, 0.0  ;;  %v552_v35 = vld [vmem:[%s2704_s27 + $0x8] sm:$0xff]  ;;  %v551_v41 = vld [vmem:[%s2704_s27] sm:$0xff]  ;;  %v553_v44 = vld [vmem:[%s2704_s27 + $0x10] sm:$0xff] }
  0x12   :  { %1940 = vmatprep.mubr.msk.f32.mxu0 %vm2152_vm1, %v2151_v0  ;;  %1943 = vmatprep.subr.mxu1 %v2151_v0  ;;  %v592_v36 = vsel %vm588_vm4, %v552_v35, 0.0  ;;  %v589_v43 = vsel %vm588_vm4, %v551_v41, 0.0  ;;  %v595_v45 = vsel %vm588_vm4, %v553_v44, 0.0  ;;  %v554_v46 = vld [vmem:[%s2704_s27 + $0x18] sm:$0x3] }
  0x13   :  { %1937 = vmatpush3.msra.mxu0 %v229_v16  ;;  %v598_v47 = vsel %vm557_vm5, %v554_v46, 0.0  ;;  %v2083_v14 = vld [vmem:[%s2678_s9 + $0x18] sm:$0xff]  }
  0x14   :  { %1938 = vmatprep.subr.mxu0 %v2151_v0 }
  0x15   :  { %1939 = vmatpush3.msra.mxu0 %v228_v17 }
  0x16   :  { %1952 = vmatprep.subr.mxu0 %v2151_v0 }
  0xd1   :  { %v143_v9 = vpop.f32.mrf.mxu0 }
  0xd2   :  { %1934 = vmatmul.mubr.msk.f32.vlgmr.msra.gmra.mxu1 %vm69_vm2, %v143_v9 }
  0xd3   :  { %v1926_v11 = vpop.f32.mrf.mxu0  ;;  %1944 = vmatpush3.msk.msra.mxu1 %vm73_vm0, %v1766_v8  ;;  %1949 = vmatprep.mubr.msk.f32.mxu1 %vm2152_vm1, %v2151_v0 }
  0xd4   :  { %1945 = vmatprep.subr.mxu1 %v2151_v0  ;;  %v2080_v11 = vld [vmem:[%s2705_s23 + $0x10] sm:$0xff]  }
  0xd5   :  { %1946 = vmatpush3.msra.mxu1 %v1765_v10  ;;  %v2079_v10 = vld [vmem:[%s2705_s23 + $0x18] sm:$0xff]  }
  0xd6   :  { %1947 = vmatprep.subr.mxu1 %v2151_v0 }
  0xd7   :  { %1948 = vmatpush3.msra.mxu1 %v1764_v12  ;;  %v2081_v12 = vld [vmem:[%s2705_s23 + $0x8] sm:$0xff]  }
  0xd8   :  { %1950 = vmatmul.mubr.msk.f32.vlgmr.msra.gmra.mxu1 %vm69_vm2, %v1763_v13  ;;  %1961 = vmatprep.subr.mxu1 %v2151_v0  ;;  %v2082_v13 = vld [vmem:[%s2705_s23] sm:$0xff]  }
  0xd9   :  { %1965 = vmatprep.mubr.msk.f32.mxu1 %vm2152_vm1, %v2151_v0  ;;  %1962 = vmatpush3.msra.mxu1 %v471_v28 }
  0xda   :  { %1963 = vmatprep.subr.mxu1 %v2151_v0 }
  0xdb   :  { %1964 = vmatpush3.msra.mxu1 %v470_v29 }
  0xdc   :  { %1968 = vmatprep.subr.bf16.mxu1 %v2151_v0 }
 0x192   :  { %v222_v18 = vpop.f32.mrf.mxu1 }
 0x193   :  { %231 = vrot.lane.b32.xlu0 %v222_v18, %s2153_s29 }
 0x194   :  { %v1935_v19 = vpop.f32.mrf.mxu1 }
 0x198   :  { %v384_v20 = vpop.f32.mrf.mxu1 }
 0x19a   :  { %v1951_v21 = vpop.f32.mrf.mxu1 }
 0x205   :  { %v232_v23 = vpop.permute.xlu0 %231 }
 0x206   :  { %1941 = vmatmul.mubr.msk.f32.vlgmr.msra.gmra.mxu0 %vm233_vm3, %v232_v23 }
 0x207   :  { %1953 = vmatpush3.msk.msra.mxu0 %vm73_vm0, %v1771_v22  ;;  %1958 = vmatprep.mubr.msk.f32.mxu0 %vm2152_vm1, %v2151_v0 }
 0x208   :  { %1954 = vmatprep.subr.mxu0 %v2151_v0 }
 0x209   :  { %1955 = vmatpush3.msra.mxu0 %v1770_v24 }
 0x20a   :  { %1956 = vmatprep.subr.mxu0 %v2151_v0 }
 0x20b   :  { %1957 = vmatpush3.msra.mxu0 %v1769_v25 }
 0x20c   :  { %1959 = vmatmul.mubr.msk.f32.vlgmr.msra.gmra.mxu0 %vm69_vm2, %v384_v20  ;;  %1992 = vmatprep.subr.bf16.mxu0 %v2151_v0 }
 0x20d   :  { %1996 = vmatprep.mubr.msk.bf16.mxu0 %vm2152_vm1, %v2151_v0 }
 0x2c6   :  { %v302_v30 = vpop.f32.mrf.mxu0 }
 0x2c8   :  { %v1942_v31 = vpop.f32.mrf.mxu0 }
 0x2cc   :  { %v464_v32 = vpop.f32.mrf.mxu0 }
 0x2cd   :  { %473 = vrot.lane.b32.xlu0 %v464_v32, %s2153_s29  ;;  %s2157_s29 = smov 96  }
 0x2ce   :  { %v1960_v33 = vpop.f32.mrf.mxu0 }
 0x2cf   :  { %v1776_v33 = vld [vmem:[%s2680_s4] ss:$0 sm:$0xff] }
 0x2ec   :  { %593 = vadd.xlane.f32.xlu0 %v592_v36 }
 0x33f   :  { %v474_v34 = vpop.permute.xlu0 %473 }
 0x340   :  { %1966 = vmatmul.mubr.msk.f32.vlgmr.msra.gmra.mxu1 %vm233_vm3, %v474_v34 }
 0x341   :  { %1976 = vmatprep.mubr.msk.bf16.mxu1 %vm2152_vm1, %v2151_v0  ;;  %1969 = vmatpush3.bf16.msra.mxu1 %v2079_v10 }
 0x342   :  { %1970 = vmatprep.subr.bf16.mxu1 %v2151_v0 }
 0x345   :  { %1971 = vmatpush3.bf16.msra.mxu1 %v2080_v11 }
 0x346   :  { %1972 = vmatprep.subr.bf16.mxu1 %v2151_v0 }
 0x349   :  { %1973 = vmatpush3.bf16.msra.mxu1 %v2081_v12 }
 0x34a   :  { %1974 = vmatprep.subr.bf16.mxu1 %v2151_v0 }
 0x34d   :  { %1975 = vmatpush3.bf16.msra.mxu1 %v2082_v13  ;;  %v1779_v13 = vld [vmem:[%s2684_s8] ss:$0 sm:$0xff]  ;;  %s2154_s8 = smov 64  }
 0x34e   :  { %1980 = vmatprep.subr.bf16.mxu1 %v2083_v14 }
 0x375   :  { %v594_v48 = vpop.xlane.xlu0 %593 }
 0x376   :  { %v602_v51 = vmul.f32 0.015625, %v594_v48 }
 0x378   :  { %v2388_v56 = vsub.f32 %v552_v35, %v602_v51 }
 0x37a   :  { %v610_v62 = vmul.f32 %v2388_v56, %v2388_v56 }
 0x37c   :  { %v616_v4 = vsel %vm588_vm4, %v610_v62, 0.0 }
 0x400   :  { %v543_v37 = vpop.f32.mrf.mxu1 }
 0x401   :  { %v548_v38 = vrot.slane %v543_v37, 7 }
 0x402   :  { %v1967_v39 = vpop.f32.mrf.mxu1 }
 0x403   :  { %v2367_v40 = vsel %vm73_vm0, %v302_v30, %v548_v38  ;;  %v1775_v30 = vld [vmem:[%s2679_s3] ss:$0 sm:$0xff] }
 0x404   :  { %v558_v42 = vsel %vm557_vm5, %v2367_v40, 0.0  ;;  %v1777_v38 = vld [vmem:[%s2681_s5] ss:$0 sm:$0xff] }
 0x405   :  { %559 = vadd.xlane.f32.xlu1 %v558_v42 }
 0x409   :  { %590 = vadd.xlane.f32.xlu1 %v589_v43 }
 0x40d   :  { %596 = vadd.xlane.f32.xlu1 %v595_v45  ;;  %v1778_v45 = vld [vmem:[%s2682_s6] ss:$0 sm:$0xff] }
 0x411   :  { %599 = vadd.xlane.f32.xlu1 %v598_v47 }
 0x48e   :  { %v560_v49 = vpop.xlane.xlu1 %559 }
 0x48f   :  { %v562_v50 = vmul.f32 0.015625, %v560_v49 }
 0x491   :  { %v2384_v52 = vsub.f32 %v2367_v40, %v562_v50 }
 0x492   :  { %v591_v53 = vpop.xlane.xlu1 %590 }
 0x493   :  { %v601_v54 = vmul.f32 0.015625, %v591_v53  ;;  %v564_v55 = vmul.f32 %v2384_v52, %v2384_v52  ;;  %v2086_v53 = vld [vmem:[%s2678_s9] sm:$0xff]  }
 0x495   :  { %v2390_v57 = vsub.f32 %v551_v41, %v601_v54  ;;  %v565_v58 = vsel %vm557_vm5, %v564_v55, 0.0  ;;  %v2084_v41 = vld [vmem:[%s2678_s9 + $0x10] sm:$0xff]  }
 0x496   :  { %566 = vadd.xlane.f32.xlu1 %v565_v58  ;;  %v597_v59 = vpop.xlane.xlu1 %596 }
 0x497   :  { %v609_v60 = vmul.f32 %v2390_v57, %v2390_v57  ;;  %v603_v61 = vmul.f32 0.015625, %v597_v59 }
 0x499   :  { %v613_v63 = vsel %vm588_vm4, %v609_v60, 0.0  ;;  %v2398_v1 = vsub.f32 %v553_v44, %v603_v61 }
 0x49a   :  { %614 = vadd.xlane.f32.xlu1 %v613_v63  ;;  %v600_v2 = vpop.xlane.xlu1 %599 }
 0x49b   :  { %v604_v3 = vmul.f32 0.015625, %v600_v2  ;;  %v611_v5 = vmul.f32 %v2398_v1, %v2398_v1 }
 0x49d   :  { %v2403_v6 = vsub.f32 %v554_v46, %v604_v3  ;;  %v619_v7 = vsel %vm588_vm4, %v611_v5, 0.0  ;;  %v2085_v46 = vld [vmem:[%s2678_s9 + $0x8] sm:$0xff]   ;;  %v1785_v3 = vld [vmem:[%s2683_s10] ss:$0 sm:$0xff]  ;;  %s2155_s10 = smov 112  }
 0x49e   :  { %617 = vadd.xlane.f32.xlu1 %v616_v4 }
 0x49f   :  { %v612_v8 = vmul.f32 %v2403_v6, %v2403_v6 }
 0x4a1   :  { %v622_v9 = vsel %vm557_vm5, %v612_v8, 0.0 }
 0x4a2   :  { %620 = vadd.xlane.f32.xlu1 %v619_v7 }
 0x4a6   :  { %623 = vadd.xlane.f32.xlu1 %v622_v9 }
 0x51f   :  { %v567_v15 = vpop.xlane.xlu1 %566 }
 0x520   :  { %v568_v16 = vmul.f32 0.015625, %v567_v15 }
 0x522   :  { %v569_v17 = vadd.f32 1e-05, %v568_v16 }
 0x523   :  { %v615_v18 = vpop.xlane.xlu1 %614 }
 0x524   :  { %2119 = vrsqrt.f32 %v569_v17  ;;  %v625_v19 = vmul.f32 0.015625, %v615_v18 }
 0x526   :  { %v629_v20 = vadd.f32 1e-05, %v625_v19 }
 0x527   :  { %v618_v21 = vpop.xlane.xlu1 %617 }
 0x528   :  { %2121 = vrsqrt.f32 %v629_v20  ;;  %v626_v22 = vmul.f32 0.015625, %v618_v21 }
 0x52a   :  { %v630_v23 = vadd.f32 1e-05, %v626_v22 }
 0x52b   :  { %v621_v24 = vpop.xlane.xlu1 %620 }
 0x52c   :  { %2123 = vrsqrt.f32 %v630_v23  ;;  %v627_v25 = vmul.f32 0.015625, %v621_v24 }
 0x52e   :  { %v631_v26 = vadd.f32 1e-05, %v627_v25 }
 0x52f   :  { %v624_v27 = vpop.xlane.xlu1 %623 }
 0x530   :  { %2125 = vrsqrt.f32 %v631_v26  ;;  %v628_v28 = vmul.f32 0.015625, %v624_v27 }
 0x531   :  { %v2120_v29 = vpop.eup %2119 }
 0x532   :  { %v571_v31 = vmul.f32 %v2120_v29, %v2384_v52  ;;  %v632_v32 = vadd.f32 1e-05, %v628_v28 }
 0x534   :  { %2127 = vrsqrt.f32 %v632_v32  ;;  %v578_v34 = vmul.f32 %v1775_v30, %v571_v31 }
 0x535   :  { %v2122_v35 = vpop.eup %2121 }
 0x536   :  { %v585_v36 = vadd.f32 %v1776_v33, %v578_v34  ;;  %v637_v37 = vmul.f32 %v2122_v35, %v2390_v57 }
 0x538   :  { %v661_v39 = vpack.c.bf16 %v585_v36, %v585_v36  ;;  %v647_v44 = vmul.f32 %v1777_v38, %v637_v37 }
 0x539   :  { %v2124_v42 = vpop.eup %2123 }
 0x53a   :  { %1977 = vmatmul.mubr.msk.bf16.vlgmr.msra.gmra.mxu1 %vm588_vm4, %v661_v39  ;;  %v638_v43 = vmul.f32 %v2124_v42, %v2388_v56  ;;  %v657_v50 = vadd.f32 %v1778_v45, %v647_v44 }
 0x53b   :  { %1981 = vmatpush3.bf16.msra.mxu1 %v2083_v14 }
 0x53c   :  { %1982 = vmatprep.subr.bf16.mxu1 %v2084_v41  ;;  %v648_v47 = vmul.f32 %v1777_v38, %v638_v43 }
 0x53d   :  { %v2126_v48 = vpop.eup %2125 }
 0x53e   :  { %v639_v49 = vmul.f32 %v2126_v48, %v2398_v1  ;;  %v658_v51 = vadd.f32 %v1778_v45, %v648_v47 }
 0x53f   :  { %1983 = vmatpush3.bf16.msra.mxu1 %v2084_v41 }
 0x540   :  { %1984 = vmatprep.subr.bf16.mxu1 %v2085_v46  ;;  %v745_v52 = vpack.c.bf16 %v658_v51, %v657_v50  ;;  %v649_v56 = vmul.f32 %v1777_v38, %v639_v49 }
 0x541   :  { %v2128_v54 = vpop.eup %2127 }
 0x542   :  { %v640_v55 = vmul.f32 %v2128_v54, %v2403_v6  ;;  %1988 = vmatprep.mubr.msk.bf16.mxu1 %vm588_vm4, %v745_v52  ;;  %v659_v58 = vadd.f32 %v1778_v45, %v649_v56 }
 0x543   :  { %1985 = vmatpush3.bf16.msra.mxu1 %v2085_v46 }
 0x544   :  { %1986 = vmatprep.subr.bf16.mxu1 %v2086_v53  ;;  %v650_v57 = vmul.f32 %v1777_v38, %v640_v55 }
 0x546   :  { %v660_v59 = vadd.f32 %v1778_v45, %v650_v57 }
 0x547   :  { %1987 = vmatpush3.bf16.msra.mxu1 %v2086_v53 }
 0x548   :  { %v746_v60 = vpack.c.bf16 %v660_v59, %v659_v58  ;;  %2000 = vmatprep.subr.bf16.mxu1 %v2151_v0 }
 0x54a   :  { %1989 = vmatmul.mubr.msk.bf16.vlgmr.msra.gmra.mxu1 %vm588_vm4, %v746_v60 }
 0x54b   :  { %2004 = vmatprep.mubr.msk.bf16.mxu1 %vm2152_vm1, %v2151_v0 }
 0x5fa   :  { %v738_v61 = vpop.f32.mrf.mxu1 }
 0x5fb   :  { %v739_v15 = vadd.f32 %v1779_v13, %v738_v61 }
 0x5fc   :  { %v1978_v62 = vpop.f32.mrf.mxu1 }
 0x5fd   :  { %v744_v17 = vmul.f32 0.25, %v739_v15 }
 0x5fe   :  { %v741_v63 = vpop.f32.mrf.mxu1 }
 0x5ff   :  { %v2475_v18 = vpack.c.bf16 %v744_v17, %v744_v17 }
 0x600   :  { %v1979_v1 = vpop.f32.mrf.mxu1 }
 0x60a   :  { %v1990_v2 = vpop.f32.mrf.mxu1 }
 0x60b   :  { %v835_v6 = vadd.f32 %v1990_v2, %v1785_v3 }
 0x60c   :  { %v826_v4 = vpop.f32.mrf.mxu1 }
 0x60d   :  { %v827_v12 = vadd.f32 %v1785_v3, %v826_v4 }
 0x60e   :  { %v1991_v5 = vpop.f32.mrf.mxu1 }
 0x60f   :  { %v838_v7 = vadd.f32 %v1991_v5, %v1785_v3 }
 0x610   :  { %v829_v8 = vpop.f32.mrf.mxu1 }
 0x611   :  { %v2462_v9 = vpack.c.bf16 %v838_v7, %v835_v6  ;;  %v830_v10 = vadd.f32 %v1785_v3, %v829_v8 }
 0x613   :  { %v851_v11 = vsel %vm233_vm3, %v2462_v9, 0  ;;  %v2470_v14 = vpack.c.bf16 %v830_v10, %v827_v12 }
 0x614   :  { %1993 = vmatpush3.bf16.xpose.msra.mxu0 %v851_v11 }
 0x615   :  { %1994 = vmatprep.subr.bf16.mxu0 %v2151_v0  ;;  %v848_v16 = vsel %vm233_vm3, %v2470_v14, 0 }
 0x61c   :  { %1995 = vmatpush3.bf16.xpose.msra.mxu0 %v848_v16 }
 0x61d   :  { %2016 = vmatprep.subr.bf16.mxu0 %v2151_v0 }
 0x623   :  { %1997 = vmatmul.mubr.msk.bf16.vlgmr.msra.gmra.mxu0 %vm233_vm3, %v2475_v18 }
 0x624   :  { %2020 = vmatprep.mubr.msk.bf16.mxu0 %vm2152_vm1, %v2151_v0 }
 0x6e3   :  { %v887_v19 = vpop.f32.mrf.mxu0 }
 0x6e4   :  { %v894_v20 = vsel %vm893_vm6, %v887_v19, -inf }
 0x6e5   :  { %895 = vmax.xlane.f32.xlu1 %v894_v20  ;;  %v1998_v21 = vpop.f32.mrf.mxu0 }
 0x6e7   :  { %v890_v22 = vpop.f32.mrf.mxu0 }
 0x6e9   :  { %v1999_v23 = vpop.f32.mrf.mxu0 }
 0x6f6   :  { %910 = vrot.lane.b32.xlu1 %v2462_v9, %s2154_s8 }
 0x6fa   :  { %966 = vrot.lane.b32.xlu1 %v2462_v9, %s2155_s10 }
 0x6fe   :  { %964 = vrot.lane.b32.xlu1 %v2470_v14, %s2155_s10 }
 0x76e   :  { %v896_v24 = vpop.xlane.xlu1 %895 }
 0x76f   :  { %v897_v25 = vsub.f32 %v887_v19, %v896_v24 }
 0x771   :  { %v898_v26 = vmul.f32 1.442695, %v897_v25 }
 0x772   :  { %v911_v27 = vpop.permute.xlu1 %910 }
 0x773   :  { %2129 = vpow2.f32 %v898_v26  ;;  %v919_v28 = vsel %vm917_vm7, %v911_v27, 0 }
 0x774   :  { %2001 = vmatpush3.bf16.msra.mxu1 %v919_v28 }
 0x775   :  { %2002 = vmatprep.subr.bf16.mxu1 %v2151_v0 }
 0x776   :  { %v967_v35 = vpop.permute.xlu1 %966 }
 0x777   :  { %v975_v37 = vsel %vm233_vm3, %v967_v35, 0 }
 0x77a   :  { %v965_v38 = vpop.permute.xlu1 %964 }
 0x77b   :  { %v972_v39 = vsel %vm233_vm3, %v965_v38, 0 }
 0x780   :  { %v2130_v29 = vpop.eup %2129 }
 0x781   :  { %v900_v30 = vsel %vm893_vm6, %v2130_v29, 0.0 }
 0x782   :  { %901 = vadd.xlane.f32.xlu0 %v900_v30 }
 0x798   :  { %908 = vrot.lane.b32.xlu0 %v2470_v14, %s2154_s8 }
 0x79c   :  { %962 = vrot.lane.b32.xlu0 %v2475_v18, %s2155_s10 }
 0x80b   :  { %v902_v31 = vpop.xlane.xlu0 %901 }
 0x80c   :  { %2131 = vrcp.f32 %v902_v31 }
 0x80f   :  { %v909_v32 = vpop.permute.xlu0 %908 }
 0x810   :  { %2003 = vmatpush3.bf16.msra.mxu1 %v909_v32 }
 0x811   :  { %2008 = vmatprep.subr.bf16.mxu1 %v2151_v0 }
 0x813   :  { %v963_v41 = vpop.permute.xlu0 %962 }
 0x819   :  { %v2132_v33 = vpop.eup %2131 }
 0x81a   :  { %v904_v34 = vmul.f32 %v2132_v33, %v2130_v29 }
 0x81c   :  { %v905_v36 = vpack.c.bf16 %v904_v34, %v904_v34 }
 0x81e   :  { %2005 = vmatmul.mubr.msk.bf16.vlgmr.msra.gmra.mxu1 %vm913_vm8, %v905_v36 }
 0x81f   :  { %2009 = vmatpush3.bf16.xpose.msra.mxu1 %v975_v37  ;;  %2012 = vmatprep.mubr.msk.bf16.mxu1 %vm2152_vm1, %v2151_v0 }
 0x820   :  { %2010 = vmatprep.subr.bf16.mxu1 %v2151_v0 }
 0x827   :  { %2011 = vmatpush3.bf16.xpose.msra.mxu1 %v972_v39 }
 0x828   :  { %2032 = vmatprep.subr.bf16.mxu1 %v2151_v0 }
 0x82e   :  { %2013 = vmatmul.mubr.msk.bf16.vlgmr.msra.gmra.mxu1 %vm233_vm3, %v963_v41 }
 0x82f   :  { %2036 = vmatprep.mubr.msk.bf16.mxu1 %vm2152_vm1, %v2151_v0 }
 0x8de   :  { %v2501_v42 = vpop.f32.mrf.mxu1 }
 0x8e0   :  { %v2006_v43 = vpop.f32.mrf.mxu1 }
 0x8e2   :  { %v958_v44 = vpop.f32.mrf.mxu1 }
 0x8e4   :  { %v2007_v45 = vpop.f32.mrf.mxu1 }
 0x8ee   :  { %v1011_v46 = vpop.f32.mrf.mxu1 }
 0x8ef   :  { %v1017_v47 = vsel %vm893_vm6, %v1011_v46, -inf }
 0x8f0   :  { %1018 = vmax.xlane.f32.xlu1 %v1017_v47  ;;  %v2014_v48 = vpop.f32.mrf.mxu1 }
 0x8f2   :  { %v1014_v49 = vpop.f32.mrf.mxu1 }
 0x8f4   :  { %v2015_v50 = vpop.f32.mrf.mxu1 }
 0x901   :  { %1029 = vrot.lane.b32.xlu1 %v2470_v14, %s2156_s28 }
 0x905   :  { %1084 = vrot.lane.b32.xlu1 %v2462_v9, %s2157_s29 }
 0x909   :  { %1080 = vrot.lane.b32.xlu1 %v2475_v18, %s2157_s29 }
 0x979   :  { %v1019_v51 = vpop.xlane.xlu1 %1018 }
 0x97a   :  { %v1020_v52 = vsub.f32 %v1011_v46, %v1019_v51 }
 0x97c   :  { %v1021_v53 = vmul.f32 1.442695, %v1020_v52 }
 0x97d   :  { %v1030_v59 = vpop.permute.xlu1 %1029 }
 0x97e   :  { %2133 = vpow2.f32 %v1021_v53 }
 0x981   :  { %v1085_v62 = vpop.permute.xlu1 %1084 }
 0x982   :  { %v1093_v1 = vsel %vm233_vm3, %v1085_v62, 0 }
 0x985   :  { %v1081_v4 = vpop.permute.xlu1 %1080 }
 0x98b   :  { %v2134_v54 = vpop.eup %2133 }
 0x98c   :  { %v1023_v55 = vsel %vm893_vm6, %v2134_v54, 0.0 }
 0x98d   :  { %1024 = vadd.xlane.f32.xlu0 %v1023_v55  ;;  %v2088_v55 = vld [vmem:[%s2685_s11 + $0x10] sm:$0xff]  }
 0x9a3   :  { %1031 = vrot.lane.b32.xlu0 %v2462_v9, %s2156_s28 }
 0x9a7   :  { %1082 = vrot.lane.b32.xlu0 %v2470_v14, %s2157_s29 }
 0xa16   :  { %v1025_v56 = vpop.xlane.xlu0 %1024 }
 0xa17   :  { %2135 = vrcp.f32 %v1025_v56  ;;  %v2089_v56 = vld [vmem:[%s2685_s11 + $0x8] sm:$0xff]  }
 0xa1a   :  { %v1032_v57 = vpop.permute.xlu0 %1031 }
 0xa1b   :  { %v1038_v58 = vsel %vm917_vm7, %v1032_v57, 0  ;;  %v2090_v57 = vld [vmem:[%s2685_s11] sm:$0xff]  }
 0xa1c   :  { %2017 = vmatpush3.bf16.msra.mxu0 %v1038_v58 }
 0xa1d   :  { %2018 = vmatprep.subr.bf16.mxu0 %v2151_v0 }
 0xa1e   :  { %v1083_v2 = vpop.permute.xlu0 %1082 }
 0xa1f   :  { %v1090_v3 = vsel %vm233_vm3, %v1083_v2, 0 }
 0xa20   :  { %2019 = vmatpush3.bf16.msra.mxu0 %v1030_v59 }
 0xa21   :  { %2024 = vmatprep.subr.bf16.mxu0 %v2151_v0 }
 0xa24   :  { %v2136_v60 = vpop.eup %2135 }
 0xa25   :  { %v1027_v61 = vmul.f32 %v2136_v60, %v2134_v54 }
 0xa27   :  { %v1028_v63 = vpack.c.bf16 %v1027_v61, %v1027_v61 }
 0xa29   :  { %2021 = vmatmul.mubr.msk.bf16.vlgmr.msra.gmra.mxu0 %vm913_vm8, %v1028_v63 }
 0xa2a   :  { %2025 = vmatpush3.bf16.xpose.msra.mxu0 %v1093_v1  ;;  %2028 = vmatprep.mubr.msk.bf16.mxu0 %vm2152_vm1, %v2151_v0 }
 0xa2b   :  { %2026 = vmatprep.subr.bf16.mxu0 %v2151_v0 }
 0xa32   :  { %2027 = vmatpush3.bf16.xpose.msra.mxu0 %v1090_v3 }
 0xa33   :  { %2048 = vmatprep.subr.bf16.mxu0 %v2151_v0 }
 0xa39   :  { %2029 = vmatmul.mubr.msk.bf16.vlgmr.msra.gmra.mxu0 %vm233_vm3, %v1081_v4 }
 0xa3a   :  { %2052 = vmatprep.mubr.msk.bf16.mxu0 %vm2152_vm1, %v2151_v0 }
 0xae9   :  { %v1074_v5 = vpop.f32.mrf.mxu0 }
 0xaeb   :  { %v2022_v6 = vpop.f32.mrf.mxu0 }
 0xaec   :  { %v1805_v6 = vld [vmem:[%s2686_s12] ss:$0 sm:$0xff] }
 0xaed   :  { %v1077_v7 = vpop.f32.mrf.mxu0 }
 0xaef   :  { %v2023_v8 = vpop.f32.mrf.mxu0 }
 0xaf9   :  { %v1129_v10 = vpop.f32.mrf.mxu0 }
 0xafa   :  { %v1135_v11 = vsel %vm893_vm6, %v1129_v10, -inf }
 0xafb   :  { %1136 = vmax.xlane.f32.xlu0 %v1135_v11  ;;  %v2030_v12 = vpop.f32.mrf.mxu0 }
 0xafd   :  { %v1132_v13 = vpop.f32.mrf.mxu0 }
 0xaff   :  { %v2031_v15 = vpop.f32.mrf.mxu0 }
 0xb11   :  { %1149 = vrot.lane.b32.xlu0 %v2462_v9, %s2158_s0 }
 0xb15   :  { %1202 = vrot.lane.b32.xlu0 %v2462_v9, %s2159_s30 }
 0xb19   :  { %1198 = vrot.lane.b32.xlu0 %v2475_v18, %s2159_s30 }
 0xb84   :  { %v1137_v16 = vpop.xlane.xlu0 %1136 }
 0xb85   :  { %v1138_v17 = vsub.f32 %v1129_v10, %v1137_v16 }
 0xb87   :  { %v1139_v19 = vmul.f32 1.442695, %v1138_v17 }
 0xb88   :  { %v1150_v20 = vpop.permute.xlu0 %1149 }
 0xb89   :  { %2137 = vpow2.f32 %v1139_v19  ;;  %v1156_v21 = vsel %vm917_vm7, %v1150_v20, 0  ;;  %v2091_v20 = vld [vmem:[%s2687_s15 + $0x30] ss:$8 sps:$4 sm:$0xff]  }
 0xb8a   :  { %2033 = vmatpush3.bf16.msra.mxu1 %v1156_v21  ;;  %v2096_v21 = vld [vmem:[%s2687_s15 + $0x24] ss:$8 sps:$4 sm:$0xff]  }
 0xb8b   :  { %2034 = vmatprep.subr.bf16.mxu1 %v2151_v0 }
 0xb8c   :  { %v1203_v27 = vpop.permute.xlu0 %1202 }
 0xb8d   :  { %v1211_v29 = vsel %vm233_vm3, %v1203_v27, 0 }
 0xb90   :  { %v1199_v32 = vpop.permute.xlu0 %1198 }
 0xb96   :  { %v2138_v22 = vpop.eup %2137 }
 0xb97   :  { %v1141_v23 = vsel %vm893_vm6, %v2138_v22, 0.0 }
 0xb98   :  { %1142 = vadd.xlane.f32.xlu1 %v1141_v23  ;;  %v2099_v23 = vld [vmem:[%s2687_s15 + $0x14] ss:$8 sps:$4 sm:$0xff]  }
 0xba9   :  { %1147 = vrot.lane.b32.xlu1 %v2470_v14, %s2158_s0 }
 0xbad   :  { %1200 = vrot.lane.b32.xlu1 %v2470_v14, %s2159_s30 }
 0xc21   :  { %v1143_v18 = vpop.xlane.xlu1 %1142 }
 0xc22   :  { %2139 = vrcp.f32 %v1143_v18  ;;  %v2097_v18 = vld [vmem:[%s2687_s15 + $0x10] ss:$8 sps:$4 sm:$0xff]  }
 0xc25   :  { %v1148_v24 = vpop.permute.xlu1 %1147 }
 0xc26   :  { %2035 = vmatpush3.bf16.msra.mxu1 %v1148_v24  ;;  %v2102_v24 = vld [vmem:[%s2687_s15 + $0x4] ss:$8 sps:$4 sm:$0xff]  }
 0xc27   :  { %2040 = vmatprep.subr.bf16.mxu1 %v2151_v0 }
 0xc29   :  { %v1201_v30 = vpop.permute.xlu1 %1200 }
 0xc2a   :  { %v1208_v31 = vsel %vm233_vm3, %v1201_v30, 0 }
 0xc2f   :  { %v2140_v25 = vpop.eup %2139 }
 0xc30   :  { %v1145_v26 = vmul.f32 %v2140_v25, %v2138_v22  ;;  %v2094_v22 = vld [vmem:[%s2687_s15 + $0x20] ss:$8 sps:$4 sm:$0xff]  }
 0xc31   :  { %v2100_v25 = vld [vmem:[%s2687_s15] ss:$8 sps:$4 sm:$0xff]  }
 0xc32   :  { %v1146_v28 = vpack.c.bf16 %v1145_v26, %v1145_v26  ;;  %v2161_v26 = vmov 0  }
 0xc34   :  { %2037 = vmatmul.mubr.msk.bf16.vlgmr.msra.gmra.mxu1 %vm913_vm8, %v1146_v28 }
 0xc35   :  { %2041 = vmatpush3.bf16.xpose.msra.mxu1 %v1211_v29  ;;  %2044 = vmatprep.mubr.msk.bf16.mxu1 %vm2152_vm1, %v2151_v0 }
 0xc36   :  { %2042 = vmatprep.subr.bf16.mxu1 %v2151_v0 }
 0xc3d   :  { %2043 = vmatpush3.bf16.xpose.msra.mxu1 %v1208_v31  ;;  %v1806_v31 = vld [vmem:[%s2688_s13] ss:$0 sm:$0xff] }
 0xc44   :  { %2045 = vmatmul.mubr.msk.bf16.vlgmr.msra.gmra.mxu1 %vm233_vm3, %v1199_v32 }
 0xc45   :  { %1543 = vmatprep.mubr.bf16.mxu1 %v2161_v26  ;;  %v1833_v26 = vld [vmem:[%s2692_s18] ss:$0 sm:$0xff] }
 0xcf4   :  { %v1192_v33 = vpop.f32.mrf.mxu1 }
 0xcf6   :  { %v2038_v34 = vpop.f32.mrf.mxu1 }
 0xcf8   :  { %v1195_v35 = vpop.f32.mrf.mxu1 }
 0xcfa   :  { %v2039_v36 = vpop.f32.mrf.mxu1 }
 0xd04   :  { %v1247_v37 = vpop.f32.mrf.mxu1 }
 0xd05   :  { %v1253_v38 = vsel %vm893_vm6, %v1247_v37, -inf }
 0xd06   :  { %1254 = vmax.xlane.f32.xlu1 %v1253_v38  ;;  %v2046_v39 = vpop.f32.mrf.mxu1  ;;  %v2104_v38 = vld [vmem:[%s2690_s17 + $0x38] sm:$0xff]  }
 0xd07   :  { %v2105_v39 = vld [vmem:[%s2690_s17 + $0x70] sm:$0xff]  }
 0xd08   :  { %v1250_v41 = vpop.f32.mrf.mxu1 }
 0xd09   :  { %v2106_v41 = vld [vmem:[%s2690_s17 + $0x30] sm:$0xff]  }
 0xd0a   :  { %v2047_v43 = vpop.f32.mrf.mxu1 }
 0xd0b   :  { %v2107_v43 = vld [vmem:[%s2690_s17 + $0x68] sm:$0xff]  }
 0xd17   :  { %1265 = vrot.lane.b32.xlu1 %v2470_v14, %s2160_s21 }
 0xd1b   :  { %1317 = vrot.lane.b32.xlu1 %v1074_v5, %s2160_s21 }
 0xd8f   :  { %v1255_v44 = vpop.xlane.xlu1 %1254 }
 0xd90   :  { %v1256_v45 = vsub.f32 %v1247_v37, %v1255_v44  ;;  %v2103_v37 = vld [vmem:[%s2690_s17 + $0x78] sm:$0xff]   ;;  %v2108_v44 = vld [vmem:[%s2690_s17 + $0x28] sm:$0xff]  }
 0xd92   :  { %v1257_v46 = vmul.f32 1.442695, %v1256_v45  ;;  %v2109_v45 = vld [vmem:[%s2690_s17 + $0x60] sm:$0xff]  }
 0xd93   :  { %v1266_v14 = vpop.permute.xlu1 %1265 }
 0xd94   :  { %2141 = vpow2.f32 %v1257_v46  ;;  %v2110_v46 = vld [vmem:[%s2690_s17 + $0x20] sm:$0xff]  }
 0xd97   :  { %v1318_v62 = vpop.permute.xlu1 %1317 }
 0xd98   :  { %v1328_v1 = vsel %vm233_vm3, %v2501_v42, %v1318_v62 }
 0xda1   :  { %v2142_v47 = vpop.eup %2141 }
 0xda2   :  { %v1259_v48 = vsel %vm893_vm6, %v2142_v47, 0.0 }
 0xda3   :  { %1260 = vadd.xlane.f32.xlu0 %v1259_v48  ;;  %v2112_v48 = vld [vmem:[%s2690_s17 + $0x18] sm:$0xff]  }
 0xdb9   :  { %1267 = vrot.lane.b32.xlu0 %v2462_v9, %s2160_s21  ;;  %v2087_v9 = vld [vmem:[%s2685_s11 + $0x18] sm:$0xff]  }
 0xdbd   :  { %1321 = vrot.lane.b32.xlu0 %v1192_v33, %s2158_s0  ;;  %v1807_v33 = vld [vmem:[%s2689_s14] ss:$0 sm:$0xff] }
 0xe2c   :  { %v1261_v49 = vpop.xlane.xlu0 %1260 }
 0xe2d   :  { %2143 = vrcp.f32 %v1261_v49  ;;  %v2113_v49 = vld [vmem:[%s2690_s17 + $0x50] sm:$0xff]  }
 0xe30   :  { %v1268_v50 = vpop.permute.xlu0 %1267 }
 0xe31   :  { %v1274_v51 = vsel %vm917_vm7, %v1268_v50, 0  ;;  %v2114_v50 = vld [vmem:[%s2690_s17 + $0x10] sm:$0xff]  }
 0xe32   :  { %2049 = vmatpush3.bf16.msra.mxu0 %v1274_v51  ;;  %v2115_v51 = vld [vmem:[%s2690_s17 + $0x48] sm:$0xff]  }
 0xe33   :  { %2050 = vmatprep.subr.bf16.mxu0 %v2151_v0 }
 0xe34   :  { %v1322_v63 = vpop.permute.xlu0 %1321 }
 0xe35   :  { %v1330_v2 = vsel %vm1329_vm9, %v1328_v1, %v1322_v63 }
 0xe36   :  { %2051 = vmatpush3.bf16.msra.mxu0 %v1266_v14  ;;  %v2116_v14 = vld [vmem:[%s2690_s17 + $0x8] sm:$0xff]  }
 0xe37   :  { %2056 = vmatprep.subr.bf16.mxu0 %v2151_v0 }
 0xe3a   :  { %v2144_v52 = vpop.eup %2143 }
 0xe3b   :  { %v1263_v53 = vmul.f32 %v2144_v52, %v2142_v47  ;;  %v2111_v47 = vld [vmem:[%s2690_s17 + $0x58] sm:$0xff]   ;;  %v2117_v52 = vld [vmem:[%s2690_s17 + $0x40] sm:$0xff]  }
 0xe3d   :  { %v1264_v54 = vpack.c.bf16 %v1263_v53, %v1263_v53  ;;  %v2118_v53 = vld [vmem:[%s2690_s17] sm:$0xff]  }
 0xe3f   :  { %2053 = vmatmul.mubr.msk.bf16.vlgmr.msra.gmra.mxu0 %vm913_vm8, %v1264_v54  ;;  %v1458_v54 = vlaneseq }
 0xe40   :  { %2064 = vmatprep.mubr.msk.bf16.mxu0 %vm2152_vm1, %v2151_v0  ;;  %2057 = vmatpush3.bf16.msra.mxu0 %v2087_v9 }
 0xe41   :  { %2058 = vmatprep.subr.bf16.mxu0 %v2151_v0  ;;  %v1459_v9 = vshrl.u32 %v1458_v54, 7 }
 0xe44   :  { %2059 = vmatpush3.bf16.msra.mxu0 %v2088_v55  ;;  %v1460_v55 = vsub.s32 0, %v1459_v9 }
 0xe45   :  { %2060 = vmatprep.subr.bf16.mxu0 %v2151_v0 }
 0xe48   :  { %2061 = vmatpush3.bf16.msra.mxu0 %v2089_v56  ;;  %v1456_v56 = vld [vmem:[%s2691_s16] sm:$0x3] }
 0xe49   :  { %2062 = vmatprep.subr.bf16.mxu0 %v2151_v0 }
 0xe4c   :  { %2063 = vmatpush3.bf16.msra.mxu0 %v2090_v57  ;;  %v1464_v57 = vsub.s32 1, %v1459_v9 }
 0xe4d   :  { %1896 = vmatprep.subr.bf16.mxu0 %v2103_v37 }
 0xeff   :  { %v1310_v58 = vpop.f32.mrf.mxu0 }
 0xf00   :  { %1325 = vrot.lane.b32.xlu1 %v1310_v58, %s2156_s28  ;;  %v1461_v58 = vrot.slane %v1456_v56, %v1460_v55 }
 0xf01   :  { %v2054_v59 = vpop.f32.mrf.mxu0 }
 0xf02   :  { %v1465_v59 = vrot.slane %v1456_v56, %v1464_v57 }
 0xf03   :  { %v1313_v60 = vpop.f32.mrf.mxu0 }
 0xf05   :  { %v2055_v61 = vpop.f32.mrf.mxu0 }
 0xf72   :  { %v1326_v0 = vpop.permute.xlu1 %1325 }
 0xf73   :  { %v1332_v3 = vsel %vm1331_vm10, %v1330_v2, %v1326_v0 }
 0xf74   :  { %v1333_v4 = vpack.c.bf16 %v1332_v3, %v1332_v3 }
 0xf76   :  { %2065 = vmatmul.mubr.msk.bf16.vlgmr.msra.gmra.mxu0 %vm588_vm4, %v1333_v4 }
 0xf77   :  { %1897 = vmatpush3.bf16.msra.mxu0 %v2104_v38 }
 0xf78   :  { %1898 = vmatprep.subr.bf16.mxu0 %v2105_v39 }
 0xf7b   :  { %1899 = vmatpush3.bf16.msra.mxu0 %v2106_v41 }
 0xf7c   :  { %1900 = vmatprep.subr.bf16.mxu0 %v2107_v43 }
 0xf7f   :  { %1901 = vmatpush3.bf16.msra.mxu0 %v2108_v44 }
 0xf80   :  { %1902 = vmatprep.subr.bf16.mxu0 %v2109_v45 }
 0xf83   :  { %1903 = vmatpush3.bf16.msra.mxu0 %v2110_v46 }
 0xf84   :  { %1904 = vmatprep.subr.bf16.mxu0 %v2111_v47 }
 0xf87   :  { %1905 = vmatpush3.bf16.msra.mxu0 %v2112_v48 }
 0xf88   :  { %1906 = vmatprep.subr.bf16.mxu0 %v2113_v49 }
 0xf8b   :  { %1907 = vmatpush3.bf16.msra.mxu0 %v2114_v50 }
 0xf8c   :  { %1908 = vmatprep.subr.bf16.mxu0 %v2115_v51 }
 0xf8f   :  { %1909 = vmatpush3.bf16.msra.mxu0 %v2116_v14 }
 0xf90   :  { %1910 = vmatprep.subr.bf16.mxu0 %v2117_v52 }
 0xf93   :  { %1911 = vmatpush3.bf16.msra.mxu0 %v2118_v53 }
0x1036   :  { %v1403_v5 = vpop.f32.mrf.mxu0 }
0x1037   :  { %v1409_v7 = vadd.f32 %v1403_v5, %v2367_v40  ;;  %v2093_v40 = vld [vmem:[%s2687_s15 + $0x34] ss:$8 sps:$4 sm:$0xff]  }
0x1038   :  { %v2066_v8 = vpop.f32.mrf.mxu0  ;;  %1519 = vmatprep.subr.bf16.mxu1 %v2093_v40 }
0x1039   :  { %v2578_v10 = vadd.f32 %v1805_v6, %v1409_v7  ;;  %1520 = vmatpush1.bf16.msra.mxu1 %v2091_v20 }
0x103a   :  { %v1406_v11 = vpop.f32.mrf.mxu0  ;;  %1521 = vmatprep.subr.bf16.mxu1 %v2096_v21 }
0x103b   :  { %v1420_v42 = vsel %vm557_vm5, %v2578_v10, 0.0 }
0x103c   :  { %1421 = vadd.xlane.f32.xlu0 %v1420_v42  ;;  %v2067_v12 = vpop.f32.mrf.mxu0 }
0x103d   :  { %1522 = vmatpush1.bf16.msra.mxu1 %v2094_v22 }
0x103e   :  { %1523 = vmatprep.subr.bf16.mxu1 %v2099_v23 }
0x1041   :  { %1524 = vmatpush1.bf16.msra.mxu1 %v2097_v18 }
0x1042   :  { %1525 = vmatprep.subr.bf16.mxu1 %v2102_v24 }
0x1045   :  { %1526 = vmatpush1.bf16.msra.mxu1 %v2100_v25 }
0x10c5   :  { %v1422_v13 = vpop.xlane.xlu0 %1421 }
0x10c6   :  { %v1423_v15 = vmul.f32 0.015625, %v1422_v13 }
0x10c8   :  { %v1424_v16 = vsub.f32 %v2578_v10, %v1423_v15 }
0x10ca   :  { %v1425_v17 = vmul.f32 %v1424_v16, %v1424_v16 }
0x10cc   :  { %v1426_v19 = vsel %vm557_vm5, %v1425_v17, 0.0 }
0x10cd   :  { %1427 = vadd.xlane.f32.xlu1 %v1426_v19 }
0x1156   :  { %v1428_v27 = vpop.xlane.xlu1 %1427 }
0x1157   :  { %v1429_v28 = vmul.f32 0.015625, %v1428_v27 }
0x1159   :  { %v1430_v29 = vadd.f32 1e-05, %v1429_v28 }
0x115b   :  { %2145 = vrsqrt.f32 %v1430_v29 }
0x1168   :  { %v2146_v30 = vpop.eup %2145 }
0x1169   :  { %v1432_v32 = vmul.f32 %v2146_v30, %v1424_v16 }
0x116b   :  { %v1439_v34 = vmul.f32 %v1806_v31, %v1432_v32 }
0x116d   :  { %v1446_v35 = vadd.f32 %v1807_v33, %v1439_v34 }
0x116f   :  { %v1447_v36 = vpack.c.bf16 %v1446_v35, %v1446_v35 }
0x1171   :  { %1816 = vmatmul.mubr.msk.bf16.vlgmr.msra.gmra.mxu1 %vm588_vm4, %v1447_v36 }
0x1231   :  { %v1545_v60 = vpop.f32.mrf.mxu1 }
0x1232   :  { %v1546_v61 = vadd.f32 %v1545_v60, %v1461_v58 }
0x1233   :  { %v1547_v62 = vpop.f32.mrf.mxu1 }
0x1234   :  { %v1552_v63 = vmul.f32 %v1546_v61, %v1546_v61  ;;  %v1548_v1 = vadd.f32 %v1547_v62, %v1465_v59 }
0x1235   :  { %v1549_v2 = vpop.f32.mrf.mxu1 }
0x1236   :  { %v1554_v0 = vmul.f32 %v1552_v63, %v1546_v61  ;;  %v1553_v3 = vmul.f32 %v1548_v1, %v1548_v1 }
0x1237   :  { %v1550_v4 = vpop.f32.mrf.mxu1 }
0x1238   :  { %v1556_v5 = vmul.f32 0.044715, %v1554_v0  ;;  %v1555_v6 = vmul.f32 %v1553_v3, %v1548_v1 }
0x123a   :  { %v1558_v7 = vadd.f32 %v1556_v5, %v1546_v61  ;;  %v1557_v8 = vmul.f32 0.044715, %v1555_v6 }
0x123c   :  { %v1560_v11 = vmul.f32 0.7978846, %v1558_v7  ;;  %v1559_v42 = vadd.f32 %v1557_v8, %v1548_v1 }
0x123e   :  { %2147 = vtanh.f32 %v1560_v11  ;;  %v1561_v12 = vmul.f32 0.7978846, %v1559_v42 }
0x1240   :  { %2149 = vtanh.f32 %v1561_v12 }
0x124b   :  { %v2148_v13 = vpop.eup %2147 }
0x124c   :  { %v1564_v15 = vadd.f32 1.0, %v2148_v13 }
0x124d   :  { %v2150_v16 = vpop.eup %2149 }
0x124e   :  { %v1565_v17 = vadd.f32 1.0, %v2150_v16  ;;  %v1566_v19 = vmul.f32 0.5, %v1564_v15 }
0x1250   :  { %v1567_v40 = vmul.f32 0.5, %v1565_v17  ;;  %v1568_v20 = vmul.f32 %v1566_v19, %v1546_v61 }
0x1252   :  { %v1569_v21 = vmul.f32 %v1567_v40, %v1548_v1  ;;  %v1570_v23 = vpack.c.bf16 %v1568_v20, %v1568_v20 }
0x1254   :  { %v1571_v22 = vpack.c.bf16 %v1569_v21, %v1569_v21 }
0x1256   :  { %1732 = vmatprep.mubr.bf16.mxu0 %v1571_v22 }
0x1257   :  { %1733 = vmatmul.mubr.bf16.vlgmr.msra.gmra.mxu0 %v1570_v23 }
0x1317   :  { %v1912_v18 = vpop.f32.mrf.mxu0 }
0x1319   :  { %v1913_v24 = vpop.f32.mrf.mxu0 }
0x131a   :  { %v1914_v25 = vadd.f32 %v1913_v24, %v1912_v18 }
0x131b   :  { %v1915_v27 = vpop.f32.mrf.mxu0 }
0x131c   :  { %v1740_v28 = vadd.f32 %v1914_v25, %v2578_v10 }
0x131d   :  { %v1916_v29 = vpop.f32.mrf.mxu0 }
0x131e   :  { %v1748_v30 = vadd.f32 %v1833_v26, %v1740_v28 }
0x1320   :  { %1749 = vst.msk [vmem:[%s2693_s19] sm:$0x3] %vm557_vm5, %v1748_v30 }

// kernel: transformer_classifier_forward.5
= control target key start
LH: loop header
LB: loop body
LE: loop exit
PB: predicated region body
PF: predicated region fallthrough
CT: control target
= control target key end

     0   :  { %s6508_s6 = smov 1   ;;  %s6509_s10 = smov 2   ;;  %s7583_s0 = inlined_call_operand.smem [shape: u32[41], index: -1, kind: input, shape index: {}] }
   0x1   :  { %s6575_s5 = sld [smem:[%s7583_s0]]   ;;  %s6510_s14 = smov 3  }
   0x2   :  { %s6580_s9 = sld [smem:[%s7583_s0 + %s6508_s6]]   ;;  %s6511_s18 = smov 4  }
   0x3   :  { %s6585_s13 = sld [smem:[%s7583_s0 + %s6509_s10]]   ;;  %s6512_s22 = smov 5  }
   0x4   :  { %s6590_s17 = sld [smem:[%s7583_s0 + %s6510_s14]]   ;;  %s6513_s26 = smov 6  }
   0x5   :  { %s6595_s21 = sld [smem:[%s7583_s0 + %s6511_s18]]   ;;  %s6514_s30 = smov 7  }
   0x6   :  { %s6600_s25 = sld [smem:[%s7583_s0 + %s6512_s22]]   ;;  %s6515_s4 = smov 8  }
   0x7   :  { %s6605_s29 = sld [smem:[%s7583_s0 + %s6513_s26]]   ;;  %s6516_s10 = smov 9  }
   0x8   :  { %s6610_s3 = sld [smem:[%s7583_s0 + %s6514_s30]]   ;;  %s6517_s15 = smov 10  }
   0x9   :  { %s6615_s8 = sld [smem:[%s7583_s0 + %s6515_s4]]   ;;  %s6518_s20 = smov 11  }
   0xa   :  { %7591 = sst [smem:[#allocation17_spill]] %s6590_s17  ;;  %s6519_s26 = smov 12  }
   0xb   :  { %7592 = sst [smem:[#allocation18_spill]] %s6595_s21  ;;  %s6520_s1 = smov 13  }
   0xc   :  { %7593 = sst [smem:[#allocation19_spill]] %s6600_s25  ;;  %s6521_s7 = smov 14  }
   0xd   :  { %7594 = sst [smem:[#allocation20_spill]] %s6605_s29  ;;  %s6523_s22 = smov 16  }
   0xe   :  { %7595 = sst [smem:[#allocation21_spill]] %s6610_s3  ;;  %s6524_s28 = smov 17  }
   0xf   :  { %7596 = sst [smem:[#allocation22_spill]] %s6615_s8 }
  0x10   :  { %s6620_s14 = sld [smem:[%s7583_s0 + %s6516_s10]]  }
  0x11   :  { %s6625_s19 = sld [smem:[%s7583_s0 + %s6517_s15]]   ;;  %s6522_s15 = smov 15  }
  0x12   :  { %s6630_s24 = sld [smem:[%s7583_s0 + %s6518_s20]]  }
  0x13   :  { %s6635_s30 = sld [smem:[%s7583_s0 + %s6519_s26]]  }
  0x14   :  { %s6640_s6 = sld [smem:[%s7583_s0 + %s6520_s1]]  }
  0x15   :  { %s6645_s12 = sld [smem:[%s7583_s0 + %s6521_s7]]   ;;  %s6525_s7 = smov 18  }
  0x16   :  { %7597 = sst [smem:[#allocation23_spill]] %s6620_s14 }
  0x17   :  { %s6650_s20 = sld [smem:[%s7583_s0 + %s6522_s15]]   ;;  %s6526_s15 = smov 19  }
  0x18   :  { %7598 = sst [smem:[#allocation24_spill]] %s6630_s24 }
  0x19   :  { %7599 = sst [smem:[#allocation25_spill]] %s6635_s30 }
  0x1a   :  { %7600 = sst [smem:[#allocation26_spill]] %s6640_s6 }
  0x1b   :  { %7601 = sst [smem:[#allocation27_spill]] %s6645_s12 }
  0x1c   :  { %s6655_s27 = sld [smem:[%s7583_s0 + %s6523_s22]]   ;;  %s6527_s22 = smov 20  }
  0x1d   :  { %7602 = sst [smem:[#allocation28_spill]] %s6650_s20 }
  0x1e   :  { %s6660_s4 = sld [smem:[%s7583_s0 + %s6524_s28]]   ;;  %s6528_s28 = smov 21  }
  0x1f   :  { %s6665_s17 = sld [smem:[%s7583_s0 + %s6525_s7]]   ;;  %s6529_s7 = smov 22  }
  0x20   :  { %s6670_s20 = sld [smem:[%s7583_s0 + %s6526_s15]]   ;;  %s6530_s15 = smov 23  }
  0x21   :  { %s6675_s12 = sld [smem:[%s7583_s0 + %s6527_s22]]   ;;  %s6531_s22 = smov 24  }
  0x22   :  { %7603 = sst [smem:[#allocation29_spill]] %s6655_s27 }
  0x24   :  { %7604 = sst [smem:[#allocation30_spill]] %s6660_s4 }
  0x25   :  { %7605 = sst [smem:[#allocation31_spill]] %s6665_s17 }
  0x26   :  { %7606 = sst [smem:[#allocation32_spill]] %s6670_s20 }
  0x27   :  { %7607 = sst [smem:[#allocation33_spill]] %s6675_s12 }
  0x28   :  { %s6680_s4 = sld [smem:[%s7583_s0 + %s6528_s28]]   ;;  %s6532_s28 = smov 25  }
  0x29   :  { %s6685_s17 = sld [smem:[%s7583_s0 + %s6529_s7]]   ;;  %s6533_s7 = smov 26  }
  0x2a   :  { %s6690_s20 = sld [smem:[%s7583_s0 + %s6530_s15]]   ;;  %s6534_s15 = smov 27  }
  0x2b   :  { %s6695_s12 = sld [smem:[%s7583_s0 + %s6531_s22]]   ;;  %s6535_s22 = smov 28  }
  0x2e   :  { %7608 = sst [smem:[#allocation34_spill]] %s6680_s4 }
  0x2f   :  { %7609 = sst [smem:[#allocation35_spill]] %s6685_s17 }
  0x30   :  { %7610 = sst [smem:[#allocation36_spill]] %s6690_s20 }
  0x31   :  { %7611 = sst [smem:[#allocation37_spill]] %s6695_s12 }
  0x32   :  { %s6700_s4 = sld [smem:[%s7583_s0 + %s6532_s28]]   ;;  %s6536_s28 = smov 29  }
  0x33   :  { %s6705_s17 = sld [smem:[%s7583_s0 + %s6533_s7]]   ;;  %s6537_s7 = smov 30  }
  0x34   :  { %s6710_s20 = sld [smem:[%s7583_s0 + %s6534_s15]]   ;;  %s6538_s15 = smov 31  }
  0x35   :  { %s6715_s12 = sld [smem:[%s7583_s0 + %s6535_s22]]   ;;  %s6539_s22 = smov 32  }
  0x36   :  { %s6725_s27 = sld [smem:[%s7583_s0 + %s6537_s7]]   ;;  %s6541_s7 = smov 34  }
  0x37   :  { %s6735_s6 = sld [smem:[%s7583_s0 + %s6539_s22]]   ;;  %s6543_s22 = smov 36  }
  0x38   :  { %7612 = sst [smem:[#allocation38_spill]] %s6700_s4 }
  0x39   :  { %s6720_s4 = sld [smem:[%s7583_s0 + %s6536_s28]]   ;;  %s6540_s28 = smov 33  }
  0x3a   :  { %7613 = sst [smem:[#allocation39_spill]] %s6710_s20 }
  0x3b   :  { %7614 = sst [smem:[#allocation40_spill]] %s6715_s12 }
  0x3c   :  { %s6730_s20 = sld [smem:[%s7583_s0 + %s6538_s15]]   ;;  %s6542_s15 = smov 35  }
  0x3d   :  { %7617 = sst [smem:[#allocation43_spill]] %s6735_s6 }
  0x3e   :  { %s6745_s24 = sld [smem:[%s7583_s0 + %s6541_s7]]   ;;  %s6545_s7 = smov 38  }
  0x3f   :  { %7615 = sst [smem:[#allocation41_spill]] %s6720_s4 }
  0x40   :  { %s6740_s4 = sld [smem:[%s7583_s0 + %s6540_s28]]   ;;  %s6544_s28 = smov 37  }
  0x41   :  { %s6755_s6 = sld [smem:[%s7583_s0 + %s6543_s22]]   ;;  %s6547_s22 = smov 40  }
  0x42   :  { %7616 = sst [smem:[#allocation42_spill]] %s6730_s20 }
  0x43   :  { %s6750_s20 = sld [smem:[%s7583_s0 + %s6542_s15]]   ;;  %s6546_s15 = smov 39  }
  0x44   :  { %7619 = sst [smem:[#allocation45_spill]] %s6745_s24 }
  0x45   :  { %s6765_s24 = sld [smem:[%s7583_s0 + %s6545_s7]]  }
  0x46   :  { %7618 = sst [smem:[#allocation44_spill]] %s6740_s4 }
  0x47   :  { %7621 = sst [smem:[#allocation47_spill]] %s6755_s6 }
  0x48   :  { %s6760_s4 = sld [smem:[%s7583_s0 + %s6544_s28]]  }
  0x49   :  { %7620 = sst [smem:[#allocation46_spill]] %s6750_s20 }
  0x4a   :  { %s6770_s20 = sld [smem:[%s7583_s0 + %s6546_s15]]  }
  0x4b   :  { %7623 = sst [smem:[#allocation49_spill]] %s6765_s24 }
  0x4c   :  { %s6775_s6 = sld [smem:[%s7583_s0 + %s6547_s22]]  }
  0x4e   :  { %7622 = sst [smem:[#allocation48_spill]] %s6760_s4 }
  0x50   :  { %7624 = sst [smem:[#allocation50_spill]] %s6770_s20 }
  0x52   :  { %7625 = sst [smem:[#allocation51_spill]] %s6775_s6 }
  0x53   :  { %86 = vsyncpa [#allocation3], 0 }
  0x54   :  { %88 = vsyncpa [#allocation3 + $0x1], 0 }
  0x55   :  { %89 = vsyncpa [#allocation5], 0 }
  0x56   :  { %91 = vsyncpa [#allocation5 + $0x1], 0 }
  0x57   :  { %92 = vsyncpa [#allocation8], 0 }
  0x58   :  { %94 = vsyncpa [#allocation8 + $0x1], 0 }
  0x59   :  { %95 = vsyncpa [#allocation11], 0 }
  0x5a   :  { %97 = vsyncpa [#allocation11 + $0x1], 0  ;;  %s6777_s28 = smov 0   ;;  %s6779_s1 = smov 0  }
  0x5b   :  { %s6781_s2 = smov 0   ;;  %s6783_s7 = smov 0  }
  0x5c LB: > { %s7626_s12 = sld [smem:[#allocation40_spill]]  ;;  %s6796_s0 = sadd.s32 4294967295, %s6506_s7   ;;  %s6502_s2 = sphi %s6781_s2, %s7676_s2   ;;  %s6498_s1 = sphi %s6779_s1, %s7678_s1   ;;  %s6494_s28 = sphi %s6777_s28, %s7677_s28   ;;  %s6506_s7 = sphi %s6783_s7, %s7674_s7  }
  0x5d   : > { %s7627_s30 = sld [smem:[#allocation25_spill]]  ;;  %s6799_s10 = sadd.s32 1, %s6506_s7  }
  0x5e   : > { %s7628_s8 = sld [smem:[#allocation22_spill]]  ;;  %s154_s11 = ssub.s32 %s6506_s7, %s6799_s10 }
  0x5f   : > { %7629 = sst [smem:[#allocation52_spill]] %s6502_s2  ;;  %s157_s15 = sadd.s32 1, %s6502_s2 }
  0x60   : > { %7630 = sst [smem:[#allocation53_spill]] %s6799_s10  ;;  %p155_p0 = scmp.eq.s32.totalorder %s154_s11, 0 }
  0x61   : > { %p164_p1 = scmp.ne.s32.totalorder %s6502_s2, %s6498_s1  ;;  %p165_p2 = scmp.eq.s32.totalorder %s6506_s7, 0 }
  0x62   : > { %p170_p3 = scmp.ne.s32.totalorder %s6498_s1, %s6494_s28  ;;  %p171_p5 = scmp.eq.s32.totalorder %s6796_s0, 0 }
  0x63   : > { %s6809_s16 = scalar_select %p155_p0, %s6502_s2, %s157_s15  }
  0x64   : > { %p166_p4 = por %p165_p2, %p164_p1  ;;  %p6006_p6 = scmp.lt.s32.totalorder %s6506_s7, 8 }
  0x65   : > { %7631 = sst [smem:[#allocation54_spill]] %s6809_s16  ;;  %p6813_p7 = por %p171_p5, %p170_p3 }
  0x66   : > { %s6818_s22 = sand.u32 1, %s6502_s2   ;;  %p6820_p8 = pnand %p6006_p6, %p166_p4 }
  0x67   : > { %s7632_s18 = scalar_select %p6813_p7, 1, 0 }
  0x68   : > { %s6825_s26 = sand.u32 1, %s6506_s7   ;;  %s6828_s28 = sshll.u32 %s6818_s22, 5 }
  0x69   : > { %s6831_s11 = sshll.u32 %s6506_s7, 9  ;;  %s1244_s15 = scalar_lea.vmem [#allocation4], %s6828_s28 }
  0x6a   : > { %s1251_s16 = sshll.u32 %s1244_s15, 4  ;;  %s6836_s2 = scalar_lea.hbm %s7628_s8, %s6831_s11  ;;  %s6838_s16 = int_to_ptr.vmem [resolvable:$true] %s1251_s16 }
  0x6b   : > { %s6264_s6 = scalar_lea.hbm %s6836_s2, 512  ;;  %p6845_p10 = pneg %p6820_p8 }
  0x6c   : > { %p6265_p9 = scmp.ne.s32.totalorder %s6836_s2, %s6264_s6  ;;  %s6269_s15 = scalar_lea.hbm %s7628_s8, 4096 }
  0x6d   : > { %p6270_p13 = scmp.lt.s32.totalorder %s6836_s2, %s7628_s8  ;;  %p6271_p0 = scmp.lt.s32.totalorder %s6269_s15, %s6264_s6 }
  0x6e   : > { %p6267_p11 = pnand %p6845_p10, %p6265_p9 }
  0x6f   : > { %p6272_p1 = por %p6271_p0, %p6270_p13 }
  0x70   : > { %p6268_p12 = pneg %p6267_p11 }
  0x72   : > { %p6273_p2 = pnand %p6272_p1, %p6268_p12 }
  0x74   : > { %6276 = shalt.err (!%p6273_p2)
}
  0x75   : > { %s6277_s10 = scalar_lea.vmem %s6838_s16, 512  ;;  %s6548_s24 = smov [#allocation4]  }
  0x76   : > { %p6278_p3 = scmp.ne.s32.totalorder %s6838_s16, %s6277_s10  ;;  %s6282_s4 = sshll.u32 %s6548_s24, 4  ;;  %s6283_s4 = int_to_ptr.vmem [resolvable:$false] %s6282_s4 }
  0x77   : > { %s6284_s14 = scalar_lea.vmem %s6283_s4, 1024  ;;  %p6285_p6 = scmp.lt.s32.totalorder %s6838_s16, %s6283_s4 }
  0x78   : > { %p6280_p4 = pnand %p6278_p3, %p6845_p10  ;;  %p6286_p9 = scmp.lt.s32.totalorder %s6284_s14, %s6277_s10 }
  0x7a   : > { %p6281_p5 = pneg %p6280_p4  ;;  %p6287_p11 = por %p6286_p9, %p6285_p6 }
  0x7c   : > { %p6288_p7 = pnand %p6287_p11, %p6281_p5 }
  0x7e   : > { %6291 = shalt.err (!%p6288_p7)
}
  0x7f   : > { %s6549_s6 = smov 64   ;;  %s6550_s24 = smov 4  }
  0x80   : > { %s7635_s14 = scalar_lea.sflag [#allocation5], %s6825_s26  ;;  %p5447_p7 = scmp.ge.s32.totalorder %s6506_s7, 1 }
  0x81   : > { %5990 = dma.hbm_to_vmem [thread:$0]  (!%p6820_p8), %s6836_s2, 512, %s6838_s16, %s7635_s14, %s6549_s6, %s6549_s6, %s6550_s24  }
  0x82   : > { %p1530_p12 = scmp.lt.s32.totalorder %s6506_s7, 9  ;;  %s6876_s10 = scalar_lea.hbm %s7627_s30, %s6831_s11 }
  0x83   : > { %s1298_s15 = scalar_lea.vmem [#allocation7], %s6828_s28  ;;  %s6292_s29 = scalar_lea.hbm %s6876_s10, 512 }
  0x84   : > { %p6870_p13 = pnand %p5447_p7, %p1530_p12  ;;  %s1305_s8 = sshll.u32 %s1298_s15, 4  ;;  %s6879_s8 = int_to_ptr.vmem [resolvable:$true] %s1305_s8 }
  0x85   : > { %p6293_p0 = scmp.ne.s32.totalorder %s6876_s10, %s6292_s29  ;;  %s6297_s2 = scalar_lea.hbm %s7627_s30, 4096 }
  0x86   : > { %s7636_s4 = scalar_select %p6870_p13, 1, 0 }
  0x87   : > { %p6295_p1 = pnand %p6293_p0, %p6845_p10  ;;  %p6298_p3 = scmp.lt.s32.totalorder %s6876_s10, %s7627_s30 }
  0x88   : > { %p6299_p4 = scmp.lt.s32.totalorder %s6297_s2, %s6292_s29 }
  0x89   : > { %p6296_p2 = pneg %p6295_p1 }
  0x8a   : > { %p6300_p5 = por %p6299_p4, %p6298_p3 }
  0x8c   : > { %p6301_p6 = pnand %p6300_p5, %p6296_p2 }
  0x8e   : > { %6304 = shalt.err (!%p6301_p6)
}
  0x8f   : > { %s6305_s16 = scalar_lea.vmem %s6879_s8, 512  ;;  %s6551_s14 = smov [#allocation7]  }
  0x90   : > { %p6306_p9 = scmp.ne.s32.totalorder %s6879_s8, %s6305_s16  ;;  %s6310_s15 = sshll.u32 %s6551_s14, 4  ;;  %s6311_s15 = int_to_ptr.vmem [resolvable:$false] %s6310_s15 }
  0x91   : > { %s6312_s3 = scalar_lea.vmem %s6311_s15, 1024  ;;  %p6313_p12 = scmp.lt.s32.totalorder %s6879_s8, %s6311_s15 }
  0x92   : > { %p6308_p11 = pnand %p6306_p9, %p6845_p10  ;;  %p6314_p0 = scmp.lt.s32.totalorder %s6312_s3, %s6305_s16 }
  0x94   : > { %p6309_p7 = pneg %p6308_p11  ;;  %p6315_p1 = por %p6314_p0, %p6313_p12 }
  0x96   : > { %p6316_p13 = pnand %p6315_p1, %p6309_p7 }
  0x98   : > { %6319 = shalt.err (!%p6316_p13)
}
  0x99   : > { %s7637_s29 = scalar_lea.sflag [#allocation8], %s6825_s26  ;;  %s6905_s3 = scalar_lea.hbm %s7626_s12, %s6831_s11 }
  0x9a   : > { %5996 = dma.hbm_to_vmem [thread:$0]  (!%p6820_p8), %s6876_s10, 512, %s6879_s8, %s7637_s29, %s6549_s6, %s6549_s6, %s6550_s24  }
  0x9b   : > { %s1429_s2 = scalar_lea.vmem [#allocation10], %s6828_s28  ;;  %s1426_s14 = scalar_lea.sflag [#allocation11], %s6825_s26 }
  0x9c   : > { %s1436_s16 = sshll.u32 %s1429_s2, 4  ;;  %s6320_s15 = scalar_lea.hbm %s6905_s3, 512  ;;  %s6908_s16 = int_to_ptr.vmem [resolvable:$true] %s1436_s16 }
  0x9d   : > { %p6321_p13 = scmp.ne.s32.totalorder %s6905_s3, %s6320_s15  ;;  %s6325_s30 = scalar_lea.hbm %s7626_s12, 4096 }
  0x9e   : > { %p6326_p4 = scmp.lt.s32.totalorder %s6905_s3, %s7626_s12  ;;  %p6327_p5 = scmp.lt.s32.totalorder %s6325_s30, %s6320_s15 }
  0x9f   : > { %p6323_p2 = pnand %p6321_p13, %p6845_p10 }
  0xa0   : > { %p6328_p6 = por %p6327_p5, %p6326_p4 }
  0xa1   : > { %p6324_p3 = pneg %p6323_p2 }
  0xa3   : > { %p6329_p9 = pnand %p6328_p6, %p6324_p3 }
  0xa5   : > { %6332 = shalt.err (!%p6329_p9)
}
  0xa6   : > { %s6333_s8 = scalar_lea.vmem %s6908_s16, 512  ;;  %s6552_s10 = smov [#allocation10]  }
  0xa7   : > { %p6334_p11 = scmp.ne.s32.totalorder %s6908_s16, %s6333_s8  ;;  %s6338_s29 = sshll.u32 %s6552_s10, 4  ;;  %s6339_s29 = int_to_ptr.vmem [resolvable:$false] %s6338_s29 }
  0xa8   : > { %s6340_s2 = scalar_lea.vmem %s6339_s29, 1024  ;;  %p6341_p0 = scmp.lt.s32.totalorder %s6908_s16, %s6339_s29 }
  0xa9   : > { %p6336_p7 = pnand %p6334_p11, %p6845_p10  ;;  %p6342_p1 = scmp.lt.s32.totalorder %s6340_s2, %s6333_s8 }
  0xab   : > { %p6337_p12 = pneg %p6336_p7  ;;  %p6343_p13 = por %p6342_p1, %p6341_p0 }
  0xad   : > { %p6344_p2 = pnand %p6343_p13, %p6337_p12 }
  0xaf   : > { %6347 = shalt.err (!%p6344_p2)
}
  0xb0   : > { %6002 = dma.hbm_to_vmem [thread:$0]  (!%p6820_p8), %s6905_s3, 512, %s6908_s16, %s1426_s14, %s6549_s6, %s6549_s6, %s6550_s24  }
  0xb1   : > { %s5427_s30 = sshll.u32 %s6818_s22, 3  ;;  %s5428_s15 = sshll.u32 %s6506_s7, 7 }
  0xb2   : > { %s6935_s8 = scalar_lea.hbm %s6585_s13, %s5428_s15  ;;  %s1196_s10 = scalar_lea.vmem [#allocation2], %s5427_s30 }
  0xb3   : > { %s1203_s29 = sshll.u32 %s1196_s10, 4  ;;  %s6939_s2 = scalar_lea.hbm %s6625_s19, %s6831_s11  ;;  %s1204_s29 = int_to_ptr.vmem [resolvable:$true] %s1203_s29 }
  0xb4   : > { %s1193_s12 = scalar_lea.sflag [#allocation3], %s6818_s22  ;;  %s6348_s25 = scalar_lea.hbm %s6935_s8, 128 }
  0xb5   : > { %p6349_p3 = scmp.ne.s32.totalorder %s6935_s8, %s6348_s25  ;;  %s6353_s21 = scalar_lea.hbm %s6585_s13, 1024 }
  0xb6   : > { %p6354_p6 = scmp.lt.s32.totalorder %s6935_s8, %s6585_s13  ;;  %p6355_p9 = scmp.lt.s32.totalorder %s6353_s21, %s6348_s25 }
  0xb7   : > { %p6351_p4 = pnand %p6349_p3, %p6845_p10 }
  0xb8   : > { %p6356_p11 = por %p6355_p9, %p6354_p6 }
  0xb9   : > { %p6352_p5 = pneg %p6351_p4 }
  0xbb   : > { %p6357_p7 = pnand %p6356_p11, %p6352_p5 }
  0xbd   : > { %6360 = shalt.err (!%p6357_p7)
}
  0xbe   : > { %s6361_s7 = scalar_lea.vmem %s1204_s29, 128  ;;  %s6553_s3 = smov [#allocation2]  }
  0xbf   : > { %p6362_p12 = scmp.ne.s32.totalorder %s1204_s29, %s6361_s7  ;;  %s6366_s16 = sshll.u32 %s6553_s3, 4  ;;  %s6367_s16 = int_to_ptr.vmem [resolvable:$false] %s6366_s16 }
  0xc0   : > { %s6368_s22 = scalar_lea.vmem %s6367_s16, 256  ;;  %p6369_p13 = scmp.lt.s32.totalorder %s1204_s29, %s6367_s16 }
  0xc1   : > { %p6364_p0 = pnand %p6362_p12, %p6845_p10  ;;  %p6370_p2 = scmp.lt.s32.totalorder %s6368_s22, %s6361_s7 }
  0xc3   : > { %p6365_p1 = pneg %p6364_p0  ;;  %p6371_p3 = por %p6370_p2, %p6369_p13 }
  0xc5   : > { %p6372_p4 = pnand %p6371_p3, %p6365_p1 }
  0xc7   : > { %6375 = shalt.err (!%p6372_p4)
}
  0xc8   : > { %5987 = dma.hbm_to_vmem [thread:$0]  (!%p6820_p8), %s6935_s8, 128, %s1204_s29, %s1193_s12  }
  0xc9   : > { %s1271_s21 = scalar_lea.vmem [#allocation6], %s6828_s28  ;;  %s6959_s30 = scalar_lea.hbm %s6705_s17, %s6831_s11 }
  0xca   : > { %s1278_s25 = sshll.u32 %s1271_s21, 4  ;;  %s6376_s15 = scalar_lea.hbm %s6939_s2, 512  ;;  %s6955_s25 = int_to_ptr.vmem [resolvable:$true] %s1278_s25 }
  0xcb   : > { %p6377_p5 = scmp.ne.s32.totalorder %s6939_s2, %s6376_s15  ;;  %s6381_s10 = scalar_lea.hbm %s6625_s19, 4096 }
  0xcc   : > { %p6382_p11 = scmp.lt.s32.totalorder %s6939_s2, %s6625_s19  ;;  %p6383_p7 = scmp.lt.s32.totalorder %s6381_s10, %s6376_s15 }
  0xcd   : > { %p6379_p6 = pnand %p6377_p5, %p6845_p10 }
  0xce   : > { %p6384_p12 = por %p6383_p7, %p6382_p11 }
  0xcf   : > { %p6380_p9 = pneg %p6379_p6 }
  0xd1   : > { %p6385_p0 = pnand %p6384_p12, %p6380_p9 }
  0xd3   : > { %6388 = shalt.err (!%p6385_p0)
}
  0xd4   : > { %s6389_s12 = scalar_lea.vmem %s6955_s25, 512  ;;  %s6554_s8 = smov [#allocation6]  }
  0xd5   : > { %p6390_p1 = scmp.ne.s32.totalorder %s6955_s25, %s6389_s12  ;;  %s6394_s29 = sshll.u32 %s6554_s8, 4  ;;  %s6395_s29 = int_to_ptr.vmem [resolvable:$false] %s6394_s29 }
  0xd6   : > { %s6396_s7 = scalar_lea.vmem %s6395_s29, 1024  ;;  %p6397_p3 = scmp.lt.s32.totalorder %s6955_s25, %s6395_s29 }
  0xd7   : > { %p6392_p13 = pnand %p6390_p1, %p6845_p10  ;;  %p6398_p4 = scmp.lt.s32.totalorder %s6396_s7, %s6389_s12 }
  0xd9   : > { %p6393_p2 = pneg %p6392_p13  ;;  %p6399_p5 = por %p6398_p4, %p6397_p3 }
  0xdb   : > { %p6400_p6 = pnand %p6399_p5, %p6393_p2 }
  0xdd   : > { %6403 = shalt.err (!%p6400_p6)
}
  0xde   : > { %s7638_s3 = scalar_lea.sflag [#allocation5], %s6825_s26  ;;  %s1402_s16 = scalar_lea.vmem [#allocation9], %s6828_s28 }
  0xdf   : > { %5993 = dma.hbm_to_vmem [thread:$0]  (!%p6820_p8), %s6939_s2, 512, %s6955_s25, %s7638_s3, %s6549_s6, %s6549_s6, %s6550_s24  }
  0xe0   : > { %s1409_s22 = sshll.u32 %s1402_s16, 4  ;;  %s6987_s21 = scalar_lea.hbm %s6725_s27, %s6831_s11  ;;  %s6983_s22 = int_to_ptr.vmem [resolvable:$true] %s1409_s22 }
  0xe1   : > { %s6404_s15 = scalar_lea.hbm %s6959_s30, 512  ;;  %s6409_s10 = scalar_lea.hbm %s6705_s17, 4096 }
  0xe2   : > { %p6405_p9 = scmp.ne.s32.totalorder %s6959_s30, %s6404_s15  ;;  %p6410_p12 = scmp.lt.s32.totalorder %s6959_s30, %s6705_s17 }
  0xe3   : > { %p6411_p0 = scmp.lt.s32.totalorder %s6409_s10, %s6404_s15 }
  0xe4   : > { %p6407_p11 = pnand %p6405_p9, %p6845_p10 }
  0xe5   : > { %p6412_p1 = por %p6411_p0, %p6410_p12 }
  0xe6   : > { %p6408_p7 = pneg %p6407_p11 }
  0xe8   : > { %p6413_p13 = pnand %p6412_p1, %p6408_p7 }
  0xea   : > { %6416 = shalt.err (!%p6413_p13)
}
  0xeb   : > { %s6417_s2 = scalar_lea.vmem %s6983_s22, 512  ;;  %s6555_s11 = smov [#allocation9]  }
  0xec   : > { %p6418_p2 = scmp.ne.s32.totalorder %s6983_s22, %s6417_s2  ;;  %s6422_s25 = sshll.u32 %s6555_s11, 4  ;;  %s6423_s25 = int_to_ptr.vmem [resolvable:$false] %s6422_s25 }
  0xed   : > { %s6424_s12 = scalar_lea.vmem %s6423_s25, 1024  ;;  %p6425_p5 = scmp.lt.s32.totalorder %s6983_s22, %s6423_s25 }
  0xee   : > { %p6420_p3 = pnand %p6418_p2, %p6845_p10  ;;  %p6426_p6 = scmp.lt.s32.totalorder %s6424_s12, %s6417_s2 }
  0xf0   : > { %p6421_p4 = pneg %p6420_p3  ;;  %p6427_p9 = por %p6426_p6, %p6425_p5 }
  0xf2   : > { %p6428_p11 = pnand %p6427_p9, %p6421_p4 }
  0xf4   : > { %6431 = shalt.err (!%p6428_p11)
}
  0xf5   : > { %s7639_s8 = scalar_lea.sflag [#allocation8], %s6825_s26  ;;  %s1456_s29 = scalar_lea.vmem [#allocation12], %s6828_s28 }
  0xf6   : > { %5999 = dma.hbm_to_vmem [thread:$0]  (!%p6820_p8), %s6959_s30, 512, %s6983_s22, %s7639_s8, %s6549_s6, %s6549_s6, %s6550_s24  }
  0xf7   : > { %s1463_s7 = sshll.u32 %s1456_s29, 4  ;;  %s6432_s3 = scalar_lea.hbm %s6987_s21, 512  ;;  %s1464_s7 = int_to_ptr.vmem [resolvable:$true] %s1463_s7 }
  0xf8   : > { %p6433_p7 = scmp.ne.s32.totalorder %s6987_s21, %s6432_s3  ;;  %s6437_s16 = scalar_lea.hbm %s6725_s27, 4096 }
  0xf9   : > { %p6438_p1 = scmp.lt.s32.totalorder %s6987_s21, %s6725_s27  ;;  %p6439_p13 = scmp.lt.s32.totalorder %s6437_s16, %s6432_s3 }
  0xfa   : > { %p6435_p12 = pnand %p6433_p7, %p6845_p10 }
  0xfb   : > { %p6440_p2 = por %p6439_p13, %p6438_p1 }
  0xfc   : > { %p6436_p0 = pneg %p6435_p12 }
  0xfe   : > { %p6441_p3 = pnand %p6440_p2, %p6436_p0 }
 0x100   : > { %6444 = shalt.err (!%p6441_p3)
}
 0x101   : > { %s6445_s15 = scalar_lea.vmem %s1464_s7, 512  ;;  %s6556_s28 = smov [#allocation12]  }
 0x102   : > { %p6446_p4 = scmp.ne.s32.totalorder %s1464_s7, %s6445_s15  ;;  %s6450_s30 = sshll.u32 %s6556_s28, 4  ;;  %s6451_s30 = int_to_ptr.vmem [resolvable:$false] %s6450_s30 }
 0x103   : > { %s6452_s22 = scalar_lea.vmem %s6451_s30, 1024  ;;  %p6453_p9 = scmp.lt.s32.totalorder %s1464_s7, %s6451_s30 }
 0x104   : > { %p6448_p5 = pnand %p6446_p4, %p6845_p10  ;;  %p6454_p11 = scmp.lt.s32.totalorder %s6452_s22, %s6445_s15 }
 0x106   : > { %p6449_p6 = pneg %p6448_p5  ;;  %p6455_p7 = por %p6454_p11, %p6453_p9 }
 0x108   : > { %p6456_p12 = pnand %p6455_p7, %p6449_p6 }
 0x10a   : > { %6459 = shalt.err (!%p6456_p12)
}
 0x10b   : > { %6005 = dma.hbm_to_vmem [thread:$0]  (!%p6820_p8), %s6987_s21, 512, %s1464_s7, %s1426_s14, %s6549_s6, %s6549_s6, %s6550_s24  }
 0x10c   : > { %p7640_p10 = scmp.ne.s32.totalorder %s7636_s4, 0 }
 0x10d   : > { %s1536_s20 = sand.u32 (!%p7640_p10), 1, %s6498_s1   ;;  %p7641_p0 = scmp.ne.s32.totalorder (!%p7640_p10), %s7632_s18, 0 }
 0x10e   : > { %1534 = sbr.rel (%p7640_p10) target bundleno = 5479 (0x1567), region = 180  ;;  %s5448_s10 = sshll.u32 (!%p7640_p10), %s1536_s20, 3 }
 0x10f   : > { %s1537_s2 = scalar_lea.sflag (!%p7640_p10), [#allocation3], %s1536_s20  ;;  %s7031_s11 = scalar_lea.vmem (!%p7640_p10), [#allocation2], %s5448_s10 }
 0x113   : > { %6477 = dma.done.wait (%p7641_p0), %s1537_s2, 128  }
 0x114   : > { %6479 = vsyncadd (%p7641_p0), %s1537_s2, 4294967168  ;;  %s1545_s23 = sand.u32 1, %s6796_s0   ;;  %s7038_s26 = sshll.u32 %s1536_s20, 5 }
 0x115   : > { %s1546_s6 = scalar_lea.sflag [#allocation5], %s1545_s23  ;;  %s7041_s24 = scalar_lea.vmem [#allocation4], %s7038_s26 }
 0x116   : > { %6481 = dma.done.wait (%p7641_p0), %s1546_s6, 1024  }
 0x117   : > { %6483 = vsyncadd (%p7641_p0), %s1546_s6, 4294966272  ;;  %s7048_s4 = scalar_lea.vmem [#allocation6], %s7038_s26  ;;  %s1564_s14 = scalar_lea.sflag [#allocation8], %s1545_s23 }
 0x118   : > { %s7051_s21 = scalar_lea.vmem [#allocation7], %s7038_s26 }
 0x119   : > { %6485 = dma.done.wait (%p7641_p0), %s1564_s14, 1024  }
 0x11a   : > { %6487 = vsyncadd (%p7641_p0), %s1564_s14, 4294966272  ;;  %s7058_s25 = scalar_lea.vmem [#allocation9], %s7038_s26  ;;  %s1582_s12 = scalar_lea.sflag [#allocation11], %s1545_s23 }
 0x11b   : > { %s7061_s8 = scalar_lea.vmem [#allocation10], %s7038_s26 }
 0x11c   : > { %6489 = dma.done.wait (%p7641_p0), %s1582_s12, 1024  }
 0x11d   : > { %6491 = vsyncadd (%p7641_p0), %s1582_s12, 4294966272  ;;  %p1827_p8 = scmp.lt.s32.totalorder %s6796_s0, 7  ;;  %vm1948_vm0 = vcmask 517120   ;;  %vm1979_vm1 = vcmask 523264   ;;  %v1941_v1 = vld [vmem:[%s6580_s9 + $0x8] sm:$0xff]  ;;  %v1940_v2 = vld [vmem:[%s6580_s9] sm:$0xff] }
 0x11e   : > { %v1983_v4 = vsel %vm1979_vm1, %v1941_v1, 0.0  ;;  %v1980_v5 = vsel %vm1979_vm1, %v1940_v2, 0.0  ;;  %v1942_v6 = vld [vmem:[%s6580_s9 + $0x10] sm:$0xff]  ;;  %v1943_v7 = vld [vmem:[%s6580_s9 + $0x18] sm:$0xff]  ;;  %v6101_v35 = vld [vmem:[%s7041_s24 + $0x18] sm:$0xff]   ;;  %v6557_v36 = vmov 0.0  }
 0x11f   : > { %s7680_s0 = smov (!%p1827_p8, %s6796_s0), 7  ;;  %1984 = vadd.xlane.f32.xlu1 %v1983_v4  ;;  %v1986_v8 = vsel %vm1979_vm1, %v1942_v6, 0.0  ;;  %v1989_v9 = vsel %vm1979_vm1, %v1943_v7, 0.0  ;;  %5740 = vmatprep.subr.bf16.mxu0 %v6557_v36  ;;  %v6102_v37 = vld [vmem:[%s7041_s24 + $0x10] sm:$0xff]   ;;  %v6103_v38 = vld [vmem:[%s7041_s24 + $0x8] sm:$0xff]   ;;  %v6104_v39 = vld [vmem:[%s7041_s24] sm:$0xff]  }
 0x120   : > { %s7072_s29 = sshll.u32 %s7680_s0, 1  ;;  %5770 = vmatprep.subr.bf16.mxu1 %v6557_v36  ;;  %5741 = vmatpush3.bf16.msra.mxu0 %v6101_v35  ;;  %v6105_v40 = vld [vmem:[%s7048_s4 + $0x18] sm:$0xff]   ;;  %vm6558_vm2 = vmmov 0   ;;  %s7642_s18 = sld [smem:[#allocation18_spill]]  ;;  %vm2234_vm3 = vcmask 130048   ;;  %vm2281_vm4 = vcmask 122880  }
 0x121   : > { %s7076_s7 = scalar_lea.vmem %s6575_s5, %s7072_s29  ;;  %5742 = vmatprep.subr.bf16.mxu0 %v6557_v36  ;;  %5748 = vmatprep.mubr.msk.bf16.mxu0 %vm6558_vm2, %v6557_v36  ;;  %s7643_s3 = sld [smem:[#allocation19_spill]]  ;;  %vm2683_vm5 = vcmask 261120   ;;  %vm2685_vm6 = vcmask 392192   ;;  %vm3143_vm7 = vcmask 1040384   ;;  %vm3771_vm8 = vcmask 521216  }
 0x122   : > { %v1939_v0 = vld [vmem:[%s7076_s7] sm:$0x3]  ;;  %5772 = vmatprep.mubr.msk.bf16.mxu1 %vm6558_vm2, %v6557_v36  ;;  %s7644_s16 = sld [smem:[#allocation20_spill]]  ;;  %s6559_s6 = smov 112   ;;  %vm4020_vm9 = vcmask 41984   ;;  %vm4040_vm10 = vcmask 1042432  }
 0x123   : > { %v1949_v3 = vsel %vm1948_vm0, %v1939_v0, 0.0  ;;  %1987 = vadd.xlane.f32.xlu1 %v1986_v8  ;;  %s7645_s15 = sld [smem:[#allocation21_spill]]  ;;  %s6561_s14 = smov 80   ;;  %vm4036_vm11 = vcmask 48128  }
 0x124   : > { %1950 = vadd.xlane.f32.xlu0 %v1949_v3  ;;  %5743 = vmatpush3.bf16.msra.mxu0 %v6102_v37  ;;  %s7646_s10 = sld [smem:[#allocation23_spill]]  ;;  %s6562_s12 = smov 64  }
 0x125   : > { %5744 = vmatprep.subr.bf16.mxu0 %v6557_v36  ;;  %s7647_s2 = sld [smem:[#allocation24_spill]] }
 0x126   : > { %s1836_s28 = scalar_lea.vmem %s7642_s18, %s7680_s0  ;;  %s6563_s18 = smov 48  }
 0x127   : > { %s1839_s30 = scalar_lea.vmem %s7643_s3, %s7680_s0  ;;  %v5467_v57 = vld [vmem:[%s1836_s28] ss:$0 sm:$0xff]  ;;  %s6564_s3 = smov 32  }
 0x128   : > { %1981 = vadd.xlane.f32.xlu0 %v1980_v5  ;;  %5745 = vmatpush3.bf16.msra.mxu0 %v6103_v38  ;;  %s1842_s22 = scalar_lea.vmem %s7644_s16, %s7680_s0  ;;  %v5468_v59 = vld [vmem:[%s1839_s30] ss:$0 sm:$0xff]  ;;  %s6565_s16 = smov 16  }
 0x129   : > { %5746 = vmatprep.subr.bf16.mxu0 %v6557_v36  ;;  %s1845_s20 = scalar_lea.vmem %s7645_s15, %s7680_s0  ;;  %v5469_v62 = vld [vmem:[%s1842_s22] ss:$0 sm:$0xff]  ;;  %s7648_s15 = sld [smem:[#allocation26_spill]] }
 0x12a   : > { %v6106_v5 = vld [vmem:[%s7048_s4 + $0x10] sm:$0xff]   ;;  %s1848_s23 = scalar_lea.vmem %s7646_s10, %s7680_s0  ;;  %s7649_s28 = sld [smem:[#allocation29_spill]] }
 0x12b   : > { %s1851_s24 = scalar_lea.vmem %s7647_s2, %s7680_s0  ;;  %s5607_s30 = sshll.u32 %s7680_s0, 6 }
 0x12c   : > { %1990 = vadd.xlane.f32.xlu0 %v1989_v9  ;;  %5747 = vmatpush3.bf16.msra.mxu0 %v6104_v39  ;;  %s7650_s22 = sld [smem:[#allocation27_spill]] }
 0x12d   : > { %5752 = vmatprep.subr.bf16.mxu0 %v6105_v40 }
 0x132   : > { %s1857_s10 = scalar_lea.vmem %s7650_s22, %s7680_s0 }
 0x1a8   : > { %v1985_v11 = vpop.xlane.xlu1 %1984 }
 0x1a9   : > { %v1993_v13 = vmul.f32 0.015625, %v1985_v11 }
 0x1ab   : > { %v7090_v15 = vsub.f32 %v1941_v1, %v1993_v13 }
 0x1ac   : > { %v1988_v17 = vpop.xlane.xlu1 %1987 }
 0x1ad   : > { %v1951_v10 = vpop.xlane.xlu0 %1950  ;;  %v1994_v19 = vmul.f32 0.015625, %v1988_v17  ;;  %v2001_v21 = vmul.f32 %v7090_v15, %v7090_v15 }
 0x1ae   : > { %v1953_v12 = vmul.f32 0.015625, %v1951_v10 }
 0x1af   : > { %v7098_v23 = vsub.f32 %v1942_v6, %v1994_v19  ;;  %v2007_v27 = vsel %vm1979_vm1, %v2001_v21, 0.0 }
 0x1b0   : > { %v7088_v14 = vsub.f32 %v1939_v0, %v1953_v12 }
 0x1b1   : > { %v1982_v16 = vpop.xlane.xlu0 %1981  ;;  %v2002_v29 = vmul.f32 %v7098_v23, %v7098_v23 }
 0x1b2   : > { %v1992_v18 = vmul.f32 0.015625, %v1982_v16  ;;  %v1955_v20 = vmul.f32 %v7088_v14, %v7088_v14  ;;  %v6108_v16 = vld [vmem:[%s7048_s4] sm:$0xff]  }
 0x1b3   : > { %v2010_v32 = vsel %vm1979_vm1, %v2002_v29, 0.0 }
 0x1b4   : > { %v7096_v22 = vsub.f32 %v1940_v2, %v1992_v18  ;;  %v1956_v24 = vsel %vm1948_vm0, %v1955_v20, 0.0  ;;  %v5470_v2 = vld [vmem:[%s1845_s20] ss:$0 sm:$0xff]  ;;  %s7651_s20 = sld [smem:[#allocation28_spill]] }
 0x1b5   : > { %1957 = vadd.xlane.f32.xlu1 %v1956_v24  ;;  %v1991_v25 = vpop.xlane.xlu0 %1990 }
 0x1b6   : > { %v1995_v26 = vmul.f32 0.015625, %v1991_v25  ;;  %v2000_v28 = vmul.f32 %v7096_v22, %v7096_v22 }
 0x1b8   : > { %v7106_v30 = vsub.f32 %v1943_v7, %v1995_v26  ;;  %v2004_v31 = vsel %vm1979_vm1, %v2000_v28, 0.0 }
 0x1b9   : > { %2008 = vadd.xlane.f32.xlu1 %v2007_v27  ;;  %2005 = vadd.xlane.f32.xlu0 %v2004_v31 }
 0x1ba   : > { %v2003_v33 = vmul.f32 %v7106_v30, %v7106_v30  ;;  %s1860_s2 = scalar_lea.vmem %s7651_s20, %s7680_s0 }
 0x1bc   : > { %v2013_v34 = vsel %vm1979_vm1, %v2003_v33, 0.0  ;;  %v5477_v33 = vld [vmem:[%s1851_s24] ss:$0 sm:$0xff]  ;;  %s5608_s24 = sshll.u32 %s7680_s0, 7 }
 0x1bd   : > { %2011 = vadd.xlane.f32.xlu0 %v2010_v32  ;;  %2014 = vadd.xlane.f32.xlu1 %v2013_v34 }
 0x23e   : > { %v1958_v41 = vpop.xlane.xlu1 %1957 }
 0x23f   : > { %v1959_v42 = vmul.f32 0.015625, %v1958_v41 }
 0x241   : > { %v1960_v43 = vadd.f32 1e-05, %v1959_v42 }
 0x242   : > { %v2009_v44 = vpop.xlane.xlu1 %2008  ;;  %v2006_v45 = vpop.xlane.xlu0 %2005 }
 0x243   : > { %6181 = vrsqrt.f32 %v1960_v43  ;;  %v2017_v46 = vmul.f32 0.015625, %v2009_v44  ;;  %v2016_v47 = vmul.f32 0.015625, %v2006_v45 }
 0x245   : > { %v2021_v48 = vadd.f32 1e-05, %v2017_v46  ;;  %v2020_v49 = vadd.f32 1e-05, %v2016_v47 }
 0x246   : > { %v2015_v50 = vpop.xlane.xlu1 %2014  ;;  %v2012_v51 = vpop.xlane.xlu0 %2011 }
 0x247   : > { %6183 = vrsqrt.f32 %v2021_v48  ;;  %v2019_v52 = vmul.f32 0.015625, %v2015_v50  ;;  %v2018_v53 = vmul.f32 0.015625, %v2012_v51 }
 0x248   : > { %6185 = vrsqrt.f32 %v2020_v49 }
 0x249   : > { %v2023_v54 = vadd.f32 1e-05, %v2019_v52  ;;  %v2022_v55 = vadd.f32 1e-05, %v2018_v53 }
 0x24b   : > { %6187 = vrsqrt.f32 %v2023_v54 }
 0x24c   : > { %6189 = vrsqrt.f32 %v2022_v55 }
 0x250   : > { %v6182_v56 = vpop.eup %6181 }
 0x251   : > { %v1962_v58 = vmul.f32 %v6182_v56, %v7088_v14  ;;  %v6107_v14 = vld [vmem:[%s7048_s4 + $0x8] sm:$0xff]   ;;  %s6560_s4 = smov 96  }
 0x253   : > { %v1969_v60 = vmul.f32 %v5467_v57, %v1962_v58 }
 0x254   : > { %v6184_v61 = vpop.eup %6183 }
 0x255   : > { %v6186_v63 = vpop.eup %6185  ;;  %v1976_v0 = vadd.f32 %v5468_v59, %v1969_v60  ;;  %v2029_v1 = vmul.f32 %v6184_v61, %v7090_v15 }
 0x256   : > { %v2028_v3 = vmul.f32 %v6186_v63, %v7096_v22  ;;  %v5471_v22 = vld [vmem:[%s1848_s23] ss:$0 sm:$0xff]  ;;  %s7652_s23 = sld [smem:[#allocation31_spill]] }
 0x257   : > { %v2052_v4 = vpack.c.bf16 %v1976_v0, %v1976_v0  ;;  %v2039_v6 = vmul.f32 %v5469_v62, %v2029_v1 }
 0x258   : > { %v6188_v7 = vpop.eup %6187  ;;  %v2038_v8 = vmul.f32 %v5469_v62, %v2028_v3 }
 0x259   : > { %v6190_v9 = vpop.eup %6189  ;;  %5749 = vmatmul.mubr.msk.bf16.vlgmr.msra.gmra.mxu0 %vm1979_vm1, %v2052_v4  ;;  %v2049_v10 = vadd.f32 %v5470_v2, %v2039_v6  ;;  %v2031_v12 = vmul.f32 %v6188_v7, %v7106_v30 }
 0x25a   : > { %5753 = vmatpush3.bf16.msra.mxu0 %v6105_v40  ;;  %v2048_v11 = vadd.f32 %v5470_v2, %v2038_v8  ;;  %v2030_v13 = vmul.f32 %v6190_v9, %v7098_v23 }
 0x25b   : > { %5754 = vmatprep.subr.bf16.mxu0 %v6106_v5  ;;  %v2041_v18 = vmul.f32 %v5469_v62, %v2031_v12 }
 0x25c   : > { %v2136_v15 = vpack.c.bf16 %v2049_v10, %v2048_v11  ;;  %v2040_v17 = vmul.f32 %v5469_v62, %v2030_v13 }
 0x25d   : > { %v2051_v20 = vadd.f32 %v5470_v2, %v2041_v18 }
 0x25e   : > { %5755 = vmatpush3.bf16.msra.mxu0 %v6106_v5  ;;  %5760 = vmatprep.mubr.msk.bf16.mxu0 %vm1979_vm1, %v2136_v15  ;;  %v2050_v19 = vadd.f32 %v5470_v2, %v2040_v17 }
 0x25f   : > { %5756 = vmatprep.subr.bf16.mxu0 %v6107_v14 }
 0x260   : > { %v2137_v21 = vpack.c.bf16 %v2051_v20, %v2050_v19 }
 0x262   : > { %5757 = vmatpush3.bf16.msra.mxu0 %v6107_v14 }
 0x263   : > { %5758 = vmatprep.subr.bf16.mxu0 %v6108_v16 }
 0x266   : > { %5759 = vmatpush3.bf16.msra.mxu0 %v6108_v16 }
 0x267   : > { %5764 = vmatprep.subr.bf16.mxu0 %v6557_v36 }
 0x269   : > { %5761 = vmatmul.mubr.msk.bf16.vlgmr.msra.gmra.mxu0 %vm1979_vm1, %v2137_v21 }
 0x26a   : > { %5766 = vmatprep.mubr.msk.bf16.mxu0 %vm6558_vm2, %v6557_v36 }
 0x319   : > { %v2129_v23 = vpop.f32.mrf.mxu0 }
 0x31a   : > { %v2130_v24 = vadd.f32 %v5471_v22, %v2129_v23 }
 0x31b   : > { %v5750_v25 = vpop.f32.mrf.mxu0 }
 0x31c   : > { %v2135_v26 = vmul.f32 0.25, %v2130_v24 }
 0x31d   : > { %v2132_v27 = vpop.f32.mrf.mxu0 }
 0x31e   : > { %v2232_v28 = vpack.c.bf16 %v2135_v26, %v2135_v26 }
 0x31f   : > { %v5751_v29 = vpop.f32.mrf.mxu0 }
 0x320   : > { %2343 = vrot.lane.b32.xlu1 %v2232_v28, %s6559_s6  ;;  %v2689_v43 = vshrl.u32 %v2232_v28, 16 }
 0x329   : > { %v5762_v30 = vpop.f32.mrf.mxu0 }
 0x32a   : > { %v2226_v41 = vadd.f32 %v5762_v30, %v5477_v33 }
 0x32b   : > { %v2217_v31 = vpop.f32.mrf.mxu0 }
 0x32c   : > { %v2218_v35 = vadd.f32 %v5477_v33, %v2217_v31 }
 0x32d   : > { %v5763_v32 = vpop.f32.mrf.mxu0 }
 0x32e   : > { %v2229_v40 = vadd.f32 %v5763_v32, %v5477_v33 }
 0x32f   : > { %v2220_v34 = vpop.f32.mrf.mxu0 }
 0x330   : > { %v2221_v37 = vadd.f32 %v5477_v33, %v2220_v34  ;;  %v7166_v42 = vpack.c.bf16 %v2229_v40, %v2226_v41 }
 0x332   : > { %v7154_v38 = vpack.c.bf16 %v2221_v37, %v2218_v35  ;;  %v2695_v53 = vsel %vm2234_vm3, %v7166_v42, 0 }
 0x334   : > { %2454 = vrot.lane.b32.xlu1 %v7154_v38, %s6560_s4  ;;  %2345 = vrot.lane.b32.xlu0 %v7154_v38, %s6559_s6  ;;  %v2239_v39 = vsel %vm2234_vm3, %v7154_v38, 0 }
 0x335   : > { %5765 = vmatpush3.bf16.xpose.msra.mxu0 %v2239_v39 }
 0x336   : > { %5776 = vmatprep.subr.bf16.mxu0 %v6557_v36 }
 0x338   : > { %2452 = vrot.lane.b32.xlu1 %v2232_v28, %s6560_s4  ;;  %2563 = vrot.lane.b32.xlu0 %v7154_v38, %s6561_s14 }
 0x33c   : > { %2561 = vrot.lane.b32.xlu1 %v2232_v28, %s6561_s14  ;;  %2799 = vrot.lane.b32.xlu0 %v7166_v42, %s6559_s6 }
 0x33d   : > { %5767 = vmatmul.mubr.msk.bf16.vlgmr.msra.gmra.mxu0 %vm2234_vm3, %v2232_v28 }
 0x33e   : > { %5778 = vmatprep.mubr.msk.bf16.mxu0 %vm6558_vm2, %v6557_v36 }
 0x340   : > { %2797 = vrot.lane.b32.xlu1 %v2689_v43, %s6559_s6  ;;  %2908 = vrot.lane.b32.xlu0 %v7166_v42, %s6560_s4 }
 0x344   : > { %2906 = vrot.lane.b32.xlu1 %v2689_v43, %s6560_s4  ;;  %3017 = vrot.lane.b32.xlu0 %v7166_v42, %s6561_s14 }
 0x348   : > { %3015 = vrot.lane.b32.xlu1 %v2689_v43, %s6561_s14 }
 0x392   : > { %v2344_v46 = vpop.permute.xlu1 %2343 }
 0x3a6   : > { %v2346_v44 = vpop.permute.xlu0 %2345  ;;  %v2455_v47 = vpop.permute.xlu1 %2454 }
 0x3a7   : > { %v2351_v45 = vsel %vm2234_vm3, %v2346_v44, 0  ;;  %v2460_v48 = vsel %vm2234_vm3, %v2455_v47, 0 }
 0x3a8   : > { %5777 = vmatpush3.bf16.xpose.msra.mxu0 %v2351_v45 }
 0x3a9   : > { %5788 = vmatprep.subr.bf16.mxu0 %v6557_v36 }
 0x3aa   : > { %v2564_v49 = vpop.permute.xlu0 %2563  ;;  %v2453_v50 = vpop.permute.xlu1 %2452 }
 0x3ab   : > { %v2569_v51 = vsel %vm2234_vm3, %v2564_v49, 0 }
 0x3ae   : > { %v2562_v52 = vpop.permute.xlu1 %2561  ;;  %v2800_v54 = vpop.permute.xlu0 %2799 }
 0x3af   : > { %5779 = vmatmul.mubr.msk.bf16.vlgmr.msra.gmra.mxu0 %vm2234_vm3, %v2344_v46  ;;  %v2805_v55 = vsel %vm2234_vm3, %v2800_v54, 0 }
 0x3b0   : > { %5789 = vmatpush3.bf16.xpose.msra.mxu0 %v2460_v48  ;;  %5790 = vmatprep.mubr.msk.bf16.mxu0 %vm6558_vm2, %v6557_v36 }
 0x3b1   : > { %5800 = vmatprep.subr.bf16.mxu0 %v6557_v36 }
 0x3b2   : > { %v2909_v56 = vpop.permute.xlu0 %2908  ;;  %v2798_v57 = vpop.permute.xlu1 %2797 }
 0x3b3   : > { %v2914_v58 = vsel %vm2234_vm3, %v2909_v56, 0 }
 0x3b6   : > { %v3018_v59 = vpop.permute.xlu0 %3017  ;;  %v2907_v60 = vpop.permute.xlu1 %2906 }
 0x3b7   : > { %5791 = vmatmul.mubr.msk.bf16.vlgmr.msra.gmra.mxu0 %vm2234_vm3, %v2453_v50  ;;  %v3023_v61 = vsel %vm2234_vm3, %v3018_v59, 0 }
 0x3b8   : > { %5801 = vmatpush3.bf16.xpose.msra.mxu0 %v2569_v51  ;;  %5802 = vmatprep.mubr.msk.bf16.mxu0 %vm6558_vm2, %v6557_v36 }
 0x3b9   : > { %5812 = vmatprep.subr.bf16.mxu0 %v6557_v36 }
 0x3ba   : > { %v3016_v62 = vpop.permute.xlu1 %3015 }
 0x3bf   : > { %5803 = vmatmul.mubr.msk.bf16.vlgmr.msra.gmra.mxu0 %vm2234_vm3, %v2562_v52 }
 0x3c0   : > { %5813 = vmatpush3.bf16.xpose.msra.mxu0 %v2695_v53  ;;  %5814 = vmatprep.mubr.msk.bf16.mxu0 %vm6558_vm2, %v6557_v36 }
 0x3c1   : > { %5824 = vmatprep.subr.bf16.mxu0 %v6557_v36 }
 0x3c7   : > { %5815 = vmatmul.mubr.msk.bf16.vlgmr.msra.gmra.mxu0 %vm2234_vm3, %v2689_v43 }
 0x3c8   : > { %5825 = vmatpush3.bf16.xpose.msra.mxu0 %v2805_v55  ;;  %5826 = vmatprep.mubr.msk.bf16.mxu0 %vm6558_vm2, %v6557_v36 }
 0x3c9   : > { %5836 = vmatprep.subr.bf16.mxu0 %v6557_v36 }
 0x3cf   : > { %5827 = vmatmul.mubr.msk.bf16.vlgmr.msra.gmra.mxu0 %vm2234_vm3, %v2798_v57 }
 0x3d0   : > { %5837 = vmatpush3.bf16.xpose.msra.mxu0 %v2914_v58  ;;  %5838 = vmatprep.mubr.msk.bf16.mxu0 %vm6558_vm2, %v6557_v36 }
 0x3d1   : > { %5848 = vmatprep.subr.bf16.mxu0 %v6557_v36 }
 0x3d7   : > { %5839 = vmatmul.mubr.msk.bf16.vlgmr.msra.gmra.mxu0 %vm2234_vm3, %v2907_v60 }
 0x3d8   : > { %5849 = vmatpush3.bf16.xpose.msra.mxu0 %v3023_v61  ;;  %5850 = vmatprep.mubr.msk.bf16.mxu0 %vm6558_vm2, %v6557_v36 }
 0x3d9   : > { %5860 = vmatprep.subr.bf16.mxu0 %v6557_v36 }
 0x3df   : > { %5851 = vmatmul.mubr.msk.bf16.vlgmr.msra.gmra.mxu0 %vm2234_vm3, %v3016_v62 }
 0x3e0   : > { %5868 = vmatprep.mubr.msk.bf16.mxu0 %vm6558_vm2, %v6557_v36 }
 0x3fd   : > { %v2275_v63 = vpop.f32.mrf.mxu0 }
 0x3fe   : > { %v2282_v0 = vsel %vm2281_vm4, %v2275_v63, -inf }
 0x3ff   : > { %2283 = vmax.xlane.f32.xlu0 %v2282_v0  ;;  %v5768_v1 = vpop.f32.mrf.mxu0 }
 0x401   : > { %v2278_v2 = vpop.f32.mrf.mxu0 }
 0x403   : > { %v5769_v3 = vpop.f32.mrf.mxu0 }
 0x415   : > { %2296 = vrot.lane.b32.xlu0 %v7154_v38, %s6562_s12 }
 0x46f   : > { %v2387_v4 = vpop.f32.mrf.mxu0 }
 0x470   : > { %v2393_v5 = vsel %vm2281_vm4, %v2387_v4, -inf }
 0x471   : > { %2394 = vmax.xlane.f32.xlu1 %v2393_v5  ;;  %v5780_v6 = vpop.f32.mrf.mxu0 }
 0x473   : > { %v2390_v7 = vpop.f32.mrf.mxu0 }
 0x475   : > { %v5781_v8 = vpop.f32.mrf.mxu0 }
 0x477   : > { %v2496_v9 = vpop.f32.mrf.mxu0 }
 0x478   : > { %v2502_v10 = vsel %vm2281_vm4, %v2496_v9, -inf }
 0x479   : > { %2503 = vmax.xlane.f32.xlu0 %v2502_v10  ;;  %v5792_v11 = vpop.f32.mrf.mxu0 }
 0x47b   : > { %v2499_v12 = vpop.f32.mrf.mxu0 }
 0x47d   : > { %v5793_v13 = vpop.f32.mrf.mxu0 }
 0x47f   : > { %v7222_v14 = vpop.f32.mrf.mxu0 }
 0x480   : > { %v2611_v15 = vsel %vm2281_vm4, %v7222_v14, -inf }
 0x481   : > { %2612 = vmax.xlane.f32.xlu0 %v2611_v15  ;;  %v5804_v16 = vpop.f32.mrf.mxu0 }
 0x482   : > { %2406 = vrot.lane.b32.xlu1 %v7154_v38, %s6563_s18 }
 0x483   : > { %v2608_v17 = vpop.f32.mrf.mxu0 }
 0x485   : > { %v5805_v18 = vpop.f32.mrf.mxu0 }
 0x487   : > { %v7228_v19 = vpop.f32.mrf.mxu0 }
 0x488   : > { %v2284_v20 = vpop.xlane.xlu0 %2283  ;;  %v2737_v21 = vsel %vm2281_vm4, %v7228_v19, -inf }
 0x489   : > { %2738 = vmax.xlane.f32.xlu0 %v2737_v21  ;;  %v5816_v22 = vpop.f32.mrf.mxu0  ;;  %v2285_v44 = vsub.f32 %v2275_v63, %v2284_v20 }
 0x48b   : > { %v2734_v23 = vpop.f32.mrf.mxu0  ;;  %v2286_v45 = vmul.f32 1.442695, %v2285_v44 }
 0x48c   : > { %v2297_v24 = vpop.permute.xlu0 %2296 }
 0x48d   : > { %5771 = vmatpush3.bf16.msra.mxu1 %v2297_v24  ;;  %v5817_v25 = vpop.f32.mrf.mxu0  ;;  %6191 = vpow2.f32 %v2286_v45 }
 0x48e   : > { %5782 = vmatprep.subr.bf16.mxu1 %v6557_v36 }
 0x48f   : > { %v2841_v26 = vpop.f32.mrf.mxu0 }
 0x490   : > { %v2847_v41 = vsel %vm2281_vm4, %v2841_v26, -inf }
 0x491   : > { %v5828_v27 = vpop.f32.mrf.mxu0 }
 0x493   : > { %v2844_v28 = vpop.f32.mrf.mxu0 }
 0x495   : > { %v5829_v29 = vpop.f32.mrf.mxu0 }
 0x497   : > { %v2950_v30 = vpop.f32.mrf.mxu0 }
 0x498   : > { %v2956_v31 = vsel %vm2281_vm4, %v2950_v30, -inf }
 0x499   : > { %2957 = vmax.xlane.f32.xlu0 %v2956_v31  ;;  %v5840_v32 = vpop.f32.mrf.mxu0 }
 0x49a   : > { %v6192_v46 = vpop.eup %6191 }
 0x49b   : > { %v2953_v33 = vpop.f32.mrf.mxu0  ;;  %v2288_v47 = vsel %vm2281_vm4, %v6192_v46, 0.0 }
 0x49d   : > { %v5841_v34 = vpop.f32.mrf.mxu0 }
 0x49f   : > { %v7234_v35 = vpop.f32.mrf.mxu0 }
 0x4a0   : > { %v3065_v43 = vsel %vm2281_vm4, %v7234_v35, -inf }
 0x4a1   : > { %v5852_v37 = vpop.f32.mrf.mxu0 }
 0x4a3   : > { %v3062_v39 = vpop.f32.mrf.mxu0 }
 0x4a5   : > { %v5853_v40 = vpop.f32.mrf.mxu0 }
 0x4a6   : > { %2848 = vmax.xlane.f32.xlu1 %v2847_v41 }
 0x4aa   : > { %3066 = vmax.xlane.f32.xlu1 %v3065_v43 }
 0x4af   : > { %2515 = vrot.lane.b32.xlu0 %v7154_v38, %s6564_s3 }
 0x4ce   : > { %2289 = vadd.xlane.f32.xlu0 %v2288_v47 }
 0x4fa   : > { %v2395_v48 = vpop.xlane.xlu1 %2394 }
 0x4fb   : > { %v2396_v49 = vsub.f32 %v2387_v4, %v2395_v48 }
 0x4fd   : > { %v2397_v50 = vmul.f32 1.442695, %v2396_v49 }
 0x4fe   : > { %v2407_v61 = vpop.permute.xlu1 %2406 }
 0x4ff   : > { %6193 = vpow2.f32 %v2397_v50 }
 0x502   : > { %v2504_v51 = vpop.xlane.xlu0 %2503 }
 0x503   : > { %v2505_v52 = vsub.f32 %v2496_v9, %v2504_v51 }
 0x505   : > { %v2506_v53 = vmul.f32 1.442695, %v2505_v52 }
 0x507   : > { %6195 = vpow2.f32 %v2506_v53 }
 0x50a   : > { %v2613_v58 = vpop.xlane.xlu0 %2612 }
 0x50b   : > { %v2614_v59 = vsub.f32 %v7222_v14, %v2613_v58 }
 0x50c   : > { %v7242_v54 = vpop.eup %6193 }
 0x50d   : > { %v2399_v55 = vsel %vm2281_vm4, %v7242_v54, 0.0  ;;  %v2615_v62 = vmul.f32 1.442695, %v2614_v59 }
 0x50e   : > { %2400 = vadd.xlane.f32.xlu1 %v2399_v55 }
 0x50f   : > { %6197 = vpow2.f32 %v2615_v62 }
 0x512   : > { %v2739_v60 = vpop.xlane.xlu0 %2738 }
 0x513   : > { %v2740_v63 = vsub.f32 %v7228_v19, %v2739_v60 }
 0x514   : > { %v7246_v56 = vpop.eup %6195 }
 0x515   : > { %v2508_v57 = vsel %vm2281_vm4, %v7246_v56, 0.0  ;;  %v2741_v3 = vmul.f32 1.442695, %v2740_v63 }
 0x516   : > { %2509 = vadd.xlane.f32.xlu0 %v2508_v57 }
 0x517   : > { %6199 = vpow2.f32 %v2741_v3 }
 0x51c   : > { %v7256_v7 = vpop.eup %6197 }
 0x51d   : > { %v2617_v8 = vsel %vm2281_vm4, %v7256_v7, 0.0 }
 0x51f   : > { %2751 = vrot.lane.b32.xlu1 %v7166_v42, %s6562_s12 }
 0x522   : > { %v2958_v0 = vpop.xlane.xlu0 %2957 }
 0x523   : > { %v2959_v2 = vsub.f32 %v2950_v30, %v2958_v0 }
 0x525   : > { %v2960_v5 = vmul.f32 1.442695, %v2959_v2 }
 0x526   : > { %v2516_v14 = vpop.permute.xlu0 %2515 }
 0x527   : > { %6201 = vpow2.f32 %v2960_v5 }
 0x52c   : > { %2624 = vrot.lane.b32.xlu0 %v7154_v38, %s6565_s16  ;;  %v7260_v38 = vpop.eup %6199 }
 0x52d   : > { %v2743_v10 = vsel %vm2281_vm4, %v7260_v38, 0.0 }
 0x52f   : > { %v2849_v1 = vpop.xlane.xlu1 %2848 }
 0x530   : > { %v2850_v4 = vsub.f32 %v2841_v26, %v2849_v1 }
 0x532   : > { %v2851_v6 = vmul.f32 1.442695, %v2850_v4 }
 0x533   : > { %v3067_v16 = vpop.xlane.xlu1 %3066 }
 0x534   : > { %6203 = vpow2.f32 %v2851_v6  ;;  %v7262_v9 = vpop.eup %6201  ;;  %v3068_v19 = vsub.f32 %v7234_v35, %v3067_v16 }
 0x535   : > { %v2962_v12 = vsel %vm2281_vm4, %v7262_v9, 0.0 }
 0x536   : > { %v3069_v21 = vmul.f32 1.442695, %v3068_v19 }
 0x541   : > { %v7266_v11 = vpop.eup %6203 }
 0x542   : > { %v2853_v13 = vsel %vm2281_vm4, %v7266_v11, 0.0 }
 0x543   : > { %2618 = vadd.xlane.f32.xlu1 %v2617_v8 }
 0x547   : > { %2744 = vadd.xlane.f32.xlu1 %v2743_v10 }
 0x54b   : > { %2963 = vadd.xlane.f32.xlu0 %v2962_v12  ;;  %2854 = vadd.xlane.f32.xlu1 %v2853_v13 }
 0x557   : > { %v2290_v15 = vpop.xlane.xlu0 %2289 }
 0x558   : > { %6205 = vrcp.f32 %v2290_v15 }
 0x559   : > { %6207 = vpow2.f32 %v3069_v21 }
 0x55c   : > { %2860 = vrot.lane.b32.xlu1 %v7166_v42, %s6563_s18 }
 0x561   : > { %2969 = vrot.lane.b32.xlu0 %v7166_v42, %s6564_s3 }
 0x565   : > { %v6206_v17 = vpop.eup %6205 }
 0x566   : > { %v2292_v18 = vmul.f32 %v6206_v17, %v6192_v46  ;;  %v7281_v22 = vpop.eup %6207 }
 0x567   : > { %v3071_v23 = vsel %vm2281_vm4, %v7281_v22, 0.0 }
 0x568   : > { %v2294_v20 = vpack.c.bf16 %v2292_v18, %v2292_v18 }
 0x56a   : > { %5773 = vmatmul.mubr.msk.bf16.vlgmr.msra.gmra.mxu1 %vm2234_vm3, %v2294_v20 }
 0x56b   : > { %5783 = vmatpush3.bf16.msra.mxu1 %v2407_v61  ;;  %5784 = vmatprep.mubr.msk.bf16.mxu1 %vm6558_vm2, %v6557_v36 }
 0x56c   : > { %5794 = vmatprep.subr.bf16.mxu1 %v6557_v36 }
 0x580   : > { %3072 = vadd.xlane.f32.xlu1 %v3071_v23  ;;  %v6109_v23 = vld [vmem:[%s7051_s21 + $0x18] sm:$0xff]  }
 0x581   : > { %5861 = vmatpush3.bf16.msra.mxu0 %v6109_v23  ;;  %v5507_v23 = vld [vmem:[%s1860_s2] ss:$0 sm:$0xff] }
 0x582   : > { %5862 = vmatprep.subr.bf16.mxu0 %v6557_v36 }
 0x591   : > { %3078 = vrot.lane.b32.xlu1 %v7166_v42, %s6565_s16 }
 0x597   : > { %v2401_v24 = vpop.xlane.xlu1 %2400 }
 0x598   : > { %6209 = vrcp.f32 %v2401_v24 }
 0x59b   : > { %v2752_v34 = vpop.permute.xlu1 %2751 }
 0x59f   : > { %v2510_v25 = vpop.xlane.xlu0 %2509 }
 0x5a0   : > { %6211 = vrcp.f32 %v2510_v25  ;;  %v6110_v25 = vld [vmem:[%s7051_s21 + $0x10] sm:$0xff]  }
 0x5a1   : > { %5863 = vmatpush3.bf16.msra.mxu0 %v6110_v25 }
 0x5a2   : > { %5864 = vmatprep.subr.bf16.mxu0 %v6557_v36 }
 0x5a3   : > { %v2625_v33 = vpop.permute.xlu0 %2624 }
 0x5a5   : > { %v6210_v26 = vpop.eup %6209 }
 0x5a6   : > { %v2403_v27 = vmul.f32 %v6210_v26, %v7242_v54 }
 0x5a8   : > { %v2404_v28 = vadd.f32 %v2403_v27, %v2292_v18  ;;  %v2405_v29 = vpack.c.bf16 %v2403_v27, %v2403_v27 }
 0x5aa   : > { %5785 = vmatmul.mubr.msk.bf16.vlgmr.msra.gmra.mxu1 %vm2234_vm3, %v2405_v29 }
 0x5ab   : > { %5795 = vmatpush3.bf16.msra.mxu1 %v2516_v14  ;;  %5796 = vmatprep.mubr.msk.bf16.mxu1 %vm6558_vm2, %v6557_v36 }
 0x5ac   : > { %5806 = vmatprep.subr.bf16.mxu1 %v6557_v36 }
 0x5ad   : > { %v6212_v30 = vpop.eup %6211 }
 0x5ae   : > { %v2512_v42 = vmul.f32 %v6212_v30, %v7246_v56 }
 0x5b0   : > { %v2514_v31 = vpack.c.bf16 %v2512_v42, %v2512_v42  ;;  %v2513_v32 = vadd.f32 %v2512_v42, %v2404_v28  ;;  %v6111_v28 = vld [vmem:[%s7051_s21 + $0x8] sm:$0xff]  }
 0x5b1   : > { %5865 = vmatpush3.bf16.msra.mxu0 %v6111_v28  ;;  %v6261_v28 = vld [vmem:[%s6580_s9] sm:$0xff] }
 0x5b2   : > { %5797 = vmatmul.mubr.msk.bf16.vlgmr.msra.gmra.mxu1 %vm2234_vm3, %v2514_v31  ;;  %5866 = vmatprep.subr.bf16.mxu0 %v6557_v36 }
 0x5b3   : > { %5807 = vmatpush3.bf16.msra.mxu1 %v2625_v33  ;;  %5808 = vmatprep.mubr.msk.bf16.mxu1 %vm6558_vm2, %v6557_v36 }
 0x5b4   : > { %5818 = vmatprep.subr.bf16.mxu1 %v6557_v36 }
 0x5cc   : > { %v2619_v35 = vpop.xlane.xlu1 %2618 }
 0x5cd   : > { %6213 = vrcp.f32 %v2619_v35 }
 0x5d0   : > { %v2745_v37 = vpop.xlane.xlu1 %2744 }
 0x5d1   : > { %6215 = vrcp.f32 %v2745_v37 }
 0x5d4   : > { %v2964_v39 = vpop.xlane.xlu0 %2963  ;;  %v2855_v40 = vpop.xlane.xlu1 %2854 }
 0x5d5   : > { %6217 = vrcp.f32 %v2964_v39 }
 0x5d6   : > { %6219 = vrcp.f32 %v2855_v40 }
 0x5d8   : > { %v2861_v54 = vpop.permute.xlu1 %2860  ;;  %v2970_v57 = vpop.permute.xlu0 %2969 }
 0x5da   : > { %v6214_v41 = vpop.eup %6213 }
 0x5db   : > { %v2621_v43 = vmul.f32 %v6214_v41, %v7256_v7 }
 0x5dd   : > { %v2623_v44 = vpack.c.bf16 %v2621_v43, %v2621_v43  ;;  %v7298_v45 = vadd.f32 %v2621_v43, %v2513_v32  ;;  %v6112_v32 = vld [vmem:[%s7051_s21] sm:$0xff]   ;;  %s1854_s21 = scalar_lea.vmem %s7648_s15, %s7680_s0  ;;  %s1874_s15 = scalar_lea.vmem %s7652_s23, %s5608_s24 }
 0x5de   : > { %v6216_v46 = vpop.eup %6215  ;;  %5867 = vmatpush3.bf16.msra.mxu0 %v6112_v32  ;;  %v6126_v32 = vld [vmem:[%s1874_s15 + $0x38] sm:$0xff]   ;;  %s7658_s23 = sld [smem:[#allocation39_spill]] }
 0x5df   : > { %5809 = vmatmul.mubr.msk.bf16.vlgmr.msra.gmra.mxu1 %vm2234_vm3, %v2623_v44  ;;  %v2747_v47 = vmul.f32 %v6216_v46, %v7260_v38 }
 0x5e0   : > { %5819 = vmatpush3.bf16.msra.mxu1 %v2752_v34  ;;  %5820 = vmatprep.mubr.msk.bf16.mxu1 %vm6558_vm2, %v6557_v36 }
 0x5e1   : > { %5830 = vmatprep.subr.bf16.mxu1 %v6557_v36  ;;  %v2749_v51 = vpack.c.bf16 %v2747_v47, %v2747_v47 }
 0x5e2   : > { %v6218_v48 = vpop.eup %6217 }
 0x5e3   : > { %v6220_v49 = vpop.eup %6219  ;;  %v2966_v53 = vmul.f32 %v6218_v48, %v7262_v9 }
 0x5e4   : > { %v2857_v50 = vmul.f32 %v6220_v49, %v7266_v11 }
 0x5e5   : > { %v2968_v58 = vpack.c.bf16 %v2966_v53, %v2966_v53 }
 0x5e6   : > { %v2858_v52 = vadd.f32 %v2857_v50, %v2747_v47  ;;  %v2859_v56 = vpack.c.bf16 %v2857_v50, %v2857_v50 }
 0x5e7   : > { %5821 = vmatmul.mubr.msk.bf16.vlgmr.msra.gmra.mxu1 %vm2234_vm3, %v2749_v51 }
 0x5e8   : > { %5831 = vmatpush3.bf16.msra.mxu1 %v2861_v54  ;;  %5832 = vmatprep.mubr.msk.bf16.mxu1 %vm6558_vm2, %v6557_v36  ;;  %v2967_v55 = vadd.f32 %v2966_v53, %v2858_v52 }
 0x5e9   : > { %5842 = vmatprep.subr.bf16.mxu1 %v6557_v36 }
 0x5ef   : > { %5833 = vmatmul.mubr.msk.bf16.vlgmr.msra.gmra.mxu1 %vm2234_vm3, %v2859_v56 }
 0x5f0   : > { %5843 = vmatpush3.bf16.msra.mxu1 %v2970_v57  ;;  %5844 = vmatprep.mubr.msk.bf16.mxu1 %vm6558_vm2, %v6557_v36 }
 0x5f1   : > { %5854 = vmatprep.subr.bf16.mxu1 %v6557_v36 }
 0x5f7   : > { %5845 = vmatmul.mubr.msk.bf16.vlgmr.msra.gmra.mxu1 %vm2234_vm3, %v2968_v58 }
 0x5f8   : > { %5856 = vmatprep.mubr.msk.bf16.mxu1 %vm6558_vm2, %v6557_v36 }
 0x609   : > { %v3073_v59 = vpop.xlane.xlu1 %3072 }
 0x60a   : > { %6221 = vrcp.f32 %v3073_v59  ;;  %v5505_v59 = vld [vmem:[%s1854_s21] ss:$0 sm:$0xff]  ;;  %s7653_s21 = sld [smem:[#allocation30_spill]] }
 0x60d   : > { %v3079_v60 = vpop.permute.xlu1 %3078 }
 0x60e   : > { %5855 = vmatpush3.bf16.msra.mxu1 %v3079_v60  ;;  %v6259_v60 = vld [vmem:[%s7076_s7] sm:$0x3]  ;;  %s1865_s7 = scalar_lea.vmem %s7649_s28, %s5607_s30 }
 0x610   : > { %s1869_s28 = scalar_lea.vmem %s7653_s21, %s7072_s29  ;;  %s7659_s21 = sld [smem:[#allocation41_spill]] }
 0x617   : > { %v6222_v61 = vpop.eup %6221 }
 0x618   : > { %v3075_v62 = vmul.f32 %v6222_v61, %v7281_v22 }
 0x61a   : > { %v3077_v63 = vpack.c.bf16 %v3075_v62, %v3075_v62  ;;  %v7319_v0 = vadd.f32 %v3075_v62, %v2967_v55 }
 0x61c   : > { %5857 = vmatmul.mubr.msk.bf16.vlgmr.msra.gmra.mxu1 %vm2234_vm3, %v3077_v63 }
 0x62a   : > { %v2336_v1 = vpop.f32.mrf.mxu1 }
 0x62c   : > { %v5774_v2 = vpop.f32.mrf.mxu1 }
 0x62e   : > { %v2339_v3 = vpop.f32.mrf.mxu1 }
 0x630   : > { %v5775_v4 = vpop.f32.mrf.mxu1 }
 0x66a   : > { %v2446_v5 = vpop.f32.mrf.mxu1 }
 0x66c   : > { %v5786_v6 = vpop.f32.mrf.mxu1 }
 0x66e   : > { %v2449_v7 = vpop.f32.mrf.mxu1 }
 0x670   : > { %v5787_v8 = vpop.f32.mrf.mxu1 }
 0x672   : > { %v2555_v38 = vpop.f32.mrf.mxu1 }
 0x674   : > { %v5798_v9 = vpop.f32.mrf.mxu1 }
 0x675   : > { %v6113_v9 = vld [vmem:[%s1865_s7 + $0x30] ss:$8 sps:$4 sm:$0xff]  }
 0x676   : > { %v2558_v10 = vpop.f32.mrf.mxu1 }
 0x677   : > { %v6118_v10 = vld [vmem:[%s1865_s7 + $0x24] ss:$8 sps:$4 sm:$0xff]  }
 0x678   : > { %v5799_v11 = vpop.f32.mrf.mxu1 }
 0x679   : > { %v6116_v11 = vld [vmem:[%s1865_s7 + $0x20] ss:$8 sps:$4 sm:$0xff]  }
 0x69f   : > { %v2664_v12 = vpop.f32.mrf.mxu1 }
 0x6a1   : > { %v5810_v13 = vpop.f32.mrf.mxu1 }
 0x6a2   : > { %v6119_v13 = vld [vmem:[%s1865_s7 + $0x10] ss:$8 sps:$4 sm:$0xff]  }
 0x6a3   : > { %v2667_v14 = vpop.f32.mrf.mxu1 }
 0x6a4   : > { %v6124_v14 = vld [vmem:[%s1865_s7 + $0x4] ss:$8 sps:$4 sm:$0xff]  }
 0x6a5   : > { %v5811_v15 = vpop.f32.mrf.mxu1 }
 0x6a6   : > { %v6122_v15 = vld [vmem:[%s1865_s7] ss:$8 sps:$4 sm:$0xff]  }
 0x6a7   : > { %v2791_v16 = vpop.f32.mrf.mxu1 }
 0x6a9   : > { %v5822_v17 = vpop.f32.mrf.mxu1 }
 0x6ab   : > { %v2794_v18 = vpop.f32.mrf.mxu1 }
 0x6ad   : > { %v5823_v19 = vpop.f32.mrf.mxu1 }
 0x6af   : > { %v2900_v20 = vpop.f32.mrf.mxu1 }
 0x6b0   : > { %v6091_v21 = vpack.i.bf16 %v2446_v5, %v2900_v20 }
 0x6b1   : > { %v5834_v22 = vpop.f32.mrf.mxu1 }
 0x6b2   : > { %6092 = vrot.lane.b32.xlu0 %v6091_v21, %s6565_s16  ;;  %v5506_v21 = vld [vmem:[%s1857_s10] ss:$0 sm:$0xff]  ;;  %s7657_s10 = sld [smem:[#allocation38_spill]] }
 0x6b3   : > { %v2903_v24 = vpop.f32.mrf.mxu1 }
 0x6b5   : > { %v5835_v26 = vpop.f32.mrf.mxu1 }
 0x6b7   : > { %v3009_v27 = vpop.f32.mrf.mxu1 }
 0x6b8   : > { %v6096_v29 = vpack.i.bf16 %v2555_v38, %v3009_v27  ;;  %v6115_v38 = vld [vmem:[%s1865_s7 + $0x34] ss:$8 sps:$4 sm:$0xff]   ;;  %v6260_v27 = vld [vmem:[%s6580_s9 + $0x8] sm:$0xff] }
 0x6b9   : > { %v5846_v30 = vpop.f32.mrf.mxu1  ;;  %3331 = vmatprep.subr.bf16.mxu1 %v6115_v38 }
 0x6ba   : > { %6097 = vrot.lane.b32.xlu1 %v6096_v29, %s6564_s3  ;;  %3332 = vmatpush1.bf16.msra.mxu1 %v6113_v9  ;;  %v2687_v29 = vmul.f32 0.25, %v7298_v45  ;;  %v6262_v30 = vld [vmem:[%s6580_s9 + $0x18] sm:$0xff] }
 0x6bb   : > { %v3012_v42 = vpop.f32.mrf.mxu1  ;;  %3333 = vmatprep.subr.bf16.mxu1 %v6118_v10  ;;  %v6125_v45 = vld [vmem:[%s1874_s15 + $0x78] sm:$0xff]  }
 0x6bc   : > { %v3139_v42 = vmul.f32 0.25, %v7319_v0  ;;  %5659 = vmatprep.subr.bf16.mxu0 %v6125_v45  ;;  %v6129_v0 = vld [vmem:[%s1874_s15 + $0x68] sm:$0xff]  }
 0x6bd   : > { %v5847_v31 = vpop.f32.mrf.mxu1 }
 0x6be   : > { %2679 = vrot.lane.b32.xlu1 %v2664_v12, %s6563_s18  ;;  %3334 = vmatpush1.bf16.msra.mxu1 %v6116_v11  ;;  %v6121_v12 = vld [vmem:[%s1865_s7 + $0x14] ss:$8 sps:$4 sm:$0xff]   ;;  %s7655_s7 = sld [smem:[#allocation36_spill]] }
 0x6bf   : > { %3335 = vmatprep.subr.bf16.mxu1 %v6121_v12  ;;  %v6263_v31 = vld [vmem:[%s6580_s9 + $0x10] sm:$0xff] }
 0x6c2   : > { %3336 = vmatpush1.bf16.msra.mxu1 %v6119_v13 }
 0x6c3   : > { %3337 = vmatprep.subr.bf16.mxu1 %v6124_v14 }
 0x6c4   : > { %s1889_s20 = scalar_lea.vmem %s7655_s7, %s7680_s0  ;;  %s7664_s7 = sld [smem:[#allocation44_spill]] }
 0x6c6   : > { %3338 = vmatpush1.bf16.msra.mxu1 %v6122_v15 }
 0x6c7   : > { %5872 = vmatprep.subr.mxu1 %v6557_v36 }
 0x6dc   : > { %v3118_v33 = vpop.f32.mrf.mxu1 }
 0x6dd   : > { %3133 = vrot.lane.b32.xlu0 %v3118_v33, %s6563_s18  ;;  %v6127_v33 = vld [vmem:[%s1874_s15 + $0x70] sm:$0xff]  }
 0x6de   : > { %v5858_v34 = vpop.f32.mrf.mxu1 }
 0x6df   : > { %v6128_v34 = vld [vmem:[%s1874_s15 + $0x30] sm:$0xff]  }
 0x6e0   : > { %v3121_v35 = vpop.f32.mrf.mxu1 }
 0x6e1   : > { %v6130_v35 = vld [vmem:[%s1874_s15 + $0x28] sm:$0xff]  }
 0x6e2   : > { %v5859_v37 = vpop.f32.mrf.mxu1 }
 0x6e3   : > { %v6131_v37 = vld [vmem:[%s1874_s15 + $0x60] sm:$0xff]  }
 0x724   : > { %v6093_v39 = vpop.permute.xlu0 %6092 }
 0x725   : > { %v6095_v41 = vunpack.i.h.bf16 %v6093_v39  ;;  %v6094_v43 = vunpack.i.l.bf16 %v6093_v39  ;;  %v6132_v39 = vld [vmem:[%s1874_s15 + $0x20] sm:$0xff]  }
 0x727   : > { %v2682_v47 = vsel %vm2234_vm3, %v2336_v1, %v6095_v41  ;;  %v3136_v48 = vsel %vm2234_vm3, %v2791_v16, %v6094_v43  ;;  %v6566_v16 = vmov 0   ;;  %v6134_v41 = vld [vmem:[%s1874_s15 + $0x18] sm:$0xff]   ;;  %v6135_v43 = vld [vmem:[%s1874_s15 + $0x50] sm:$0xff]  }
 0x728   : > { %3355 = vmatprep.mubr.bf16.mxu1 %v6566_v16 }
 0x72c   : > { %v6098_v40 = vpop.permute.xlu1 %6097 }
 0x72d   : > { %v6100_v44 = vunpack.i.h.bf16 %v6098_v40  ;;  %v6099_v46 = vunpack.i.l.bf16 %v6098_v40  ;;  %v6133_v40 = vld [vmem:[%s1874_s15 + $0x58] sm:$0xff]  }
 0x72f   : > { %v2684_v50 = vsel %vm2683_vm5, %v2682_v47, %v6100_v44  ;;  %v3137_v52 = vsel %vm2683_vm5, %v3136_v48, %v6099_v46  ;;  %v6136_v44 = vld [vmem:[%s1874_s15 + $0x10] sm:$0xff]   ;;  %v6137_v46 = vld [vmem:[%s1874_s15 + $0x48] sm:$0xff]   ;;  %v6139_v48 = vld [vmem:[%s1874_s15 + $0x40] sm:$0xff]  }
 0x730   : > { %v2680_v49 = vpop.permute.xlu1 %2679  ;;  %v6138_v47 = vld [vmem:[%s1874_s15 + $0x8] sm:$0xff]  }
 0x731   : > { %v2686_v55 = vsel %vm2685_vm6, %v2684_v50, %v2680_v49  ;;  %v6140_v49 = vld [vmem:[%s1874_s15] sm:$0xff]   ;;  %v3270_v50 = vlaneseq  ;;  %s1895_s15 = scalar_lea.vmem %s7657_s10, %s7680_s0  ;;  %s7666_s10 = sld [smem:[#allocation46_spill]] }
 0x74f   : > { %v3134_v51 = vpop.permute.xlu0 %3133 }
 0x750   : > { %v3138_v53 = vsel %vm2685_vm6, %v3137_v52, %v3134_v51  ;;  %v7384_v51 = vshrl.u32 %v3270_v50, 7 }
 0x751   : > { %v3141_v54 = vrot.slane %v3138_v53, 7  ;;  %v3268_v53 = vld [vmem:[%s1869_s28] sm:$0x3]  ;;  %s1898_s28 = scalar_lea.vmem %s7658_s23, %s7680_s0  ;;  %s7668_s23 = sld [smem:[#allocation32_spill]] }
 0x752   : > { %v3272_v52 = vsub.s32 0, %v7384_v51 }
 0x753   : > { %v3144_v56 = vsel %vm3143_vm7, %v2686_v55, %v3141_v54  ;;  %v3276_v54 = vsub.s32 1, %v7384_v51 }
 0x754   : > { %v3145_v57 = vpack.c.bf16 %v3144_v56, %v3144_v56  ;;  %v3273_v55 = vrot.slane %v3268_v53, %v3272_v52 }
 0x755   : > { %v3277_v56 = vrot.slane %v3268_v53, %v3276_v54 }
 0x756   : > { %5869 = vmatmul.mubr.msk.bf16.vlgmr.msra.gmra.mxu0 %vm1979_vm1, %v3145_v57 }
 0x757   : > { %5660 = vmatpush3.bf16.msra.mxu0 %v6126_v32 }
 0x758   : > { %5661 = vmatprep.subr.bf16.mxu0 %v6127_v33 }
 0x75b   : > { %5662 = vmatpush3.bf16.msra.mxu0 %v6128_v34 }
 0x75c   : > { %5663 = vmatprep.subr.bf16.mxu0 %v6129_v0 }
 0x75f   : > { %5664 = vmatpush3.bf16.msra.mxu0 %v6130_v35 }
 0x760   : > { %5665 = vmatprep.subr.bf16.mxu0 %v6131_v37 }
 0x763   : > { %5666 = vmatpush3.bf16.msra.mxu0 %v6132_v39  ;;  %v6141_v39 = vld [vmem:[%s7058_s25 + $0x18] sm:$0xff]  }
 0x764   : > { %5667 = vmatprep.subr.bf16.mxu0 %v6133_v40  ;;  %v6142_v40 = vld [vmem:[%s7058_s25 + $0x10] sm:$0xff]  }
 0x767   : > { %5668 = vmatpush3.bf16.msra.mxu0 %v6134_v41  ;;  %v6143_v41 = vld [vmem:[%s7058_s25 + $0x8] sm:$0xff]  }
 0x768   : > { %5669 = vmatprep.subr.bf16.mxu0 %v6135_v43  ;;  %v6144_v43 = vld [vmem:[%s7058_s25] sm:$0xff]   ;;  %s7656_s25 = sld [smem:[#allocation37_spill]] }
 0x76b   : > { %5670 = vmatpush3.bf16.msra.mxu0 %v6136_v44 }
 0x76c   : > { %5671 = vmatprep.subr.bf16.mxu0 %v6137_v46 }
 0x76e   : > { %s1892_s2 = scalar_lea.vmem %s7656_s25, %s7680_s0 }
 0x76f   : > { %5672 = vmatpush3.bf16.msra.mxu0 %v6138_v47 }
 0x770   : > { %5673 = vmatprep.subr.bf16.mxu0 %v6139_v48 }
 0x773   : > { %5674 = vmatpush3.bf16.msra.mxu0 %v6140_v49 }
 0x774   : > { %5910 = vmatprep.subr.bf16.mxu0 %v6557_v36 }
 0x816   : > { %v3215_v58 = vpop.f32.mrf.mxu0 }
 0x817   : > { %v3221_v61 = vadd.f32 %v6259_v60, %v3215_v58 }
 0x818   : > { %v5870_v62 = vpop.f32.mrf.mxu0 }
 0x819   : > { %v7344_v63 = vadd.f32 %v5505_v59, %v3221_v61 }
 0x81a   : > { %v3218_v1 = vpop.f32.mrf.mxu0 }
 0x81b   : > { %v3232_v2 = vsel %vm1948_vm0, %v7344_v63, 0.0 }
 0x81c   : > { %3233 = vadd.xlane.f32.xlu0 %v3232_v2  ;;  %v5871_v3 = vpop.f32.mrf.mxu0 }
 0x8a5   : > { %v3234_v4 = vpop.xlane.xlu0 %3233 }
 0x8a6   : > { %v3235_v5 = vmul.f32 0.015625, %v3234_v4 }
 0x8a8   : > { %v3236_v6 = vsub.f32 %v7344_v63, %v3235_v5 }
 0x8aa   : > { %v3237_v7 = vmul.f32 %v3236_v6, %v3236_v6 }
 0x8ac   : > { %v3238_v8 = vsel %vm1948_vm0, %v3237_v7, 0.0 }
 0x8ad   : > { %3239 = vadd.xlane.f32.xlu1 %v3238_v8 }
 0x936   : > { %v3240_v17 = vpop.xlane.xlu1 %3239 }
 0x937   : > { %v3241_v18 = vmul.f32 0.015625, %v3240_v17  ;;  %v1944_v17 = vld [vmem:[%s7031_s11] sm:$0x3f]  ;;  %s7654_s11 = sld [smem:[#allocation35_spill]] }
 0x939   : > { %v3242_v19 = vadd.f32 1e-05, %v3241_v18 }
 0x93b   : > { %6223 = vrsqrt.f32 %v3242_v19  ;;  %v3772_v19 = vsel %vm3771_vm8, %v1944_v17, 0.0 }
 0x93d   : > { %s1886_s22 = scalar_lea.vmem %s7654_s11, %s7680_s0  ;;  %s7663_s11 = sld [smem:[#allocation43_spill]] }
 0x943   : > { %s1907_s25 = scalar_lea.vmem %s7663_s11, %s7680_s0 }
 0x948   : > { %v6224_v20 = vpop.eup %6223 }
 0x949   : > { %v3244_v22 = vmul.f32 %v6224_v20, %v3236_v6 }
 0x94b   : > { %v3251_v24 = vmul.f32 %v5506_v21, %v3244_v22 }
 0x94d   : > { %v3258_v25 = vadd.f32 %v5507_v23, %v3251_v24 }
 0x94f   : > { %v3259_v26 = vpack.c.bf16 %v3258_v25, %v3258_v25 }
 0x951   : > { %5516 = vmatmul.mubr.msk.bf16.vlgmr.msra.gmra.mxu1 %vm1979_vm1, %v3259_v26 }
 0x952   : > { %5873 = vmatpush3.msra.mxu1 %v6260_v27  ;;  %5876 = vmatprep.mubr.msk.f32.mxu1 %vm6558_vm2, %v6557_v36 }
 0x953   : > { %5874 = vmatprep.subr.mxu1 %v6557_v36 }
 0x954   : > { %5875 = vmatpush3.msra.mxu1 %v6261_v28 }
 0x955   : > { %5879 = vmatprep.subr.mxu1 %v6557_v36 }
 0x959   : > { %5877 = vmatmul.mubr.msk.f32.vlgmr.msra.gmra.mxu1 %vm2234_vm3, %v2687_v29 }
 0x95a   : > { %5880 = vmatpush3.msra.mxu1 %v6262_v30  ;;  %5883 = vmatprep.mubr.msk.f32.mxu1 %vm6558_vm2, %v6557_v36 }
 0x95b   : > { %5881 = vmatprep.subr.mxu1 %v6557_v36 }
 0x95c   : > { %5882 = vmatpush3.msra.mxu1 %v6263_v31 }
 0x95d   : > { %5884 = vmatmul.mubr.msk.f32.vlgmr.msra.gmra.mxu1 %vm2234_vm3, %v3139_v42  ;;  %5886 = vmatprep.subr.bf16.mxu1 %v6557_v36 }
 0x95e   : > { %5894 = vmatprep.mubr.msk.bf16.mxu1 %vm6558_vm2, %v6557_v36  ;;  %5887 = vmatpush3.bf16.msra.mxu1 %v6141_v39 }
 0x95f   : > { %5888 = vmatprep.subr.bf16.mxu1 %v6557_v36 }
 0x962   : > { %5889 = vmatpush3.bf16.msra.mxu1 %v6142_v40 }
 0x963   : > { %5890 = vmatprep.subr.bf16.mxu1 %v6557_v36 }
 0x966   : > { %5891 = vmatpush3.bf16.msra.mxu1 %v6143_v41 }
 0x967   : > { %5892 = vmatprep.subr.bf16.mxu1 %v6557_v36 }
 0x96a   : > { %5893 = vmatpush3.bf16.msra.mxu1 %v6144_v43 }
 0x96b   : > { %5898 = vmatprep.subr.bf16.mxu1 %v6557_v36 }
 0xa11   : > { %v3357_v57 = vpop.f32.mrf.mxu1 }
 0xa12   : > { %v3358_v58 = vadd.f32 %v3357_v57, %v3273_v55 }
 0xa13   : > { %v3359_v59 = vpop.f32.mrf.mxu1 }
 0xa14   : > { %v3364_v60 = vmul.f32 %v3358_v58, %v3358_v58  ;;  %v3360_v61 = vadd.f32 %v3359_v59, %v3277_v56 }
 0xa15   : > { %v3361_v62 = vpop.f32.mrf.mxu1 }
 0xa16   : > { %v3366_v1 = vmul.f32 %v3364_v60, %v3358_v58  ;;  %v3365_v2 = vmul.f32 %v3360_v61, %v3360_v61  ;;  %v5538_v60 = vld [vmem:[%s1886_s22] ss:$0 sm:$0xff]  ;;  %s1910_s22 = scalar_lea.vmem %s7664_s7, %s7680_s0 }
 0xa17   : > { %v3362_v3 = vpop.f32.mrf.mxu1  ;;  %v5539_v62 = vld [vmem:[%s1889_s20] ss:$0 sm:$0xff] }
 0xa18   : > { %v3368_v4 = vmul.f32 0.044715, %v3366_v1  ;;  %v3367_v5 = vmul.f32 %v3365_v2, %v3360_v61  ;;  %v6145_v3 = vld [vmem:[%s7061_s8 + $0x18] sm:$0xff]  }
 0xa19   : > { %v3659_v6 = vpop.f32.mrf.mxu1 }
 0xa1a   : > { %v3370_v7 = vadd.f32 %v3368_v4, %v3358_v58  ;;  %v3369_v8 = vmul.f32 0.044715, %v3367_v5 }
 0xa1b   : > { %v5878_v38 = vpop.f32.mrf.mxu1 }
 0xa1c   : > { %v3372_v9 = vmul.f32 0.7978846, %v3370_v7  ;;  %v3371_v10 = vadd.f32 %v3369_v8, %v3360_v61  ;;  %v5540_v8 = vld [vmem:[%s1892_s2] ss:$0 sm:$0xff]  ;;  %v6147_v38 = vld [vmem:[%s7061_s8 + $0x8] sm:$0xff]   ;;  %s7667_s2 = sld [smem:[#allocation48_spill]] }
 0xa1d   : > { %v3732_v11 = vpop.f32.mrf.mxu1 }
 0xa1e   : > { %6225 = vtanh.f32 %v3372_v9  ;;  %v3373_v12 = vmul.f32 0.7978846, %v3371_v10  ;;  %v3737_v13 = vrot.slane %v3732_v11, 7  ;;  %v5541_v10 = vld [vmem:[%s1895_s15] ss:$0 sm:$0xff]  ;;  %v6148_v11 = vld [vmem:[%s7061_s8] sm:$0xff]  }
 0xa1f   : > { %v5885_v14 = vpop.f32.mrf.mxu1 }
 0xa20   : > { %6227 = vtanh.f32 %v3373_v12  ;;  %v7395_v15 = vsel %vm3143_vm7, %v3659_v6, %v3737_v13  ;;  %v6146_v6 = vld [vmem:[%s7061_s8 + $0x10] sm:$0xff]   ;;  %s1901_s8 = scalar_lea.vmem %s7659_s21, %s7680_s0  ;;  %s1877_s21 = scalar_lea.vmem %s7668_s23, %s7680_s0 }
 0xa21   : > { %v3742_v18 = vsel %vm1948_vm0, %v7395_v15, 0.0  ;;  %v5542_v14 = vld [vmem:[%s1898_s28] ss:$0 sm:$0xff]  ;;  %s7669_s28 = sld [smem:[#allocation49_spill]] }
 0xa22   : > { %3743 = vadd.xlane.f32.xlu0 %v3742_v18  ;;  %s1927_s15 = scalar_lea.vmem %s7667_s2, %s7680_s0 }
 0xa26   : > { %3773 = vadd.xlane.f32.xlu0 %v3772_v19 }
 0xa2b   : > { %v6226_v20 = vpop.eup %6225 }
 0xa2c   : > { %v3376_v21 = vadd.f32 1.0, %v6226_v20 }
 0xa2d   : > { %v6228_v22 = vpop.eup %6227 }
 0xa2e   : > { %v3377_v23 = vadd.f32 1.0, %v6228_v22  ;;  %v3378_v24 = vmul.f32 0.5, %v3376_v21 }
 0xa30   : > { %v3379_v25 = vmul.f32 0.5, %v3377_v23  ;;  %v3380_v26 = vmul.f32 %v3378_v24, %v3358_v58  ;;  %v5548_v24 = vld [vmem:[%s1901_s8] ss:$0 sm:$0xff]  ;;  %s7670_s8 = sld [smem:[#allocation50_spill]] }
 0xa32   : > { %v3381_v27 = vmul.f32 %v3379_v25, %v3360_v61  ;;  %v3382_v29 = vpack.c.bf16 %v3380_v26, %v3380_v26 }
 0xa34   : > { %v3383_v28 = vpack.c.bf16 %v3381_v27, %v3381_v27 }
 0xa36   : > { %3544 = vmatprep.mubr.bf16.mxu0 %v3383_v28 }
 0xa37   : > { %3545 = vmatmul.mubr.bf16.vlgmr.msra.gmra.mxu0 %v3382_v29 }
 0xa38   : > { %5912 = vmatprep.mubr.msk.bf16.mxu0 %vm6558_vm2, %v6557_v36 }
 0xaab   : > { %v3744_v30 = vpop.xlane.xlu0 %3743 }
 0xaac   : > { %v3745_v42 = vmul.f32 0.015625, %v3744_v30 }
 0xaae   : > { %v3746_v31 = vsub.f32 %v7395_v15, %v3745_v42 }
 0xaaf   : > { %v3774_v45 = vpop.xlane.xlu0 %3773 }
 0xab0   : > { %v3775_v32 = vmul.f32 0.015625, %v3774_v45  ;;  %v3747_v33 = vmul.f32 %v3746_v31, %v3746_v31 }
 0xab2   : > { %v3776_v34 = vsub.f32 %v1944_v17, %v3775_v32  ;;  %v3748_v0 = vsel %vm1948_vm0, %v3747_v33, 0.0 }
 0xab3   : > { %3749 = vadd.xlane.f32.xlu0 %v3748_v0 }
 0xab4   : > { %v3777_v35 = vmul.f32 %v3776_v34, %v3776_v34 }
 0xab6   : > { %v3778_v37 = vsel %vm3771_vm8, %v3777_v35, 0.0 }
 0xab7   : > { %3779 = vadd.xlane.f32.xlu1 %v3778_v37 }
 0xaf7   : > { %v5675_v44 = vpop.f32.mrf.mxu0 }
 0xaf9   : > { %v5676_v46 = vpop.f32.mrf.mxu0 }
 0xafa   : > { %v7414_v47 = vadd.f32 %v5676_v46, %v5675_v44 }
 0xafb   : > { %v5678_v48 = vpop.f32.mrf.mxu0 }
 0xafd   : > { %v5679_v49 = vpop.f32.mrf.mxu0 }
 0xb3c   : > { %v3750_v50 = vpop.xlane.xlu0 %3749 }
 0xb3d   : > { %v3751_v53 = vmul.f32 0.015625, %v3750_v50 }
 0xb3f   : > { %v3752_v55 = vadd.f32 1e-05, %v3751_v53 }
 0xb40   : > { %v3780_v56 = vpop.xlane.xlu1 %3779 }
 0xb41   : > { %6229 = vrsqrt.f32 %v3752_v55  ;;  %v3781_v57 = vmul.f32 0.015625, %v3780_v56 }
 0xb43   : > { %v3782_v58 = vadd.f32 1e-05, %v3781_v57 }
 0xb45   : > { %6231 = vrsqrt.f32 %v3782_v58 }
 0xb4e   : > { %v6230_v59 = vpop.eup %6229 }
 0xb4f   : > { %v3754_v61 = vmul.f32 %v6230_v59, %v3746_v31 }
 0xb51   : > { %v3761_v1 = vmul.f32 %v5538_v60, %v3754_v61 }
 0xb52   : > { %v6232_v5 = vpop.eup %6231 }
 0xb53   : > { %v3768_v2 = vadd.f32 %v5539_v62, %v3761_v1  ;;  %v3784_v7 = vmul.f32 %v6232_v5, %v3776_v34 }
 0xb55   : > { %v3799_v4 = vpack.c.bf16 %v3768_v2, %v3768_v2  ;;  %v3791_v9 = vmul.f32 %v5540_v8, %v3784_v7 }
 0xb57   : > { %5895 = vmatmul.mubr.msk.bf16.vlgmr.msra.gmra.mxu1 %vm1979_vm1, %v3799_v4  ;;  %v3798_v12 = vadd.f32 %v5541_v10, %v3791_v9 }
 0xb58   : > { %5899 = vmatpush3.bf16.msra.mxu1 %v6145_v3  ;;  %5906 = vmatprep.mubr.msk.bf16.mxu1 %vm6558_vm2, %v6557_v36 }
 0xb59   : > { %5900 = vmatprep.subr.bf16.mxu1 %v6557_v36  ;;  %v3883_v13 = vpack.c.bf16 %v3798_v12, %v3798_v12 }
 0xb5c   : > { %5901 = vmatpush3.bf16.msra.mxu1 %v6146_v6 }
 0xb5d   : > { %5902 = vmatprep.subr.bf16.mxu1 %v6557_v36 }
 0xb60   : > { %5903 = vmatpush3.bf16.msra.mxu1 %v6147_v38 }
 0xb61   : > { %5904 = vmatprep.subr.bf16.mxu1 %v6557_v36 }
 0xb64   : > { %5905 = vmatpush3.bf16.msra.mxu1 %v6148_v11 }
 0xb65   : > { %5922 = vmatprep.subr.bf16.mxu1 %v6557_v36 }
 0xb67   : > { %5907 = vmatmul.mubr.msk.bf16.vlgmr.msra.gmra.mxu1 %vm1979_vm1, %v3883_v13 }
 0xb68   : > { %5924 = vmatprep.mubr.msk.bf16.mxu1 %vm6558_vm2, %v6557_v36 }
 0xc17   : > { %v3876_v17 = vpop.f32.mrf.mxu1 }
 0xc18   : > { %v3877_v18 = vadd.f32 %v5542_v14, %v3876_v17 }
 0xc19   : > { %v5896_v19 = vpop.f32.mrf.mxu1 }
 0xc1a   : > { %v3882_v20 = vmul.f32 0.25, %v3877_v18 }
 0xc1b   : > { %v3879_v21 = vpop.f32.mrf.mxu1 }
 0xc1c   : > { %v3966_v22 = vpack.c.bf16 %v3882_v20, %v3882_v20 }
 0xc1d   : > { %v5897_v23 = vpop.f32.mrf.mxu1 }
 0xc1e   : > { %4085 = vrot.lane.b32.xlu1 %v3966_v22, %s6559_s6 }
 0xc27   : > { %v3960_v25 = vpop.f32.mrf.mxu1 }
 0xc28   : > { %v3961_v26 = vadd.f32 %v5548_v24, %v3960_v25 }
 0xc29   : > { %v5908_v27 = vpop.f32.mrf.mxu1 }
 0xc2a   : > { %v7443_v28 = vpack.c.bf16 %v3961_v26, %v3961_v26 }
 0xc2b   : > { %v3963_v29 = vpop.f32.mrf.mxu1 }
 0xc2c   : > { %4197 = vrot.lane.b32.xlu1 %v7443_v28, %s6560_s4  ;;  %4087 = vrot.lane.b32.xlu0 %v7443_v28, %s6559_s6  ;;  %v3978_v30 = vsel %vm2234_vm3, %v7443_v28, 0  ;;  %s7660_s6 = sld [smem:[#allocation17_spill]] }
 0xc2d   : > { %v5909_v42 = vpop.f32.mrf.mxu1  ;;  %5911 = vmatpush3.bf16.xpose.msra.mxu0 %v3978_v30 }
 0xc2e   : > { %5916 = vmatprep.subr.bf16.mxu0 %v6557_v36 }
 0xc30   : > { %4195 = vrot.lane.b32.xlu1 %v3966_v22, %s6560_s4  ;;  %4307 = vrot.lane.b32.xlu0 %v7443_v28, %s6561_s14 }
 0xc32   : > { %s1833_s4 = scalar_lea.vmem %s7660_s6, %s7680_s0  ;;  %s7671_s6 = sld [smem:[#allocation33_spill]] }
 0xc33   : > { %v5554_v40 = vld [vmem:[%s1833_s4] ss:$0 sm:$0xff]  ;;  %s1930_s4 = scalar_lea.vmem %s7669_s28, %s7680_s0 }
 0xc34   : > { %4305 = vrot.lane.b32.xlu1 %v3966_v22, %s6561_s14  ;;  %5913 = vmatmul.mubr.msk.bf16.vlgmr.msra.gmra.mxu0 %vm2234_vm3, %v3966_v22  ;;  %s1594_s14 = scalar_lea.vmem [#allocation12], %s7038_s26  ;;  %s7661_s26 = sld [smem:[#allocation42_spill]] }
 0xc35   : > { %5918 = vmatprep.mubr.msk.bf16.mxu0 %vm6558_vm2, %v6557_v36 }
 0xc90   : > { %v4086_v32 = vpop.permute.xlu1 %4085 }
 0xc9e   : > { %v4088_v31 = vpop.permute.xlu0 %4087  ;;  %v4198_v33 = vpop.permute.xlu1 %4197 }
 0xc9f   : > { %v4093_v45 = vsel %vm2234_vm3, %v4088_v31, 0  ;;  %v4203_v34 = vsel %vm2234_vm3, %v4198_v33, 0 }
 0xca0   : > { %5923 = vmatpush3.bf16.xpose.msra.mxu1 %v4093_v45 }
 0xca1   : > { %5934 = vmatprep.subr.bf16.mxu1 %v6557_v36 }
 0xca2   : > { %v4308_v0 = vpop.permute.xlu0 %4307  ;;  %v4196_v35 = vpop.permute.xlu1 %4195 }
 0xca3   : > { %v4313_v37 = vsel %vm2234_vm3, %v4308_v0, 0 }
 0xca6   : > { %v4306_v39 = vpop.permute.xlu1 %4305 }
 0xca7   : > { %5925 = vmatmul.mubr.msk.bf16.vlgmr.msra.gmra.mxu1 %vm2234_vm3, %v4086_v32 }
 0xca8   : > { %5935 = vmatpush3.bf16.xpose.msra.mxu1 %v4203_v34  ;;  %5936 = vmatprep.mubr.msk.bf16.mxu1 %vm6558_vm2, %v6557_v36 }
 0xca9   : > { %5946 = vmatprep.subr.bf16.mxu1 %v6557_v36 }
 0xcaf   : > { %5937 = vmatmul.mubr.msk.bf16.vlgmr.msra.gmra.mxu1 %vm2234_vm3, %v4196_v35 }
 0xcb0   : > { %5947 = vmatpush3.bf16.xpose.msra.mxu1 %v4313_v37  ;;  %5948 = vmatprep.mubr.msk.bf16.mxu1 %vm6558_vm2, %v6557_v36 }
 0xcb1   : > { %5958 = vmatprep.subr.bf16.mxu1 %v6557_v36 }
 0xcb7   : > { %5949 = vmatmul.mubr.msk.bf16.vlgmr.msra.gmra.mxu1 %vm2234_vm3, %v4306_v39 }
 0xcb8   : > { %5966 = vmatprep.mubr.msk.bf16.mxu1 %vm6558_vm2, %v6557_v36 }
 0xcf4   : > { %v4014_v41 = vpop.f32.mrf.mxu0 }
 0xcf5   : > { %v4015_v43 = vadd.f32 %v5554_v40, %v4014_v41 }
 0xcf6   : > { %v5914_v44 = vpop.f32.mrf.mxu0 }
 0xcf7   : > { %v4021_v46 = vsel %vm4020_vm9, %v4015_v43, -inf }
 0xcf8   : > { %4022 = vmax.xlane.f32.xlu0 %v4021_v46  ;;  %v4017_v48 = vpop.f32.mrf.mxu0 }
 0xcfa   : > { %v5915_v49 = vpop.f32.mrf.mxu0 }
 0xd67   : > { %v4129_v50 = vpop.f32.mrf.mxu1 }
 0xd68   : > { %v4130_v53 = vadd.f32 %v5554_v40, %v4129_v50 }
 0xd69   : > { %v5926_v55 = vpop.f32.mrf.mxu1 }
 0xd6a   : > { %v4135_v56 = vsel %vm4020_vm9, %v4130_v53, -inf }
 0xd6b   : > { %4136 = vmax.xlane.f32.xlu1 %v4135_v56  ;;  %v4132_v57 = vpop.f32.mrf.mxu1 }
 0xd6d   : > { %v5927_v58 = vpop.f32.mrf.mxu1 }
 0xd6f   : > { %v4239_v59 = vpop.f32.mrf.mxu1 }
 0xd70   : > { %v4240_v60 = vadd.f32 %v5554_v40, %v4239_v59 }
 0xd71   : > { %v5938_v61 = vpop.f32.mrf.mxu1 }
 0xd72   : > { %v4245_v62 = vsel %vm4020_vm9, %v4240_v60, -inf }
 0xd73   : > { %v4242_v1 = vpop.f32.mrf.mxu1  ;;  %4246 = vmax.xlane.f32.xlu0 %v4245_v62  ;;  %v6149_v62 = vld [vmem:[%s1594_s14 + $0x18] sm:$0xff]  }
 0xd74   : > { %5959 = vmatpush3.bf16.msra.mxu1 %v6149_v62 }
 0xd75   : > { %v5939_v2 = vpop.f32.mrf.mxu1  ;;  %5960 = vmatprep.subr.bf16.mxu1 %v6557_v36 }
 0xd76   : > { %v6150_v2 = vld [vmem:[%s1594_s14 + $0x10] sm:$0xff]  }
 0xd77   : > { %v4349_v3 = vpop.f32.mrf.mxu1 }
 0xd78   : > { %v4350_v4 = vadd.f32 %v5554_v40, %v4349_v3  ;;  %5961 = vmatpush3.bf16.msra.mxu1 %v6150_v2 }
 0xd79   : > { %v5950_v5 = vpop.f32.mrf.mxu1  ;;  %5962 = vmatprep.subr.bf16.mxu1 %v6557_v36 }
 0xd7a   : > { %v4355_v6 = vsel %vm4020_vm9, %v4350_v4, -inf  ;;  %v6151_v5 = vld [vmem:[%s1594_s14 + $0x8] sm:$0xff]  }
 0xd7b   : > { %v4352_v7 = vpop.f32.mrf.mxu1  ;;  %4356 = vmax.xlane.f32.xlu0 %v4355_v6 }
 0xd7c   : > { %5963 = vmatpush3.bf16.msra.mxu1 %v6151_v5 }
 0xd7d   : > { %v5951_v8 = vpop.f32.mrf.mxu1  ;;  %5964 = vmatprep.subr.bf16.mxu1 %v6557_v36 }
 0xd81   : > { %v4023_v38 = vpop.xlane.xlu0 %4022 }
 0xd82   : > { %v4024_v9 = vsub.f32 %v4015_v43, %v4023_v38 }
 0xd84   : > { %v4025_v10 = vmul.f32 1.442695, %v4024_v9 }
 0xd86   : > { %6233 = vpow2.f32 %v4025_v10  ;;  %v6152_v10 = vld [vmem:[%s1594_s14] sm:$0xff]   ;;  %s1933_s14 = scalar_lea.vmem %s7670_s8, %s7680_s0 }
 0xd87   : > { %5965 = vmatpush3.bf16.msra.mxu1 %v6152_v10 }
 0xd93   : > { %v6234_v11 = vpop.eup %6233 }
 0xd94   : > { %v4027_v12 = vsel %vm4020_vm9, %v6234_v11, 0.0 }
 0xd95   : > { %4028 = vadd.xlane.f32.xlu0 %v4027_v12 }
 0xdf4   : > { %v4137_v13 = vpop.xlane.xlu1 %4136 }
 0xdf5   : > { %v4138_v14 = vsub.f32 %v4130_v53, %v4137_v13 }
 0xdf7   : > { %v4139_v17 = vmul.f32 1.442695, %v4138_v14 }
 0xdf9   : > { %6235 = vpow2.f32 %v4139_v17 }
 0xdfc   : > { %v4247_v18 = vpop.xlane.xlu0 %4246 }
 0xdfd   : > { %v4248_v19 = vsub.f32 %v4240_v60, %v4247_v18 }
 0xdff   : > { %v4249_v20 = vmul.f32 1.442695, %v4248_v19 }
 0xe01   : > { %6237 = vpow2.f32 %v4249_v20 }
 0xe04   : > { %v4357_v25 = vpop.xlane.xlu0 %4356 }
 0xe05   : > { %v4358_v26 = vsub.f32 %v4350_v4, %v4357_v25 }
 0xe06   : > { %v6236_v21 = vpop.eup %6235 }
 0xe07   : > { %v4141_v22 = vsel %vm4020_vm9, %v6236_v21, 0.0  ;;  %v4359_v27 = vmul.f32 1.442695, %v4358_v26 }
 0xe08   : > { %4142 = vadd.xlane.f32.xlu1 %v4141_v22 }
 0xe09   : > { %6239 = vpow2.f32 %v4359_v27 }
 0xe0e   : > { %v6238_v23 = vpop.eup %6237 }
 0xe0f   : > { %v4251_v24 = vsel %vm4020_vm9, %v6238_v23, 0.0 }
 0xe10   : > { %4252 = vadd.xlane.f32.xlu0 %v4251_v24 }
 0xe16   : > { %v6240_v29 = vpop.eup %6239 }
 0xe17   : > { %v4361_v30 = vsel %vm4020_vm9, %v6240_v29, 0.0 }
 0xe19   : > { %4147 = vrot.lane.b32.xlu1 %v7443_v28, %s6563_s18 }
 0xe1d   : > { %4257 = vrot.lane.b32.xlu1 %v7443_v28, %s6564_s3 }
 0xe1e   : > { %v4029_v42 = vpop.xlane.xlu0 %4028 }
 0xe1f   : > { %6241 = vrcp.f32 %v4029_v42 }
 0xe26   : > { %4034 = vrot.lane.b32.xlu0 %v7443_v28, %s6562_s12 }
 0xe2c   : > { %v6242_v45 = vpop.eup %6241 }
 0xe2d   : > { %v4031_v33 = vmul.f32 %v6242_v45, %v6234_v11 }
 0xe2f   : > { %v4032_v37 = vpack.c.bf16 %v4031_v33, %v4031_v33 }
 0xe41   : > { %4362 = vadd.xlane.f32.xlu1 %v4361_v30 }
 0xe52   : > { %4367 = vrot.lane.b32.xlu1 %v7443_v28, %s6565_s16 }
 0xe91   : > { %v4143_v31 = vpop.xlane.xlu1 %4142 }
 0xe92   : > { %6243 = vrcp.f32 %v4143_v31 }
 0xe95   : > { %v4148_v35 = vpop.permute.xlu1 %4147 }
 0xe96   : > { %v4153_v28 = vsel %vm4040_vm10, %v4148_v35, 0 }
 0xe99   : > { %v4253_v32 = vpop.xlane.xlu0 %4252  ;;  %v4258_v41 = vpop.permute.xlu1 %4257 }
 0xe9a   : > { %6245 = vrcp.f32 %v4253_v32  ;;  %v4263_v46 = vsel %vm4040_vm10, %v4258_v41, 0 }
 0xe9d   : > { %v4035_v34 = vpop.permute.xlu0 %4034 }
 0xe9e   : > { %v4042_v0 = vsel %vm4040_vm10, %v4035_v34, 0 }
 0xe9f   : > { %5917 = vmatpush3.bf16.msra.mxu0 %v4042_v0  ;;  %v6244_v39 = vpop.eup %6243 }
 0xea0   : > { %5928 = vmatprep.subr.bf16.mxu0 %v6557_v36  ;;  %v4145_v40 = vmul.f32 %v6244_v39, %v6236_v21 }
 0xea2   : > { %5919 = vmatmul.mubr.msk.bf16.vlgmr.msra.gmra.mxu0 %vm4036_vm11, %v4032_v37  ;;  %v4146_v43 = vpack.c.bf16 %v4145_v40, %v4145_v40 }
 0xea3   : > { %5929 = vmatpush3.bf16.msra.mxu0 %v4153_v28  ;;  %5930 = vmatprep.mubr.msk.bf16.mxu0 %vm6558_vm2, %v6557_v36 }
 0xea4   : > { %5940 = vmatprep.subr.bf16.mxu0 %v6557_v36 }
 0xea7   : > { %v6246_v44 = vpop.eup %6245 }
 0xea8   : > { %v4255_v48 = vmul.f32 %v6246_v44, %v6238_v23 }
 0xeaa   : > { %5931 = vmatmul.mubr.msk.bf16.vlgmr.msra.gmra.mxu0 %vm4036_vm11, %v4146_v43  ;;  %v4256_v49 = vpack.c.bf16 %v4255_v48, %v4255_v48 }
 0xeab   : > { %5941 = vmatpush3.bf16.msra.mxu0 %v4263_v46  ;;  %5942 = vmatprep.mubr.msk.bf16.mxu0 %vm6558_vm2, %v6557_v36 }
 0xeac   : > { %5952 = vmatprep.subr.bf16.mxu0 %v6557_v36 }
 0xeb2   : > { %5943 = vmatmul.mubr.msk.bf16.vlgmr.msra.gmra.mxu0 %vm4036_vm11, %v4256_v49  ;;  %v5569_v49 = vld [vmem:[%s1907_s25] ss:$0 sm:$0xff] }
 0xeb3   : > { %5954 = vmatprep.mubr.msk.bf16.mxu0 %vm6558_vm2, %v6557_v36 }
 0xeca   : > { %v4363_v50 = vpop.xlane.xlu1 %4362 }
 0xecb   : > { %6247 = vrcp.f32 %v4363_v50 }
 0xece   : > { %v4368_v53 = vpop.permute.xlu1 %4367 }
 0xecf   : > { %v4373_v55 = vsel %vm4040_vm10, %v4368_v53, 0  ;;  %v5570_v53 = vld [vmem:[%s1910_s22] ss:$0 sm:$0xff] }
 0xed0   : > { %5953 = vmatpush3.bf16.msra.mxu0 %v4373_v55 }
 0xed8   : > { %v6248_v56 = vpop.eup %6247 }
 0xed9   : > { %v4365_v57 = vmul.f32 %v6248_v56, %v6240_v29 }
 0xedb   : > { %v4366_v58 = vpack.c.bf16 %v4365_v57, %v4365_v57 }
 0xedd   : > { %5955 = vmatmul.mubr.msk.bf16.vlgmr.msra.gmra.mxu0 %vm4036_vm11, %v4366_v58 }
 0xede   : > { %4640 = vmatprep.mubr.bf16.mxu0 %v6566_v16 }
 0xf62   : > { %v4078_v59 = vpop.f32.mrf.mxu0 }
 0xf64   : > { %v5920_v60 = vpop.f32.mrf.mxu0 }
 0xf66   : > { %v4081_v61 = vpop.f32.mrf.mxu0 }
 0xf68   : > { %v5921_v1 = vpop.f32.mrf.mxu0 }
 0xf6a   : > { %v4189_v3 = vpop.f32.mrf.mxu0 }
 0xf6b   : > { %4416 = vrot.lane.b32.xlu0 %v4189_v3, %s6565_s16  ;;  %s7662_s16 = sld [smem:[#allocation45_spill]] }
 0xf6c   : > { %v5932_v4 = vpop.f32.mrf.mxu0 }
 0xf6e   : > { %v4192_v6 = vpop.f32.mrf.mxu0 }
 0xf70   : > { %v5933_v16 = vpop.f32.mrf.mxu0 }
 0xf72   : > { %v4299_v7 = vpop.f32.mrf.mxu0 }
 0xf73   : > { %4420 = vrot.lane.b32.xlu1 %v4299_v7, %s6564_s3  ;;  %s1904_s3 = scalar_lea.vmem %s7661_s26, %s7680_s0  ;;  %s7672_s26 = sld [smem:[#allocation34_spill]] }
 0xf74   : > { %v5944_v8 = vpop.f32.mrf.mxu0  ;;  %v5568_v24 = vld [vmem:[%s1904_s3] ss:$0 sm:$0xff]  ;;  %s7673_s3 = sld [smem:[#allocation51_spill]] }
 0xf76   : > { %v4302_v38 = vpop.f32.mrf.mxu0 }
 0xf78   : > { %v5945_v9 = vpop.f32.mrf.mxu0 }
 0xf7a   : > { %s1937_s11 = scalar_lea.vmem %s7673_s3, %s7072_s29 }
 0xf9d   : > { %v4409_v11 = vpop.f32.mrf.mxu0 }
 0xf9e   : > { %4424 = vrot.lane.b32.xlu0 %v4409_v11, %s6563_s18  ;;  %s1915_s18 = scalar_lea.vmem %s7662_s16, %s5607_s30  ;;  %s7665_s30 = sld [smem:[#allocation47_spill]] }
 0xf9f   : > { %v5956_v12 = vpop.f32.mrf.mxu0  ;;  %v6153_v0 = vld [vmem:[%s1915_s18 + $0x30] ss:$8 sps:$4 sm:$0xff]   ;;  %v6158_v35 = vld [vmem:[%s1915_s18 + $0x24] ss:$8 sps:$4 sm:$0xff]   ;;  %v6156_v37 = vld [vmem:[%s1915_s18 + $0x20] ss:$8 sps:$4 sm:$0xff]   ;;  %s1880_s16 = scalar_lea.vmem %s7671_s6, %s7680_s0 }
 0xfa0   : > { %v6161_v39 = vld [vmem:[%s1915_s18 + $0x14] ss:$8 sps:$4 sm:$0xff]   ;;  %v6159_v28 = vld [vmem:[%s1915_s18 + $0x10] ss:$8 sps:$4 sm:$0xff]   ;;  %v6164_v40 = vld [vmem:[%s1915_s18 + $0x4] ss:$8 sps:$4 sm:$0xff]  }
 0xfa1   : > { %v4412_v13 = vpop.f32.mrf.mxu0  ;;  %v6162_v41 = vld [vmem:[%s1915_s18] ss:$8 sps:$4 sm:$0xff]  }
 0xfa3   : > { %v5957_v14 = vpop.f32.mrf.mxu0 }
 0xfa4   : > { %s1924_s20 = scalar_lea.vmem %s7665_s30, %s5608_s24  ;;  %s1919_s24 = scalar_lea.vmem %s7666_s10, %s7072_s29 }
 0xfa5   : > { %v6165_v58 = vld [vmem:[%s1924_s20 + $0x78] sm:$0xff]   ;;  %v6167_v60 = vld [vmem:[%s1924_s20 + $0x70] sm:$0xff]   ;;  %v6169_v62 = vld [vmem:[%s1924_s20 + $0x68] sm:$0xff]  }
 0xfa6   : > { %5718 = vmatprep.subr.bf16.mxu1 %v6165_v58  ;;  %v6168_v61 = vld [vmem:[%s1924_s20 + $0x30] sm:$0xff]   ;;  %v6170_v1 = vld [vmem:[%s1924_s20 + $0x28] sm:$0xff]   ;;  %v6171_v2 = vld [vmem:[%s1924_s20 + $0x60] sm:$0xff]  }
 0xfa7   : > { %v6172_v3 = vld [vmem:[%s1924_s20 + $0x20] sm:$0xff]   ;;  %v6173_v4 = vld [vmem:[%s1924_s20 + $0x58] sm:$0xff]   ;;  %v6175_v6 = vld [vmem:[%s1924_s20 + $0x50] sm:$0xff]  }
 0xfa8   : > { %v6174_v5 = vld [vmem:[%s1924_s20 + $0x18] sm:$0xff]   ;;  %v6176_v16 = vld [vmem:[%s1924_s20 + $0x10] sm:$0xff]   ;;  %v6177_v7 = vld [vmem:[%s1924_s20 + $0x48] sm:$0xff]  }
 0xfa9   : > { %v6178_v8 = vld [vmem:[%s1924_s20 + $0x8] sm:$0xff]   ;;  %v6179_v38 = vld [vmem:[%s1924_s20 + $0x40] sm:$0xff]  }
 0xfaa   : > { %v6180_v9 = vld [vmem:[%s1924_s20] sm:$0xff]  }
 0xfab   : > { %v4553_v10 = vld [vmem:[%s1919_s24] sm:$0x3] }
 0xfac   : > { %v4558_v11 = vrot.slane %v4553_v10, %v3272_v52  ;;  %v4562_v12 = vrot.slane %v4553_v10, %v3276_v54 }
 0xfdd   : > { %v4417_v17 = vpop.permute.xlu0 %4416 }
 0xfde   : > { %v4427_v19 = vsel %vm2234_vm3, %v4078_v59, %v4417_v17  ;;  %v6166_v59 = vld [vmem:[%s1924_s20 + $0x38] sm:$0xff]  }
 0xfe5   : > { %v4421_v18 = vpop.permute.xlu1 %4420 }
 0xfe6   : > { %v4428_v36 = vsel %vm2683_vm5, %v4427_v19, %v4421_v18 }
0x1010   : > { %v4425_v20 = vpop.permute.xlu0 %4424 }
0x1011   : > { %v4429_v21 = vsel %vm2685_vm6, %v4428_v36, %v4425_v20 }
0x1012   : > { %v4430_v22 = vpack.c.bf16 %v4429_v21, %v4429_v21 }
0x1014   : > { %5967 = vmatmul.mubr.msk.bf16.vlgmr.msra.gmra.mxu1 %vm1979_vm1, %v4430_v22 }
0x1015   : > { %5719 = vmatpush3.bf16.msra.mxu1 %v6166_v59 }
0x1016   : > { %5720 = vmatprep.subr.bf16.mxu1 %v6167_v60 }
0x1019   : > { %5721 = vmatpush3.bf16.msra.mxu1 %v6168_v61 }
0x101a   : > { %5722 = vmatprep.subr.bf16.mxu1 %v6169_v62 }
0x101d   : > { %5723 = vmatpush3.bf16.msra.mxu1 %v6170_v1 }
0x101e   : > { %5724 = vmatprep.subr.bf16.mxu1 %v6171_v2 }
0x1021   : > { %5725 = vmatpush3.bf16.msra.mxu1 %v6172_v3 }
0x1022   : > { %5726 = vmatprep.subr.bf16.mxu1 %v6173_v4  ;;  %v5597_v4 = vld [vmem:[%s1930_s4] ss:$0 sm:$0xff] }
0x1025   : > { %5727 = vmatpush3.bf16.msra.mxu1 %v6174_v5 }
0x1026   : > { %5728 = vmatprep.subr.bf16.mxu1 %v6175_v6  ;;  %v5598_v6 = vld [vmem:[%s1933_s14] ss:$0 sm:$0xff] }
0x1029   : > { %5729 = vmatpush3.bf16.msra.mxu1 %v6176_v16 }
0x102a   : > { %5730 = vmatprep.subr.bf16.mxu1 %v6177_v7 }
0x102d   : > { %5731 = vmatpush3.bf16.msra.mxu1 %v6178_v8 }
0x102e   : > { %5732 = vmatprep.subr.bf16.mxu1 %v6179_v38 }
0x1031   : > { %5733 = vmatpush3.bf16.msra.mxu1 %v6180_v9 }
0x10d4   : > { %v4500_v23 = vpop.f32.mrf.mxu1 }
0x10d5   : > { %v4506_v25 = vadd.f32 %v4500_v23, %v7395_v15  ;;  %v6155_v15 = vld [vmem:[%s1915_s18 + $0x34] ss:$8 sps:$4 sm:$0xff]   ;;  %s1883_s18 = scalar_lea.vmem %s7672_s26, %s7680_s0 }
0x10d6   : > { %v5968_v26 = vpop.f32.mrf.mxu1  ;;  %4616 = vmatprep.subr.bf16.mxu0 %v6155_v15 }
0x10d7   : > { %v7524_v27 = vadd.f32 %v5568_v24, %v4506_v25  ;;  %4617 = vmatpush1.bf16.msra.mxu0 %v6153_v0 }
0x10d8   : > { %v4503_v29 = vpop.f32.mrf.mxu1  ;;  %4618 = vmatprep.subr.bf16.mxu0 %v6158_v35 }
0x10d9   : > { %v4517_v30 = vsel %vm1948_vm0, %v7524_v27, 0.0 }
0x10da   : > { %4518 = vadd.xlane.f32.xlu1 %v4517_v30  ;;  %v5969_v42 = vpop.f32.mrf.mxu1 }
0x10db   : > { %4619 = vmatpush1.bf16.msra.mxu0 %v6156_v37 }
0x10dc   : > { %4620 = vmatprep.subr.bf16.mxu0 %v6161_v39 }
0x10df   : > { %4621 = vmatpush1.bf16.msra.mxu0 %v6159_v28 }
0x10e0   : > { %4622 = vmatprep.subr.bf16.mxu0 %v6164_v40  ;;  %v5596_v40 = vld [vmem:[%s1927_s15] ss:$0 sm:$0xff] }
0x10e3   : > { %4623 = vmatpush1.bf16.msra.mxu0 %v6162_v41  ;;  %v3552_v41 = vadd.f32 %v7414_v47, %v7344_v63 }
0x1163   : > { %v4519_v31 = vpop.xlane.xlu1 %4518 }
0x1164   : > { %v4520_v45 = vmul.f32 0.015625, %v4519_v31 }
0x1166   : > { %v4521_v32 = vsub.f32 %v7524_v27, %v4520_v45 }
0x1168   : > { %v4522_v33 = vmul.f32 %v4521_v32, %v4521_v32 }
0x116a   : > { %v4523_v34 = vsel %vm1948_vm0, %v4522_v33, 0.0 }
0x116b   : > { %4524 = vadd.xlane.f32.xlu0 %v4523_v34 }
0x11f4   : > { %v4525_v43 = vpop.xlane.xlu0 %4524 }
0x11f5   : > { %v4526_v44 = vmul.f32 0.015625, %v4525_v43 }
0x11f7   : > { %v4527_v46 = vadd.f32 1e-05, %v4526_v44 }
0x11f9   : > { %6249 = vrsqrt.f32 %v4527_v46  ;;  %v5533_v46 = vld [vmem:[%s1877_s21] ss:$0 sm:$0xff] }
0x1206   : > { %v6250_v48 = vpop.eup %6249 }
0x1207   : > { %v4529_v50 = vmul.f32 %v6250_v48, %v4521_v32 }
0x1209   : > { %v4536_v55 = vmul.f32 %v5569_v49, %v4529_v50  ;;  %v3560_v50 = vadd.f32 %v5533_v46, %v3552_v41 }
0x120b   : > { %v4543_v56 = vadd.f32 %v5570_v53, %v4536_v55  ;;  %v3563_v53 = vsel %vm1948_vm0, %v3560_v50, 0.0 }
0x120d   : > { %v4544_v57 = vpack.c.bf16 %v4543_v56, %v4543_v56 }
0x120f   : > { %5579 = vmatmul.mubr.msk.bf16.vlgmr.msra.gmra.mxu0 %vm1979_vm1, %v4544_v57 }
0x12cf   : > { %v4642_v13 = vpop.f32.mrf.mxu0 }
0x12d0   : > { %v4643_v14 = vadd.f32 %v4642_v13, %v4558_v11 }
0x12d1   : > { %v4644_v17 = vpop.f32.mrf.mxu0 }
0x12d2   : > { %v4649_v18 = vmul.f32 %v4643_v14, %v4643_v14  ;;  %v4645_v19 = vadd.f32 %v4644_v17, %v4562_v12  ;;  %v5534_v12 = vld [vmem:[%s1880_s16] ss:$0 sm:$0xff] }
0x12d3   : > { %v4646_v36 = vpop.f32.mrf.mxu0 }
0x12d4   : > { %v4651_v20 = vmul.f32 %v4649_v18, %v4643_v14  ;;  %v4650_v21 = vmul.f32 %v4645_v19, %v4645_v19 }
0x12d5   : > { %v4647_v22 = vpop.f32.mrf.mxu0 }
0x12d6   : > { %v4653_v23 = vmul.f32 0.044715, %v4651_v20  ;;  %v4652_v24 = vmul.f32 %v4650_v21, %v4645_v19 }
0x12d8   : > { %v4655_v25 = vadd.f32 %v4653_v23, %v4643_v14  ;;  %v4654_v26 = vmul.f32 0.044715, %v4652_v24 }
0x12da   : > { %v4657_v29 = vmul.f32 0.7978846, %v4655_v25  ;;  %v4656_v30 = vadd.f32 %v4654_v26, %v4645_v19 }
0x12dc   : > { %6251 = vtanh.f32 %v4657_v29  ;;  %v4658_v51 = vmul.f32 0.7978846, %v4656_v30 }
0x12de   : > { %6253 = vtanh.f32 %v4658_v51 }
0x12e9   : > { %v6252_v52 = vpop.eup %6251 }
0x12ea   : > { %v4661_v54 = vadd.f32 1.0, %v6252_v52 }
0x12eb   : > { %v6254_v42 = vpop.eup %6253 }
0x12ec   : > { %v4662_v31 = vadd.f32 1.0, %v6254_v42  ;;  %v4663_v45 = vmul.f32 0.5, %v4661_v54 }
0x12ee   : > { %v4664_v32 = vmul.f32 0.5, %v4662_v31  ;;  %v4665_v33 = vmul.f32 %v4663_v45, %v4643_v14  ;;  %v5535_v14 = vld [vmem:[%s1883_s18] ss:$0 sm:$0xff] }
0x12f0   : > { %v4666_v34 = vmul.f32 %v4664_v32, %v4645_v19  ;;  %v4667_v0 = vpack.c.bf16 %v4665_v33, %v4665_v33 }
0x12f2   : > { %v4668_v15 = vpack.c.bf16 %v4666_v34, %v4666_v34 }
0x12f4   : > { %4829 = vmatprep.mubr.bf16.mxu1 %v4668_v15 }
0x12f5   : > { %4830 = vmatmul.mubr.bf16.vlgmr.msra.gmra.mxu1 %v4667_v0 }
0x13b5   : > { %v5734_v35 = vpop.f32.mrf.mxu1 }
0x13b7   : > { %v5735_v37 = vpop.f32.mrf.mxu1 }
0x13b8   : > { %v5736_v39 = vadd.f32 %v5735_v37, %v5734_v35 }
0x13b9   : > { %v5737_v28 = vpop.f32.mrf.mxu1 }
0x13ba   : > { %v4837_v43 = vadd.f32 %v5736_v39, %v7524_v27 }
0x13bb   : > { %v5738_v44 = vpop.f32.mrf.mxu1 }
0x13bc   : > { %v4845_v48 = vadd.f32 %v5596_v40, %v4837_v43 }
0x13be   : > { %v4848_v49 = vsel %vm1948_vm0, %v4845_v48, 0.0 }
0x13bf   : > { %4849 = vadd.xlane.f32.xlu0 %v4848_v49 }
0x13c3   : > { %3564 = vadd.xlane.f32.xlu0 %v3563_v53 }
0x1448   : > { %v4850_v55 = vpop.xlane.xlu0 %4849 }
0x1449   : > { %v4851_v56 = vmul.f32 0.015625, %v4850_v55 }
0x144b   : > { %v4852_v57 = vsub.f32 %v4845_v48, %v4851_v56 }
0x144c   : > { %v3565_v63 = vpop.xlane.xlu0 %3564 }
0x144d   : > { %v3566_v47 = vmul.f32 0.015625, %v3565_v63  ;;  %v4853_v27 = vmul.f32 %v4852_v57, %v4852_v57 }
0x144f   : > { %v3567_v58 = vsub.f32 %v3560_v50, %v3566_v47  ;;  %v4854_v59 = vsel %vm1948_vm0, %v4853_v27, 0.0 }
0x1450   : > { %4855 = vadd.xlane.f32.xlu1 %v4854_v59 }
0x1451   : > { %v3568_v60 = vmul.f32 %v3567_v58, %v3567_v58 }
0x1453   : > { %v3569_v61 = vsel %vm1948_vm0, %v3568_v60, 0.0 }
0x1454   : > { %3570 = vadd.xlane.f32.xlu0 %v3569_v61 }
0x14d9   : > { %v4856_v62 = vpop.xlane.xlu1 %4855 }
0x14da   : > { %v4857_v1 = vmul.f32 0.015625, %v4856_v62 }
0x14dc   : > { %v4858_v2 = vadd.f32 1e-05, %v4857_v1 }
0x14dd   : > { %v3571_v8 = vpop.xlane.xlu0 %3570 }
0x14de   : > { %6255 = vrsqrt.f32 %v4858_v2  ;;  %v3572_v38 = vmul.f32 0.015625, %v3571_v8 }
0x14e0   : > { %v3573_v9 = vadd.f32 1e-05, %v3572_v38 }
0x14e2   : > { %6257 = vrsqrt.f32 %v3573_v9 }
0x14eb   : > { %v6256_v3 = vpop.eup %6255 }
0x14ec   : > { %v4860_v5 = vmul.f32 %v6256_v3, %v4852_v57 }
0x14ee   : > { %v4867_v16 = vmul.f32 %v5597_v4, %v4860_v5 }
0x14ef   : > { %v6258_v10 = vpop.eup %6257 }
0x14f0   : > { %v4874_v7 = vadd.f32 %v5598_v6, %v4867_v16  ;;  %v3575_v11 = vmul.f32 %v6258_v10, %v3567_v58 }
0x14f2   : > { %4876 = vrot.lane.b32.xlu1 %v4874_v7, %s6562_s12  ;;  %v3582_v13 = vmul.f32 %v5534_v12, %v3575_v11 }
0x14f4   : > { %v3589_v17 = vadd.f32 %v5535_v14, %v3582_v13 }
0x1564   : > { %v4877_v18 = vpop.permute.xlu1 %4876 }
0x1565   : > { %v4879_v19 = vsel %vm1979_vm1, %v3589_v17, %v4877_v18 }
0x1566   : > { %4880 = vst [vmem:[%s1937_s11] sm:$0x3] %v4879_v19 }
0x1567 PF: > { %s7674_s7 = sld [smem:[#allocation53_spill]]  ;;  %s7677_s28 = smov %s6498_s1 }
0x1568   : > { %s7675_s12 = sld [smem:[#allocation52_spill]] }
0x1569   : > { %s7676_s2 = sld [smem:[#allocation54_spill]] }
0x156d   : > { %p100_p1 = scmp.ge.s32.totalorder %s7674_s7, 10  }
0x156e   : > { %s7678_s1 = smov %s7675_s12 }
0x156f   :  { %102 = sbr.rel (!%p100_p1) target bundleno = 92 (0x5c), region = 428 }
0x1574   :  { %4900 = vsyncpa [#allocation3], 1 }
0x1575   :  { %4902 = vsyncpa [#allocation3 + $0x1], 1 }
0x1576   :  { %4903 = vsyncpa [#allocation5], 1 }
0x1577   :  { %4905 = vsyncpa [#allocation5 + $0x1], 1 }
0x1578   :  { %4906 = vsyncpa [#allocation8], 1 }
0x1579   :  { %4908 = vsyncpa [#allocation8 + $0x1], 1 }
0x157a   :  { %4909 = vsyncpa [#allocation11], 1 }
0x157b   :  { %4911 = vsyncpa [#allocation11 + $0x1], 1 }

</bundles_post_ra>
